<compile_context>
chip_gen: v7x
topology: tpu7x:2x2x1
jax: 0.10.0
libtpu: 0.0.40
codegen_flags: <defaults>
</compile_context>

<pallas_src>
import math

import jax
import jax.numpy as jnp
import numpy as np
from jax.experimental import pallas as pl
from jax.experimental.pallas import tpu as pltpu  # noqa: F401  (kept for TPU backend import parity)

# ----------------------------- config (small) -------------------------------
HIDDEN = 32          # __C.HIDDEN_SIZE
FF = 64              # __C.FF_SIZE
NH = 4               # __C.MULTI_HEAD
DK = HIDDEN // NH    # head dim
LAYER = 2            # __C.LAYER
LN_EPS = 1e-6
NEG_INF = -1e9
INV_SQRT_DK = 1.0 / math.sqrt(DK)

B = 2
SY = 16              # "y" (encoder / language) sequence length
SX = 8               # "x" (decoder / image) sequence length

# Fixed ordering of the stacked per-layer weight arrays fed to the fused kernel.
ENC_W_NAMES = ("wqkv", "bqkv", "wm", "bm",
               "w1", "b1", "w2", "b2",
               "ln1g", "ln1b", "ln2g", "ln2b")
DEC_W_NAMES = ("s_wqkv", "s_bqkv", "s_wm", "s_bm",
               "c_wq", "c_bq", "c_wkv", "c_bkv", "c_wm", "c_bm",
               "w1", "b1", "w2", "b2",
               "ln1g", "ln1b", "ln2g", "ln2b", "ln3g", "ln3b")


# --------------------------- in-kernel building blocks -----------------------
def _attend(q, k, v, amask, wm, bm):
    """q:(Sq,H), k/v:(Sk,H) already projected (scale folded into Q); amask:(Sq,Sk) additive."""
    head_outs = []
    for h in range(NH):                       # static unroll over NH=4 heads
        lo = h * DK
        qh = q[:, lo:lo + DK]                 # (Sq, DK)
        kh = k[:, lo:lo + DK]                 # (Sk, DK)
        vh = v[:, lo:lo + DK]                 # (Sk, DK)
        s = jax.lax.dot_general(qh, kh, (((1,), (1,)), ((), ())),
                                preferred_element_type=jnp.float32)
        s = s + amask                         # pre-built full-shape additive mask (0 / -1e9)
        m = jnp.max(s, axis=-1, keepdims=True)
        e = jnp.exp(s - m)
        p = e / jnp.sum(e, axis=-1, keepdims=True)          # softmax over keys
        head_outs.append(jnp.dot(p, vh, preferred_element_type=jnp.float32))  # (Sq, DK)
    # single full-width merge: lane-concat heads then one (Sq,H)@(H,H) MXU push
    o = jnp.concatenate(head_outs, axis=-1)   # (Sq, HIDDEN)
    return jnp.dot(o, wm, preferred_element_type=jnp.float32) + bm


def _mhatt_self(x_in, amask, wqkv, bqkv, wm, bm):
    """Self-attention: fused QKV projection, (S,H)@(H,3H)."""
    qkv = jnp.dot(x_in, wqkv, preferred_element_type=jnp.float32) + bqkv
    q = qkv[:, 0:HIDDEN]
    k = qkv[:, HIDDEN:2 * HIDDEN]
    v = qkv[:, 2 * HIDDEN:3 * HIDDEN]
    return _attend(q, k, v, amask, wm, bm)


def _mhatt_cross(x_q, y_kv, amask, wq, bq, wkv, bkv, wm, bm):
    """Cross-attention: Q from x (scale pre-folded), fused K/V projection from y."""
    q = jnp.dot(x_q, wq, preferred_element_type=jnp.float32) + bq
    kv = jnp.dot(y_kv, wkv, preferred_element_type=jnp.float32) + bkv
    k = kv[:, 0:HIDDEN]
    v = kv[:, HIDDEN:2 * HIDDEN]
    return _attend(q, k, v, amask, wm, bm)


def _ffn(x_in, w1, b1, w2, b2):
    h = jnp.dot(x_in, w1, preferred_element_type=jnp.float32) + b1
    h = jnp.maximum(h, 0.0)
    return jnp.dot(h, w2, preferred_element_type=jnp.float32) + b2


def _add_ln(x_in, delta, g, b):
    """LayerNorm(x + delta), torch/MCAN-style: unbiased std, (std + eps) in denominator."""
    xs = x_in + delta
    mean = jnp.mean(xs, axis=-1, keepdims=True)
    xc = xs - mean
    var = jnp.sum(xc * xc, axis=-1, keepdims=True) * (1.0 / (HIDDEN - 1))
    std = jnp.sqrt(var)
    return g * xc / (std + LN_EPS) + b


# ------------------------------- fused kernel --------------------------------
def mca_ed_kernel(y_ref, x_ref, encm_ref, dsm_ref, dcm_ref, *refs):
    """Whole (batch-folded) encoder-decoder stack in one invocation, all in VMEM."""
    n_enc = len(ENC_W_NAMES)
    n_dec = len(DEC_W_NAMES)
    enc = dict(zip(ENC_W_NAMES, refs[:n_enc]))
    dec = dict(zip(DEC_W_NAMES, refs[n_enc:n_enc + n_dec]))
    y_out_ref, x_out_ref = refs[n_enc + n_dec:]

    y = y_ref[...]        # (B*SY, H) batch folded along sublanes
    x = x_ref[...]        # (B*SX, H)
    enc_m = encm_ref[...]  # (B*SY, B*SY) additive: block-diag batch + key padding
    dsm = dsm_ref[...]     # (B*SX, B*SX)
    dcm = dcm_ref[...]     # (B*SX, B*SY)

    # ---------------- encoder: LAYER x SA ----------------
    for l in range(LAYER):
        wqkv = enc["wqkv"][l]; bqkv = enc["bqkv"][l]
        wm = enc["wm"][l]; bm = enc["bm"][l]
        att = _mhatt_self(y, enc_m, wqkv, bqkv, wm, bm)
        y = _add_ln(y, att, enc["ln1g"][l], enc["ln1b"][l])
        y = _add_ln(y, _ffn(y, enc["w1"][l], enc["b1"][l], enc["w2"][l], enc["b2"][l]),
                    enc["ln2g"][l], enc["ln2b"][l])

    # ---------------- decoder: LAYER x SGA ----------------
    for l in range(LAYER):
        att = _mhatt_self(x, dsm, dec["s_wqkv"][l], dec["s_bqkv"][l],
                          dec["s_wm"][l], dec["s_bm"][l])
        x = _add_ln(x, att, dec["ln1g"][l], dec["ln1b"][l])
        att = _mhatt_cross(x, y, dcm, dec["c_wq"][l], dec["c_bq"][l],
                           dec["c_wkv"][l], dec["c_bkv"][l],
                           dec["c_wm"][l], dec["c_bm"][l])
        x = _add_ln(x, att, dec["ln2g"][l], dec["ln2b"][l])
        x = _add_ln(x, _ffn(x, dec["w1"][l], dec["b1"][l], dec["w2"][l], dec["b2"][l]),
                    dec["ln3g"][l], dec["ln3b"][l])

    y_out_ref[...] = y
    x_out_ref[...] = x


# ----------------------------- parameter packing -----------------------------
def pack_params(params):
    """One-time weight transform (call OUTSIDE the jitted forward):
    stack per-layer weights along a leading LAYER axis, fuse QKV (and KV) projections,
    and fold the 1/sqrt(DK) attention scale into the Q projections."""
    def qkv(m):
        wq = m["wq"] * INV_SQRT_DK
        bq = m["bq"] * INV_SQRT_DK
        return (jnp.concatenate([wq, m["wk"], m["wv"]], axis=1),
                jnp.concatenate([bq, m["bk"], m["bv"]], axis=1))

    enc = {n: [] for n in ENC_W_NAMES}
    for lp in params["enc"]:
        wqkv, bqkv = qkv(lp["mhatt"])
        enc["wqkv"].append(wqkv); enc["bqkv"].append(bqkv)
        enc["wm"].append(lp["mhatt"]["wm"]); enc["bm"].append(lp["mhatt"]["bm"])
        enc["w1"].append(lp["ffn"]["w1"]); enc["b1"].append(lp["ffn"]["b1"])
        enc["w2"].append(lp["ffn"]["w2"]); enc["b2"].append(lp["ffn"]["b2"])
        enc["ln1g"].append(lp["ln1"]["g"]); enc["ln1b"].append(lp["ln1"]["b"])
        enc["ln2g"].append(lp["ln2"]["g"]); enc["ln2b"].append(lp["ln2"]["b"])

    dec = {n: [] for n in DEC_W_NAMES}
    for lp in params["dec"]:
        wqkv, bqkv = qkv(lp["mhatt1"])
        dec["s_wqkv"].append(wqkv); dec["s_bqkv"].append(bqkv)
        dec["s_wm"].append(lp["mhatt1"]["wm"]); dec["s_bm"].append(lp["mhatt1"]["bm"])
        m2 = lp["mhatt2"]
        dec["c_wq"].append(m2["wq"] * INV_SQRT_DK)
        dec["c_bq"].append(m2["bq"] * INV_SQRT_DK)
        dec["c_wkv"].append(jnp.concatenate([m2["wk"], m2["wv"]], axis=1))
        dec["c_bkv"].append(jnp.concatenate([m2["bk"], m2["bv"]], axis=1))
        dec["c_wm"].append(m2["wm"]); dec["c_bm"].append(m2["bm"])
        dec["w1"].append(lp["ffn"]["w1"]); dec["b1"].append(lp["ffn"]["b1"])
        dec["w2"].append(lp["ffn"]["w2"]); dec["b2"].append(lp["ffn"]["b2"])
        for i in (1, 2, 3):
            dec[f"ln{i}g"].append(lp[f"ln{i}"]["g"])
            dec[f"ln{i}b"].append(lp[f"ln{i}"]["b"])

    enc = {n: jnp.stack(v, axis=0) for n, v in enc.items()}
    dec = {n: jnp.stack(v, axis=0) for n, v in dec.items()}
    return [enc[n] for n in ENC_W_NAMES] + [dec[n] for n in DEC_W_NAMES]


# ------------------------------- public wrapper -------------------------------
def mca_ed(packed_weights, y, x, y_mask, x_mask):
    """y: (B,SY,H) language feats, x: (B,SX,H) image feats.
    y_mask/x_mask: (B,1,1,S) bool (True = masked), as in MCAN.
    packed_weights: output of pack_params() (computed once, not per call)."""
    Bn, Sy, H = y.shape
    Sx = x.shape[1]

    # Fold batch along sublanes: whole stack runs in ONE grid-less kernel invocation.
    yf = y.reshape(Bn * Sy, H)
    xf = x.reshape(Bn * Sx, H)

    # Block-diagonal additive masks (0.0 attended / -1e9 masked or cross-batch),
    # built once per call in the wrapper -> no broadcasts inside the kernel.
    y_pad = y_mask.reshape(Bn * Sy)
    x_pad = x_mask.reshape(Bn * Sx)
    yb = jnp.repeat(jnp.arange(Bn), Sy)
    xb = jnp.repeat(jnp.arange(Bn), Sx)

    def additive(q_b, k_b, k_pad):
        ok = (q_b[:, None] == k_b[None, :]) & jnp.logical_not(k_pad)[None, :]
        return jnp.where(ok, 0.0, NEG_INF).astype(jnp.float32)

    enc_m = additive(yb, yb, y_pad)      # (B*SY, B*SY)  encoder self-attn
    dsm = additive(xb, xb, x_pad)        # (B*SX, B*SX)  decoder self-attn
    dcm = additive(xb, yb, y_pad)        # (B*SX, B*SY)  decoder cross-attn

    # No grid / no BlockSpecs: every input is a whole-array VMEM block loaded once;
    # weights (~170 KiB) + activations (<10 KiB) stay resident for the full stack.
    # TODO(synk): on v7x, a grid=(B,) + CORE_PARALLEL variant could use both TensorCores.
    y_out, x_out = pl.pallas_call(
        mca_ed_kernel,
        out_shape=(jax.ShapeDtypeStruct((Bn * Sy, H), jnp.float32),
                   jax.ShapeDtypeStruct((Bn * Sx, H), jnp.float32)),
    )(yf, xf, enc_m, dsm, dcm, *packed_weights)

    return y_out.reshape(Bn, Sy, H), x_out.reshape(Bn, Sx, H)


# ------------------------------ parameter init -------------------------------
def init_linear(key, d_in, d_out):
    return {"w": jax.random.normal(key, (d_in, d_out), jnp.float32) * 0.05,
            "b": jnp.zeros((1, d_out), jnp.float32)}


def init_mhatt(key):
    ks = jax.random.split(key, 4)
    lv = init_linear(ks[0], HIDDEN, HIDDEN)
    lk = init_linear(ks[1], HIDDEN, HIDDEN)
    lq = init_linear(ks[2], HIDDEN, HIDDEN)
    lm = init_linear(ks[3], HIDDEN, HIDDEN)
    return {"wv": lv["w"], "bv": lv["b"], "wk": lk["w"], "bk": lk["b"],
            "wq": lq["w"], "bq": lq["b"], "wm": lm["w"], "bm": lm["b"]}


def init_ffn(key):
    k1, k2 = jax.random.split(key)
    l1 = init_linear(k1, HIDDEN, FF)
    l2 = init_linear(k2, FF, HIDDEN)
    return {"w1": l1["w"], "b1": l1["b"], "w2": l2["w"], "b2": l2["b"]}


def init_ln():
    return {"g": jnp.ones((1, HIDDEN), jnp.float32),
            "b": jnp.zeros((1, HIDDEN), jnp.float32)}


def init_params(key):
    enc, dec = [], []
    keys = jax.random.split(key, 2 * LAYER)
    for l in range(LAYER):
        k1, k2 = jax.random.split(keys[l])
        enc.append({"mhatt": init_mhatt(k1), "ffn": init_ffn(k2),
                    "ln1": init_ln(), "ln2": init_ln()})
    for l in range(LAYER):
        k1, k2, k3 = jax.random.split(keys[LAYER + l], 3)
        dec.append({"mhatt1": init_mhatt(k1), "mhatt2": init_mhatt(k2),
                    "ffn": init_ffn(k3),
                    "ln1": init_ln(), "ln2": init_ln(), "ln3": init_ln()})
    return {"enc": enc, "dec": dec}


# ------------------------------ pure-JAX reference ---------------------------
def ref_mhatt(p, v, k, q, mask):
    Bn, Sq, H = q.shape
    def proj(x, w, b):
        return x @ w + b
    v = proj(v, p["wv"], p["bv"]).reshape(Bn, -1, NH, DK).transpose(0, 2, 1, 3)
    k = proj(k, p["wk"], p["bk"]).reshape(Bn, -1, NH, DK).transpose(0, 2, 1, 3)
    q = proj(q, p["wq"], p["bq"]).reshape(Bn, -1, NH, DK).transpose(0, 2, 1, 3)
    scores = jnp.einsum("bhqd,bhkd->bhqk", q, k) / math.sqrt(DK)
    scores = jnp.where(mask, NEG_INF, scores)
    att = jax.nn.softmax(scores, axis=-1)
    out = jnp.einsum("bhqk,bhkd->bhqd", att, v).transpose(0, 2, 1, 3).reshape(Bn, Sq, H)
    return out @ p["wm"] + p["bm"]


def ref_ffn(p, x):
    return jnp.maximum(x @ p["w1"] + p["b1"], 0.0) @ p["w2"] + p["b2"]


def ref_add_ln(p, x, d):
    x = x + d
    mean = jnp.mean(x, axis=-1, keepdims=True)
    xc = x - mean
    std = jnp.sqrt(jnp.sum(xc * xc, axis=-1, keepdims=True) / (HIDDEN - 1))
    return p["g"] * xc / (std + LN_EPS) + p["b"]


def ref_mca_ed(params, y, x, y_mask, x_mask):
    for lp in params["enc"]:
        y = ref_add_ln(lp["ln1"], y, ref_mhatt(lp["mhatt"], y, y, y, y_mask))
        y = ref_add_ln(lp["ln2"], y, ref_ffn(lp["ffn"], y))
    for lp in params["dec"]:
        x = ref_add_ln(lp["ln1"], x, ref_mhatt(lp["mhatt1"], x, x, x, x_mask))
        x = ref_add_ln(lp["ln2"], x, ref_mhatt(lp["mhatt2"], y, y, x, y_mask))
        x = ref_add_ln(lp["ln3"], x, ref_ffn(lp["ffn"], x))
    return y, x


# ------------------------------------ main ------------------------------------
if __name__ == "__main__":
    key = jax.random.PRNGKey(0)
    kp, ky, kx = jax.random.split(key, 3)

    params = init_params(kp)
    y = jax.random.normal(ky, (B, SY, HIDDEN), jnp.float32)
    x = jax.random.normal(kx, (B, SX, HIDDEN), jnp.float32)

    # MCAN-style masks: (B, 1, 1, S), True = padded/masked position.
    y_lens = jnp.array([SY, 12])
    x_lens = jnp.array([SX, 6])
    y_mask = (jnp.arange(SY)[None, :] >= y_lens[:, None]).reshape(B, 1, 1, SY)
    x_mask = (jnp.arange(SX)[None, :] >= x_lens[:, None]).reshape(B, 1, 1, SX)

    # Pack weights ONCE (hoisted out of the per-call path), then jit the forward.
    packed = pack_params(params)
    fwd = jax.jit(mca_ed)

    y_out, x_out = fwd(packed, y, x, y_mask, x_mask)
    jax.block_until_ready((y_out, x_out))

    y_ref, x_ref = ref_mca_ed(params, y, x, y_mask, x_mask)
    np.testing.assert_allclose(np.asarray(y_out), np.asarray(y_ref), atol=2e-3, rtol=2e-3)
    np.testing.assert_allclose(np.asarray(x_out), np.asarray(x_ref), atol=2e-3, rtol=2e-3)

    print("KERNEL_OK")
</pallas_src>

<mosaic_0001>
module attributes {stable_mosaic.version = 11 : i64} {
  func.func @mca_ed_kernel(%arg0: memref<32x32xf32, #tpu.memory_space<vmem>>, %arg1: memref<16x32xf32, #tpu.memory_space<vmem>>, %arg2: memref<32x32xf32, #tpu.memory_space<vmem>>, %arg3: memref<16x16xf32, #tpu.memory_space<vmem>>, %arg4: memref<16x32xf32, #tpu.memory_space<vmem>>, %arg5: memref<2x32x96xf32, #tpu.memory_space<vmem>>, %arg6: memref<2x1x96xf32, #tpu.memory_space<vmem>>, %arg7: memref<2x32x32xf32, #tpu.memory_space<vmem>>, %arg8: memref<2x1x32xf32, #tpu.memory_space<vmem>>, %arg9: memref<2x32x64xf32, #tpu.memory_space<vmem>>, %arg10: memref<2x1x64xf32, #tpu.memory_space<vmem>>, %arg11: memref<2x64x32xf32, #tpu.memory_space<vmem>>, %arg12: memref<2x1x32xf32, #tpu.memory_space<vmem>>, %arg13: memref<2x1x32xf32, #tpu.memory_space<vmem>>, %arg14: memref<2x1x32xf32, #tpu.memory_space<vmem>>, %arg15: memref<2x1x32xf32, #tpu.memory_space<vmem>>, %arg16: memref<2x1x32xf32, #tpu.memory_space<vmem>>, %arg17: memref<2x32x96xf32, #tpu.memory_space<vmem>>, %arg18: memref<2x1x96xf32, #tpu.memory_space<vmem>>, %arg19: memref<2x32x32xf32, #tpu.memory_space<vmem>>, %arg20: memref<2x1x32xf32, #tpu.memory_space<vmem>>, %arg21: memref<2x32x32xf32, #tpu.memory_space<vmem>>, %arg22: memref<2x1x32xf32, #tpu.memory_space<vmem>>, %arg23: memref<2x32x64xf32, #tpu.memory_space<vmem>>, %arg24: memref<2x1x64xf32, #tpu.memory_space<vmem>>, %arg25: memref<2x32x32xf32, #tpu.memory_space<vmem>>, %arg26: memref<2x1x32xf32, #tpu.memory_space<vmem>>, %arg27: memref<2x32x64xf32, #tpu.memory_space<vmem>>, %arg28: memref<2x1x64xf32, #tpu.memory_space<vmem>>, %arg29: memref<2x64x32xf32, #tpu.memory_space<vmem>>, %arg30: memref<2x1x32xf32, #tpu.memory_space<vmem>>, %arg31: memref<2x1x32xf32, #tpu.memory_space<vmem>>, %arg32: memref<2x1x32xf32, #tpu.memory_space<vmem>>, %arg33: memref<2x1x32xf32, #tpu.memory_space<vmem>>, %arg34: memref<2x1x32xf32, #tpu.memory_space<vmem>>, %arg35: memref<2x1x32xf32, #tpu.memory_space<vmem>>, %arg36: memref<2x1x32xf32, #tpu.memory_space<vmem>>, %arg37: memref<32x32xf32, #tpu.memory_space<vmem>>, %arg38: memref<16x32xf32, #tpu.memory_space<vmem>>) attributes {dimension_semantics = [], scalar_prefetch = 0 : i64, scratch_operands = 0 : i64, tpu.core_type = #tpu.core_type<tc>} {
    %c0 = arith.constant 0 : index
    %c0_0 = arith.constant 0 : index
    %0 = vector.load %arg0[%c0, %c0_0] : memref<32x32xf32, #tpu.memory_space<vmem>>, vector<32x32xf32>
    %c0_1 = arith.constant 0 : index
    %c0_2 = arith.constant 0 : index
    %1 = vector.load %arg1[%c0_1, %c0_2] : memref<16x32xf32, #tpu.memory_space<vmem>>, vector<16x32xf32>
    %c0_3 = arith.constant 0 : index
    %c0_4 = arith.constant 0 : index
    %2 = vector.load %arg2[%c0_3, %c0_4] : memref<32x32xf32, #tpu.memory_space<vmem>>, vector<32x32xf32>
    %c0_5 = arith.constant 0 : index
    %c0_6 = arith.constant 0 : index
    %3 = vector.load %arg3[%c0_5, %c0_6] : memref<16x16xf32, #tpu.memory_space<vmem>>, vector<16x16xf32>
    %c0_7 = arith.constant 0 : index
    %c0_8 = arith.constant 0 : index
    %4 = vector.load %arg4[%c0_7, %c0_8] : memref<16x32xf32, #tpu.memory_space<vmem>>, vector<16x32xf32>
    %c0_9 = arith.constant 0 : index
    %c0_10 = arith.constant 0 : index
    %c0_11 = arith.constant 0 : index
    %5 = vector.load %arg5[%c0_9, %c0_10, %c0_11] : memref<2x32x96xf32, #tpu.memory_space<vmem>>, vector<1x32x96xf32>
    %6 = vector.shape_cast %5 : vector<1x32x96xf32> to vector<32x96xf32>
    %c0_12 = arith.constant 0 : index
    %c0_13 = arith.constant 0 : index
    %c0_14 = arith.constant 0 : index
    %7 = vector.load %arg6[%c0_12, %c0_13, %c0_14] : memref<2x1x96xf32, #tpu.memory_space<vmem>>, vector<1x1x96xf32>
    %8 = vector.shape_cast %7 : vector<1x1x96xf32> to vector<1x96xf32>
    %c0_15 = arith.constant 0 : index
    %c0_16 = arith.constant 0 : index
    %c0_17 = arith.constant 0 : index
    %9 = vector.load %arg7[%c0_15, %c0_16, %c0_17] : memref<2x32x32xf32, #tpu.memory_space<vmem>>, vector<1x32x32xf32>
    %10 = vector.shape_cast %9 : vector<1x32x32xf32> to vector<32x32xf32>
    %c0_18 = arith.constant 0 : index
    %c0_19 = arith.constant 0 : index
    %c0_20 = arith.constant 0 : index
    %11 = vector.load %arg8[%c0_18, %c0_19, %c0_20] : memref<2x1x32xf32, #tpu.memory_space<vmem>>, vector<1x1x32xf32>
    %12 = vector.shape_cast %11 : vector<1x1x32xf32> to vector<1x32xf32>
    %cst = arith.constant dense<0.000000e+00> : vector<32x96xf32>
    %13 = tpu.matmul %0, %6, %cst {dimension_numbers = #tpu.dot_dimension_numbers<[1], [0], [0], [1], [0, 0, 1, 1], [], []>} : vector<32x32xf32>, vector<32x96xf32>, vector<32x96xf32> -> vector<32x96xf32>
    %14 = vector.broadcast %8 : vector<1x96xf32> to vector<32x96xf32>
    %15 = arith.addf %13, %14 : vector<32x96xf32>
    %16 = vector.extract_strided_slice %15 {offsets = [0, 0], sizes = [32, 32], strides = [1, 1]} : vector<32x96xf32> to vector<32x32xf32>
    %17 = vector.extract_strided_slice %15 {offsets = [0, 32], sizes = [32, 32], strides = [1, 1]} : vector<32x96xf32> to vector<32x32xf32>
    %18 = vector.extract_strided_slice %15 {offsets = [0, 64], sizes = [32, 32], strides = [1, 1]} : vector<32x96xf32> to vector<32x32xf32>
    %19 = vector.extract_strided_slice %16 {offsets = [0, 0], sizes = [32, 8], strides = [1, 1]} : vector<32x32xf32> to vector<32x8xf32>
    %20 = vector.extract_strided_slice %17 {offsets = [0, 0], sizes = [32, 8], strides = [1, 1]} : vector<32x32xf32> to vector<32x8xf32>
    %21 = vector.extract_strided_slice %18 {offsets = [0, 0], sizes = [32, 8], strides = [1, 1]} : vector<32x32xf32> to vector<32x8xf32>
    %cst_21 = arith.constant dense<0.000000e+00> : vector<32x32xf32>
    %22 = tpu.matmul %19, %20, %cst_21 {dimension_numbers = #tpu.dot_dimension_numbers<[1], [1], [0], [0], [0, 0, 1, 0], [], []>} : vector<32x8xf32>, vector<32x8xf32>, vector<32x32xf32> -> vector<32x32xf32>
    %23 = arith.addf %22, %2 : vector<32x32xf32>
    %cst_22 = arith.constant dense<0xFF800000> : vector<32xf32>
    %24 = vector.multi_reduction <maximumf>, %23, %cst_22 [1] : vector<32x32xf32> to vector<32xf32>
    %25 = vector.shape_cast %24 : vector<32xf32> to vector<32x1xf32>
    %26 = vector.broadcast %25 : vector<32x1xf32> to vector<32x32xf32>
    %27 = arith.subf %23, %26 : vector<32x32xf32>
    %28 = math.exp %27 : vector<32x32xf32>
    %cst_23 = arith.constant dense<0.000000e+00> : vector<32xf32>
    %29 = vector.multi_reduction <add>, %28, %cst_23 [1] : vector<32x32xf32> to vector<32xf32>
    %30 = vector.shape_cast %29 : vector<32xf32> to vector<32x1xf32>
    %31 = vector.broadcast %30 : vector<32x1xf32> to vector<32x32xf32>
    %32 = arith.divf %28, %31 : vector<32x32xf32>
    %cst_24 = arith.constant dense<0.000000e+00> : vector<32x8xf32>
    %33 = tpu.matmul %32, %21, %cst_24 {dimension_numbers = #tpu.dot_dimension_numbers<[1], [0], [0], [1], [0, 0, 1, 1], [], []>} : vector<32x32xf32>, vector<32x8xf32>, vector<32x8xf32> -> vector<32x8xf32>
    %34 = vector.extract_strided_slice %16 {offsets = [0, 8], sizes = [32, 8], strides = [1, 1]} : vector<32x32xf32> to vector<32x8xf32>
    %35 = vector.extract_strided_slice %17 {offsets = [0, 8], sizes = [32, 8], strides = [1, 1]} : vector<32x32xf32> to vector<32x8xf32>
    %36 = vector.extract_strided_slice %18 {offsets = [0, 8], sizes = [32, 8], strides = [1, 1]} : vector<32x32xf32> to vector<32x8xf32>
    %cst_25 = arith.constant dense<0.000000e+00> : vector<32x32xf32>
    %37 = tpu.matmul %34, %35, %cst_25 {dimension_numbers = #tpu.dot_dimension_numbers<[1], [1], [0], [0], [0, 0, 1, 0], [], []>} : vector<32x8xf32>, vector<32x8xf32>, vector<32x32xf32> -> vector<32x32xf32>
    %38 = arith.addf %37, %2 : vector<32x32xf32>
    %cst_26 = arith.constant dense<0xFF800000> : vector<32xf32>
    %39 = vector.multi_reduction <maximumf>, %38, %cst_26 [1] : vector<32x32xf32> to vector<32xf32>
    %40 = vector.shape_cast %39 : vector<32xf32> to vector<32x1xf32>
    %41 = vector.broadcast %40 : vector<32x1xf32> to vector<32x32xf32>
    %42 = arith.subf %38, %41 : vector<32x32xf32>
    %43 = math.exp %42 : vector<32x32xf32>
    %cst_27 = arith.constant dense<0.000000e+00> : vector<32xf32>
    %44 = vector.multi_reduction <add>, %43, %cst_27 [1] : vector<32x32xf32> to vector<32xf32>
    %45 = vector.shape_cast %44 : vector<32xf32> to vector<32x1xf32>
    %46 = vector.broadcast %45 : vector<32x1xf32> to vector<32x32xf32>
    %47 = arith.divf %43, %46 : vector<32x32xf32>
    %cst_28 = arith.constant dense<0.000000e+00> : vector<32x8xf32>
    %48 = tpu.matmul %47, %36, %cst_28 {dimension_numbers = #tpu.dot_dimension_numbers<[1], [0], [0], [1], [0, 0, 1, 1], [], []>} : vector<32x32xf32>, vector<32x8xf32>, vector<32x8xf32> -> vector<32x8xf32>
    %49 = vector.extract_strided_slice %16 {offsets = [0, 16], sizes = [32, 8], strides = [1, 1]} : vector<32x32xf32> to vector<32x8xf32>
    %50 = vector.extract_strided_slice %17 {offsets = [0, 16], sizes = [32, 8], strides = [1, 1]} : vector<32x32xf32> to vector<32x8xf32>
    %51 = vector.extract_strided_slice %18 {offsets = [0, 16], sizes = [32, 8], strides = [1, 1]} : vector<32x32xf32> to vector<32x8xf32>
    %cst_29 = arith.constant dense<0.000000e+00> : vector<32x32xf32>
    %52 = tpu.matmul %49, %50, %cst_29 {dimension_numbers = #tpu.dot_dimension_numbers<[1], [1], [0], [0], [0, 0, 1, 0], [], []>} : vector<32x8xf32>, vector<32x8xf32>, vector<32x32xf32> -> vector<32x32xf32>
    %53 = arith.addf %52, %2 : vector<32x32xf32>
    %cst_30 = arith.constant dense<0xFF800000> : vector<32xf32>
    %54 = vector.multi_reduction <maximumf>, %53, %cst_30 [1] : vector<32x32xf32> to vector<32xf32>
    %55 = vector.shape_cast %54 : vector<32xf32> to vector<32x1xf32>
    %56 = vector.broadcast %55 : vector<32x1xf32> to vector<32x32xf32>
    %57 = arith.subf %53, %56 : vector<32x32xf32>
    %58 = math.exp %57 : vector<32x32xf32>
    %cst_31 = arith.constant dense<0.000000e+00> : vector<32xf32>
    %59 = vector.multi_reduction <add>, %58, %cst_31 [1] : vector<32x32xf32> to vector<32xf32>
    %60 = vector.shape_cast %59 : vector<32xf32> to vector<32x1xf32>
    %61 = vector.broadcast %60 : vector<32x1xf32> to vector<32x32xf32>
    %62 = arith.divf %58, %61 : vector<32x32xf32>
    %cst_32 = arith.constant dense<0.000000e+00> : vector<32x8xf32>
    %63 = tpu.matmul %62, %51, %cst_32 {dimension_numbers = #tpu.dot_dimension_numbers<[1], [0], [0], [1], [0, 0, 1, 1], [], []>} : vector<32x32xf32>, vector<32x8xf32>, vector<32x8xf32> -> vector<32x8xf32>
    %64 = vector.extract_strided_slice %16 {offsets = [0, 24], sizes = [32, 8], strides = [1, 1]} : vector<32x32xf32> to vector<32x8xf32>
    %65 = vector.extract_strided_slice %17 {offsets = [0, 24], sizes = [32, 8], strides = [1, 1]} : vector<32x32xf32> to vector<32x8xf32>
    %66 = vector.extract_strided_slice %18 {offsets = [0, 24], sizes = [32, 8], strides = [1, 1]} : vector<32x32xf32> to vector<32x8xf32>
    %cst_33 = arith.constant dense<0.000000e+00> : vector<32x32xf32>
    %67 = tpu.matmul %64, %65, %cst_33 {dimension_numbers = #tpu.dot_dimension_numbers<[1], [1], [0], [0], [0, 0, 1, 0], [], []>} : vector<32x8xf32>, vector<32x8xf32>, vector<32x32xf32> -> vector<32x32xf32>
    %68 = arith.addf %67, %2 : vector<32x32xf32>
    %cst_34 = arith.constant dense<0xFF800000> : vector<32xf32>
    %69 = vector.multi_reduction <maximumf>, %68, %cst_34 [1] : vector<32x32xf32> to vector<32xf32>
    %70 = vector.shape_cast %69 : vector<32xf32> to vector<32x1xf32>
    %71 = vector.broadcast %70 : vector<32x1xf32> to vector<32x32xf32>
    %72 = arith.subf %68, %71 : vector<32x32xf32>
    %73 = math.exp %72 : vector<32x32xf32>
    %cst_35 = arith.constant dense<0.000000e+00> : vector<32xf32>
    %74 = vector.multi_reduction <add>, %73, %cst_35 [1] : vector<32x32xf32> to vector<32xf32>
    %75 = vector.shape_cast %74 : vector<32xf32> to vector<32x1xf32>
    %76 = vector.broadcast %75 : vector<32x1xf32> to vector<32x32xf32>
    %77 = arith.divf %73, %76 : vector<32x32xf32>
    %cst_36 = arith.constant dense<0.000000e+00> : vector<32x8xf32>
    %78 = tpu.matmul %77, %66, %cst_36 {dimension_numbers = #tpu.dot_dimension_numbers<[1], [0], [0], [1], [0, 0, 1, 1], [], []>} : vector<32x32xf32>, vector<32x8xf32>, vector<32x8xf32> -> vector<32x8xf32>
    %79 = tpu.concatenate %33, %48, %63, %78 in 1 : vector<32x8xf32>, vector<32x8xf32>, vector<32x8xf32>, vector<32x8xf32> -> vector<32x32xf32>
    %cst_37 = arith.constant dense<0.000000e+00> : vector<32x32xf32>
    %80 = tpu.matmul %79, %10, %cst_37 {dimension_numbers = #tpu.dot_dimension_numbers<[1], [0], [0], [1], [0, 0, 1, 1], [], []>} : vector<32x32xf32>, vector<32x32xf32>, vector<32x32xf32> -> vector<32x32xf32>
    %81 = vector.broadcast %12 : vector<1x32xf32> to vector<32x32xf32>
    %82 = arith.addf %80, %81 : vector<32x32xf32>
    %c0_38 = arith.constant 0 : index
    %c0_39 = arith.constant 0 : index
    %c0_40 = arith.constant 0 : index
    %83 = vector.load %arg13[%c0_38, %c0_39, %c0_40] : memref<2x1x32xf32, #tpu.memory_space<vmem>>, vector<1x1x32xf32>
    %84 = vector.shape_cast %83 : vector<1x1x32xf32> to vector<1x32xf32>
    %c0_41 = arith.constant 0 : index
    %c0_42 = arith.constant 0 : index
    %c0_43 = arith.constant 0 : index
    %85 = vector.load %arg14[%c0_41, %c0_42, %c0_43] : memref<2x1x32xf32, #tpu.memory_space<vmem>>, vector<1x1x32xf32>
    %86 = vector.shape_cast %85 : vector<1x1x32xf32> to vector<1x32xf32>
    %87 = arith.addf %0, %82 : vector<32x32xf32>
    %cst_44 = arith.constant dense<0.000000e+00> : vector<32xf32>
    %88 = vector.multi_reduction <add>, %87, %cst_44 [1] : vector<32x32xf32> to vector<32xf32>
    %89 = vector.shape_cast %88 : vector<32xf32> to vector<32x1xf32>
    %cst_45 = arith.constant 3.200000e+01 : f32
    %90 = vector.broadcast %cst_45 : f32 to vector<32x1xf32>
    %91 = arith.divf %89, %90 : vector<32x1xf32>
    %92 = vector.broadcast %91 : vector<32x1xf32> to vector<32x32xf32>
    %93 = arith.subf %87, %92 : vector<32x32xf32>
    %94 = arith.mulf %93, %93 : vector<32x32xf32>
    %cst_46 = arith.constant dense<0.000000e+00> : vector<32xf32>
    %95 = vector.multi_reduction <add>, %94, %cst_46 [1] : vector<32x32xf32> to vector<32xf32>
    %96 = vector.shape_cast %95 : vector<32xf32> to vector<32x1xf32>
    %cst_47 = arith.constant 0.0322580636 : f32
    %97 = vector.broadcast %cst_47 : f32 to vector<32x1xf32>
    %98 = arith.mulf %96, %97 : vector<32x1xf32>
    %99 = math.sqrt %98 : vector<32x1xf32>
    %100 = vector.broadcast %84 : vector<1x32xf32> to vector<32x32xf32>
    %101 = arith.mulf %100, %93 : vector<32x32xf32>
    %cst_48 = arith.constant 9.99999997E-7 : f32
    %102 = vector.broadcast %cst_48 : f32 to vector<32x1xf32>
    %103 = arith.addf %99, %102 : vector<32x1xf32>
    %104 = vector.broadcast %103 : vector<32x1xf32> to vector<32x32xf32>
    %105 = arith.divf %101, %104 : vector<32x32xf32>
    %106 = vector.broadcast %86 : vector<1x32xf32> to vector<32x32xf32>
    %107 = arith.addf %105, %106 : vector<32x32xf32>
    %c0_49 = arith.constant 0 : index
    %c0_50 = arith.constant 0 : index
    %c0_51 = arith.constant 0 : index
    %108 = vector.load %arg9[%c0_49, %c0_50, %c0_51] : memref<2x32x64xf32, #tpu.memory_space<vmem>>, vector<1x32x64xf32>
    %109 = vector.shape_cast %108 : vector<1x32x64xf32> to vector<32x64xf32>
    %c0_52 = arith.constant 0 : index
    %c0_53 = arith.constant 0 : index
    %c0_54 = arith.constant 0 : index
    %110 = vector.load %arg10[%c0_52, %c0_53, %c0_54] : memref<2x1x64xf32, #tpu.memory_space<vmem>>, vector<1x1x64xf32>
    %111 = vector.shape_cast %110 : vector<1x1x64xf32> to vector<1x64xf32>
    %c0_55 = arith.constant 0 : index
    %c0_56 = arith.constant 0 : index
    %c0_57 = arith.constant 0 : index
    %112 = vector.load %arg11[%c0_55, %c0_56, %c0_57] : memref<2x64x32xf32, #tpu.memory_space<vmem>>, vector<1x64x32xf32>
    %113 = vector.shape_cast %112 : vector<1x64x32xf32> to vector<64x32xf32>
    %c0_58 = arith.constant 0 : index
    %c0_59 = arith.constant 0 : index
    %c0_60 = arith.constant 0 : index
    %114 = vector.load %arg12[%c0_58, %c0_59, %c0_60] : memref<2x1x32xf32, #tpu.memory_space<vmem>>, vector<1x1x32xf32>
    %115 = vector.shape_cast %114 : vector<1x1x32xf32> to vector<1x32xf32>
    %cst_61 = arith.constant dense<0.000000e+00> : vector<32x64xf32>
    %116 = tpu.matmul %107, %109, %cst_61 {dimension_numbers = #tpu.dot_dimension_numbers<[1], [0], [0], [1], [0, 0, 1, 1], [], []>} : vector<32x32xf32>, vector<32x64xf32>, vector<32x64xf32> -> vector<32x64xf32>
    %117 = vector.broadcast %111 : vector<1x64xf32> to vector<32x64xf32>
    %118 = arith.addf %116, %117 : vector<32x64xf32>
    %cst_62 = arith.constant 0.000000e+00 : f32
    %119 = vector.broadcast %cst_62 : f32 to vector<32x64xf32>
    %120 = arith.maximumf %118, %119 : vector<32x64xf32>
    %cst_63 = arith.constant dense<0.000000e+00> : vector<32x32xf32>
    %121 = tpu.matmul %120, %113, %cst_63 {dimension_numbers = #tpu.dot_dimension_numbers<[1], [0], [0], [1], [0, 0, 1, 1], [], []>} : vector<32x64xf32>, vector<64x32xf32>, vector<32x32xf32> -> vector<32x32xf32>
    %122 = vector.broadcast %115 : vector<1x32xf32> to vector<32x32xf32>
    %123 = arith.addf %121, %122 : vector<32x32xf32>
    %c0_64 = arith.constant 0 : index
    %c0_65 = arith.constant 0 : index
    %c0_66 = arith.constant 0 : index
    %124 = vector.load %arg15[%c0_64, %c0_65, %c0_66] : memref<2x1x32xf32, #tpu.memory_space<vmem>>, vector<1x1x32xf32>
    %125 = vector.shape_cast %124 : vector<1x1x32xf32> to vector<1x32xf32>
    %c0_67 = arith.constant 0 : index
    %c0_68 = arith.constant 0 : index
    %c0_69 = arith.constant 0 : index
    %126 = vector.load %arg16[%c0_67, %c0_68, %c0_69] : memref<2x1x32xf32, #tpu.memory_space<vmem>>, vector<1x1x32xf32>
    %127 = vector.shape_cast %126 : vector<1x1x32xf32> to vector<1x32xf32>
    %128 = arith.addf %107, %123 : vector<32x32xf32>
    %cst_70 = arith.constant dense<0.000000e+00> : vector<32xf32>
    %129 = vector.multi_reduction <add>, %128, %cst_70 [1] : vector<32x32xf32> to vector<32xf32>
    %130 = vector.shape_cast %129 : vector<32xf32> to vector<32x1xf32>
    %cst_71 = arith.constant 3.200000e+01 : f32
    %131 = vector.broadcast %cst_71 : f32 to vector<32x1xf32>
    %132 = arith.divf %130, %131 : vector<32x1xf32>
    %133 = vector.broadcast %132 : vector<32x1xf32> to vector<32x32xf32>
    %134 = arith.subf %128, %133 : vector<32x32xf32>
    %135 = arith.mulf %134, %134 : vector<32x32xf32>
    %cst_72 = arith.constant dense<0.000000e+00> : vector<32xf32>
    %136 = vector.multi_reduction <add>, %135, %cst_72 [1] : vector<32x32xf32> to vector<32xf32>
    %137 = vector.shape_cast %136 : vector<32xf32> to vector<32x1xf32>
    %cst_73 = arith.constant 0.0322580636 : f32
    %138 = vector.broadcast %cst_73 : f32 to vector<32x1xf32>
    %139 = arith.mulf %137, %138 : vector<32x1xf32>
    %140 = math.sqrt %139 : vector<32x1xf32>
    %141 = vector.broadcast %125 : vector<1x32xf32> to vector<32x32xf32>
    %142 = arith.mulf %141, %134 : vector<32x32xf32>
    %cst_74 = arith.constant 9.99999997E-7 : f32
    %143 = vector.broadcast %cst_74 : f32 to vector<32x1xf32>
    %144 = arith.addf %140, %143 : vector<32x1xf32>
    %145 = vector.broadcast %144 : vector<32x1xf32> to vector<32x32xf32>
    %146 = arith.divf %142, %145 : vector<32x32xf32>
    %147 = vector.broadcast %127 : vector<1x32xf32> to vector<32x32xf32>
    %148 = arith.addf %146, %147 : vector<32x32xf32>
    %c1 = arith.constant 1 : index
    %c0_75 = arith.constant 0 : index
    %c0_76 = arith.constant 0 : index
    %149 = vector.load %arg5[%c1, %c0_75, %c0_76] : memref<2x32x96xf32, #tpu.memory_space<vmem>>, vector<1x32x96xf32>
    %150 = vector.shape_cast %149 : vector<1x32x96xf32> to vector<32x96xf32>
    %c1_77 = arith.constant 1 : index
    %c0_78 = arith.constant 0 : index
    %c0_79 = arith.constant 0 : index
    %151 = vector.load %arg6[%c1_77, %c0_78, %c0_79] : memref<2x1x96xf32, #tpu.memory_space<vmem>>, vector<1x1x96xf32>
    %152 = vector.shape_cast %151 : vector<1x1x96xf32> to vector<1x96xf32>
    %c1_80 = arith.constant 1 : index
    %c0_81 = arith.constant 0 : index
    %c0_82 = arith.constant 0 : index
    %153 = vector.load %arg7[%c1_80, %c0_81, %c0_82] : memref<2x32x32xf32, #tpu.memory_space<vmem>>, vector<1x32x32xf32>
    %154 = vector.shape_cast %153 : vector<1x32x32xf32> to vector<32x32xf32>
    %c1_83 = arith.constant 1 : index
    %c0_84 = arith.constant 0 : index
    %c0_85 = arith.constant 0 : index
    %155 = vector.load %arg8[%c1_83, %c0_84, %c0_85] : memref<2x1x32xf32, #tpu.memory_space<vmem>>, vector<1x1x32xf32>
    %156 = vector.shape_cast %155 : vector<1x1x32xf32> to vector<1x32xf32>
    %cst_86 = arith.constant dense<0.000000e+00> : vector<32x96xf32>
    %157 = tpu.matmul %148, %150, %cst_86 {dimension_numbers = #tpu.dot_dimension_numbers<[1], [0], [0], [1], [0, 0, 1, 1], [], []>} : vector<32x32xf32>, vector<32x96xf32>, vector<32x96xf32> -> vector<32x96xf32>
    %158 = vector.broadcast %152 : vector<1x96xf32> to vector<32x96xf32>
    %159 = arith.addf %157, %158 : vector<32x96xf32>
    %160 = vector.extract_strided_slice %159 {offsets = [0, 0], sizes = [32, 32], strides = [1, 1]} : vector<32x96xf32> to vector<32x32xf32>
    %161 = vector.extract_strided_slice %159 {offsets = [0, 32], sizes = [32, 32], strides = [1, 1]} : vector<32x96xf32> to vector<32x32xf32>
    %162 = vector.extract_strided_slice %159 {offsets = [0, 64], sizes = [32, 32], strides = [1, 1]} : vector<32x96xf32> to vector<32x32xf32>
    %163 = vector.extract_strided_slice %160 {offsets = [0, 0], sizes = [32, 8], strides = [1, 1]} : vector<32x32xf32> to vector<32x8xf32>
    %164 = vector.extract_strided_slice %161 {offsets = [0, 0], sizes = [32, 8], strides = [1, 1]} : vector<32x32xf32> to vector<32x8xf32>
    %165 = vector.extract_strided_slice %162 {offsets = [0, 0], sizes = [32, 8], strides = [1, 1]} : vector<32x32xf32> to vector<32x8xf32>
    %cst_87 = arith.constant dense<0.000000e+00> : vector<32x32xf32>
    %166 = tpu.matmul %163, %164, %cst_87 {dimension_numbers = #tpu.dot_dimension_numbers<[1], [1], [0], [0], [0, 0, 1, 0], [], []>} : vector<32x8xf32>, vector<32x8xf32>, vector<32x32xf32> -> vector<32x32xf32>
    %167 = arith.addf %166, %2 : vector<32x32xf32>
    %cst_88 = arith.constant dense<0xFF800000> : vector<32xf32>
    %168 = vector.multi_reduction <maximumf>, %167, %cst_88 [1] : vector<32x32xf32> to vector<32xf32>
    %169 = vector.shape_cast %168 : vector<32xf32> to vector<32x1xf32>
    %170 = vector.broadcast %169 : vector<32x1xf32> to vector<32x32xf32>
    %171 = arith.subf %167, %170 : vector<32x32xf32>
    %172 = math.exp %171 : vector<32x32xf32>
    %cst_89 = arith.constant dense<0.000000e+00> : vector<32xf32>
    %173 = vector.multi_reduction <add>, %172, %cst_89 [1] : vector<32x32xf32> to vector<32xf32>
    %174 = vector.shape_cast %173 : vector<32xf32> to vector<32x1xf32>
    %175 = vector.broadcast %174 : vector<32x1xf32> to vector<32x32xf32>
    %176 = arith.divf %172, %175 : vector<32x32xf32>
    %cst_90 = arith.constant dense<0.000000e+00> : vector<32x8xf32>
    %177 = tpu.matmul %176, %165, %cst_90 {dimension_numbers = #tpu.dot_dimension_numbers<[1], [0], [0], [1], [0, 0, 1, 1], [], []>} : vector<32x32xf32>, vector<32x8xf32>, vector<32x8xf32> -> vector<32x8xf32>
    %178 = vector.extract_strided_slice %160 {offsets = [0, 8], sizes = [32, 8], strides = [1, 1]} : vector<32x32xf32> to vector<32x8xf32>
    %179 = vector.extract_strided_slice %161 {offsets = [0, 8], sizes = [32, 8], strides = [1, 1]} : vector<32x32xf32> to vector<32x8xf32>
    %180 = vector.extract_strided_slice %162 {offsets = [0, 8], sizes = [32, 8], strides = [1, 1]} : vector<32x32xf32> to vector<32x8xf32>
    %cst_91 = arith.constant dense<0.000000e+00> : vector<32x32xf32>
    %181 = tpu.matmul %178, %179, %cst_91 {dimension_numbers = #tpu.dot_dimension_numbers<[1], [1], [0], [0], [0, 0, 1, 0], [], []>} : vector<32x8xf32>, vector<32x8xf32>, vector<32x32xf32> -> vector<32x32xf32>
    %182 = arith.addf %181, %2 : vector<32x32xf32>
    %cst_92 = arith.constant dense<0xFF800000> : vector<32xf32>
    %183 = vector.multi_reduction <maximumf>, %182, %cst_92 [1] : vector<32x32xf32> to vector<32xf32>
    %184 = vector.shape_cast %183 : vector<32xf32> to vector<32x1xf32>
    %185 = vector.broadcast %184 : vector<32x1xf32> to vector<32x32xf32>
    %186 = arith.subf %182, %185 : vector<32x32xf32>
    %187 = math.exp %186 : vector<32x32xf32>
    %cst_93 = arith.constant dense<0.000000e+00> : vector<32xf32>
    %188 = vector.multi_reduction <add>, %187, %cst_93 [1] : vector<32x32xf32> to vector<32xf32>
    %189 = vector.shape_cast %188 : vector<32xf32> to vector<32x1xf32>
    %190 = vector.broadcast %189 : vector<32x1xf32> to vector<32x32xf32>
    %191 = arith.divf %187, %190 : vector<32x32xf32>
    %cst_94 = arith.constant dense<0.000000e+00> : vector<32x8xf32>
    %192 = tpu.matmul %191, %180, %cst_94 {dimension_numbers = #tpu.dot_dimension_numbers<[1], [0], [0], [1], [0, 0, 1, 1], [], []>} : vector<32x32xf32>, vector<32x8xf32>, vector<32x8xf32> -> vector<32x8xf32>
    %193 = vector.extract_strided_slice %160 {offsets = [0, 16], sizes = [32, 8], strides = [1, 1]} : vector<32x32xf32> to vector<32x8xf32>
    %194 = vector.extract_strided_slice %161 {offsets = [0, 16], sizes = [32, 8], strides = [1, 1]} : vector<32x32xf32> to vector<32x8xf32>
    %195 = vector.extract_strided_slice %162 {offsets = [0, 16], sizes = [32, 8], strides = [1, 1]} : vector<32x32xf32> to vector<32x8xf32>
    %cst_95 = arith.constant dense<0.000000e+00> : vector<32x32xf32>
    %196 = tpu.matmul %193, %194, %cst_95 {dimension_numbers = #tpu.dot_dimension_numbers<[1], [1], [0], [0], [0, 0, 1, 0], [], []>} : vector<32x8xf32>, vector<32x8xf32>, vector<32x32xf32> -> vector<32x32xf32>
    %197 = arith.addf %196, %2 : vector<32x32xf32>
    %cst_96 = arith.constant dense<0xFF800000> : vector<32xf32>
    %198 = vector.multi_reduction <maximumf>, %197, %cst_96 [1] : vector<32x32xf32> to vector<32xf32>
    %199 = vector.shape_cast %198 : vector<32xf32> to vector<32x1xf32>
    %200 = vector.broadcast %199 : vector<32x1xf32> to vector<32x32xf32>
    %201 = arith.subf %197, %200 : vector<32x32xf32>
    %202 = math.exp %201 : vector<32x32xf32>
    %cst_97 = arith.constant dense<0.000000e+00> : vector<32xf32>
    %203 = vector.multi_reduction <add>, %202, %cst_97 [1] : vector<32x32xf32> to vector<32xf32>
    %204 = vector.shape_cast %203 : vector<32xf32> to vector<32x1xf32>
    %205 = vector.broadcast %204 : vector<32x1xf32> to vector<32x32xf32>
    %206 = arith.divf %202, %205 : vector<32x32xf32>
    %cst_98 = arith.constant dense<0.000000e+00> : vector<32x8xf32>
    %207 = tpu.matmul %206, %195, %cst_98 {dimension_numbers = #tpu.dot_dimension_numbers<[1], [0], [0], [1], [0, 0, 1, 1], [], []>} : vector<32x32xf32>, vector<32x8xf32>, vector<32x8xf32> -> vector<32x8xf32>
    %208 = vector.extract_strided_slice %160 {offsets = [0, 24], sizes = [32, 8], strides = [1, 1]} : vector<32x32xf32> to vector<32x8xf32>
    %209 = vector.extract_strided_slice %161 {offsets = [0, 24], sizes = [32, 8], strides = [1, 1]} : vector<32x32xf32> to vector<32x8xf32>
    %210 = vector.extract_strided_slice %162 {offsets = [0, 24], sizes = [32, 8], strides = [1, 1]} : vector<32x32xf32> to vector<32x8xf32>
    %cst_99 = arith.constant dense<0.000000e+00> : vector<32x32xf32>
    %211 = tpu.matmul %208, %209, %cst_99 {dimension_numbers = #tpu.dot_dimension_numbers<[1], [1], [0], [0], [0, 0, 1, 0], [], []>} : vector<32x8xf32>, vector<32x8xf32>, vector<32x32xf32> -> vector<32x32xf32>
    %212 = arith.addf %211, %2 : vector<32x32xf32>
    %cst_100 = arith.constant dense<0xFF800000> : vector<32xf32>
    %213 = vector.multi_reduction <maximumf>, %212, %cst_100 [1] : vector<32x32xf32> to vector<32xf32>
    %214 = vector.shape_cast %213 : vector<32xf32> to vector<32x1xf32>
    %215 = vector.broadcast %214 : vector<32x1xf32> to vector<32x32xf32>
    %216 = arith.subf %212, %215 : vector<32x32xf32>
    %217 = math.exp %216 : vector<32x32xf32>
    %cst_101 = arith.constant dense<0.000000e+00> : vector<32xf32>
    %218 = vector.multi_reduction <add>, %217, %cst_101 [1] : vector<32x32xf32> to vector<32xf32>
    %219 = vector.shape_cast %218 : vector<32xf32> to vector<32x1xf32>
    %220 = vector.broadcast %219 : vector<32x1xf32> to vector<32x32xf32>
    %221 = arith.divf %217, %220 : vector<32x32xf32>
    %cst_102 = arith.constant dense<0.000000e+00> : vector<32x8xf32>
    %222 = tpu.matmul %221, %210, %cst_102 {dimension_numbers = #tpu.dot_dimension_numbers<[1], [0], [0], [1], [0, 0, 1, 1], [], []>} : vector<32x32xf32>, vector<32x8xf32>, vector<32x8xf32> -> vector<32x8xf32>
    %223 = tpu.concatenate %177, %192, %207, %222 in 1 : vector<32x8xf32>, vector<32x8xf32>, vector<32x8xf32>, vector<32x8xf32> -> vector<32x32xf32>
    %cst_103 = arith.constant dense<0.000000e+00> : vector<32x32xf32>
    %224 = tpu.matmul %223, %154, %cst_103 {dimension_numbers = #tpu.dot_dimension_numbers<[1], [0], [0], [1], [0, 0, 1, 1], [], []>} : vector<32x32xf32>, vector<32x32xf32>, vector<32x32xf32> -> vector<32x32xf32>
    %225 = vector.broadcast %156 : vector<1x32xf32> to vector<32x32xf32>
    %226 = arith.addf %224, %225 : vector<32x32xf32>
    %c1_104 = arith.constant 1 : index
    %c0_105 = arith.constant 0 : index
    %c0_106 = arith.constant 0 : index
    %227 = vector.load %arg13[%c1_104, %c0_105, %c0_106] : memref<2x1x32xf32, #tpu.memory_space<vmem>>, vector<1x1x32xf32>
    %228 = vector.shape_cast %227 : vector<1x1x32xf32> to vector<1x32xf32>
    %c1_107 = arith.constant 1 : index
    %c0_108 = arith.constant 0 : index
    %c0_109 = arith.constant 0 : index
    %229 = vector.load %arg14[%c1_107, %c0_108, %c0_109] : memref<2x1x32xf32, #tpu.memory_space<vmem>>, vector<1x1x32xf32>
    %230 = vector.shape_cast %229 : vector<1x1x32xf32> to vector<1x32xf32>
    %231 = arith.addf %148, %226 : vector<32x32xf32>
    %cst_110 = arith.constant dense<0.000000e+00> : vector<32xf32>
    %232 = vector.multi_reduction <add>, %231, %cst_110 [1] : vector<32x32xf32> to vector<32xf32>
    %233 = vector.shape_cast %232 : vector<32xf32> to vector<32x1xf32>
    %cst_111 = arith.constant 3.200000e+01 : f32
    %234 = vector.broadcast %cst_111 : f32 to vector<32x1xf32>
    %235 = arith.divf %233, %234 : vector<32x1xf32>
    %236 = vector.broadcast %235 : vector<32x1xf32> to vector<32x32xf32>
    %237 = arith.subf %231, %236 : vector<32x32xf32>
    %238 = arith.mulf %237, %237 : vector<32x32xf32>
    %cst_112 = arith.constant dense<0.000000e+00> : vector<32xf32>
    %239 = vector.multi_reduction <add>, %238, %cst_112 [1] : vector<32x32xf32> to vector<32xf32>
    %240 = vector.shape_cast %239 : vector<32xf32> to vector<32x1xf32>
    %cst_113 = arith.constant 0.0322580636 : f32
    %241 = vector.broadcast %cst_113 : f32 to vector<32x1xf32>
    %242 = arith.mulf %240, %241 : vector<32x1xf32>
    %243 = math.sqrt %242 : vector<32x1xf32>
    %244 = vector.broadcast %228 : vector<1x32xf32> to vector<32x32xf32>
    %245 = arith.mulf %244, %237 : vector<32x32xf32>
    %cst_114 = arith.constant 9.99999997E-7 : f32
    %246 = vector.broadcast %cst_114 : f32 to vector<32x1xf32>
    %247 = arith.addf %243, %246 : vector<32x1xf32>
    %248 = vector.broadcast %247 : vector<32x1xf32> to vector<32x32xf32>
    %249 = arith.divf %245, %248 : vector<32x32xf32>
    %250 = vector.broadcast %230 : vector<1x32xf32> to vector<32x32xf32>
    %251 = arith.addf %249, %250 : vector<32x32xf32>
    %c1_115 = arith.constant 1 : index
    %c0_116 = arith.constant 0 : index
    %c0_117 = arith.constant 0 : index
    %252 = vector.load %arg9[%c1_115, %c0_116, %c0_117] : memref<2x32x64xf32, #tpu.memory_space<vmem>>, vector<1x32x64xf32>
    %253 = vector.shape_cast %252 : vector<1x32x64xf32> to vector<32x64xf32>
    %c1_118 = arith.constant 1 : index
    %c0_119 = arith.constant 0 : index
    %c0_120 = arith.constant 0 : index
    %254 = vector.load %arg10[%c1_118, %c0_119, %c0_120] : memref<2x1x64xf32, #tpu.memory_space<vmem>>, vector<1x1x64xf32>
    %255 = vector.shape_cast %254 : vector<1x1x64xf32> to vector<1x64xf32>
    %c1_121 = arith.constant 1 : index
    %c0_122 = arith.constant 0 : index
    %c0_123 = arith.constant 0 : index
    %256 = vector.load %arg11[%c1_121, %c0_122, %c0_123] : memref<2x64x32xf32, #tpu.memory_space<vmem>>, vector<1x64x32xf32>
    %257 = vector.shape_cast %256 : vector<1x64x32xf32> to vector<64x32xf32>
    %c1_124 = arith.constant 1 : index
    %c0_125 = arith.constant 0 : index
    %c0_126 = arith.constant 0 : index
    %258 = vector.load %arg12[%c1_124, %c0_125, %c0_126] : memref<2x1x32xf32, #tpu.memory_space<vmem>>, vector<1x1x32xf32>
    %259 = vector.shape_cast %258 : vector<1x1x32xf32> to vector<1x32xf32>
    %cst_127 = arith.constant dense<0.000000e+00> : vector<32x64xf32>
    %260 = tpu.matmul %251, %253, %cst_127 {dimension_numbers = #tpu.dot_dimension_numbers<[1], [0], [0], [1], [0, 0, 1, 1], [], []>} : vector<32x32xf32>, vector<32x64xf32>, vector<32x64xf32> -> vector<32x64xf32>
    %261 = vector.broadcast %255 : vector<1x64xf32> to vector<32x64xf32>
    %262 = arith.addf %260, %261 : vector<32x64xf32>
    %cst_128 = arith.constant 0.000000e+00 : f32
    %263 = vector.broadcast %cst_128 : f32 to vector<32x64xf32>
    %264 = arith.maximumf %262, %263 : vector<32x64xf32>
    %cst_129 = arith.constant dense<0.000000e+00> : vector<32x32xf32>
    %265 = tpu.matmul %264, %257, %cst_129 {dimension_numbers = #tpu.dot_dimension_numbers<[1], [0], [0], [1], [0, 0, 1, 1], [], []>} : vector<32x64xf32>, vector<64x32xf32>, vector<32x32xf32> -> vector<32x32xf32>
    %266 = vector.broadcast %259 : vector<1x32xf32> to vector<32x32xf32>
    %267 = arith.addf %265, %266 : vector<32x32xf32>
    %c1_130 = arith.constant 1 : index
    %c0_131 = arith.constant 0 : index
    %c0_132 = arith.constant 0 : index
    %268 = vector.load %arg15[%c1_130, %c0_131, %c0_132] : memref<2x1x32xf32, #tpu.memory_space<vmem>>, vector<1x1x32xf32>
    %269 = vector.shape_cast %268 : vector<1x1x32xf32> to vector<1x32xf32>
    %c1_133 = arith.constant 1 : index
    %c0_134 = arith.constant 0 : index
    %c0_135 = arith.constant 0 : index
    %270 = vector.load %arg16[%c1_133, %c0_134, %c0_135] : memref<2x1x32xf32, #tpu.memory_space<vmem>>, vector<1x1x32xf32>
    %271 = vector.shape_cast %270 : vector<1x1x32xf32> to vector<1x32xf32>
    %272 = arith.addf %251, %267 : vector<32x32xf32>
    %cst_136 = arith.constant dense<0.000000e+00> : vector<32xf32>
    %273 = vector.multi_reduction <add>, %272, %cst_136 [1] : vector<32x32xf32> to vector<32xf32>
    %274 = vector.shape_cast %273 : vector<32xf32> to vector<32x1xf32>
    %cst_137 = arith.constant 3.200000e+01 : f32
    %275 = vector.broadcast %cst_137 : f32 to vector<32x1xf32>
    %276 = arith.divf %274, %275 : vector<32x1xf32>
    %277 = vector.broadcast %276 : vector<32x1xf32> to vector<32x32xf32>
    %278 = arith.subf %272, %277 : vector<32x32xf32>
    %279 = arith.mulf %278, %278 : vector<32x32xf32>
    %cst_138 = arith.constant dense<0.000000e+00> : vector<32xf32>
    %280 = vector.multi_reduction <add>, %279, %cst_138 [1] : vector<32x32xf32> to vector<32xf32>
    %281 = vector.shape_cast %280 : vector<32xf32> to vector<32x1xf32>
    %cst_139 = arith.constant 0.0322580636 : f32
    %282 = vector.broadcast %cst_139 : f32 to vector<32x1xf32>
    %283 = arith.mulf %281, %282 : vector<32x1xf32>
    %284 = math.sqrt %283 : vector<32x1xf32>
    %285 = vector.broadcast %269 : vector<1x32xf32> to vector<32x32xf32>
    %286 = arith.mulf %285, %278 : vector<32x32xf32>
    %cst_140 = arith.constant 9.99999997E-7 : f32
    %287 = vector.broadcast %cst_140 : f32 to vector<32x1xf32>
    %288 = arith.addf %284, %287 : vector<32x1xf32>
    %289 = vector.broadcast %288 : vector<32x1xf32> to vector<32x32xf32>
    %290 = arith.divf %286, %289 : vector<32x32xf32>
    %291 = vector.broadcast %271 : vector<1x32xf32> to vector<32x32xf32>
    %292 = arith.addf %290, %291 : vector<32x32xf32>
    %c0_141 = arith.constant 0 : index
    %c0_142 = arith.constant 0 : index
    %c0_143 = arith.constant 0 : index
    %293 = vector.load %arg17[%c0_141, %c0_142, %c0_143] : memref<2x32x96xf32, #tpu.memory_space<vmem>>, vector<1x32x96xf32>
    %294 = vector.shape_cast %293 : vector<1x32x96xf32> to vector<32x96xf32>
    %c0_144 = arith.constant 0 : index
    %c0_145 = arith.constant 0 : index
    %c0_146 = arith.constant 0 : index
    %295 = vector.load %arg18[%c0_144, %c0_145, %c0_146] : memref<2x1x96xf32, #tpu.memory_space<vmem>>, vector<1x1x96xf32>
    %296 = vector.shape_cast %295 : vector<1x1x96xf32> to vector<1x96xf32>
    %c0_147 = arith.constant 0 : index
    %c0_148 = arith.constant 0 : index
    %c0_149 = arith.constant 0 : index
    %297 = vector.load %arg19[%c0_147, %c0_148, %c0_149] : memref<2x32x32xf32, #tpu.memory_space<vmem>>, vector<1x32x32xf32>
    %298 = vector.shape_cast %297 : vector<1x32x32xf32> to vector<32x32xf32>
    %c0_150 = arith.constant 0 : index
    %c0_151 = arith.constant 0 : index
    %c0_152 = arith.constant 0 : index
    %299 = vector.load %arg20[%c0_150, %c0_151, %c0_152] : memref<2x1x32xf32, #tpu.memory_space<vmem>>, vector<1x1x32xf32>
    %300 = vector.shape_cast %299 : vector<1x1x32xf32> to vector<1x32xf32>
    %cst_153 = arith.constant dense<0.000000e+00> : vector<16x96xf32>
    %301 = tpu.matmul %1, %294, %cst_153 {dimension_numbers = #tpu.dot_dimension_numbers<[1], [0], [0], [1], [0, 0, 1, 1], [], []>} : vector<16x32xf32>, vector<32x96xf32>, vector<16x96xf32> -> vector<16x96xf32>
    %302 = vector.broadcast %296 : vector<1x96xf32> to vector<16x96xf32>
    %303 = arith.addf %301, %302 : vector<16x96xf32>
    %304 = vector.extract_strided_slice %303 {offsets = [0, 0], sizes = [16, 32], strides = [1, 1]} : vector<16x96xf32> to vector<16x32xf32>
    %305 = vector.extract_strided_slice %303 {offsets = [0, 32], sizes = [16, 32], strides = [1, 1]} : vector<16x96xf32> to vector<16x32xf32>
    %306 = vector.extract_strided_slice %303 {offsets = [0, 64], sizes = [16, 32], strides = [1, 1]} : vector<16x96xf32> to vector<16x32xf32>
    %307 = vector.extract_strided_slice %304 {offsets = [0, 0], sizes = [16, 8], strides = [1, 1]} : vector<16x32xf32> to vector<16x8xf32>
    %308 = vector.extract_strided_slice %305 {offsets = [0, 0], sizes = [16, 8], strides = [1, 1]} : vector<16x32xf32> to vector<16x8xf32>
    %309 = vector.extract_strided_slice %306 {offsets = [0, 0], sizes = [16, 8], strides = [1, 1]} : vector<16x32xf32> to vector<16x8xf32>
    %cst_154 = arith.constant dense<0.000000e+00> : vector<16x16xf32>
    %310 = tpu.matmul %307, %308, %cst_154 {dimension_numbers = #tpu.dot_dimension_numbers<[1], [1], [0], [0], [0, 0, 1, 0], [], []>} : vector<16x8xf32>, vector<16x8xf32>, vector<16x16xf32> -> vector<16x16xf32>
    %311 = arith.addf %310, %3 : vector<16x16xf32>
    %cst_155 = arith.constant dense<0xFF800000> : vector<16xf32>
    %312 = vector.multi_reduction <maximumf>, %311, %cst_155 [1] : vector<16x16xf32> to vector<16xf32>
    %313 = vector.shape_cast %312 : vector<16xf32> to vector<16x1xf32>
    %314 = vector.broadcast %313 : vector<16x1xf32> to vector<16x16xf32>
    %315 = arith.subf %311, %314 : vector<16x16xf32>
    %316 = math.exp %315 : vector<16x16xf32>
    %cst_156 = arith.constant dense<0.000000e+00> : vector<16xf32>
    %317 = vector.multi_reduction <add>, %316, %cst_156 [1] : vector<16x16xf32> to vector<16xf32>
    %318 = vector.shape_cast %317 : vector<16xf32> to vector<16x1xf32>
    %319 = vector.broadcast %318 : vector<16x1xf32> to vector<16x16xf32>
    %320 = arith.divf %316, %319 : vector<16x16xf32>
    %cst_157 = arith.constant dense<0.000000e+00> : vector<16x8xf32>
    %321 = tpu.matmul %320, %309, %cst_157 {dimension_numbers = #tpu.dot_dimension_numbers<[1], [0], [0], [1], [0, 0, 1, 1], [], []>} : vector<16x16xf32>, vector<16x8xf32>, vector<16x8xf32> -> vector<16x8xf32>
    %322 = vector.extract_strided_slice %304 {offsets = [0, 8], sizes = [16, 8], strides = [1, 1]} : vector<16x32xf32> to vector<16x8xf32>
    %323 = vector.extract_strided_slice %305 {offsets = [0, 8], sizes = [16, 8], strides = [1, 1]} : vector<16x32xf32> to vector<16x8xf32>
    %324 = vector.extract_strided_slice %306 {offsets = [0, 8], sizes = [16, 8], strides = [1, 1]} : vector<16x32xf32> to vector<16x8xf32>
    %cst_158 = arith.constant dense<0.000000e+00> : vector<16x16xf32>
    %325 = tpu.matmul %322, %323, %cst_158 {dimension_numbers = #tpu.dot_dimension_numbers<[1], [1], [0], [0], [0, 0, 1, 0], [], []>} : vector<16x8xf32>, vector<16x8xf32>, vector<16x16xf32> -> vector<16x16xf32>
    %326 = arith.addf %325, %3 : vector<16x16xf32>
    %cst_159 = arith.constant dense<0xFF800000> : vector<16xf32>
    %327 = vector.multi_reduction <maximumf>, %326, %cst_159 [1] : vector<16x16xf32> to vector<16xf32>
    %328 = vector.shape_cast %327 : vector<16xf32> to vector<16x1xf32>
    %329 = vector.broadcast %328 : vector<16x1xf32> to vector<16x16xf32>
    %330 = arith.subf %326, %329 : vector<16x16xf32>
    %331 = math.exp %330 : vector<16x16xf32>
    %cst_160 = arith.constant dense<0.000000e+00> : vector<16xf32>
    %332 = vector.multi_reduction <add>, %331, %cst_160 [1] : vector<16x16xf32> to vector<16xf32>
    %333 = vector.shape_cast %332 : vector<16xf32> to vector<16x1xf32>
    %334 = vector.broadcast %333 : vector<16x1xf32> to vector<16x16xf32>
    %335 = arith.divf %331, %334 : vector<16x16xf32>
    %cst_161 = arith.constant dense<0.000000e+00> : vector<16x8xf32>
    %336 = tpu.matmul %335, %324, %cst_161 {dimension_numbers = #tpu.dot_dimension_numbers<[1], [0], [0], [1], [0, 0, 1, 1], [], []>} : vector<16x16xf32>, vector<16x8xf32>, vector<16x8xf32> -> vector<16x8xf32>
    %337 = vector.extract_strided_slice %304 {offsets = [0, 16], sizes = [16, 8], strides = [1, 1]} : vector<16x32xf32> to vector<16x8xf32>
    %338 = vector.extract_strided_slice %305 {offsets = [0, 16], sizes = [16, 8], strides = [1, 1]} : vector<16x32xf32> to vector<16x8xf32>
    %339 = vector.extract_strided_slice %306 {offsets = [0, 16], sizes = [16, 8], strides = [1, 1]} : vector<16x32xf32> to vector<16x8xf32>
    %cst_162 = arith.constant dense<0.000000e+00> : vector<16x16xf32>
    %340 = tpu.matmul %337, %338, %cst_162 {dimension_numbers = #tpu.dot_dimension_numbers<[1], [1], [0], [0], [0, 0, 1, 0], [], []>} : vector<16x8xf32>, vector<16x8xf32>, vector<16x16xf32> -> vector<16x16xf32>
    %341 = arith.addf %340, %3 : vector<16x16xf32>
    %cst_163 = arith.constant dense<0xFF800000> : vector<16xf32>
    %342 = vector.multi_reduction <maximumf>, %341, %cst_163 [1] : vector<16x16xf32> to vector<16xf32>
    %343 = vector.shape_cast %342 : vector<16xf32> to vector<16x1xf32>
    %344 = vector.broadcast %343 : vector<16x1xf32> to vector<16x16xf32>
    %345 = arith.subf %341, %344 : vector<16x16xf32>
    %346 = math.exp %345 : vector<16x16xf32>
    %cst_164 = arith.constant dense<0.000000e+00> : vector<16xf32>
    %347 = vector.multi_reduction <add>, %346, %cst_164 [1] : vector<16x16xf32> to vector<16xf32>
    %348 = vector.shape_cast %347 : vector<16xf32> to vector<16x1xf32>
    %349 = vector.broadcast %348 : vector<16x1xf32> to vector<16x16xf32>
    %350 = arith.divf %346, %349 : vector<16x16xf32>
    %cst_165 = arith.constant dense<0.000000e+00> : vector<16x8xf32>
    %351 = tpu.matmul %350, %339, %cst_165 {dimension_numbers = #tpu.dot_dimension_numbers<[1], [0], [0], [1], [0, 0, 1, 1], [], []>} : vector<16x16xf32>, vector<16x8xf32>, vector<16x8xf32> -> vector<16x8xf32>
    %352 = vector.extract_strided_slice %304 {offsets = [0, 24], sizes = [16, 8], strides = [1, 1]} : vector<16x32xf32> to vector<16x8xf32>
    %353 = vector.extract_strided_slice %305 {offsets = [0, 24], sizes = [16, 8], strides = [1, 1]} : vector<16x32xf32> to vector<16x8xf32>
    %354 = vector.extract_strided_slice %306 {offsets = [0, 24], sizes = [16, 8], strides = [1, 1]} : vector<16x32xf32> to vector<16x8xf32>
    %cst_166 = arith.constant dense<0.000000e+00> : vector<16x16xf32>
    %355 = tpu.matmul %352, %353, %cst_166 {dimension_numbers = #tpu.dot_dimension_numbers<[1], [1], [0], [0], [0, 0, 1, 0], [], []>} : vector<16x8xf32>, vector<16x8xf32>, vector<16x16xf32> -> vector<16x16xf32>
    %356 = arith.addf %355, %3 : vector<16x16xf32>
    %cst_167 = arith.constant dense<0xFF800000> : vector<16xf32>
    %357 = vector.multi_reduction <maximumf>, %356, %cst_167 [1] : vector<16x16xf32> to vector<16xf32>
    %358 = vector.shape_cast %357 : vector<16xf32> to vector<16x1xf32>
    %359 = vector.broadcast %358 : vector<16x1xf32> to vector<16x16xf32>
    %360 = arith.subf %356, %359 : vector<16x16xf32>
    %361 = math.exp %360 : vector<16x16xf32>
    %cst_168 = arith.constant dense<0.000000e+00> : vector<16xf32>
    %362 = vector.multi_reduction <add>, %361, %cst_168 [1] : vector<16x16xf32> to vector<16xf32>
    %363 = vector.shape_cast %362 : vector<16xf32> to vector<16x1xf32>
    %364 = vector.broadcast %363 : vector<16x1xf32> to vector<16x16xf32>
    %365 = arith.divf %361, %364 : vector<16x16xf32>
    %cst_169 = arith.constant dense<0.000000e+00> : vector<16x8xf32>
    %366 = tpu.matmul %365, %354, %cst_169 {dimension_numbers = #tpu.dot_dimension_numbers<[1], [0], [0], [1], [0, 0, 1, 1], [], []>} : vector<16x16xf32>, vector<16x8xf32>, vector<16x8xf32> -> vector<16x8xf32>
    %367 = tpu.concatenate %321, %336, %351, %366 in 1 : vector<16x8xf32>, vector<16x8xf32>, vector<16x8xf32>, vector<16x8xf32> -> vector<16x32xf32>
    %cst_170 = arith.constant dense<0.000000e+00> : vector<16x32xf32>
    %368 = tpu.matmul %367, %298, %cst_170 {dimension_numbers = #tpu.dot_dimension_numbers<[1], [0], [0], [1], [0, 0, 1, 1], [], []>} : vector<16x32xf32>, vector<32x32xf32>, vector<16x32xf32> -> vector<16x32xf32>
    %369 = vector.broadcast %300 : vector<1x32xf32> to vector<16x32xf32>
    %370 = arith.addf %368, %369 : vector<16x32xf32>
    %c0_171 = arith.constant 0 : index
    %c0_172 = arith.constant 0 : index
    %c0_173 = arith.constant 0 : index
    %371 = vector.load %arg31[%c0_171, %c0_172, %c0_173] : memref<2x1x32xf32, #tpu.memory_space<vmem>>, vector<1x1x32xf32>
    %372 = vector.shape_cast %371 : vector<1x1x32xf32> to vector<1x32xf32>
    %c0_174 = arith.constant 0 : index
    %c0_175 = arith.constant 0 : index
    %c0_176 = arith.constant 0 : index
    %373 = vector.load %arg32[%c0_174, %c0_175, %c0_176] : memref<2x1x32xf32, #tpu.memory_space<vmem>>, vector<1x1x32xf32>
    %374 = vector.shape_cast %373 : vector<1x1x32xf32> to vector<1x32xf32>
    %375 = arith.addf %1, %370 : vector<16x32xf32>
    %cst_177 = arith.constant dense<0.000000e+00> : vector<16xf32>
    %376 = vector.multi_reduction <add>, %375, %cst_177 [1] : vector<16x32xf32> to vector<16xf32>
    %377 = vector.shape_cast %376 : vector<16xf32> to vector<16x1xf32>
    %cst_178 = arith.constant 3.200000e+01 : f32
    %378 = vector.broadcast %cst_178 : f32 to vector<16x1xf32>
    %379 = arith.divf %377, %378 : vector<16x1xf32>
    %380 = vector.broadcast %379 : vector<16x1xf32> to vector<16x32xf32>
    %381 = arith.subf %375, %380 : vector<16x32xf32>
    %382 = arith.mulf %381, %381 : vector<16x32xf32>
    %cst_179 = arith.constant dense<0.000000e+00> : vector<16xf32>
    %383 = vector.multi_reduction <add>, %382, %cst_179 [1] : vector<16x32xf32> to vector<16xf32>
    %384 = vector.shape_cast %383 : vector<16xf32> to vector<16x1xf32>
    %cst_180 = arith.constant 0.0322580636 : f32
    %385 = vector.broadcast %cst_180 : f32 to vector<16x1xf32>
    %386 = arith.mulf %384, %385 : vector<16x1xf32>
    %387 = math.sqrt %386 : vector<16x1xf32>
    %388 = vector.broadcast %372 : vector<1x32xf32> to vector<16x32xf32>
    %389 = arith.mulf %388, %381 : vector<16x32xf32>
    %cst_181 = arith.constant 9.99999997E-7 : f32
    %390 = vector.broadcast %cst_181 : f32 to vector<16x1xf32>
    %391 = arith.addf %387, %390 : vector<16x1xf32>
    %392 = vector.broadcast %391 : vector<16x1xf32> to vector<16x32xf32>
    %393 = arith.divf %389, %392 : vector<16x32xf32>
    %394 = vector.broadcast %374 : vector<1x32xf32> to vector<16x32xf32>
    %395 = arith.addf %393, %394 : vector<16x32xf32>
    %c0_182 = arith.constant 0 : index
    %c0_183 = arith.constant 0 : index
    %c0_184 = arith.constant 0 : index
    %396 = vector.load %arg21[%c0_182, %c0_183, %c0_184] : memref<2x32x32xf32, #tpu.memory_space<vmem>>, vector<1x32x32xf32>
    %397 = vector.shape_cast %396 : vector<1x32x32xf32> to vector<32x32xf32>
    %c0_185 = arith.constant 0 : index
    %c0_186 = arith.constant 0 : index
    %c0_187 = arith.constant 0 : index
    %398 = vector.load %arg22[%c0_185, %c0_186, %c0_187] : memref<2x1x32xf32, #tpu.memory_space<vmem>>, vector<1x1x32xf32>
    %399 = vector.shape_cast %398 : vector<1x1x32xf32> to vector<1x32xf32>
    %c0_188 = arith.constant 0 : index
    %c0_189 = arith.constant 0 : index
    %c0_190 = arith.constant 0 : index
    %400 = vector.load %arg23[%c0_188, %c0_189, %c0_190] : memref<2x32x64xf32, #tpu.memory_space<vmem>>, vector<1x32x64xf32>
    %401 = vector.shape_cast %400 : vector<1x32x64xf32> to vector<32x64xf32>
    %c0_191 = arith.constant 0 : index
    %c0_192 = arith.constant 0 : index
    %c0_193 = arith.constant 0 : index
    %402 = vector.load %arg24[%c0_191, %c0_192, %c0_193] : memref<2x1x64xf32, #tpu.memory_space<vmem>>, vector<1x1x64xf32>
    %403 = vector.shape_cast %402 : vector<1x1x64xf32> to vector<1x64xf32>
    %c0_194 = arith.constant 0 : index
    %c0_195 = arith.constant 0 : index
    %c0_196 = arith.constant 0 : index
    %404 = vector.load %arg25[%c0_194, %c0_195, %c0_196] : memref<2x32x32xf32, #tpu.memory_space<vmem>>, vector<1x32x32xf32>
    %405 = vector.shape_cast %404 : vector<1x32x32xf32> to vector<32x32xf32>
    %c0_197 = arith.constant 0 : index
    %c0_198 = arith.constant 0 : index
    %c0_199 = arith.constant 0 : index
    %406 = vector.load %arg26[%c0_197, %c0_198, %c0_199] : memref<2x1x32xf32, #tpu.memory_space<vmem>>, vector<1x1x32xf32>
    %407 = vector.shape_cast %406 : vector<1x1x32xf32> to vector<1x32xf32>
    %cst_200 = arith.constant dense<0.000000e+00> : vector<16x32xf32>
    %408 = tpu.matmul %395, %397, %cst_200 {dimension_numbers = #tpu.dot_dimension_numbers<[1], [0], [0], [1], [0, 0, 1, 1], [], []>} : vector<16x32xf32>, vector<32x32xf32>, vector<16x32xf32> -> vector<16x32xf32>
    %409 = vector.broadcast %399 : vector<1x32xf32> to vector<16x32xf32>
    %410 = arith.addf %408, %409 : vector<16x32xf32>
    %cst_201 = arith.constant dense<0.000000e+00> : vector<32x64xf32>
    %411 = tpu.matmul %292, %401, %cst_201 {dimension_numbers = #tpu.dot_dimension_numbers<[1], [0], [0], [1], [0, 0, 1, 1], [], []>} : vector<32x32xf32>, vector<32x64xf32>, vector<32x64xf32> -> vector<32x64xf32>
    %412 = vector.broadcast %403 : vector<1x64xf32> to vector<32x64xf32>
    %413 = arith.addf %411, %412 : vector<32x64xf32>
    %414 = vector.extract_strided_slice %413 {offsets = [0, 0], sizes = [32, 32], strides = [1, 1]} : vector<32x64xf32> to vector<32x32xf32>
    %415 = vector.extract_strided_slice %413 {offsets = [0, 32], sizes = [32, 32], strides = [1, 1]} : vector<32x64xf32> to vector<32x32xf32>
    %416 = vector.extract_strided_slice %410 {offsets = [0, 0], sizes = [16, 8], strides = [1, 1]} : vector<16x32xf32> to vector<16x8xf32>
    %417 = vector.extract_strided_slice %414 {offsets = [0, 0], sizes = [32, 8], strides = [1, 1]} : vector<32x32xf32> to vector<32x8xf32>
    %418 = vector.extract_strided_slice %415 {offsets = [0, 0], sizes = [32, 8], strides = [1, 1]} : vector<32x32xf32> to vector<32x8xf32>
    %cst_202 = arith.constant dense<0.000000e+00> : vector<16x32xf32>
    %419 = tpu.matmul %416, %417, %cst_202 {dimension_numbers = #tpu.dot_dimension_numbers<[1], [1], [0], [0], [0, 0, 1, 0], [], []>} : vector<16x8xf32>, vector<32x8xf32>, vector<16x32xf32> -> vector<16x32xf32>
    %420 = arith.addf %419, %4 : vector<16x32xf32>
    %cst_203 = arith.constant dense<0xFF800000> : vector<16xf32>
    %421 = vector.multi_reduction <maximumf>, %420, %cst_203 [1] : vector<16x32xf32> to vector<16xf32>
    %422 = vector.shape_cast %421 : vector<16xf32> to vector<16x1xf32>
    %423 = vector.broadcast %422 : vector<16x1xf32> to vector<16x32xf32>
    %424 = arith.subf %420, %423 : vector<16x32xf32>
    %425 = math.exp %424 : vector<16x32xf32>
    %cst_204 = arith.constant dense<0.000000e+00> : vector<16xf32>
    %426 = vector.multi_reduction <add>, %425, %cst_204 [1] : vector<16x32xf32> to vector<16xf32>
    %427 = vector.shape_cast %426 : vector<16xf32> to vector<16x1xf32>
    %428 = vector.broadcast %427 : vector<16x1xf32> to vector<16x32xf32>
    %429 = arith.divf %425, %428 : vector<16x32xf32>
    %cst_205 = arith.constant dense<0.000000e+00> : vector<16x8xf32>
    %430 = tpu.matmul %429, %418, %cst_205 {dimension_numbers = #tpu.dot_dimension_numbers<[1], [0], [0], [1], [0, 0, 1, 1], [], []>} : vector<16x32xf32>, vector<32x8xf32>, vector<16x8xf32> -> vector<16x8xf32>
    %431 = vector.extract_strided_slice %410 {offsets = [0, 8], sizes = [16, 8], strides = [1, 1]} : vector<16x32xf32> to vector<16x8xf32>
    %432 = vector.extract_strided_slice %414 {offsets = [0, 8], sizes = [32, 8], strides = [1, 1]} : vector<32x32xf32> to vector<32x8xf32>
    %433 = vector.extract_strided_slice %415 {offsets = [0, 8], sizes = [32, 8], strides = [1, 1]} : vector<32x32xf32> to vector<32x8xf32>
    %cst_206 = arith.constant dense<0.000000e+00> : vector<16x32xf32>
    %434 = tpu.matmul %431, %432, %cst_206 {dimension_numbers = #tpu.dot_dimension_numbers<[1], [1], [0], [0], [0, 0, 1, 0], [], []>} : vector<16x8xf32>, vector<32x8xf32>, vector<16x32xf32> -> vector<16x32xf32>
    %435 = arith.addf %434, %4 : vector<16x32xf32>
    %cst_207 = arith.constant dense<0xFF800000> : vector<16xf32>
    %436 = vector.multi_reduction <maximumf>, %435, %cst_207 [1] : vector<16x32xf32> to vector<16xf32>
    %437 = vector.shape_cast %436 : vector<16xf32> to vector<16x1xf32>
    %438 = vector.broadcast %437 : vector<16x1xf32> to vector<16x32xf32>
    %439 = arith.subf %435, %438 : vector<16x32xf32>
    %440 = math.exp %439 : vector<16x32xf32>
    %cst_208 = arith.constant dense<0.000000e+00> : vector<16xf32>
    %441 = vector.multi_reduction <add>, %440, %cst_208 [1] : vector<16x32xf32> to vector<16xf32>
    %442 = vector.shape_cast %441 : vector<16xf32> to vector<16x1xf32>
    %443 = vector.broadcast %442 : vector<16x1xf32> to vector<16x32xf32>
    %444 = arith.divf %440, %443 : vector<16x32xf32>
    %cst_209 = arith.constant dense<0.000000e+00> : vector<16x8xf32>
    %445 = tpu.matmul %444, %433, %cst_209 {dimension_numbers = #tpu.dot_dimension_numbers<[1], [0], [0], [1], [0, 0, 1, 1], [], []>} : vector<16x32xf32>, vector<32x8xf32>, vector<16x8xf32> -> vector<16x8xf32>
    %446 = vector.extract_strided_slice %410 {offsets = [0, 16], sizes = [16, 8], strides = [1, 1]} : vector<16x32xf32> to vector<16x8xf32>
    %447 = vector.extract_strided_slice %414 {offsets = [0, 16], sizes = [32, 8], strides = [1, 1]} : vector<32x32xf32> to vector<32x8xf32>
    %448 = vector.extract_strided_slice %415 {offsets = [0, 16], sizes = [32, 8], strides = [1, 1]} : vector<32x32xf32> to vector<32x8xf32>
    %cst_210 = arith.constant dense<0.000000e+00> : vector<16x32xf32>
    %449 = tpu.matmul %446, %447, %cst_210 {dimension_numbers = #tpu.dot_dimension_numbers<[1], [1], [0], [0], [0, 0, 1, 0], [], []>} : vector<16x8xf32>, vector<32x8xf32>, vector<16x32xf32> -> vector<16x32xf32>
    %450 = arith.addf %449, %4 : vector<16x32xf32>
    %cst_211 = arith.constant dense<0xFF800000> : vector<16xf32>
    %451 = vector.multi_reduction <maximumf>, %450, %cst_211 [1] : vector<16x32xf32> to vector<16xf32>
    %452 = vector.shape_cast %451 : vector<16xf32> to vector<16x1xf32>
    %453 = vector.broadcast %452 : vector<16x1xf32> to vector<16x32xf32>
    %454 = arith.subf %450, %453 : vector<16x32xf32>
    %455 = math.exp %454 : vector<16x32xf32>
    %cst_212 = arith.constant dense<0.000000e+00> : vector<16xf32>
    %456 = vector.multi_reduction <add>, %455, %cst_212 [1] : vector<16x32xf32> to vector<16xf32>
    %457 = vector.shape_cast %456 : vector<16xf32> to vector<16x1xf32>
    %458 = vector.broadcast %457 : vector<16x1xf32> to vector<16x32xf32>
    %459 = arith.divf %455, %458 : vector<16x32xf32>
    %cst_213 = arith.constant dense<0.000000e+00> : vector<16x8xf32>
    %460 = tpu.matmul %459, %448, %cst_213 {dimension_numbers = #tpu.dot_dimension_numbers<[1], [0], [0], [1], [0, 0, 1, 1], [], []>} : vector<16x32xf32>, vector<32x8xf32>, vector<16x8xf32> -> vector<16x8xf32>
    %461 = vector.extract_strided_slice %410 {offsets = [0, 24], sizes = [16, 8], strides = [1, 1]} : vector<16x32xf32> to vector<16x8xf32>
    %462 = vector.extract_strided_slice %414 {offsets = [0, 24], sizes = [32, 8], strides = [1, 1]} : vector<32x32xf32> to vector<32x8xf32>
    %463 = vector.extract_strided_slice %415 {offsets = [0, 24], sizes = [32, 8], strides = [1, 1]} : vector<32x32xf32> to vector<32x8xf32>
    %cst_214 = arith.constant dense<0.000000e+00> : vector<16x32xf32>
    %464 = tpu.matmul %461, %462, %cst_214 {dimension_numbers = #tpu.dot_dimension_numbers<[1], [1], [0], [0], [0, 0, 1, 0], [], []>} : vector<16x8xf32>, vector<32x8xf32>, vector<16x32xf32> -> vector<16x32xf32>
    %465 = arith.addf %464, %4 : vector<16x32xf32>
    %cst_215 = arith.constant dense<0xFF800000> : vector<16xf32>
    %466 = vector.multi_reduction <maximumf>, %465, %cst_215 [1] : vector<16x32xf32> to vector<16xf32>
    %467 = vector.shape_cast %466 : vector<16xf32> to vector<16x1xf32>
    %468 = vector.broadcast %467 : vector<16x1xf32> to vector<16x32xf32>
    %469 = arith.subf %465, %468 : vector<16x32xf32>
    %470 = math.exp %469 : vector<16x32xf32>
    %cst_216 = arith.constant dense<0.000000e+00> : vector<16xf32>
    %471 = vector.multi_reduction <add>, %470, %cst_216 [1] : vector<16x32xf32> to vector<16xf32>
    %472 = vector.shape_cast %471 : vector<16xf32> to vector<16x1xf32>
    %473 = vector.broadcast %472 : vector<16x1xf32> to vector<16x32xf32>
    %474 = arith.divf %470, %473 : vector<16x32xf32>
    %cst_217 = arith.constant dense<0.000000e+00> : vector<16x8xf32>
    %475 = tpu.matmul %474, %463, %cst_217 {dimension_numbers = #tpu.dot_dimension_numbers<[1], [0], [0], [1], [0, 0, 1, 1], [], []>} : vector<16x32xf32>, vector<32x8xf32>, vector<16x8xf32> -> vector<16x8xf32>
    %476 = tpu.concatenate %430, %445, %460, %475 in 1 : vector<16x8xf32>, vector<16x8xf32>, vector<16x8xf32>, vector<16x8xf32> -> vector<16x32xf32>
    %cst_218 = arith.constant dense<0.000000e+00> : vector<16x32xf32>
    %477 = tpu.matmul %476, %405, %cst_218 {dimension_numbers = #tpu.dot_dimension_numbers<[1], [0], [0], [1], [0, 0, 1, 1], [], []>} : vector<16x32xf32>, vector<32x32xf32>, vector<16x32xf32> -> vector<16x32xf32>
    %478 = vector.broadcast %407 : vector<1x32xf32> to vector<16x32xf32>
    %479 = arith.addf %477, %478 : vector<16x32xf32>
    %c0_219 = arith.constant 0 : index
    %c0_220 = arith.constant 0 : index
    %c0_221 = arith.constant 0 : index
    %480 = vector.load %arg33[%c0_219, %c0_220, %c0_221] : memref<2x1x32xf32, #tpu.memory_space<vmem>>, vector<1x1x32xf32>
    %481 = vector.shape_cast %480 : vector<1x1x32xf32> to vector<1x32xf32>
    %c0_222 = arith.constant 0 : index
    %c0_223 = arith.constant 0 : index
    %c0_224 = arith.constant 0 : index
    %482 = vector.load %arg34[%c0_222, %c0_223, %c0_224] : memref<2x1x32xf32, #tpu.memory_space<vmem>>, vector<1x1x32xf32>
    %483 = vector.shape_cast %482 : vector<1x1x32xf32> to vector<1x32xf32>
    %484 = arith.addf %395, %479 : vector<16x32xf32>
    %cst_225 = arith.constant dense<0.000000e+00> : vector<16xf32>
    %485 = vector.multi_reduction <add>, %484, %cst_225 [1] : vector<16x32xf32> to vector<16xf32>
    %486 = vector.shape_cast %485 : vector<16xf32> to vector<16x1xf32>
    %cst_226 = arith.constant 3.200000e+01 : f32
    %487 = vector.broadcast %cst_226 : f32 to vector<16x1xf32>
    %488 = arith.divf %486, %487 : vector<16x1xf32>
    %489 = vector.broadcast %488 : vector<16x1xf32> to vector<16x32xf32>
    %490 = arith.subf %484, %489 : vector<16x32xf32>
    %491 = arith.mulf %490, %490 : vector<16x32xf32>
    %cst_227 = arith.constant dense<0.000000e+00> : vector<16xf32>
    %492 = vector.multi_reduction <add>, %491, %cst_227 [1] : vector<16x32xf32> to vector<16xf32>
    %493 = vector.shape_cast %492 : vector<16xf32> to vector<16x1xf32>
    %cst_228 = arith.constant 0.0322580636 : f32
    %494 = vector.broadcast %cst_228 : f32 to vector<16x1xf32>
    %495 = arith.mulf %493, %494 : vector<16x1xf32>
    %496 = math.sqrt %495 : vector<16x1xf32>
    %497 = vector.broadcast %481 : vector<1x32xf32> to vector<16x32xf32>
    %498 = arith.mulf %497, %490 : vector<16x32xf32>
    %cst_229 = arith.constant 9.99999997E-7 : f32
    %499 = vector.broadcast %cst_229 : f32 to vector<16x1xf32>
    %500 = arith.addf %496, %499 : vector<16x1xf32>
    %501 = vector.broadcast %500 : vector<16x1xf32> to vector<16x32xf32>
    %502 = arith.divf %498, %501 : vector<16x32xf32>
    %503 = vector.broadcast %483 : vector<1x32xf32> to vector<16x32xf32>
    %504 = arith.addf %502, %503 : vector<16x32xf32>
    %c0_230 = arith.constant 0 : index
    %c0_231 = arith.constant 0 : index
    %c0_232 = arith.constant 0 : index
    %505 = vector.load %arg27[%c0_230, %c0_231, %c0_232] : memref<2x32x64xf32, #tpu.memory_space<vmem>>, vector<1x32x64xf32>
    %506 = vector.shape_cast %505 : vector<1x32x64xf32> to vector<32x64xf32>
    %c0_233 = arith.constant 0 : index
    %c0_234 = arith.constant 0 : index
    %c0_235 = arith.constant 0 : index
    %507 = vector.load %arg28[%c0_233, %c0_234, %c0_235] : memref<2x1x64xf32, #tpu.memory_space<vmem>>, vector<1x1x64xf32>
    %508 = vector.shape_cast %507 : vector<1x1x64xf32> to vector<1x64xf32>
    %c0_236 = arith.constant 0 : index
    %c0_237 = arith.constant 0 : index
    %c0_238 = arith.constant 0 : index
    %509 = vector.load %arg29[%c0_236, %c0_237, %c0_238] : memref<2x64x32xf32, #tpu.memory_space<vmem>>, vector<1x64x32xf32>
    %510 = vector.shape_cast %509 : vector<1x64x32xf32> to vector<64x32xf32>
    %c0_239 = arith.constant 0 : index
    %c0_240 = arith.constant 0 : index
    %c0_241 = arith.constant 0 : index
    %511 = vector.load %arg30[%c0_239, %c0_240, %c0_241] : memref<2x1x32xf32, #tpu.memory_space<vmem>>, vector<1x1x32xf32>
    %512 = vector.shape_cast %511 : vector<1x1x32xf32> to vector<1x32xf32>
    %cst_242 = arith.constant dense<0.000000e+00> : vector<16x64xf32>
    %513 = tpu.matmul %504, %506, %cst_242 {dimension_numbers = #tpu.dot_dimension_numbers<[1], [0], [0], [1], [0, 0, 1, 1], [], []>} : vector<16x32xf32>, vector<32x64xf32>, vector<16x64xf32> -> vector<16x64xf32>
    %514 = vector.broadcast %508 : vector<1x64xf32> to vector<16x64xf32>
    %515 = arith.addf %513, %514 : vector<16x64xf32>
    %cst_243 = arith.constant 0.000000e+00 : f32
    %516 = vector.broadcast %cst_243 : f32 to vector<16x64xf32>
    %517 = arith.maximumf %515, %516 : vector<16x64xf32>
    %cst_244 = arith.constant dense<0.000000e+00> : vector<16x32xf32>
    %518 = tpu.matmul %517, %510, %cst_244 {dimension_numbers = #tpu.dot_dimension_numbers<[1], [0], [0], [1], [0, 0, 1, 1], [], []>} : vector<16x64xf32>, vector<64x32xf32>, vector<16x32xf32> -> vector<16x32xf32>
    %519 = vector.broadcast %512 : vector<1x32xf32> to vector<16x32xf32>
    %520 = arith.addf %518, %519 : vector<16x32xf32>
    %c0_245 = arith.constant 0 : index
    %c0_246 = arith.constant 0 : index
    %c0_247 = arith.constant 0 : index
    %521 = vector.load %arg35[%c0_245, %c0_246, %c0_247] : memref<2x1x32xf32, #tpu.memory_space<vmem>>, vector<1x1x32xf32>
    %522 = vector.shape_cast %521 : vector<1x1x32xf32> to vector<1x32xf32>
    %c0_248 = arith.constant 0 : index
    %c0_249 = arith.constant 0 : index
    %c0_250 = arith.constant 0 : index
    %523 = vector.load %arg36[%c0_248, %c0_249, %c0_250] : memref<2x1x32xf32, #tpu.memory_space<vmem>>, vector<1x1x32xf32>
    %524 = vector.shape_cast %523 : vector<1x1x32xf32> to vector<1x32xf32>
    %525 = arith.addf %504, %520 : vector<16x32xf32>
    %cst_251 = arith.constant dense<0.000000e+00> : vector<16xf32>
    %526 = vector.multi_reduction <add>, %525, %cst_251 [1] : vector<16x32xf32> to vector<16xf32>
    %527 = vector.shape_cast %526 : vector<16xf32> to vector<16x1xf32>
    %cst_252 = arith.constant 3.200000e+01 : f32
    %528 = vector.broadcast %cst_252 : f32 to vector<16x1xf32>
    %529 = arith.divf %527, %528 : vector<16x1xf32>
    %530 = vector.broadcast %529 : vector<16x1xf32> to vector<16x32xf32>
    %531 = arith.subf %525, %530 : vector<16x32xf32>
    %532 = arith.mulf %531, %531 : vector<16x32xf32>
    %cst_253 = arith.constant dense<0.000000e+00> : vector<16xf32>
    %533 = vector.multi_reduction <add>, %532, %cst_253 [1] : vector<16x32xf32> to vector<16xf32>
    %534 = vector.shape_cast %533 : vector<16xf32> to vector<16x1xf32>
    %cst_254 = arith.constant 0.0322580636 : f32
    %535 = vector.broadcast %cst_254 : f32 to vector<16x1xf32>
    %536 = arith.mulf %534, %535 : vector<16x1xf32>
    %537 = math.sqrt %536 : vector<16x1xf32>
    %538 = vector.broadcast %522 : vector<1x32xf32> to vector<16x32xf32>
    %539 = arith.mulf %538, %531 : vector<16x32xf32>
    %cst_255 = arith.constant 9.99999997E-7 : f32
    %540 = vector.broadcast %cst_255 : f32 to vector<16x1xf32>
    %541 = arith.addf %537, %540 : vector<16x1xf32>
    %542 = vector.broadcast %541 : vector<16x1xf32> to vector<16x32xf32>
    %543 = arith.divf %539, %542 : vector<16x32xf32>
    %544 = vector.broadcast %524 : vector<1x32xf32> to vector<16x32xf32>
    %545 = arith.addf %543, %544 : vector<16x32xf32>
    %c1_256 = arith.constant 1 : index
    %c0_257 = arith.constant 0 : index
    %c0_258 = arith.constant 0 : index
    %546 = vector.load %arg17[%c1_256, %c0_257, %c0_258] : memref<2x32x96xf32, #tpu.memory_space<vmem>>, vector<1x32x96xf32>
    %547 = vector.shape_cast %546 : vector<1x32x96xf32> to vector<32x96xf32>
    %c1_259 = arith.constant 1 : index
    %c0_260 = arith.constant 0 : index
    %c0_261 = arith.constant 0 : index
    %548 = vector.load %arg18[%c1_259, %c0_260, %c0_261] : memref<2x1x96xf32, #tpu.memory_space<vmem>>, vector<1x1x96xf32>
    %549 = vector.shape_cast %548 : vector<1x1x96xf32> to vector<1x96xf32>
    %c1_262 = arith.constant 1 : index
    %c0_263 = arith.constant 0 : index
    %c0_264 = arith.constant 0 : index
    %550 = vector.load %arg19[%c1_262, %c0_263, %c0_264] : memref<2x32x32xf32, #tpu.memory_space<vmem>>, vector<1x32x32xf32>
    %551 = vector.shape_cast %550 : vector<1x32x32xf32> to vector<32x32xf32>
    %c1_265 = arith.constant 1 : index
    %c0_266 = arith.constant 0 : index
    %c0_267 = arith.constant 0 : index
    %552 = vector.load %arg20[%c1_265, %c0_266, %c0_267] : memref<2x1x32xf32, #tpu.memory_space<vmem>>, vector<1x1x32xf32>
    %553 = vector.shape_cast %552 : vector<1x1x32xf32> to vector<1x32xf32>
    %cst_268 = arith.constant dense<0.000000e+00> : vector<16x96xf32>
    %554 = tpu.matmul %545, %547, %cst_268 {dimension_numbers = #tpu.dot_dimension_numbers<[1], [0], [0], [1], [0, 0, 1, 1], [], []>} : vector<16x32xf32>, vector<32x96xf32>, vector<16x96xf32> -> vector<16x96xf32>
    %555 = vector.broadcast %549 : vector<1x96xf32> to vector<16x96xf32>
    %556 = arith.addf %554, %555 : vector<16x96xf32>
    %557 = vector.extract_strided_slice %556 {offsets = [0, 0], sizes = [16, 32], strides = [1, 1]} : vector<16x96xf32> to vector<16x32xf32>
    %558 = vector.extract_strided_slice %556 {offsets = [0, 32], sizes = [16, 32], strides = [1, 1]} : vector<16x96xf32> to vector<16x32xf32>
    %559 = vector.extract_strided_slice %556 {offsets = [0, 64], sizes = [16, 32], strides = [1, 1]} : vector<16x96xf32> to vector<16x32xf32>
    %560 = vector.extract_strided_slice %557 {offsets = [0, 0], sizes = [16, 8], strides = [1, 1]} : vector<16x32xf32> to vector<16x8xf32>
    %561 = vector.extract_strided_slice %558 {offsets = [0, 0], sizes = [16, 8], strides = [1, 1]} : vector<16x32xf32> to vector<16x8xf32>
    %562 = vector.extract_strided_slice %559 {offsets = [0, 0], sizes = [16, 8], strides = [1, 1]} : vector<16x32xf32> to vector<16x8xf32>
    %cst_269 = arith.constant dense<0.000000e+00> : vector<16x16xf32>
    %563 = tpu.matmul %560, %561, %cst_269 {dimension_numbers = #tpu.dot_dimension_numbers<[1], [1], [0], [0], [0, 0, 1, 0], [], []>} : vector<16x8xf32>, vector<16x8xf32>, vector<16x16xf32> -> vector<16x16xf32>
    %564 = arith.addf %563, %3 : vector<16x16xf32>
    %cst_270 = arith.constant dense<0xFF800000> : vector<16xf32>
    %565 = vector.multi_reduction <maximumf>, %564, %cst_270 [1] : vector<16x16xf32> to vector<16xf32>
    %566 = vector.shape_cast %565 : vector<16xf32> to vector<16x1xf32>
    %567 = vector.broadcast %566 : vector<16x1xf32> to vector<16x16xf32>
    %568 = arith.subf %564, %567 : vector<16x16xf32>
    %569 = math.exp %568 : vector<16x16xf32>
    %cst_271 = arith.constant dense<0.000000e+00> : vector<16xf32>
    %570 = vector.multi_reduction <add>, %569, %cst_271 [1] : vector<16x16xf32> to vector<16xf32>
    %571 = vector.shape_cast %570 : vector<16xf32> to vector<16x1xf32>
    %572 = vector.broadcast %571 : vector<16x1xf32> to vector<16x16xf32>
    %573 = arith.divf %569, %572 : vector<16x16xf32>
    %cst_272 = arith.constant dense<0.000000e+00> : vector<16x8xf32>
    %574 = tpu.matmul %573, %562, %cst_272 {dimension_numbers = #tpu.dot_dimension_numbers<[1], [0], [0], [1], [0, 0, 1, 1], [], []>} : vector<16x16xf32>, vector<16x8xf32>, vector<16x8xf32> -> vector<16x8xf32>
    %575 = vector.extract_strided_slice %557 {offsets = [0, 8], sizes = [16, 8], strides = [1, 1]} : vector<16x32xf32> to vector<16x8xf32>
    %576 = vector.extract_strided_slice %558 {offsets = [0, 8], sizes = [16, 8], strides = [1, 1]} : vector<16x32xf32> to vector<16x8xf32>
    %577 = vector.extract_strided_slice %559 {offsets = [0, 8], sizes = [16, 8], strides = [1, 1]} : vector<16x32xf32> to vector<16x8xf32>
    %cst_273 = arith.constant dense<0.000000e+00> : vector<16x16xf32>
    %578 = tpu.matmul %575, %576, %cst_273 {dimension_numbers = #tpu.dot_dimension_numbers<[1], [1], [0], [0], [0, 0, 1, 0], [], []>} : vector<16x8xf32>, vector<16x8xf32>, vector<16x16xf32> -> vector<16x16xf32>
    %579 = arith.addf %578, %3 : vector<16x16xf32>
    %cst_274 = arith.constant dense<0xFF800000> : vector<16xf32>
    %580 = vector.multi_reduction <maximumf>, %579, %cst_274 [1] : vector<16x16xf32> to vector<16xf32>
    %581 = vector.shape_cast %580 : vector<16xf32> to vector<16x1xf32>
    %582 = vector.broadcast %581 : vector<16x1xf32> to vector<16x16xf32>
    %583 = arith.subf %579, %582 : vector<16x16xf32>
    %584 = math.exp %583 : vector<16x16xf32>
    %cst_275 = arith.constant dense<0.000000e+00> : vector<16xf32>
    %585 = vector.multi_reduction <add>, %584, %cst_275 [1] : vector<16x16xf32> to vector<16xf32>
    %586 = vector.shape_cast %585 : vector<16xf32> to vector<16x1xf32>
    %587 = vector.broadcast %586 : vector<16x1xf32> to vector<16x16xf32>
    %588 = arith.divf %584, %587 : vector<16x16xf32>
    %cst_276 = arith.constant dense<0.000000e+00> : vector<16x8xf32>
    %589 = tpu.matmul %588, %577, %cst_276 {dimension_numbers = #tpu.dot_dimension_numbers<[1], [0], [0], [1], [0, 0, 1, 1], [], []>} : vector<16x16xf32>, vector<16x8xf32>, vector<16x8xf32> -> vector<16x8xf32>
    %590 = vector.extract_strided_slice %557 {offsets = [0, 16], sizes = [16, 8], strides = [1, 1]} : vector<16x32xf32> to vector<16x8xf32>
    %591 = vector.extract_strided_slice %558 {offsets = [0, 16], sizes = [16, 8], strides = [1, 1]} : vector<16x32xf32> to vector<16x8xf32>
    %592 = vector.extract_strided_slice %559 {offsets = [0, 16], sizes = [16, 8], strides = [1, 1]} : vector<16x32xf32> to vector<16x8xf32>
    %cst_277 = arith.constant dense<0.000000e+00> : vector<16x16xf32>
    %593 = tpu.matmul %590, %591, %cst_277 {dimension_numbers = #tpu.dot_dimension_numbers<[1], [1], [0], [0], [0, 0, 1, 0], [], []>} : vector<16x8xf32>, vector<16x8xf32>, vector<16x16xf32> -> vector<16x16xf32>
    %594 = arith.addf %593, %3 : vector<16x16xf32>
    %cst_278 = arith.constant dense<0xFF800000> : vector<16xf32>
    %595 = vector.multi_reduction <maximumf>, %594, %cst_278 [1] : vector<16x16xf32> to vector<16xf32>
    %596 = vector.shape_cast %595 : vector<16xf32> to vector<16x1xf32>
    %597 = vector.broadcast %596 : vector<16x1xf32> to vector<16x16xf32>
    %598 = arith.subf %594, %597 : vector<16x16xf32>
    %599 = math.exp %598 : vector<16x16xf32>
    %cst_279 = arith.constant dense<0.000000e+00> : vector<16xf32>
    %600 = vector.multi_reduction <add>, %599, %cst_279 [1] : vector<16x16xf32> to vector<16xf32>
    %601 = vector.shape_cast %600 : vector<16xf32> to vector<16x1xf32>
    %602 = vector.broadcast %601 : vector<16x1xf32> to vector<16x16xf32>
    %603 = arith.divf %599, %602 : vector<16x16xf32>
    %cst_280 = arith.constant dense<0.000000e+00> : vector<16x8xf32>
    %604 = tpu.matmul %603, %592, %cst_280 {dimension_numbers = #tpu.dot_dimension_numbers<[1], [0], [0], [1], [0, 0, 1, 1], [], []>} : vector<16x16xf32>, vector<16x8xf32>, vector<16x8xf32> -> vector<16x8xf32>
    %605 = vector.extract_strided_slice %557 {offsets = [0, 24], sizes = [16, 8], strides = [1, 1]} : vector<16x32xf32> to vector<16x8xf32>
    %606 = vector.extract_strided_slice %558 {offsets = [0, 24], sizes = [16, 8], strides = [1, 1]} : vector<16x32xf32> to vector<16x8xf32>
    %607 = vector.extract_strided_slice %559 {offsets = [0, 24], sizes = [16, 8], strides = [1, 1]} : vector<16x32xf32> to vector<16x8xf32>
    %cst_281 = arith.constant dense<0.000000e+00> : vector<16x16xf32>
    %608 = tpu.matmul %605, %606, %cst_281 {dimension_numbers = #tpu.dot_dimension_numbers<[1], [1], [0], [0], [0, 0, 1, 0], [], []>} : vector<16x8xf32>, vector<16x8xf32>, vector<16x16xf32> -> vector<16x16xf32>
    %609 = arith.addf %608, %3 : vector<16x16xf32>
    %cst_282 = arith.constant dense<0xFF800000> : vector<16xf32>
    %610 = vector.multi_reduction <maximumf>, %609, %cst_282 [1] : vector<16x16xf32> to vector<16xf32>
    %611 = vector.shape_cast %610 : vector<16xf32> to vector<16x1xf32>
    %612 = vector.broadcast %611 : vector<16x1xf32> to vector<16x16xf32>
    %613 = arith.subf %609, %612 : vector<16x16xf32>
    %614 = math.exp %613 : vector<16x16xf32>
    %cst_283 = arith.constant dense<0.000000e+00> : vector<16xf32>
    %615 = vector.multi_reduction <add>, %614, %cst_283 [1] : vector<16x16xf32> to vector<16xf32>
    %616 = vector.shape_cast %615 : vector<16xf32> to vector<16x1xf32>
    %617 = vector.broadcast %616 : vector<16x1xf32> to vector<16x16xf32>
    %618 = arith.divf %614, %617 : vector<16x16xf32>
    %cst_284 = arith.constant dense<0.000000e+00> : vector<16x8xf32>
    %619 = tpu.matmul %618, %607, %cst_284 {dimension_numbers = #tpu.dot_dimension_numbers<[1], [0], [0], [1], [0, 0, 1, 1], [], []>} : vector<16x16xf32>, vector<16x8xf32>, vector<16x8xf32> -> vector<16x8xf32>
    %620 = tpu.concatenate %574, %589, %604, %619 in 1 : vector<16x8xf32>, vector<16x8xf32>, vector<16x8xf32>, vector<16x8xf32> -> vector<16x32xf32>
    %cst_285 = arith.constant dense<0.000000e+00> : vector<16x32xf32>
    %621 = tpu.matmul %620, %551, %cst_285 {dimension_numbers = #tpu.dot_dimension_numbers<[1], [0], [0], [1], [0, 0, 1, 1], [], []>} : vector<16x32xf32>, vector<32x32xf32>, vector<16x32xf32> -> vector<16x32xf32>
    %622 = vector.broadcast %553 : vector<1x32xf32> to vector<16x32xf32>
    %623 = arith.addf %621, %622 : vector<16x32xf32>
    %c1_286 = arith.constant 1 : index
    %c0_287 = arith.constant 0 : index
    %c0_288 = arith.constant 0 : index
    %624 = vector.load %arg31[%c1_286, %c0_287, %c0_288] : memref<2x1x32xf32, #tpu.memory_space<vmem>>, vector<1x1x32xf32>
    %625 = vector.shape_cast %624 : vector<1x1x32xf32> to vector<1x32xf32>
    %c1_289 = arith.constant 1 : index
    %c0_290 = arith.constant 0 : index
    %c0_291 = arith.constant 0 : index
    %626 = vector.load %arg32[%c1_289, %c0_290, %c0_291] : memref<2x1x32xf32, #tpu.memory_space<vmem>>, vector<1x1x32xf32>
    %627 = vector.shape_cast %626 : vector<1x1x32xf32> to vector<1x32xf32>
    %628 = arith.addf %545, %623 : vector<16x32xf32>
    %cst_292 = arith.constant dense<0.000000e+00> : vector<16xf32>
    %629 = vector.multi_reduction <add>, %628, %cst_292 [1] : vector<16x32xf32> to vector<16xf32>
    %630 = vector.shape_cast %629 : vector<16xf32> to vector<16x1xf32>
    %cst_293 = arith.constant 3.200000e+01 : f32
    %631 = vector.broadcast %cst_293 : f32 to vector<16x1xf32>
    %632 = arith.divf %630, %631 : vector<16x1xf32>
    %633 = vector.broadcast %632 : vector<16x1xf32> to vector<16x32xf32>
    %634 = arith.subf %628, %633 : vector<16x32xf32>
    %635 = arith.mulf %634, %634 : vector<16x32xf32>
    %cst_294 = arith.constant dense<0.000000e+00> : vector<16xf32>
    %636 = vector.multi_reduction <add>, %635, %cst_294 [1] : vector<16x32xf32> to vector<16xf32>
    %637 = vector.shape_cast %636 : vector<16xf32> to vector<16x1xf32>
    %cst_295 = arith.constant 0.0322580636 : f32
    %638 = vector.broadcast %cst_295 : f32 to vector<16x1xf32>
    %639 = arith.mulf %637, %638 : vector<16x1xf32>
    %640 = math.sqrt %639 : vector<16x1xf32>
    %641 = vector.broadcast %625 : vector<1x32xf32> to vector<16x32xf32>
    %642 = arith.mulf %641, %634 : vector<16x32xf32>
    %cst_296 = arith.constant 9.99999997E-7 : f32
    %643 = vector.broadcast %cst_296 : f32 to vector<16x1xf32>
    %644 = arith.addf %640, %643 : vector<16x1xf32>
    %645 = vector.broadcast %644 : vector<16x1xf32> to vector<16x32xf32>
    %646 = arith.divf %642, %645 : vector<16x32xf32>
    %647 = vector.broadcast %627 : vector<1x32xf32> to vector<16x32xf32>
    %648 = arith.addf %646, %647 : vector<16x32xf32>
    %c1_297 = arith.constant 1 : index
    %c0_298 = arith.constant 0 : index
    %c0_299 = arith.constant 0 : index
    %649 = vector.load %arg21[%c1_297, %c0_298, %c0_299] : memref<2x32x32xf32, #tpu.memory_space<vmem>>, vector<1x32x32xf32>
    %650 = vector.shape_cast %649 : vector<1x32x32xf32> to vector<32x32xf32>
    %c1_300 = arith.constant 1 : index
    %c0_301 = arith.constant 0 : index
    %c0_302 = arith.constant 0 : index
    %651 = vector.load %arg22[%c1_300, %c0_301, %c0_302] : memref<2x1x32xf32, #tpu.memory_space<vmem>>, vector<1x1x32xf32>
    %652 = vector.shape_cast %651 : vector<1x1x32xf32> to vector<1x32xf32>
    %c1_303 = arith.constant 1 : index
    %c0_304 = arith.constant 0 : index
    %c0_305 = arith.constant 0 : index
    %653 = vector.load %arg23[%c1_303, %c0_304, %c0_305] : memref<2x32x64xf32, #tpu.memory_space<vmem>>, vector<1x32x64xf32>
    %654 = vector.shape_cast %653 : vector<1x32x64xf32> to vector<32x64xf32>
    %c1_306 = arith.constant 1 : index
    %c0_307 = arith.constant 0 : index
    %c0_308 = arith.constant 0 : index
    %655 = vector.load %arg24[%c1_306, %c0_307, %c0_308] : memref<2x1x64xf32, #tpu.memory_space<vmem>>, vector<1x1x64xf32>
    %656 = vector.shape_cast %655 : vector<1x1x64xf32> to vector<1x64xf32>
    %c1_309 = arith.constant 1 : index
    %c0_310 = arith.constant 0 : index
    %c0_311 = arith.constant 0 : index
    %657 = vector.load %arg25[%c1_309, %c0_310, %c0_311] : memref<2x32x32xf32, #tpu.memory_space<vmem>>, vector<1x32x32xf32>
    %658 = vector.shape_cast %657 : vector<1x32x32xf32> to vector<32x32xf32>
    %c1_312 = arith.constant 1 : index
    %c0_313 = arith.constant 0 : index
    %c0_314 = arith.constant 0 : index
    %659 = vector.load %arg26[%c1_312, %c0_313, %c0_314] : memref<2x1x32xf32, #tpu.memory_space<vmem>>, vector<1x1x32xf32>
    %660 = vector.shape_cast %659 : vector<1x1x32xf32> to vector<1x32xf32>
    %cst_315 = arith.constant dense<0.000000e+00> : vector<16x32xf32>
    %661 = tpu.matmul %648, %650, %cst_315 {dimension_numbers = #tpu.dot_dimension_numbers<[1], [0], [0], [1], [0, 0, 1, 1], [], []>} : vector<16x32xf32>, vector<32x32xf32>, vector<16x32xf32> -> vector<16x32xf32>
    %662 = vector.broadcast %652 : vector<1x32xf32> to vector<16x32xf32>
    %663 = arith.addf %661, %662 : vector<16x32xf32>
    %cst_316 = arith.constant dense<0.000000e+00> : vector<32x64xf32>
    %664 = tpu.matmul %292, %654, %cst_316 {dimension_numbers = #tpu.dot_dimension_numbers<[1], [0], [0], [1], [0, 0, 1, 1], [], []>} : vector<32x32xf32>, vector<32x64xf32>, vector<32x64xf32> -> vector<32x64xf32>
    %665 = vector.broadcast %656 : vector<1x64xf32> to vector<32x64xf32>
    %666 = arith.addf %664, %665 : vector<32x64xf32>
    %667 = vector.extract_strided_slice %666 {offsets = [0, 0], sizes = [32, 32], strides = [1, 1]} : vector<32x64xf32> to vector<32x32xf32>
    %668 = vector.extract_strided_slice %666 {offsets = [0, 32], sizes = [32, 32], strides = [1, 1]} : vector<32x64xf32> to vector<32x32xf32>
    %669 = vector.extract_strided_slice %663 {offsets = [0, 0], sizes = [16, 8], strides = [1, 1]} : vector<16x32xf32> to vector<16x8xf32>
    %670 = vector.extract_strided_slice %667 {offsets = [0, 0], sizes = [32, 8], strides = [1, 1]} : vector<32x32xf32> to vector<32x8xf32>
    %671 = vector.extract_strided_slice %668 {offsets = [0, 0], sizes = [32, 8], strides = [1, 1]} : vector<32x32xf32> to vector<32x8xf32>
    %cst_317 = arith.constant dense<0.000000e+00> : vector<16x32xf32>
    %672 = tpu.matmul %669, %670, %cst_317 {dimension_numbers = #tpu.dot_dimension_numbers<[1], [1], [0], [0], [0, 0, 1, 0], [], []>} : vector<16x8xf32>, vector<32x8xf32>, vector<16x32xf32> -> vector<16x32xf32>
    %673 = arith.addf %672, %4 : vector<16x32xf32>
    %cst_318 = arith.constant dense<0xFF800000> : vector<16xf32>
    %674 = vector.multi_reduction <maximumf>, %673, %cst_318 [1] : vector<16x32xf32> to vector<16xf32>
    %675 = vector.shape_cast %674 : vector<16xf32> to vector<16x1xf32>
    %676 = vector.broadcast %675 : vector<16x1xf32> to vector<16x32xf32>
    %677 = arith.subf %673, %676 : vector<16x32xf32>
    %678 = math.exp %677 : vector<16x32xf32>
    %cst_319 = arith.constant dense<0.000000e+00> : vector<16xf32>
    %679 = vector.multi_reduction <add>, %678, %cst_319 [1] : vector<16x32xf32> to vector<16xf32>
    %680 = vector.shape_cast %679 : vector<16xf32> to vector<16x1xf32>
    %681 = vector.broadcast %680 : vector<16x1xf32> to vector<16x32xf32>
    %682 = arith.divf %678, %681 : vector<16x32xf32>
    %cst_320 = arith.constant dense<0.000000e+00> : vector<16x8xf32>
    %683 = tpu.matmul %682, %671, %cst_320 {dimension_numbers = #tpu.dot_dimension_numbers<[1], [0], [0], [1], [0, 0, 1, 1], [], []>} : vector<16x32xf32>, vector<32x8xf32>, vector<16x8xf32> -> vector<16x8xf32>
    %684 = vector.extract_strided_slice %663 {offsets = [0, 8], sizes = [16, 8], strides = [1, 1]} : vector<16x32xf32> to vector<16x8xf32>
    %685 = vector.extract_strided_slice %667 {offsets = [0, 8], sizes = [32, 8], strides = [1, 1]} : vector<32x32xf32> to vector<32x8xf32>
    %686 = vector.extract_strided_slice %668 {offsets = [0, 8], sizes = [32, 8], strides = [1, 1]} : vector<32x32xf32> to vector<32x8xf32>
    %cst_321 = arith.constant dense<0.000000e+00> : vector<16x32xf32>
    %687 = tpu.matmul %684, %685, %cst_321 {dimension_numbers = #tpu.dot_dimension_numbers<[1], [1], [0], [0], [0, 0, 1, 0], [], []>} : vector<16x8xf32>, vector<32x8xf32>, vector<16x32xf32> -> vector<16x32xf32>
    %688 = arith.addf %687, %4 : vector<16x32xf32>
    %cst_322 = arith.constant dense<0xFF800000> : vector<16xf32>
    %689 = vector.multi_reduction <maximumf>, %688, %cst_322 [1] : vector<16x32xf32> to vector<16xf32>
    %690 = vector.shape_cast %689 : vector<16xf32> to vector<16x1xf32>
    %691 = vector.broadcast %690 : vector<16x1xf32> to vector<16x32xf32>
    %692 = arith.subf %688, %691 : vector<16x32xf32>
    %693 = math.exp %692 : vector<16x32xf32>
    %cst_323 = arith.constant dense<0.000000e+00> : vector<16xf32>
    %694 = vector.multi_reduction <add>, %693, %cst_323 [1] : vector<16x32xf32> to vector<16xf32>
    %695 = vector.shape_cast %694 : vector<16xf32> to vector<16x1xf32>
    %696 = vector.broadcast %695 : vector<16x1xf32> to vector<16x32xf32>
    %697 = arith.divf %693, %696 : vector<16x32xf32>
    %cst_324 = arith.constant dense<0.000000e+00> : vector<16x8xf32>
    %698 = tpu.matmul %697, %686, %cst_324 {dimension_numbers = #tpu.dot_dimension_numbers<[1], [0], [0], [1], [0, 0, 1, 1], [], []>} : vector<16x32xf32>, vector<32x8xf32>, vector<16x8xf32> -> vector<16x8xf32>
    %699 = vector.extract_strided_slice %663 {offsets = [0, 16], sizes = [16, 8], strides = [1, 1]} : vector<16x32xf32> to vector<16x8xf32>
    %700 = vector.extract_strided_slice %667 {offsets = [0, 16], sizes = [32, 8], strides = [1, 1]} : vector<32x32xf32> to vector<32x8xf32>
    %701 = vector.extract_strided_slice %668 {offsets = [0, 16], sizes = [32, 8], strides = [1, 1]} : vector<32x32xf32> to vector<32x8xf32>
    %cst_325 = arith.constant dense<0.000000e+00> : vector<16x32xf32>
    %702 = tpu.matmul %699, %700, %cst_325 {dimension_numbers = #tpu.dot_dimension_numbers<[1], [1], [0], [0], [0, 0, 1, 0], [], []>} : vector<16x8xf32>, vector<32x8xf32>, vector<16x32xf32> -> vector<16x32xf32>
    %703 = arith.addf %702, %4 : vector<16x32xf32>
    %cst_326 = arith.constant dense<0xFF800000> : vector<16xf32>
    %704 = vector.multi_reduction <maximumf>, %703, %cst_326 [1] : vector<16x32xf32> to vector<16xf32>
    %705 = vector.shape_cast %704 : vector<16xf32> to vector<16x1xf32>
    %706 = vector.broadcast %705 : vector<16x1xf32> to vector<16x32xf32>
    %707 = arith.subf %703, %706 : vector<16x32xf32>
    %708 = math.exp %707 : vector<16x32xf32>
    %cst_327 = arith.constant dense<0.000000e+00> : vector<16xf32>
    %709 = vector.multi_reduction <add>, %708, %cst_327 [1] : vector<16x32xf32> to vector<16xf32>
    %710 = vector.shape_cast %709 : vector<16xf32> to vector<16x1xf32>
    %711 = vector.broadcast %710 : vector<16x1xf32> to vector<16x32xf32>
    %712 = arith.divf %708, %711 : vector<16x32xf32>
    %cst_328 = arith.constant dense<0.000000e+00> : vector<16x8xf32>
    %713 = tpu.matmul %712, %701, %cst_328 {dimension_numbers = #tpu.dot_dimension_numbers<[1], [0], [0], [1], [0, 0, 1, 1], [], []>} : vector<16x32xf32>, vector<32x8xf32>, vector<16x8xf32> -> vector<16x8xf32>
    %714 = vector.extract_strided_slice %663 {offsets = [0, 24], sizes = [16, 8], strides = [1, 1]} : vector<16x32xf32> to vector<16x8xf32>
    %715 = vector.extract_strided_slice %667 {offsets = [0, 24], sizes = [32, 8], strides = [1, 1]} : vector<32x32xf32> to vector<32x8xf32>
    %716 = vector.extract_strided_slice %668 {offsets = [0, 24], sizes = [32, 8], strides = [1, 1]} : vector<32x32xf32> to vector<32x8xf32>
    %cst_329 = arith.constant dense<0.000000e+00> : vector<16x32xf32>
    %717 = tpu.matmul %714, %715, %cst_329 {dimension_numbers = #tpu.dot_dimension_numbers<[1], [1], [0], [0], [0, 0, 1, 0], [], []>} : vector<16x8xf32>, vector<32x8xf32>, vector<16x32xf32> -> vector<16x32xf32>
    %718 = arith.addf %717, %4 : vector<16x32xf32>
    %cst_330 = arith.constant dense<0xFF800000> : vector<16xf32>
    %719 = vector.multi_reduction <maximumf>, %718, %cst_330 [1] : vector<16x32xf32> to vector<16xf32>
    %720 = vector.shape_cast %719 : vector<16xf32> to vector<16x1xf32>
    %721 = vector.broadcast %720 : vector<16x1xf32> to vector<16x32xf32>
    %722 = arith.subf %718, %721 : vector<16x32xf32>
    %723 = math.exp %722 : vector<16x32xf32>
    %cst_331 = arith.constant dense<0.000000e+00> : vector<16xf32>
    %724 = vector.multi_reduction <add>, %723, %cst_331 [1] : vector<16x32xf32> to vector<16xf32>
    %725 = vector.shape_cast %724 : vector<16xf32> to vector<16x1xf32>
    %726 = vector.broadcast %725 : vector<16x1xf32> to vector<16x32xf32>
    %727 = arith.divf %723, %726 : vector<16x32xf32>
    %cst_332 = arith.constant dense<0.000000e+00> : vector<16x8xf32>
    %728 = tpu.matmul %727, %716, %cst_332 {dimension_numbers = #tpu.dot_dimension_numbers<[1], [0], [0], [1], [0, 0, 1, 1], [], []>} : vector<16x32xf32>, vector<32x8xf32>, vector<16x8xf32> -> vector<16x8xf32>
    %729 = tpu.concatenate %683, %698, %713, %728 in 1 : vector<16x8xf32>, vector<16x8xf32>, vector<16x8xf32>, vector<16x8xf32> -> vector<16x32xf32>
    %cst_333 = arith.constant dense<0.000000e+00> : vector<16x32xf32>
    %730 = tpu.matmul %729, %658, %cst_333 {dimension_numbers = #tpu.dot_dimension_numbers<[1], [0], [0], [1], [0, 0, 1, 1], [], []>} : vector<16x32xf32>, vector<32x32xf32>, vector<16x32xf32> -> vector<16x32xf32>
    %731 = vector.broadcast %660 : vector<1x32xf32> to vector<16x32xf32>
    %732 = arith.addf %730, %731 : vector<16x32xf32>
    %c1_334 = arith.constant 1 : index
    %c0_335 = arith.constant 0 : index
    %c0_336 = arith.constant 0 : index
    %733 = vector.load %arg33[%c1_334, %c0_335, %c0_336] : memref<2x1x32xf32, #tpu.memory_space<vmem>>, vector<1x1x32xf32>
    %734 = vector.shape_cast %733 : vector<1x1x32xf32> to vector<1x32xf32>
    %c1_337 = arith.constant 1 : index
    %c0_338 = arith.constant 0 : index
    %c0_339 = arith.constant 0 : index
    %735 = vector.load %arg34[%c1_337, %c0_338, %c0_339] : memref<2x1x32xf32, #tpu.memory_space<vmem>>, vector<1x1x32xf32>
    %736 = vector.shape_cast %735 : vector<1x1x32xf32> to vector<1x32xf32>
    %737 = arith.addf %648, %732 : vector<16x32xf32>
    %cst_340 = arith.constant dense<0.000000e+00> : vector<16xf32>
    %738 = vector.multi_reduction <add>, %737, %cst_340 [1] : vector<16x32xf32> to vector<16xf32>
    %739 = vector.shape_cast %738 : vector<16xf32> to vector<16x1xf32>
    %cst_341 = arith.constant 3.200000e+01 : f32
    %740 = vector.broadcast %cst_341 : f32 to vector<16x1xf32>
    %741 = arith.divf %739, %740 : vector<16x1xf32>
    %742 = vector.broadcast %741 : vector<16x1xf32> to vector<16x32xf32>
    %743 = arith.subf %737, %742 : vector<16x32xf32>
    %744 = arith.mulf %743, %743 : vector<16x32xf32>
    %cst_342 = arith.constant dense<0.000000e+00> : vector<16xf32>
    %745 = vector.multi_reduction <add>, %744, %cst_342 [1] : vector<16x32xf32> to vector<16xf32>
    %746 = vector.shape_cast %745 : vector<16xf32> to vector<16x1xf32>
    %cst_343 = arith.constant 0.0322580636 : f32
    %747 = vector.broadcast %cst_343 : f32 to vector<16x1xf32>
    %748 = arith.mulf %746, %747 : vector<16x1xf32>
    %749 = math.sqrt %748 : vector<16x1xf32>
    %750 = vector.broadcast %734 : vector<1x32xf32> to vector<16x32xf32>
    %751 = arith.mulf %750, %743 : vector<16x32xf32>
    %cst_344 = arith.constant 9.99999997E-7 : f32
    %752 = vector.broadcast %cst_344 : f32 to vector<16x1xf32>
    %753 = arith.addf %749, %752 : vector<16x1xf32>
    %754 = vector.broadcast %753 : vector<16x1xf32> to vector<16x32xf32>
    %755 = arith.divf %751, %754 : vector<16x32xf32>
    %756 = vector.broadcast %736 : vector<1x32xf32> to vector<16x32xf32>
    %757 = arith.addf %755, %756 : vector<16x32xf32>
    %c1_345 = arith.constant 1 : index
    %c0_346 = arith.constant 0 : index
    %c0_347 = arith.constant 0 : index
    %758 = vector.load %arg27[%c1_345, %c0_346, %c0_347] : memref<2x32x64xf32, #tpu.memory_space<vmem>>, vector<1x32x64xf32>
    %759 = vector.shape_cast %758 : vector<1x32x64xf32> to vector<32x64xf32>
    %c1_348 = arith.constant 1 : index
    %c0_349 = arith.constant 0 : index
    %c0_350 = arith.constant 0 : index
    %760 = vector.load %arg28[%c1_348, %c0_349, %c0_350] : memref<2x1x64xf32, #tpu.memory_space<vmem>>, vector<1x1x64xf32>
    %761 = vector.shape_cast %760 : vector<1x1x64xf32> to vector<1x64xf32>
    %c1_351 = arith.constant 1 : index
    %c0_352 = arith.constant 0 : index
    %c0_353 = arith.constant 0 : index
    %762 = vector.load %arg29[%c1_351, %c0_352, %c0_353] : memref<2x64x32xf32, #tpu.memory_space<vmem>>, vector<1x64x32xf32>
    %763 = vector.shape_cast %762 : vector<1x64x32xf32> to vector<64x32xf32>
    %c1_354 = arith.constant 1 : index
    %c0_355 = arith.constant 0 : index
    %c0_356 = arith.constant 0 : index
    %764 = vector.load %arg30[%c1_354, %c0_355, %c0_356] : memref<2x1x32xf32, #tpu.memory_space<vmem>>, vector<1x1x32xf32>
    %765 = vector.shape_cast %764 : vector<1x1x32xf32> to vector<1x32xf32>
    %cst_357 = arith.constant dense<0.000000e+00> : vector<16x64xf32>
    %766 = tpu.matmul %757, %759, %cst_357 {dimension_numbers = #tpu.dot_dimension_numbers<[1], [0], [0], [1], [0, 0, 1, 1], [], []>} : vector<16x32xf32>, vector<32x64xf32>, vector<16x64xf32> -> vector<16x64xf32>
    %767 = vector.broadcast %761 : vector<1x64xf32> to vector<16x64xf32>
    %768 = arith.addf %766, %767 : vector<16x64xf32>
    %cst_358 = arith.constant 0.000000e+00 : f32
    %769 = vector.broadcast %cst_358 : f32 to vector<16x64xf32>
    %770 = arith.maximumf %768, %769 : vector<16x64xf32>
    %cst_359 = arith.constant dense<0.000000e+00> : vector<16x32xf32>
    %771 = tpu.matmul %770, %763, %cst_359 {dimension_numbers = #tpu.dot_dimension_numbers<[1], [0], [0], [1], [0, 0, 1, 1], [], []>} : vector<16x64xf32>, vector<64x32xf32>, vector<16x32xf32> -> vector<16x32xf32>
    %772 = vector.broadcast %765 : vector<1x32xf32> to vector<16x32xf32>
    %773 = arith.addf %771, %772 : vector<16x32xf32>
    %c1_360 = arith.constant 1 : index
    %c0_361 = arith.constant 0 : index
    %c0_362 = arith.constant 0 : index
    %774 = vector.load %arg35[%c1_360, %c0_361, %c0_362] : memref<2x1x32xf32, #tpu.memory_space<vmem>>, vector<1x1x32xf32>
    %775 = vector.shape_cast %774 : vector<1x1x32xf32> to vector<1x32xf32>
    %c1_363 = arith.constant 1 : index
    %c0_364 = arith.constant 0 : index
    %c0_365 = arith.constant 0 : index
    %776 = vector.load %arg36[%c1_363, %c0_364, %c0_365] : memref<2x1x32xf32, #tpu.memory_space<vmem>>, vector<1x1x32xf32>
    %777 = vector.shape_cast %776 : vector<1x1x32xf32> to vector<1x32xf32>
    %778 = arith.addf %757, %773 : vector<16x32xf32>
    %cst_366 = arith.constant dense<0.000000e+00> : vector<16xf32>
    %779 = vector.multi_reduction <add>, %778, %cst_366 [1] : vector<16x32xf32> to vector<16xf32>
    %780 = vector.shape_cast %779 : vector<16xf32> to vector<16x1xf32>
    %cst_367 = arith.constant 3.200000e+01 : f32
    %781 = vector.broadcast %cst_367 : f32 to vector<16x1xf32>
    %782 = arith.divf %780, %781 : vector<16x1xf32>
    %783 = vector.broadcast %782 : vector<16x1xf32> to vector<16x32xf32>
    %784 = arith.subf %778, %783 : vector<16x32xf32>
    %785 = arith.mulf %784, %784 : vector<16x32xf32>
    %cst_368 = arith.constant dense<0.000000e+00> : vector<16xf32>
    %786 = vector.multi_reduction <add>, %785, %cst_368 [1] : vector<16x32xf32> to vector<16xf32>
    %787 = vector.shape_cast %786 : vector<16xf32> to vector<16x1xf32>
    %cst_369 = arith.constant 0.0322580636 : f32
    %788 = vector.broadcast %cst_369 : f32 to vector<16x1xf32>
    %789 = arith.mulf %787, %788 : vector<16x1xf32>
    %790 = math.sqrt %789 : vector<16x1xf32>
    %791 = vector.broadcast %775 : vector<1x32xf32> to vector<16x32xf32>
    %792 = arith.mulf %791, %784 : vector<16x32xf32>
    %cst_370 = arith.constant 9.99999997E-7 : f32
    %793 = vector.broadcast %cst_370 : f32 to vector<16x1xf32>
    %794 = arith.addf %790, %793 : vector<16x1xf32>
    %795 = vector.broadcast %794 : vector<16x1xf32> to vector<16x32xf32>
    %796 = arith.divf %792, %795 : vector<16x32xf32>
    %797 = vector.broadcast %777 : vector<1x32xf32> to vector<16x32xf32>
    %798 = arith.addf %796, %797 : vector<16x32xf32>
    %c0_371 = arith.constant 0 : index
    %c0_372 = arith.constant 0 : index
    %799 = vector.load %arg37[%c0_371, %c0_372] : memref<32x32xf32, #tpu.memory_space<vmem>>, vector<32x32xf32>
    tpu.vector_store %arg37[%c0_371, %c0_372], %292 {strides = array<i32>} : memref<32x32xf32, #tpu.memory_space<vmem>>, vector<32x32xf32>,
    %c0_373 = arith.constant 0 : index
    %c0_374 = arith.constant 0 : index
    %800 = vector.load %arg38[%c0_373, %c0_374] : memref<16x32xf32, #tpu.memory_space<vmem>>, vector<16x32xf32>
    tpu.vector_store %arg38[%c0_373, %c0_374], %798 {strides = array<i32>} : memref<16x32xf32, #tpu.memory_space<vmem>>, vector<16x32xf32>,
    return
  }
}

</mosaic_0001>

<bundles_post_ra>
// kernel: eq.29
= control target key start
LH: loop header
LB: loop body
LE: loop exit
PB: predicated region body
PF: predicated region fallthrough
CT: control target
= control target key end

     0   :  { %vm7_vm0 = vcmask 64512   ;;  %vm13_vm1 = vcmask 130112   ;;  %s39_s0 = inlined_call_operand.vmem [shape: s32[2,8], index: 0, kind: input, shape index: {}]   ;;  %s40_s1 = inlined_call_operand.vmem [shape: s32[16], index: 1, kind: output, shape index: {}]  }
   0x1   :  { %v4_v0 = vld [vmem:[%s39_s0] sm:$0x3]  ;;  %s22_s0 = smov 8  }
   0x2   :  { %5 = vst [vmem:[#allocation1] sm:$0x3] %v4_v0 }
   0x9   :  { %v10_v1 = vld [vmem:[#allocation1 + $0x1] sm:$0x1]   ;;  %v6_v2 = vld [vmem:[#allocation1] sm:$0x1]  }
   0xa   :  { %11 = vrot.lane.b32.xlu0 %v10_v1, %s22_s0  ;;  %8 = vst.msk [vmem:[#allocation0] sm:$0x1] %vm7_vm0, %v6_v2  }
  0x7c   :  { %v12_v3 = vpop.permute.xlu0 %11  }
  0x7d   :  { %14 = vst.msk [vmem:[#allocation0] sm:$0x1] %vm13_vm1, %v12_v3  }
  0x84   :  { %v18_v4 = vld [vmem:[#allocation0] sm:$0x1] }
  0x85   :  { %20 = vst [vmem:[%s40_s1] sm:$0x1] %v18_v4 }

// kernel: eq.22
= control target key start
LH: loop header
LB: loop body
LE: loop exit
PB: predicated region body
PF: predicated region fallthrough
CT: control target
= control target key end

     0   :  { %vm7_vm0 = vcmask 130048   ;;  %vm13_vm1 = vcmask 261248   ;;  %s39_s0 = inlined_call_operand.vmem [shape: s32[2,16], index: 0, kind: input, shape index: {}]   ;;  %s40_s1 = inlined_call_operand.vmem [shape: s32[32], index: 1, kind: output, shape index: {}]  }
   0x1   :  { %v4_v0 = vld [vmem:[%s39_s0] sm:$0x3]  ;;  %s22_s0 = smov 16  }
   0x2   :  { %5 = vst [vmem:[#allocation1] sm:$0x3] %v4_v0 }
   0x9   :  { %v10_v1 = vld [vmem:[#allocation1 + $0x1] sm:$0x1]   ;;  %v6_v2 = vld [vmem:[#allocation1] sm:$0x1]  }
   0xa   :  { %11 = vrot.lane.b32.xlu0 %v10_v1, %s22_s0  ;;  %8 = vst.msk [vmem:[#allocation0] sm:$0x1] %vm7_vm0, %v6_v2  }
  0x7c   :  { %v12_v3 = vpop.permute.xlu0 %11  }
  0x7d   :  { %14 = vst.msk [vmem:[#allocation0] sm:$0x1] %vm13_vm1, %v12_v3  }
  0x84   :  { %v18_v4 = vld [vmem:[#allocation0] sm:$0x1] }
  0x85   :  { %20 = vst [vmem:[%s40_s1] sm:$0x1] %v18_v4 }

// kernel: mca_ed.1
= control target key start
LH: loop header
LB: loop body
LE: loop exit
PB: predicated region body
PF: predicated region fallthrough
CT: control target
= control target key end

     0   :  { %s12977_s6 = smov 1   ;;  %s12978_s10 = smov 2   ;;  %s14953_s0 = inlined_call_operand.smem [shape: u32[39], index: -1, kind: input, shape index: {}] }
   0x1   :  { %s13065_s5 = sld [smem:[%s14953_s0]]   ;;  %s12979_s14 = smov 3  }
   0x2   :  { %s13070_s9 = sld [smem:[%s14953_s0 + %s12977_s6]]   ;;  %s12980_s18 = smov 4  }
   0x3   :  { %s13075_s13 = sld [smem:[%s14953_s0 + %s12978_s10]]   ;;  %s12981_s22 = smov 5  }
   0x4   :  { %s13080_s17 = sld [smem:[%s14953_s0 + %s12979_s14]]   ;;  %s12982_s26 = smov 6  }
   0x5   :  { %s13085_s21 = sld [smem:[%s14953_s0 + %s12980_s18]]   ;;  %s12983_s30 = smov 7  }
   0x6   :  { %s13090_s25 = sld [smem:[%s14953_s0 + %s12981_s22]]   ;;  %s12984_s4 = smov 8  }
   0x7   :  { %14975 = sst [smem:[#allocation58_spill]] %s13065_s5  ;;  %s12985_s10 = smov 9  }
   0x8   :  { %s13095_s29 = sld [smem:[%s14953_s0 + %s12982_s26]]   ;;  %s12986_s15 = smov 10  }
   0x9   :  { %14976 = sst [smem:[#allocation59_spill]] %s13075_s13  ;;  %s12987_s20 = smov 11  }
   0xa   :  { %14977 = sst [smem:[#allocation60_spill]] %s13080_s17  ;;  %s12988_s26 = smov 12  }
   0xb   :  { %14978 = sst [smem:[#allocation61_spill]] %s13085_s21  ;;  %s12989_s1 = smov 13  }
   0xc   :  { %14979 = sst [smem:[#allocation62_spill]] %s13090_s25  ;;  %s12990_s7 = smov 14  }
   0xd   :  { %s13100_s3 = sld [smem:[%s14953_s0 + %s12983_s30]]   ;;  %s12992_s22 = smov 16  }
   0xe   :  { %s13105_s8 = sld [smem:[%s14953_s0 + %s12984_s4]]   ;;  %s12993_s28 = smov 17  }
   0xf   :  { %s13110_s14 = sld [smem:[%s14953_s0 + %s12985_s10]]  }
  0x10   :  { %s13115_s19 = sld [smem:[%s14953_s0 + %s12986_s15]]   ;;  %s12991_s15 = smov 15  }
  0x11   :  { %s13120_s24 = sld [smem:[%s14953_s0 + %s12987_s20]]  }
  0x12   :  { %s13125_s30 = sld [smem:[%s14953_s0 + %s12988_s26]]  }
  0x13   :  { %14980 = sst [smem:[#allocation63_spill]] %s13100_s3 }
  0x14   :  { %s13130_s6 = sld [smem:[%s14953_s0 + %s12989_s1]]  }
  0x15   :  { %14981 = sst [smem:[#allocation64_spill]] %s13110_s14 }
  0x16   :  { %s13135_s12 = sld [smem:[%s14953_s0 + %s12990_s7]]   ;;  %s12994_s7 = smov 18  }
  0x17   :  { %14982 = sst [smem:[#allocation65_spill]] %s13120_s24 }
  0x18   :  { %s13140_s20 = sld [smem:[%s14953_s0 + %s12991_s15]]   ;;  %s12995_s15 = smov 19  }
  0x19   :  { %s13145_s27 = sld [smem:[%s14953_s0 + %s12992_s22]]   ;;  %s12996_s22 = smov 20  }
  0x1a   :  { %s13150_s4 = sld [smem:[%s14953_s0 + %s12993_s28]]   ;;  %s12997_s28 = smov 21  }
  0x1b   :  { %s13155_s21 = sld [smem:[%s14953_s0 + %s12994_s7]]   ;;  %s12998_s7 = smov 22  }
  0x1c   :  { %14983 = sst [smem:[#allocation66_spill]] %s13135_s12 }
  0x1d   :  { %s13160_s17 = sld [smem:[%s14953_s0 + %s12995_s15]]   ;;  %s12999_s15 = smov 23  }
  0x1e   :  { %s13165_s24 = sld [smem:[%s14953_s0 + %s12996_s22]]   ;;  %s13000_s22 = smov 24  }
  0x1f   :  { %14984 = sst [smem:[#allocation67_spill]] %s13145_s27 }
  0x20   :  { %14985 = sst [smem:[#allocation68_spill]] %s13150_s4 }
  0x21   :  { %s13170_s4 = sld [smem:[%s14953_s0 + %s12997_s28]]   ;;  %s13001_s28 = smov 25  }
  0x22   :  { %s13175_s14 = sld [smem:[%s14953_s0 + %s12998_s7]]   ;;  %s13002_s7 = smov 26  }
  0x23   :  { %14986 = sst [smem:[#allocation69_spill]] %s13160_s17 }
  0x24   :  { %14987 = sst [smem:[#allocation70_spill]] %s13165_s24 }
  0x25   :  { %s13180_s17 = sld [smem:[%s14953_s0 + %s12999_s15]]   ;;  %s13003_s15 = smov 27  }
  0x26   :  { %s13185_s3 = sld [smem:[%s14953_s0 + %s13000_s22]]   ;;  %s13004_s22 = smov 28  }
  0x27   :  { %14988 = sst [smem:[#allocation71_spill]] %s13170_s4 }
  0x28   :  { %s13190_s4 = sld [smem:[%s14953_s0 + %s13001_s28]]   ;;  %s13005_s28 = smov 29  }
  0x29   :  { %s13195_s13 = sld [smem:[%s14953_s0 + %s13002_s7]]   ;;  %s13006_s7 = smov 30  }
  0x2a   :  { %s13200_s5 = sld [smem:[%s14953_s0 + %s13003_s15]]   ;;  %s13007_s15 = smov 31  }
  0x2b   :  { %14989 = sst [smem:[#allocation72_spill]] %s13180_s17 }
  0x2c   :  { %s13205_s25 = sld [smem:[%s14953_s0 + %s13004_s22]]   ;;  %s13008_s22 = smov 32  }
  0x2d   :  { %s13215_s17 = sld [smem:[%s14953_s0 + %s13006_s7]]   ;;  %s13010_s7 = smov 34  }
  0x2e   :  { %14990 = sst [smem:[#allocation73_spill]] %s13190_s4 }
  0x2f   :  { %s13210_s4 = sld [smem:[%s14953_s0 + %s13005_s28]]   ;;  %s13009_s28 = smov 33  }
  0x30   :  { %14991 = sst [smem:[#allocation74_spill]] %s13200_s5 }
  0x31   :  { %s13220_s5 = sld [smem:[%s14953_s0 + %s13007_s15]]   ;;  %s13011_s15 = smov 35  }
  0x32   :  { %14992 = sst [smem:[#allocation75_spill]] %s13205_s25 }
  0x33   :  { %s13225_s25 = sld [smem:[%s14953_s0 + %s13008_s22]]   ;;  %s13012_s22 = smov 36  }
  0x34   :  { %s13235_s24 = sld [smem:[%s14953_s0 + %s13010_s7]]   ;;  %s13014_s7 = smov 38  }
  0x35   :  { %14993 = sst [smem:[#allocation76_spill]] %s13210_s4 }
  0x36   :  { %s13230_s4 = sld [smem:[%s14953_s0 + %s13009_s28]]   ;;  %s13013_s28 = smov 37  }
  0x37   :  { %14994 = sst [smem:[#allocation77_spill]] %s13220_s5 }
  0x38   :  { %s13240_s5 = sld [smem:[%s14953_s0 + %s13011_s15]]  }
  0x39   :  { %s13245_s27 = sld [smem:[%s14953_s0 + %s13012_s22]]  }
  0x3a   :  { %s13255_s12 = sld [smem:[%s14953_s0 + %s13014_s7]]  }
  0x3c   :  { %14995 = sst [smem:[#allocation78_spill]] %s13230_s4 }
  0x3d   :  { %s13250_s4 = sld [smem:[%s14953_s0 + %s13013_s28]]  }
  0x3e   :  { %83 = vsyncpa [#allocation3], 0 }
  0x3f   :  { %84 = vsyncpa [#allocation6], 0 }
  0x40   :  { %85 = vsyncpa [#allocation9], 0 }
  0x41   :  { %86 = vsyncpa [#allocation12], 0 }
  0x42   :  { %87 = vsyncpa [#allocation15], 0 }
  0x43   :  { %88 = vsyncpa [#allocation18], 0 }
  0x44   :  { %89 = vsyncpa [#allocation21], 0 }
  0x45   :  { %90 = vsyncpa [#allocation24], 0 }
  0x46   :  { %91 = vsyncpa [#allocation27], 0 }
  0x47   :  { %92 = vsyncpa [#allocation30], 0 }
  0x48   :  { %93 = vsyncpa [#allocation33], 0 }
  0x49   :  { %94 = vsyncpa [#allocation36], 0 }
  0x4a   :  { %95 = vsyncpa [#allocation39], 0 }
  0x4b   :  { %96 = vsyncpa [#allocation4], 0 }
  0x4c   :  { %97 = vsyncpa [#allocation42], 0  ;;  %s13015_s0 = smov [#allocation5]   ;;  %s12375_s16 = scalar_lea.hbm %s13095_s29, 32 }
  0x4d   :  { %s125_s15 = sshll.u32 %s13015_s0, 4  ;;  %p12376_p0 = scmp.ne.s32.totalorder %s13095_s29, %s12375_s16  ;;  %s126_s15 = int_to_ptr.vmem [resolvable:$true] %s125_s15 }
  0x4e   :  { %p12379_p1 = scmp.lt.u32.totalorder %s12375_s16, %s13095_s29 }
  0x50   :  { %p12381_p2 = pnand %p12379_p1, %p12376_p0 }
  0x52   :  { %12384 = shalt.err (!%p12381_p2)
}
  0x53   :  { %s12385_s18 = scalar_lea.vmem %s126_s15, 32  ;;  %p12390_p4 = scmp.lt.s32.totalorder %s126_s15, %s126_s15 }
  0x54   :  { %p12386_p3 = scmp.ne.s32.totalorder %s126_s15, %s12385_s18  ;;  %p12391_p5 = scmp.lt.s32.totalorder %s12385_s18, %s12385_s18 }
  0x56   :  { %p12392_p6 = por %p12391_p5, %p12390_p4 }
  0x58   :  { %p12393_p7 = pnand %p12392_p6, %p12386_p3 }
  0x5a   :  { %12396 = shalt.err (!%p12393_p7)
}
  0x5b   :  { %s13016_s22 = smov 16   ;;  %s13017_s23 = smov 1  }
  0x5c   :  { %131 = dma.hbm_to_vmem [thread:$0]  %s13095_s29, 32, %s126_s15, [#allocation6], %s13016_s22, %s13016_s22, %s13017_s23  }
  0x5d   :  { %s13018_s26 = smov [#allocation8]   ;;  %s13019_s1 = smov [#allocation11]  }
  0x5e   :  { %s153_s28 = sshll.u32 %s13018_s26, 4  ;;  %s179_s2 = sshll.u32 %s13019_s1, 4  ;;  %s154_s28 = int_to_ptr.vmem [resolvable:$true] %s153_s28  ;;  %s180_s2 = int_to_ptr.vmem [resolvable:$true] %s179_s2 }
  0x5f   :  { %s12397_s7 = scalar_lea.hbm %s13115_s19, 32 }
  0x60   :  { %p12398_p8 = scmp.ne.s32.totalorder %s13115_s19, %s12397_s7  ;;  %p12401_p9 = scmp.lt.u32.totalorder %s12397_s7, %s13115_s19 }
  0x62   :  { %p12403_p10 = pnand %p12401_p9, %p12398_p8 }
  0x64   :  { %12406 = shalt.err (!%p12403_p10)
}
  0x65   :  { %s12407_s10 = scalar_lea.vmem %s154_s28, 32  ;;  %p12412_p12 = scmp.lt.s32.totalorder %s154_s28, %s154_s28 }
  0x66   :  { %p12408_p11 = scmp.ne.s32.totalorder %s154_s28, %s12407_s10  ;;  %p12413_p13 = scmp.lt.s32.totalorder %s12407_s10, %s12407_s10 }
  0x68   :  { %p12414_p0 = por %p12413_p13, %p12412_p12 }
  0x6a   :  { %p12415_p1 = pnand %p12414_p0, %p12408_p11 }
  0x6c   :  { %12418 = shalt.err (!%p12415_p1)
}
  0x6d   :  { %159 = dma.hbm_to_vmem [thread:$0]  %s13115_s19, 32, %s154_s28, [#allocation9], %s13016_s22, %s13016_s22, %s13017_s23  }
  0x6e   :  { %s12419_s29 = scalar_lea.hbm %s13130_s6, 32 }
  0x6f   :  { %p12420_p2 = scmp.ne.s32.totalorder %s13130_s6, %s12419_s29  ;;  %p12423_p3 = scmp.lt.u32.totalorder %s12419_s29, %s13130_s6 }
  0x71   :  { %p12425_p4 = pnand %p12423_p3, %p12420_p2 }
  0x73   :  { %12428 = shalt.err (!%p12425_p4)
}
  0x74   :  { %s12429_s11 = scalar_lea.vmem %s180_s2, 32  ;;  %p12434_p6 = scmp.lt.s32.totalorder %s180_s2, %s180_s2 }
  0x75   :  { %p12430_p5 = scmp.ne.s32.totalorder %s180_s2, %s12429_s11  ;;  %p12435_p7 = scmp.lt.s32.totalorder %s12429_s11, %s12429_s11 }
  0x77   :  { %p12436_p8 = por %p12435_p7, %p12434_p6 }
  0x79   :  { %p12437_p9 = pnand %p12436_p8, %p12430_p5 }
  0x7b   :  { %12440 = shalt.err (!%p12437_p9)
}
  0x7c   :  { %185 = dma.hbm_to_vmem [thread:$0]  %s13130_s6, 32, %s180_s2, [#allocation12], %s13016_s22, %s13016_s22, %s13017_s23  }
  0x7d   :  { %s13020_s19 = smov [#allocation14]   ;;  %s13021_s15 = smov [#allocation17]  }
  0x7e   :  { %s203_s0 = sshll.u32 %s13020_s19, 4  ;;  %s229_s16 = sshll.u32 %s13021_s15, 4  ;;  %s204_s0 = int_to_ptr.vmem [resolvable:$true] %s203_s0  ;;  %s230_s16 = int_to_ptr.vmem [resolvable:$true] %s229_s16 }
  0x7f   :  { %s12441_s18 = scalar_lea.hbm %s13140_s20, 32 }
  0x80   :  { %p12442_p10 = scmp.ne.s32.totalorder %s13140_s20, %s12441_s18  ;;  %p12445_p11 = scmp.lt.u32.totalorder %s12441_s18, %s13140_s20 }
  0x82   :  { %p12447_p12 = pnand %p12445_p11, %p12442_p10 }
  0x84   :  { %12450 = shalt.err (!%p12447_p12)
}
  0x85   :  { %s12451_s26 = scalar_lea.vmem %s204_s0, 32  ;;  %p12456_p0 = scmp.lt.s32.totalorder %s204_s0, %s204_s0 }
  0x86   :  { %p12452_p13 = scmp.ne.s32.totalorder %s204_s0, %s12451_s26  ;;  %p12457_p1 = scmp.lt.s32.totalorder %s12451_s26, %s12451_s26 }
  0x88   :  { %p12458_p2 = por %p12457_p1, %p12456_p0 }
  0x8a   :  { %p12459_p3 = pnand %p12458_p2, %p12452_p13 }
  0x8c   :  { %12462 = shalt.err (!%p12459_p3)
}
  0x8d   :  { %209 = dma.hbm_to_vmem [thread:$0]  %s13140_s20, 32, %s204_s0, [#allocation15], %s13016_s22, %s13016_s22, %s13017_s23  }
  0x8e   :  { %s12463_s6 = scalar_lea.hbm %s13155_s21, 32 }
  0x8f   :  { %p12464_p4 = scmp.ne.s32.totalorder %s13155_s21, %s12463_s6  ;;  %p12467_p5 = scmp.lt.u32.totalorder %s12463_s6, %s13155_s21 }
  0x91   :  { %p12469_p6 = pnand %p12467_p5, %p12464_p4 }
  0x93   :  { %12472 = shalt.err (!%p12469_p6)
}
  0x94   :  { %s12473_s28 = scalar_lea.vmem %s230_s16, 32  ;;  %p12478_p8 = scmp.lt.s32.totalorder %s230_s16, %s230_s16 }
  0x95   :  { %p12474_p7 = scmp.ne.s32.totalorder %s230_s16, %s12473_s28  ;;  %p12479_p9 = scmp.lt.s32.totalorder %s12473_s28, %s12473_s28 }
  0x97   :  { %p12480_p10 = por %p12479_p9, %p12478_p8 }
  0x99   :  { %p12481_p11 = pnand %p12480_p10, %p12474_p7 }
  0x9b   :  { %12484 = shalt.err (!%p12481_p11)
}
  0x9c   :  { %235 = dma.hbm_to_vmem [thread:$0]  %s13155_s21, 32, %s230_s16, [#allocation18], %s13016_s22, %s13016_s22, %s13017_s23  }
  0x9d   :  { %s13022_s20 = smov [#allocation20]   ;;  %s13023_s2 = smov [#allocation23]  }
  0x9e   :  { %s257_s1 = sshll.u32 %s13022_s20, 4  ;;  %s281_s7 = sshll.u32 %s13023_s2, 4  ;;  %s258_s1 = int_to_ptr.vmem [resolvable:$true] %s257_s1  ;;  %s282_s7 = int_to_ptr.vmem [resolvable:$true] %s281_s7 }
  0x9f   :  { %s12485_s10 = scalar_lea.hbm %s13175_s14, 32 }
  0xa0   :  { %p12486_p12 = scmp.ne.s32.totalorder %s13175_s14, %s12485_s10  ;;  %p12489_p13 = scmp.lt.u32.totalorder %s12485_s10, %s13175_s14 }
  0xa2   :  { %p12491_p0 = pnand %p12489_p13, %p12486_p12 }
  0xa4   :  { %12494 = shalt.err (!%p12491_p0)
}
  0xa5   :  { %s12495_s29 = scalar_lea.vmem %s258_s1, 32  ;;  %p12500_p2 = scmp.lt.s32.totalorder %s258_s1, %s258_s1 }
  0xa6   :  { %p12496_p1 = scmp.ne.s32.totalorder %s258_s1, %s12495_s29  ;;  %p12501_p3 = scmp.lt.s32.totalorder %s12495_s29, %s12495_s29 }
  0xa8   :  { %p12502_p4 = por %p12501_p3, %p12500_p2 }
  0xaa   :  { %p12503_p5 = pnand %p12502_p4, %p12496_p1 }
  0xac   :  { %12506 = shalt.err (!%p12503_p5)
}
  0xad   :  { %263 = dma.hbm_to_vmem [thread:$0]  %s13175_s14, 32, %s258_s1, [#allocation21], %s13016_s22, %s13016_s22, %s13017_s23  }
  0xae   :  { %s12507_s21 = scalar_lea.hbm %s13185_s3, 32 }
  0xaf   :  { %p12508_p6 = scmp.ne.s32.totalorder %s13185_s3, %s12507_s21  ;;  %p12511_p7 = scmp.lt.u32.totalorder %s12507_s21, %s13185_s3 }
  0xb1   :  { %p12513_p8 = pnand %p12511_p7, %p12508_p6 }
  0xb3   :  { %12516 = shalt.err (!%p12513_p8)
}
  0xb4   :  { %s12517_s11 = scalar_lea.vmem %s282_s7, 32  ;;  %p12522_p10 = scmp.lt.s32.totalorder %s282_s7, %s282_s7 }
  0xb5   :  { %p12518_p9 = scmp.ne.s32.totalorder %s282_s7, %s12517_s11  ;;  %p12523_p11 = scmp.lt.s32.totalorder %s12517_s11, %s12517_s11 }
  0xb7   :  { %p12524_p12 = por %p12523_p11, %p12522_p10 }
  0xb9   :  { %p12525_p13 = pnand %p12524_p12, %p12518_p9 }
  0xbb   :  { %12528 = shalt.err (!%p12525_p13)
}
  0xbc   :  { %287 = dma.hbm_to_vmem [thread:$0]  %s13185_s3, 32, %s282_s7, [#allocation24], %s13016_s22, %s13016_s22, %s13017_s23  }
  0xbd   :  { %s13024_s14 = smov [#allocation26]   ;;  %s13025_s0 = smov [#allocation29]  }
  0xbe   :  { %s305_s19 = sshll.u32 %s13024_s14, 4  ;;  %s333_s15 = sshll.u32 %s13025_s0, 4  ;;  %s306_s19 = int_to_ptr.vmem [resolvable:$true] %s305_s19  ;;  %s334_s15 = int_to_ptr.vmem [resolvable:$true] %s333_s15 }
  0xbf   :  { %s12529_s16 = scalar_lea.hbm %s13195_s13, 32 }
  0xc0   :  { %p12530_p0 = scmp.ne.s32.totalorder %s13195_s13, %s12529_s16  ;;  %p12533_p1 = scmp.lt.u32.totalorder %s12529_s16, %s13195_s13 }
  0xc2   :  { %p12535_p2 = pnand %p12533_p1, %p12530_p0 }
  0xc4   :  { %12538 = shalt.err (!%p12535_p2)
}
  0xc5   :  { %s12539_s18 = scalar_lea.vmem %s306_s19, 32  ;;  %p12544_p4 = scmp.lt.s32.totalorder %s306_s19, %s306_s19 }
  0xc6   :  { %p12540_p3 = scmp.ne.s32.totalorder %s306_s19, %s12539_s18  ;;  %p12545_p5 = scmp.lt.s32.totalorder %s12539_s18, %s12539_s18 }
  0xc8   :  { %p12546_p6 = por %p12545_p5, %p12544_p4 }
  0xca   :  { %p12547_p7 = pnand %p12546_p6, %p12540_p3 }
  0xcc   :  { %12550 = shalt.err (!%p12547_p7)
}
  0xcd   :  { %311 = dma.hbm_to_vmem [thread:$0]  %s13195_s13, 32, %s306_s19, [#allocation27], %s13016_s22, %s13016_s22, %s13017_s23  }
  0xce   :  { %s12551_s3 = scalar_lea.hbm %s13215_s17, 32 }
  0xcf   :  { %p12552_p8 = scmp.ne.s32.totalorder %s13215_s17, %s12551_s3  ;;  %p12555_p9 = scmp.lt.u32.totalorder %s12551_s3, %s13215_s17 }
  0xd1   :  { %p12557_p10 = pnand %p12555_p9, %p12552_p8 }
  0xd3   :  { %12560 = shalt.err (!%p12557_p10)
}
  0xd4   :  { %s12561_s26 = scalar_lea.vmem %s334_s15, 32  ;;  %p12566_p12 = scmp.lt.s32.totalorder %s334_s15, %s334_s15 }
  0xd5   :  { %p12562_p11 = scmp.ne.s32.totalorder %s334_s15, %s12561_s26  ;;  %p12567_p13 = scmp.lt.s32.totalorder %s12561_s26, %s12561_s26 }
  0xd7   :  { %p12568_p0 = por %p12567_p13, %p12566_p12 }
  0xd9   :  { %p12569_p1 = pnand %p12568_p0, %p12562_p11 }
  0xdb   :  { %12572 = shalt.err (!%p12569_p1)
}
  0xdc   :  { %339 = dma.hbm_to_vmem [thread:$0]  %s13215_s17, 32, %s334_s15, [#allocation30], %s13016_s22, %s13016_s22, %s13017_s23  }
  0xdd   :  { %s13026_s13 = smov [#allocation32]   ;;  %s13027_s28 = smov [#allocation35]  }
  0xde   :  { %s357_s6 = sshll.u32 %s13026_s13, 4  ;;  %s381_s20 = sshll.u32 %s13027_s28, 4  ;;  %s358_s6 = int_to_ptr.vmem [resolvable:$true] %s357_s6  ;;  %s382_s20 = int_to_ptr.vmem [resolvable:$true] %s381_s20 }
  0xdf   :  { %s12573_s1 = scalar_lea.hbm %s13225_s25, 32 }
  0xe0   :  { %p12574_p2 = scmp.ne.s32.totalorder %s13225_s25, %s12573_s1  ;;  %p12577_p3 = scmp.lt.u32.totalorder %s12573_s1, %s13225_s25 }
  0xe2   :  { %p12579_p4 = pnand %p12577_p3, %p12574_p2 }
  0xe4   :  { %12582 = shalt.err (!%p12579_p4)
}
  0xe5   :  { %s12583_s2 = scalar_lea.vmem %s358_s6, 32  ;;  %p12588_p6 = scmp.lt.s32.totalorder %s358_s6, %s358_s6 }
  0xe6   :  { %p12584_p5 = scmp.ne.s32.totalorder %s358_s6, %s12583_s2  ;;  %p12589_p7 = scmp.lt.s32.totalorder %s12583_s2, %s12583_s2 }
  0xe8   :  { %p12590_p8 = por %p12589_p7, %p12588_p6 }
  0xea   :  { %p12591_p9 = pnand %p12590_p8, %p12584_p5 }
  0xec   :  { %12594 = shalt.err (!%p12591_p9)
}
  0xed   :  { %363 = dma.hbm_to_vmem [thread:$0]  %s13225_s25, 32, %s358_s6, [#allocation33], %s13016_s22, %s13016_s22, %s13017_s23  }
  0xee   :  { %s12595_s17 = scalar_lea.hbm %s13235_s24, 32 }
  0xef   :  { %p12596_p10 = scmp.ne.s32.totalorder %s13235_s24, %s12595_s17  ;;  %p12599_p11 = scmp.lt.u32.totalorder %s12595_s17, %s13235_s24 }
  0xf1   :  { %p12601_p12 = pnand %p12599_p11, %p12596_p10 }
  0xf3   :  { %12604 = shalt.err (!%p12601_p12)
}
  0xf4   :  { %s12605_s7 = scalar_lea.vmem %s382_s20, 32  ;;  %p12610_p0 = scmp.lt.s32.totalorder %s382_s20, %s382_s20 }
  0xf5   :  { %p12606_p13 = scmp.ne.s32.totalorder %s382_s20, %s12605_s7  ;;  %p12611_p1 = scmp.lt.s32.totalorder %s12605_s7, %s12605_s7 }
  0xf7   :  { %p12612_p2 = por %p12611_p1, %p12610_p0 }
  0xf9   :  { %p12613_p3 = pnand %p12612_p2, %p12606_p13 }
  0xfb   :  { %12616 = shalt.err (!%p12613_p3)
}
  0xfc   :  { %387 = dma.hbm_to_vmem [thread:$0]  %s13235_s24, 32, %s382_s20, [#allocation36], %s13016_s22, %s13016_s22, %s13017_s23  }
  0xfd   :  { %s13028_s25 = smov [#allocation2]   ;;  %s12617_s29 = scalar_lea.hbm %s13070_s9, 256 }
  0xfe   :  { %s105_s10 = sshll.u32 %s13028_s25, 4  ;;  %p12618_p4 = scmp.ne.s32.totalorder %s13070_s9, %s12617_s29  ;;  %s106_s10 = int_to_ptr.vmem [resolvable:$true] %s105_s10 }
  0xff   :  { %p12621_p5 = scmp.lt.u32.totalorder %s12617_s29, %s13070_s9 }
 0x101   :  { %p12623_p6 = pnand %p12621_p5, %p12618_p4 }
 0x103   :  { %12626 = shalt.err (!%p12623_p6)
}
 0x104   :  { %s12627_s21 = scalar_lea.vmem %s106_s10, 256  ;;  %p12632_p8 = scmp.lt.s32.totalorder %s106_s10, %s106_s10 }
 0x105   :  { %p12628_p7 = scmp.ne.s32.totalorder %s106_s10, %s12627_s21  ;;  %p12633_p9 = scmp.lt.s32.totalorder %s12627_s21, %s12627_s21 }
 0x107   :  { %p12634_p10 = por %p12633_p9, %p12632_p8 }
 0x109   :  { %p12635_p11 = pnand %p12634_p10, %p12628_p7 }
 0x10b   :  { %12638 = shalt.err (!%p12635_p11)
}
 0x10c   :  { %s13029_s11 = smov 128   ;;  %s13030_s24 = smov 8  }
 0x10d   :  { %111 = dma.hbm_to_vmem [thread:$0]  %s13070_s9, 256, %s106_s10, [#allocation3], %s13029_s11, %s13029_s11, %s13030_s24  }
 0x10e   :  { %s13031_s14 = smov [#allocation7]   ;;  %s13032_s0 = smov [#allocation10]  }
 0x10f   :  { %s139_s19 = sshll.u32 %s13031_s14, 4  ;;  %s167_s15 = sshll.u32 %s13032_s0, 4  ;;  %s140_s19 = int_to_ptr.vmem [resolvable:$true] %s139_s19  ;;  %s13341_s15 = int_to_ptr.vmem [resolvable:$true] %s167_s15 }
 0x110   :  { %s12639_s16 = scalar_lea.hbm %s13105_s8, 32 }
 0x111   :  { %p12640_p12 = scmp.ne.s32.totalorder %s13105_s8, %s12639_s16  ;;  %p12643_p13 = scmp.lt.u32.totalorder %s12639_s16, %s13105_s8 }
 0x113   :  { %p12645_p0 = pnand %p12643_p13, %p12640_p12 }
 0x115   :  { %12648 = shalt.err (!%p12645_p0)
}
 0x116   :  { %s12649_s18 = scalar_lea.vmem %s140_s19, 32  ;;  %p12654_p2 = scmp.lt.s32.totalorder %s140_s19, %s140_s19 }
 0x117   :  { %p12650_p1 = scmp.ne.s32.totalorder %s140_s19, %s12649_s18  ;;  %p12655_p3 = scmp.lt.s32.totalorder %s12649_s18, %s12649_s18 }
 0x119   :  { %p12656_p4 = por %p12655_p3, %p12654_p2 }
 0x11b   :  { %p12657_p5 = pnand %p12656_p4, %p12650_p1 }
 0x11d   :  { %12660 = shalt.err (!%p12657_p5)
}
 0x11e   :  { %145 = dma.hbm_to_vmem [thread:$0]  %s13105_s8, 32, %s140_s19, [#allocation6], %s13016_s22, %s13016_s22, %s13017_s23  }
 0x11f   :  { %s12661_s9 = scalar_lea.hbm %s13125_s30, 32 }
 0x120   :  { %p12662_p6 = scmp.ne.s32.totalorder %s13125_s30, %s12661_s9  ;;  %p12665_p7 = scmp.lt.u32.totalorder %s12661_s9, %s13125_s30 }
 0x122   :  { %p12667_p8 = pnand %p12665_p7, %p12662_p6 }
 0x124   :  { %12670 = shalt.err (!%p12667_p8)
}
 0x125   :  { %s12671_s3 = scalar_lea.vmem %s13341_s15, 32  ;;  %p12676_p10 = scmp.lt.s32.totalorder %s13341_s15, %s13341_s15 }
 0x126   :  { %p12672_p9 = scmp.ne.s32.totalorder %s13341_s15, %s12671_s3  ;;  %p12677_p11 = scmp.lt.s32.totalorder %s12671_s3, %s12671_s3 }
 0x128   :  { %p12678_p12 = por %p12677_p11, %p12676_p10 }
 0x12a   :  { %p12679_p13 = pnand %p12678_p12, %p12672_p9 }
 0x12c   :  { %12682 = shalt.err (!%p12679_p13)
}
 0x12d   :  { %s14996_s8 = sld [smem:[#allocation66_spill]]  ;;  %s13033_s26 = smov [#allocation13]  }
 0x12e   :  { %173 = dma.hbm_to_vmem [thread:$0]  %s13125_s30, 32, %s13341_s15, [#allocation9], %s13016_s22, %s13016_s22, %s13017_s23  }
 0x12f   :  { %s191_s13 = sshll.u32 %s13033_s26, 4  ;;  %s13034_s6 = smov [#allocation16]   ;;  %s192_s13 = int_to_ptr.vmem [resolvable:$true] %s191_s13 }
 0x130   :  { %s215_s28 = sshll.u32 %s13034_s6, 4  ;;  %s13362_s28 = int_to_ptr.vmem [resolvable:$true] %s215_s28 }
 0x133   :  { %s12683_s20 = scalar_lea.hbm %s14996_s8, 32 }
 0x134   :  { %p12684_p0 = scmp.ne.s32.totalorder %s14996_s8, %s12683_s20  ;;  %p12687_p1 = scmp.lt.u32.totalorder %s12683_s20, %s14996_s8 }
 0x136   :  { %p12689_p2 = pnand %p12687_p1, %p12684_p0 }
 0x138   :  { %12692 = shalt.err (!%p12689_p2)
}
 0x139   :  { %s12693_s1 = scalar_lea.vmem %s192_s13, 32  ;;  %p12698_p4 = scmp.lt.s32.totalorder %s192_s13, %s192_s13 }
 0x13a   :  { %p12694_p3 = scmp.ne.s32.totalorder %s192_s13, %s12693_s1  ;;  %p12699_p5 = scmp.lt.s32.totalorder %s12693_s1, %s12693_s1 }
 0x13c   :  { %p12700_p6 = por %p12699_p5, %p12698_p4 }
 0x13e   :  { %p12701_p7 = pnand %p12700_p6, %p12694_p3 }
 0x140   :  { %12704 = shalt.err (!%p12701_p7)
}
 0x141   :  { %s14997_s30 = sld [smem:[#allocation67_spill]] }
 0x142   :  { %197 = dma.hbm_to_vmem [thread:$0]  %s14996_s8, 32, %s192_s13, [#allocation12], %s13016_s22, %s13016_s22, %s13017_s23  }
 0x147   :  { %s12705_s2 = scalar_lea.hbm %s14997_s30, 32 }
 0x148   :  { %p12706_p8 = scmp.ne.s32.totalorder %s14997_s30, %s12705_s2  ;;  %p12709_p9 = scmp.lt.u32.totalorder %s12705_s2, %s14997_s30 }
 0x14a   :  { %p12711_p10 = pnand %p12709_p9, %p12706_p8 }
 0x14c   :  { %12714 = shalt.err (!%p12711_p10)
}
 0x14d   :  { %s12715_s17 = scalar_lea.vmem %s13362_s28, 32  ;;  %p12720_p12 = scmp.lt.s32.totalorder %s13362_s28, %s13362_s28 }
 0x14e   :  { %p12716_p11 = scmp.ne.s32.totalorder %s13362_s28, %s12715_s17  ;;  %p12721_p13 = scmp.lt.s32.totalorder %s12715_s17, %s12715_s17 }
 0x150   :  { %p12722_p0 = por %p12721_p13, %p12720_p12 }
 0x152   :  { %p12723_p1 = pnand %p12722_p0, %p12716_p11 }
 0x154   :  { %12726 = shalt.err (!%p12723_p1)
}
 0x155   :  { %s14998_s7 = sld [smem:[#allocation70_spill]]  ;;  %s13035_s25 = smov [#allocation19]  }
 0x156   :  { %221 = dma.hbm_to_vmem [thread:$0]  %s14997_s30, 32, %s13362_s28, [#allocation15], %s13016_s22, %s13016_s22, %s13017_s23  }
 0x157   :  { %s243_s10 = sshll.u32 %s13035_s25, 4  ;;  %s13036_s29 = smov [#allocation22]   ;;  %s244_s10 = int_to_ptr.vmem [resolvable:$true] %s243_s10 }
 0x158   :  { %s269_s21 = sshll.u32 %s13036_s29, 4  ;;  %s13383_s21 = int_to_ptr.vmem [resolvable:$true] %s269_s21 }
 0x15b   :  { %s12727_s14 = scalar_lea.hbm %s14998_s7, 32 }
 0x15c   :  { %p12728_p2 = scmp.ne.s32.totalorder %s14998_s7, %s12727_s14  ;;  %p12731_p3 = scmp.lt.u32.totalorder %s12727_s14, %s14998_s7 }
 0x15e   :  { %p12733_p4 = pnand %p12731_p3, %p12728_p2 }
 0x160   :  { %12736 = shalt.err (!%p12733_p4)
}
 0x161   :  { %s12737_s19 = scalar_lea.vmem %s244_s10, 32  ;;  %p12742_p6 = scmp.lt.s32.totalorder %s244_s10, %s244_s10 }
 0x162   :  { %p12738_p5 = scmp.ne.s32.totalorder %s244_s10, %s12737_s19  ;;  %p12743_p7 = scmp.lt.s32.totalorder %s12737_s19, %s12737_s19 }
 0x164   :  { %p12744_p8 = por %p12743_p7, %p12742_p6 }
 0x166   :  { %p12745_p9 = pnand %p12744_p8, %p12738_p5 }
 0x168   :  { %12748 = shalt.err (!%p12745_p9)
}
 0x169   :  { %s14999_s0 = sld [smem:[#allocation72_spill]] }
 0x16a   :  { %249 = dma.hbm_to_vmem [thread:$0]  %s14998_s7, 32, %s244_s10, [#allocation18], %s13016_s22, %s13016_s22, %s13017_s23  }
 0x16f   :  { %s12749_s15 = scalar_lea.hbm %s14999_s0, 1024 }
 0x170   :  { %p12750_p10 = scmp.ne.s32.totalorder %s14999_s0, %s12749_s15  ;;  %p12753_p11 = scmp.lt.u32.totalorder %s12749_s15, %s14999_s0 }
 0x172   :  { %p12755_p12 = pnand %p12753_p11, %p12750_p10 }
 0x174   :  { %12758 = shalt.err (!%p12755_p12)
}
 0x175   :  { %s12759_s16 = scalar_lea.vmem %s13383_s21, 1024  ;;  %p12764_p0 = scmp.lt.s32.totalorder %s13383_s21, %s13383_s21 }
 0x176   :  { %p12760_p13 = scmp.ne.s32.totalorder %s13383_s21, %s12759_s16  ;;  %p12765_p1 = scmp.lt.s32.totalorder %s12759_s16, %s12759_s16 }
 0x178   :  { %p12766_p2 = por %p12765_p1, %p12764_p0 }
 0x17a   :  { %p12767_p3 = pnand %p12766_p2, %p12760_p13 }
 0x17c   :  { %12770 = shalt.err (!%p12767_p3)
}
 0x17d   :  { %s15000_s18 = sld [smem:[#allocation73_spill]]  ;;  %s13037_s9 = smov [#allocation25]  }
 0x17e   :  { %275 = dma.hbm_to_vmem [thread:$0]  %s14999_s0, 1024, %s13383_s21, [#allocation21], %s13029_s11, %s13029_s11, %s13030_s24  }
 0x17f   :  { %s293_s3 = sshll.u32 %s13037_s9, 4  ;;  %s13038_s8 = smov [#allocation28]   ;;  %s294_s3 = int_to_ptr.vmem [resolvable:$true] %s293_s3 }
 0x180   :  { %s319_s26 = sshll.u32 %s13038_s8, 4  ;;  %s13404_s26 = int_to_ptr.vmem [resolvable:$true] %s319_s26 }
 0x183   :  { %s12771_s13 = scalar_lea.hbm %s15000_s18, 1024 }
 0x184   :  { %p12772_p4 = scmp.ne.s32.totalorder %s15000_s18, %s12771_s13  ;;  %p12775_p5 = scmp.lt.u32.totalorder %s12771_s13, %s15000_s18 }
 0x186   :  { %p12777_p6 = pnand %p12775_p5, %p12772_p4 }
 0x188   :  { %12780 = shalt.err (!%p12777_p6)
}
 0x189   :  { %s12781_s6 = scalar_lea.vmem %s294_s3, 1024  ;;  %p12786_p8 = scmp.lt.s32.totalorder %s294_s3, %s294_s3 }
 0x18a   :  { %p12782_p7 = scmp.ne.s32.totalorder %s294_s3, %s12781_s6  ;;  %p12787_p9 = scmp.lt.s32.totalorder %s12781_s6, %s12781_s6 }
 0x18c   :  { %p12788_p10 = por %p12787_p9, %p12786_p8 }
 0x18e   :  { %p12789_p11 = pnand %p12788_p10, %p12782_p7 }
 0x190   :  { %12792 = shalt.err (!%p12789_p11)
}
 0x191   :  { %s15001_s28 = sld [smem:[#allocation75_spill]] }
 0x192   :  { %299 = dma.hbm_to_vmem [thread:$0]  %s15000_s18, 1024, %s294_s3, [#allocation24], %s13029_s11, %s13029_s11, %s13030_s24  }
 0x197   :  { %s12793_s20 = scalar_lea.hbm %s15001_s28, 32 }
 0x198   :  { %p12794_p12 = scmp.ne.s32.totalorder %s15001_s28, %s12793_s20  ;;  %p12797_p13 = scmp.lt.u32.totalorder %s12793_s20, %s15001_s28 }
 0x19a   :  { %p12799_p0 = pnand %p12797_p13, %p12794_p12 }
 0x19c   :  { %12802 = shalt.err (!%p12799_p0)
}
 0x19d   :  { %s12803_s1 = scalar_lea.vmem %s13404_s26, 32  ;;  %p12808_p2 = scmp.lt.s32.totalorder %s13404_s26, %s13404_s26 }
 0x19e   :  { %p12804_p1 = scmp.ne.s32.totalorder %s13404_s26, %s12803_s1  ;;  %p12809_p3 = scmp.lt.s32.totalorder %s12803_s1, %s12803_s1 }
 0x1a0   :  { %p12810_p4 = por %p12809_p3, %p12808_p2 }
 0x1a2   :  { %p12811_p5 = pnand %p12810_p4, %p12804_p1 }
 0x1a4   :  { %12814 = shalt.err (!%p12811_p5)
}
 0x1a5   :  { %s15002_s30 = sld [smem:[#allocation77_spill]]  ;;  %s13039_s2 = smov [#allocation31]  }
 0x1a6   :  { %325 = dma.hbm_to_vmem [thread:$0]  %s15001_s28, 32, %s13404_s26, [#allocation27], %s13016_s22, %s13016_s22, %s13017_s23  }
 0x1a7   :  { %s345_s17 = sshll.u32 %s13039_s2, 4  ;;  %s13040_s7 = smov [#allocation34]   ;;  %s346_s17 = int_to_ptr.vmem [resolvable:$true] %s345_s17 }
 0x1a8   :  { %s369_s25 = sshll.u32 %s13040_s7, 4  ;;  %s13425_s25 = int_to_ptr.vmem [resolvable:$true] %s369_s25 }
 0x1ab   :  { %s12815_s10 = scalar_lea.hbm %s15002_s30, 32 }
 0x1ac   :  { %p12816_p6 = scmp.ne.s32.totalorder %s15002_s30, %s12815_s10  ;;  %p12819_p7 = scmp.lt.u32.totalorder %s12815_s10, %s15002_s30 }
 0x1ae   :  { %p12821_p8 = pnand %p12819_p7, %p12816_p6 }
 0x1b0   :  { %12824 = shalt.err (!%p12821_p8)
}
 0x1b1   :  { %s12825_s29 = scalar_lea.vmem %s346_s17, 32  ;;  %p12830_p10 = scmp.lt.s32.totalorder %s346_s17, %s346_s17 }
 0x1b2   :  { %p12826_p9 = scmp.ne.s32.totalorder %s346_s17, %s12825_s29  ;;  %p12831_p11 = scmp.lt.s32.totalorder %s12825_s29, %s12825_s29 }
 0x1b4   :  { %p12832_p12 = por %p12831_p11, %p12830_p10 }
 0x1b6   :  { %p12833_p13 = pnand %p12832_p12, %p12826_p9 }
 0x1b8   :  { %12836 = shalt.err (!%p12833_p13)
}
 0x1b9   :  { %s15003_s21 = sld [smem:[#allocation78_spill]] }
 0x1ba   :  { %351 = dma.hbm_to_vmem [thread:$0]  %s15002_s30, 32, %s346_s17, [#allocation30], %s13016_s22, %s13016_s22, %s13017_s23  }
 0x1bf   :  { %s12837_s14 = scalar_lea.hbm %s15003_s21, 32 }
 0x1c0   :  { %p12838_p0 = scmp.ne.s32.totalorder %s15003_s21, %s12837_s14  ;;  %p12841_p1 = scmp.lt.u32.totalorder %s12837_s14, %s15003_s21 }
 0x1c2   :  { %p12843_p2 = pnand %p12841_p1, %p12838_p0 }
 0x1c4   :  { %12846 = shalt.err (!%p12843_p2)
}
 0x1c5   :  { %s12847_s19 = scalar_lea.vmem %s13425_s25, 32  ;;  %p12852_p4 = scmp.lt.s32.totalorder %s13425_s25, %s13425_s25 }
 0x1c6   :  { %p12848_p3 = scmp.ne.s32.totalorder %s13425_s25, %s12847_s19  ;;  %p12853_p5 = scmp.lt.s32.totalorder %s12847_s19, %s12847_s19 }
 0x1c8   :  { %p12854_p6 = por %p12853_p5, %p12852_p4 }
 0x1ca   :  { %p12855_p7 = pnand %p12854_p6, %p12848_p3 }
 0x1cc   :  { %12858 = shalt.err (!%p12855_p7)
}
 0x1cd   :  { %375 = dma.hbm_to_vmem [thread:$0]  %s15003_s21, 32, %s13425_s25, [#allocation33], %s13016_s22, %s13016_s22, %s13017_s23  }
 0x1ce   :  { %s13041_s0 = smov [#allocation37]   ;;  %s13042_s16 = smov [#allocation38]  }
 0x1cf   :  { %s393_s15 = sshll.u32 %s13041_s0, 4  ;;  %s405_s18 = sshll.u32 %s13042_s16, 4  ;;  %s394_s15 = int_to_ptr.vmem [resolvable:$true] %s393_s15  ;;  %s13446_s18 = int_to_ptr.vmem [resolvable:$true] %s405_s18 }
 0x1d0   :  { %s12859_s9 = scalar_lea.hbm %s13240_s5, 32 }
 0x1d1   :  { %p12860_p8 = scmp.ne.s32.totalorder %s13240_s5, %s12859_s9  ;;  %p12863_p9 = scmp.lt.u32.totalorder %s12859_s9, %s13240_s5 }
 0x1d3   :  { %p12865_p10 = pnand %p12863_p9, %p12860_p8 }
 0x1d5   :  { %12868 = shalt.err (!%p12865_p10)
}
 0x1d6   :  { %s12869_s3 = scalar_lea.vmem %s394_s15, 32  ;;  %p12874_p12 = scmp.lt.s32.totalorder %s394_s15, %s394_s15 }
 0x1d7   :  { %p12870_p11 = scmp.ne.s32.totalorder %s394_s15, %s12869_s3  ;;  %p12875_p13 = scmp.lt.s32.totalorder %s12869_s3, %s12869_s3 }
 0x1d9   :  { %p12876_p0 = por %p12875_p13, %p12874_p12 }
 0x1db   :  { %p12877_p1 = pnand %p12876_p0, %p12870_p11 }
 0x1dd   :  { %12880 = shalt.err (!%p12877_p1)
}
 0x1de   :  { %399 = dma.hbm_to_vmem [thread:$0]  %s13240_s5, 32, %s394_s15, [#allocation36], %s13016_s22, %s13016_s22, %s13017_s23  }
 0x1df   :  { %s12881_s8 = scalar_lea.hbm %s13245_s27, 32 }
 0x1e0   :  { %p12882_p2 = scmp.ne.s32.totalorder %s13245_s27, %s12881_s8  ;;  %p12885_p3 = scmp.lt.u32.totalorder %s12881_s8, %s13245_s27 }
 0x1e2   :  { %p12887_p4 = pnand %p12885_p3, %p12882_p2 }
 0x1e4   :  { %12890 = shalt.err (!%p12887_p4)
}
 0x1e5   :  { %s12891_s26 = scalar_lea.vmem %s13446_s18, 32  ;;  %p12896_p6 = scmp.lt.s32.totalorder %s13446_s18, %s13446_s18 }
 0x1e6   :  { %p12892_p5 = scmp.ne.s32.totalorder %s13446_s18, %s12891_s26  ;;  %p12897_p7 = scmp.lt.s32.totalorder %s12891_s26, %s12891_s26 }
 0x1e8   :  { %p12898_p8 = por %p12897_p7, %p12896_p6 }
 0x1ea   :  { %p12899_p9 = pnand %p12898_p8, %p12892_p5 }
 0x1ec   :  { %12902 = shalt.err (!%p12899_p9)
}
 0x1ed   :  { %411 = dma.hbm_to_vmem [thread:$0]  %s13245_s27, 32, %s13446_s18, [#allocation39], %s13016_s22, %s13016_s22, %s13017_s23  }
 0x1ee   :  { %12947 = dma.done.wait [#allocation3], 256  }
 0x1ef   :  { %12948 = vsyncadd [#allocation3], 4294967040 }
 0x1f0   :  { %12949 = dma.done.wait [#allocation6], 64  }
 0x1f1   :  { %12950 = vsyncadd [#allocation6], 4294967232 }
 0x1f2   :  { %12951 = dma.done.wait [#allocation9], 64  }
 0x1f3   :  { %12952 = vsyncadd [#allocation9], 4294967232 }
 0x1f4   :  { %12953 = dma.done.wait [#allocation12], 64  }
 0x1f5   :  { %12954 = vsyncadd [#allocation12], 4294967232 }
 0x1f6   :  { %12955 = dma.done.wait [#allocation15], 64  }
 0x1f7   :  { %12956 = vsyncadd [#allocation15], 4294967232 }
 0x1f8   :  { %12957 = dma.done.wait [#allocation18], 64  }
 0x1f9   :  { %12958 = vsyncadd [#allocation18], 4294967232 }
 0x1fa   :  { %12959 = dma.done.wait [#allocation21], 1056  }
 0x1fb   :  { %12960 = vsyncadd [#allocation21], 4294966240 }
 0x1fc   :  { %12961 = dma.done.wait [#allocation24], 1056  }
 0x1fd   :  { %12962 = vsyncadd [#allocation24], 4294966240 }
 0x1fe   :  { %12963 = dma.done.wait [#allocation27], 64  }
 0x1ff   :  { %12964 = vsyncadd [#allocation27], 4294967232 }
 0x200   :  { %12965 = dma.done.wait [#allocation30], 64  }
 0x201   :  { %12966 = vsyncadd [#allocation30], 4294967232 }
 0x202   :  { %12967 = dma.done.wait [#allocation33], 64  }
 0x203   :  { %12968 = vsyncadd [#allocation33], 4294967232 }
 0x204   :  { %12969 = dma.done.wait [#allocation36], 64  }
 0x205   :  { %12970 = vsyncadd [#allocation36], 4294967232 }
 0x206   :  { %12971 = dma.done.wait [#allocation39], 32  }
 0x207   :  { %12972 = vsyncadd [#allocation39], 4294967264  ;;  %s15004_s5 = sld [smem:[#allocation62_spill]]  ;;  %s15005_s27 = sld [smem:[#allocation58_spill]]  ;;  %vm514_vm0 = vcmask 261120   ;;  %vm624_vm1 = vcmask 64512  }
 0x208   :  { %v9297_v10 = vld [vmem:[#allocation5] ss:$0 sm:$0xff]  ;;  %s13043_s23 = smov 96   ;;  %s15006_s13 = sld [smem:[#allocation59_spill]]  ;;  %vm13503_vm2 = vmpackc.low %vm624_vm1, %vm624_vm1  ;;  %vm1741_vm3 = vcmask 130048   ;;  %vm1746_vm4 = vcmask 195584  }
 0x209   :  { %s13044_s6 = smov 64   ;;  %s13045_s28 = smov 88   ;;  %vm2088_vm13 = vcmask 523264  }
 0x20a   :  { %s13046_s20 = smov 120   ;;  %s13047_s1 = smov 56  }
 0x20b   :  { %s13048_s30 = smov 80   ;;  %s13049_s2 = smov 112  }
 0x20c   :  { %s13050_s17 = smov 48   ;;  %s13051_s7 = smov 72  }
 0x20d   :  { %v498_v0 = vld [vmem:[%s15004_s5] sm:$0xff]  ;;  %v499_v1 = vld [vmem:[%s15004_s5 + $0x8] sm:$0xff]  ;;  %v500_v2 = vld [vmem:[%s15004_s5 + $0x10] sm:$0xff]  ;;  %s13052_s25 = smov 104   ;;  %s13053_s10 = smov 40  }
 0x20e   :  { %v10927_v3 = vpack.c.bf16 %v499_v1, %v498_v0  ;;  %v501_v4 = vld [vmem:[%s15004_s5 + $0x18] sm:$0xff]  ;;  %v484_v5 = vld [vmem:[%s15005_s27] sm:$0xff]  ;;  %v485_v7 = vld [vmem:[%s15005_s27 + $0x8] sm:$0xff]  ;;  %s15009_s29 = sld [smem:[#allocation63_spill]]  ;;  %s13054_s21 = smov 24  }
 0x20f   :  { %v10931_v6 = vpack.c.bf16 %v501_v4, %v500_v2  ;;  %10119 = vmatprep.mubr.msk.f32.mxu0 %vm514_vm0, %v484_v5  ;;  %v486_v8 = vld [vmem:[%s15005_s27 + $0x10] sm:$0xff]  ;;  %v487_v9 = vld [vmem:[%s15005_s27 + $0x18] sm:$0xff]  ;;  %v13522_v30 = vld [vmem:[%s15006_s13] sm:$0xff]  ;;  %s15010_s14 = sld [smem:[#allocation64_spill]]  ;;  %s15011_s19 = sld [smem:[#allocation65_spill]] }
 0x210   :  { %10928 = vmatprep.subr.bf16.mxu0 %v10927_v3  ;;  %v13525_v32 = vld [vmem:[%s15006_s13 + $0x8] sm:$0xff]  ;;  %v13529_v35 = vld [vmem:[%s15006_s13 + $0x10] sm:$0xff]  ;;  %v13534_v39 = vld [vmem:[%s15006_s13 + $0x18] sm:$0xff]  ;;  %s15012_s0 = sld [smem:[#allocation68_spill]]  ;;  %s15014_s16 = sld [smem:[#allocation69_spill]] }
 0x211   :  { %10930 = vmatpush3.bf16.msra.mxu0 %v10927_v3  ;;  %s15013_s15 = sld [smem:[#allocation60_spill]]  ;;  %s15015_s18 = sld [smem:[#allocation71_spill]] }
 0x212   :  { %10932 = vmatprep.subr.bf16.mxu0 %v10931_v6  ;;  %s15016_s9 = sld [smem:[#allocation61_spill]]  ;;  %s15017_s3 = sld [smem:[#allocation74_spill]] }
 0x213   :  { %s15018_s8 = sld [smem:[#allocation76_spill]] }
 0x215   :  { %10934 = vmatpush3.bf16.msra.mxu0 %v10931_v6 }
 0x218   :  { %10120 = vmatmul.mubr.msk.f32.vlgmr.msra.gmra.mrb[0].mxu0 %vm514_vm0, %v485_v7 }
 0x219   :  { %10122 = vmatprep.mubr.msk.f32.mxu0 %vm514_vm0, %v486_v8 }
 0x21c   :  { %10123 = vmatmul.mubr.msk.f32.gmra.mrb[2].mxu0 %vm514_vm0, %v487_v9 }
 0x2eb   :  { %v10121_v11 = vpop.f32.mrb[0].mxu0 }
 0x2ec   :  { %v13479_v12 = vadd.f32 %v10121_v11, %v9297_v10  ;;  %v593_v13 = vpop.f32.mrb[1].mxu0 }
 0x2ed   :  { %v13481_v14 = vadd.f32 %v9297_v10, %v593_v13 }
 0x2ef   :  { %10133 = vmatprep.mubr.msk.f32.mxu1 %vm624_vm1, %v13481_v14  ;;  %v13487_v15 = vpack.i.bf16 %v13479_v12, %v13481_v14  ;;  %v10124_v16 = vpop.f32.mrb[2].mxu0 }
 0x2f0   :  { %v13489_v17 = vadd.f32 %v10124_v16, %v9297_v10  ;;  %v603_v18 = vpop.f32.mrb[3].mxu0 }
 0x2f1   :  { %11616 = vrot.lane.b32.xlu0 %v13487_v15, %s13043_s23  ;;  %v13493_v19 = vadd.f32 %v9297_v10, %v603_v18 }
 0x2f3   :  { %v13497_v20 = vpack.i.bf16 %v13489_v17, %v13493_v19 }
 0x2f5   :  { %11621 = vrot.lane.b32.xlu0 %v13497_v20, %s13043_s23 }
 0x363   :  { %v11617_v21 = vpop.permute.xlu0 %11616 }
 0x364   :  { %v11619_v22 = vunpack.i.h.bf16 %v11617_v21  ;;  %v11618_v23 = vunpack.i.l.bf16 %v11617_v21 }
 0x366   :  { %v10935_v25 = vpack.c.bf16 %v11619_v22, %v11618_v23 }
 0x367   :  { %v11622_v26 = vpop.permute.xlu0 %11621 }
 0x368   :  { %10937 = vmatprep.subr.msk.bf16.mxu1 %vm13503_vm2, %v10935_v25  ;;  %v11624_v27 = vunpack.i.h.bf16 %v11622_v26  ;;  %v11623_v28 = vunpack.i.l.bf16 %v11622_v26 }
 0x369   :  { %10940 = vmatpush3.bf16.xpose.msk.msra.mxu1 %vm13503_vm2, %v10935_v25 }
 0x36a   :  { %v10941_v29 = vpack.c.bf16 %v11624_v27, %v11623_v28 }
 0x36c   :  { %10943 = vmatprep.subr.msk.bf16.mxu1 %vm13503_vm2, %v10941_v29 }
 0x371   :  { %10946 = vmatpush3.bf16.xpose.msk.msra.mxu1 %vm13503_vm2, %v10941_v29 }
 0x378   :  { %10134 = vmatmul.mubr.msk.f32.vlgmr.msra.gmra.mrb[0].mxu1 %vm624_vm1, %v13479_v12 }
 0x379   :  { %10136 = vmatprep.mubr.msk.f32.mxu1 %vm624_vm1, %v13493_v19 }
 0x37c   :  { %10137 = vmatmul.mubr.msk.f32.gmra.mrb[2].mxu1 %vm624_vm1, %v13489_v17 }
 0x44b   :  { %v10135_v31 = vpop.f32.mrb[0].mxu1 }
 0x44c   :  { %v707_v33 = vpop.f32.mrb[1].mxu1  ;;  %v713_v36 = vadd.f32 %v10135_v31, %v13525_v32 }
 0x44d   :  { %v708_v34 = vadd.f32 %v707_v33, %v13522_v30 }
 0x44e   :  { %v729_v44 = vsel %vm514_vm0, %v713_v36, -inf }
 0x44f   :  { %v10138_v37 = vpop.f32.mrb[2].mxu1  ;;  %v726_v38 = vsel %vm514_vm0, %v708_v34, -inf }
 0x450   :  { %v717_v40 = vpop.f32.mrb[3].mxu1  ;;  %727 = vmax.xlane.f32.xlu1 %v726_v38  ;;  %v723_v42 = vadd.f32 %v10138_v37, %v13534_v39 }
 0x451   :  { %v718_v41 = vadd.f32 %v717_v40, %v13529_v35 }
 0x452   :  { %v735_v45 = vsel %vm514_vm0, %v723_v42, -inf }
 0x453   :  { %v732_v43 = vsel %vm514_vm0, %v718_v41, -inf }
 0x454   :  { %733 = vmax.xlane.f32.xlu0 %v732_v43  ;;  %730 = vmax.xlane.f32.xlu1 %v729_v44 }
 0x458   :  { %736 = vmax.xlane.f32.xlu1 %v735_v45 }
 0x469   :  { %11626 = vrot.lane.b32.xlu1 %v13487_v15, %s13044_s6 }
 0x46a   :  { %11631 = vrot.lane.b32.xlu0 %v13497_v20, %s13044_s6 }
 0x46d   :  { %11636 = vrot.lane.b32.xlu1 %v13487_v15, %s13045_s28 }
 0x46e   :  { %883 = vrot.lane.b32.xlu0 %v13493_v19, %s13046_s20 }
 0x471   :  { %11641 = vrot.lane.b32.xlu1 %v13497_v20, %s13045_s28 }
 0x475   :  { %879 = vrot.lane.b32.xlu1 %v13481_v14, %s13046_s20 }
 0x4dd   :  { %v728_v46 = vpop.xlane.xlu1 %727 }
 0x4de   :  { %v738_v47 = vsub.f32 %v708_v34, %v728_v46 }
 0x4e0   :  { %v742_v52 = vmul.f32 1.442695, %v738_v47 }
 0x4e1   :  { %v734_v48 = vpop.xlane.xlu0 %733  ;;  %v731_v49 = vpop.xlane.xlu1 %730 }
 0x4e2   :  { %v739_v50 = vsub.f32 %v713_v36, %v731_v49  ;;  %v740_v56 = vsub.f32 %v718_v41, %v734_v48 }
 0x4e4   :  { %v744_v51 = vmul.f32 1.442695, %v739_v50  ;;  %v746_v0 = vmul.f32 1.442695, %v740_v56 }
 0x4e5   :  { %v737_v53 = vpop.xlane.xlu1 %736  ;;  %v11632_v55 = vpop.permute.xlu0 %11631 }
 0x4e6   :  { %v741_v54 = vsub.f32 %v723_v42, %v737_v53  ;;  %11995 = vpow2.f32 %v744_v51  ;;  %v11634_v59 = vunpack.i.h.bf16 %v11632_v55  ;;  %v11633_v60 = vunpack.i.l.bf16 %v11632_v55 }
 0x4e7   :  { %11997 = vpow2.f32 %v742_v52 }
 0x4e8   :  { %v748_v57 = vmul.f32 1.442695, %v741_v54  ;;  %v10951_v4 = vpack.c.bf16 %v11634_v59, %v11633_v60 }
 0x4e9   :  { %v11627_v58 = vpop.permute.xlu1 %11626  ;;  %v884_v43 = vpop.permute.xlu0 %883 }
 0x4ea   :  { %v11629_v61 = vunpack.i.h.bf16 %v11627_v58  ;;  %v11628_v62 = vunpack.i.l.bf16 %v11627_v58  ;;  %11999 = vpow2.f32 %v748_v57 }
 0x4eb   :  { %12001 = vpow2.f32 %v746_v0 }
 0x4ec   :  { %v10947_v63 = vpack.c.bf16 %v11629_v61, %v11628_v62 }
 0x4ed   :  { %v11637_v1 = vpop.permute.xlu1 %11636 }
 0x4ee   :  { %v11639_v2 = vunpack.i.h.bf16 %v11637_v1  ;;  %v11638_v3 = vunpack.i.l.bf16 %v11637_v1  ;;  %10948 = vmatprep.subr.bf16.mxu0 %v10947_v63 }
 0x4ef   :  { %10950 = vmatpush3.bf16.msra.mxu0 %v10947_v63 }
 0x4f0   :  { %10952 = vmatprep.subr.bf16.mxu0 %v10951_v4  ;;  %v11996_v5 = vpop.eup %11995  ;;  %v10955_v6 = vpack.c.bf16 %v11639_v2, %v11638_v3 }
 0x4f1   :  { %v753_v7 = vsel %vm514_vm0, %v11996_v5, 0.0  ;;  %v11998_v8 = vpop.eup %11997  ;;  %v11642_v18 = vpop.permute.xlu1 %11641 }
 0x4f2   :  { %754 = vadd.xlane.f32.xlu1 %v753_v7  ;;  %v750_v9 = vsel %vm514_vm0, %v11998_v8, 0.0  ;;  %v11644_v29 = vunpack.i.h.bf16 %v11642_v18  ;;  %v11643_v31 = vunpack.i.l.bf16 %v11642_v18 }
 0x4f3   :  { %10954 = vmatpush3.bf16.msra.mxu0 %v10951_v4 }
 0x4f4   :  { %10957 = vmatprep.subr.msk.bf16.mxu0 %vm13503_vm2, %v10955_v6  ;;  %v12000_v10 = vpop.eup %11999  ;;  %v10961_v36 = vpack.c.bf16 %v11644_v29, %v11643_v31 }
 0x4f5   :  { %v759_v11 = vsel %vm514_vm0, %v12000_v10, 0.0  ;;  %v12002_v13 = vpop.eup %12001  ;;  %v880_v21 = vpop.permute.xlu1 %879 }
 0x4f6   :  { %751 = vadd.xlane.f32.xlu1 %v750_v9  ;;  %v756_v16 = vsel %vm514_vm0, %v12002_v13, 0.0 }
 0x4fa   :  { %760 = vadd.xlane.f32.xlu1 %v759_v11 }
 0x4fe   :  { %757 = vadd.xlane.f32.xlu1 %v756_v16 }
 0x50f   :  { %881 = vrot.lane.b32.xlu1 %v13479_v12, %s13046_s20 }
 0x513   :  { %885 = vrot.lane.b32.xlu1 %v13489_v17, %s13046_s20 }
 0x57f   :  { %v755_v22 = vpop.xlane.xlu1 %754 }
 0x580   :  { %12003 = vrcp.f32 %v755_v22 }
 0x583   :  { %v752_v23 = vpop.xlane.xlu1 %751 }
 0x584   :  { %12005 = vrcp.f32 %v752_v23 }
 0x587   :  { %v761_v25 = vpop.xlane.xlu1 %760 }
 0x588   :  { %12007 = vrcp.f32 %v761_v25 }
 0x58a   :  { %v12004_v27 = vpop.eup %12003 }
 0x58b   :  { %v758_v26 = vpop.xlane.xlu1 %757  ;;  %v765_v34 = vmul.f32 %v12004_v27, %v11996_v5 }
 0x58c   :  { %12009 = vrcp.f32 %v758_v26 }
 0x58e   :  { %v12006_v28 = vpop.eup %12005 }
 0x58f   :  { %v763_v33 = vmul.f32 %v12006_v28, %v11998_v8  ;;  %v882_v42 = vpop.permute.xlu1 %881 }
 0x591   :  { %10147 = vmatprep.mubr.msk.f32.mxu0 %vm514_vm0, %v763_v33 }
 0x592   :  { %10148 = vmatmul.mubr.msk.f32.vlgmr.msra.gmra.mrb[4].mxu0 %vm514_vm0, %v765_v34  ;;  %v12008_v37 = vpop.eup %12007 }
 0x593   :  { %10960 = vmatpush3.bf16.xpose.msk.msra.mxu0 %vm13503_vm2, %v10955_v6  ;;  %v769_v41 = vmul.f32 %v12008_v37, %v12000_v10  ;;  %v886_v44 = vpop.permute.xlu1 %885 }
 0x594   :  { %10963 = vmatprep.subr.msk.bf16.mxu0 %vm13503_vm2, %v10961_v36 }
 0x596   :  { %v12010_v38 = vpop.eup %12009 }
 0x597   :  { %v767_v40 = vmul.f32 %v12010_v38, %v12002_v13 }
 0x599   :  { %10150 = vmatprep.mubr.msk.f32.mxu0 %vm514_vm0, %v767_v40 }
 0x59a   :  { %10151 = vmatmul.mubr.msk.f32.gmra.mrb[6].mxu0 %vm514_vm0, %v769_v41 }
 0x59b   :  { %10966 = vmatpush3.bf16.xpose.msk.msra.mxu0 %vm13503_vm2, %v10961_v36  ;;  %10161 = vmatprep.mubr.msk.f32.mxu0 %vm624_vm1, %v880_v21 }
 0x5a2   :  { %10162 = vmatmul.mubr.msk.f32.vlgmr.msra.gmra.mrb[8].mxu0 %vm624_vm1, %v882_v42 }
 0x5a3   :  { %10164 = vmatprep.mubr.msk.f32.mxu0 %vm624_vm1, %v884_v43 }
 0x5a6   :  { %10165 = vmatmul.mubr.msk.f32.gmra.mrb[10].mxu0 %vm624_vm1, %v886_v44 }
 0x665   :  { %v13577_v45 = vpop.f32.mrb[4].mxu0 }
 0x666   :  { %v13579_v46 = vpop.f32.mrb[5].mxu0 }
 0x66d   :  { %v13581_v47 = vpop.f32.mrb[6].mxu0 }
 0x66e   :  { %v13583_v48 = vpop.f32.mrb[7].mxu0 }
 0x675   :  { %v10163_v49 = vpop.f32.mrb[8].mxu0 }
 0x676   :  { %v983_v50 = vadd.f32 %v10163_v49, %v13525_v32  ;;  %v977_v51 = vpop.f32.mrb[9].mxu0 }
 0x677   :  { %v978_v52 = vadd.f32 %v977_v51, %v13522_v30 }
 0x678   :  { %v999_v53 = vsel %vm514_vm0, %v983_v50, -inf }
 0x679   :  { %1000 = vmax.xlane.f32.xlu1 %v999_v53  ;;  %v10166_v54 = vpop.f32.mrb[10].mxu0  ;;  %v996_v55 = vsel %vm514_vm0, %v978_v52, -inf }
 0x67a   :  { %v987_v56 = vpop.f32.mrb[11].mxu0  ;;  %997 = vmax.xlane.f32.xlu0 %v996_v55  ;;  %v993_v58 = vadd.f32 %v10166_v54, %v13534_v39 }
 0x67b   :  { %v988_v57 = vadd.f32 %v987_v56, %v13529_v35 }
 0x67c   :  { %v1005_v60 = vsel %vm514_vm0, %v993_v58, -inf }
 0x67d   :  { %v1002_v59 = vsel %vm514_vm0, %v988_v57, -inf }
 0x67e   :  { %1003 = vmax.xlane.f32.xlu0 %v1002_v59 }
 0x682   :  { %1006 = vmax.xlane.f32.xlu0 %v1005_v60 }
 0x68a   :  { %11646 = vrot.lane.b32.xlu1 %v13487_v15, %s13047_s1 }
 0x68e   :  { %11656 = vrot.lane.b32.xlu1 %v13487_v15, %s13048_s30 }
 0x706   :  { %v1001_v61 = vpop.xlane.xlu1 %1000 }
 0x707   :  { %v1009_v62 = vsub.f32 %v983_v50, %v1001_v61  ;;  %v998_v63 = vpop.xlane.xlu0 %997 }
 0x708   :  { %v1008_v0 = vsub.f32 %v978_v52, %v998_v63 }
 0x709   :  { %v1014_v1 = vmul.f32 1.442695, %v1009_v62 }
 0x70a   :  { %v1012_v2 = vmul.f32 1.442695, %v1008_v0  ;;  %v11647_v3 = vpop.permute.xlu1 %11646 }
 0x70b   :  { %12011 = vpow2.f32 %v1014_v1  ;;  %v11649_v4 = vunpack.i.h.bf16 %v11647_v3  ;;  %v11648_v5 = vunpack.i.l.bf16 %v11647_v3  ;;  %v1004_v11 = vpop.xlane.xlu0 %1003 }
 0x70c   :  { %12013 = vpow2.f32 %v1012_v2  ;;  %v1010_v18 = vsub.f32 %v988_v57, %v1004_v11 }
 0x70d   :  { %v10967_v6 = vpack.c.bf16 %v11649_v4, %v11648_v5 }
 0x70e   :  { %v1016_v22 = vmul.f32 1.442695, %v1010_v18  ;;  %v11657_v28 = vpop.permute.xlu1 %11656 }
 0x70f   :  { %10968 = vmatprep.subr.bf16.mxu1 %v10967_v6  ;;  %v1007_v13 = vpop.xlane.xlu0 %1006  ;;  %v11659_v34 = vunpack.i.h.bf16 %v11657_v28  ;;  %v11658_v36 = vunpack.i.l.bf16 %v11657_v28 }
 0x710   :  { %10970 = vmatpush3.bf16.msra.mxu1 %v10967_v6  ;;  %v1011_v16 = vsub.f32 %v993_v58, %v1007_v13 }
 0x711   :  { %v10975_v41 = vpack.c.bf16 %v11659_v34, %v11658_v36 }
 0x712   :  { %v1018_v21 = vmul.f32 1.442695, %v1011_v16 }
 0x714   :  { %12015 = vpow2.f32 %v1018_v21 }
 0x715   :  { %v12012_v7 = vpop.eup %12011  ;;  %12017 = vpow2.f32 %v1016_v22 }
 0x716   :  { %v12014_v8 = vpop.eup %12013  ;;  %v1023_v9 = vsel %vm514_vm0, %v12012_v7, 0.0 }
 0x717   :  { %1024 = vadd.xlane.f32.xlu0 %v1023_v9  ;;  %v1020_v10 = vsel %vm514_vm0, %v12014_v8, 0.0 }
 0x718   :  { %1021 = vadd.xlane.f32.xlu1 %v1020_v10 }
 0x71e   :  { %v12016_v23 = vpop.eup %12015 }
 0x71f   :  { %v12018_v25 = vpop.eup %12017  ;;  %v1029_v26 = vsel %vm514_vm0, %v12016_v23, 0.0 }
 0x720   :  { %v1026_v27 = vsel %vm514_vm0, %v12018_v25, 0.0 }
 0x729   :  { %11661 = vrot.lane.b32.xlu1 %v13497_v20, %s13048_s30 }
 0x72d   :  { %11651 = vrot.lane.b32.xlu0 %v13497_v20, %s13047_s1 }
 0x74c   :  { %1030 = vadd.xlane.f32.xlu0 %v1029_v26 }
 0x74d   :  { %1027 = vadd.xlane.f32.xlu1 %v1026_v27 }
 0x75e   :  { %1151 = vrot.lane.b32.xlu1 %v13479_v12, %s13049_s2 }
 0x762   :  { %1155 = vrot.lane.b32.xlu1 %v13489_v17, %s13049_s2  ;;  %1149 = vrot.lane.b32.xlu0 %v13481_v14, %s13049_s2 }
 0x766   :  { %1153 = vrot.lane.b32.xlu0 %v13493_v19, %s13049_s2 }
 0x7a4   :  { %v1025_v29 = vpop.xlane.xlu0 %1024 }
 0x7a5   :  { %12019 = vrcp.f32 %v1025_v29  ;;  %v1022_v31 = vpop.xlane.xlu1 %1021 }
 0x7a6   :  { %12021 = vrcp.f32 %v1022_v31 }
 0x7a8   :  { %v11652_v33 = vpop.permute.xlu0 %11651 }
 0x7a9   :  { %v11654_v37 = vunpack.i.h.bf16 %v11652_v33  ;;  %v11653_v38 = vunpack.i.l.bf16 %v11652_v33  ;;  %v11662_v43 = vpop.permute.xlu1 %11661 }
 0x7aa   :  { %v11664_v51 = vunpack.i.h.bf16 %v11662_v43  ;;  %v11663_v52 = vunpack.i.l.bf16 %v11662_v43 }
 0x7ab   :  { %v10971_v40 = vpack.c.bf16 %v11654_v37, %v11653_v38 }
 0x7ac   :  { %v10981_v53 = vpack.c.bf16 %v11664_v51, %v11663_v52 }
 0x7ad   :  { %10972 = vmatprep.subr.bf16.mxu1 %v10971_v40 }
 0x7ae   :  { %10974 = vmatpush3.bf16.msra.mxu1 %v10971_v40 }
 0x7af   :  { %v12020_v42 = vpop.eup %12019  ;;  %10977 = vmatprep.subr.msk.bf16.mxu1 %vm13503_vm2, %v10975_v41 }
 0x7b0   :  { %v12022_v44 = vpop.eup %12021  ;;  %v1035_v50 = vmul.f32 %v12020_v42, %v12012_v7 }
 0x7b1   :  { %v1033_v49 = vmul.f32 %v12022_v44, %v12014_v8 }
 0x7b3   :  { %10175 = vmatprep.mubr.msk.f32.mxu1 %vm514_vm0, %v1033_v49 }
 0x7b4   :  { %10176 = vmatmul.mubr.msk.f32.vlgmr.msra.gmra.mrb[4].mxu1 %vm514_vm0, %v1035_v50 }
 0x7b7   :  { %10980 = vmatpush3.bf16.xpose.msk.msra.mxu1 %vm13503_vm2, %v10975_v41 }
 0x7b8   :  { %10983 = vmatprep.subr.msk.bf16.mxu1 %vm13503_vm2, %v10981_v53 }
 0x7bf   :  { %10986 = vmatpush3.bf16.xpose.msk.msra.mxu1 %vm13503_vm2, %v10981_v53 }
 0x7d9   :  { %v1031_v54 = vpop.xlane.xlu0 %1030 }
 0x7da   :  { %12023 = vrcp.f32 %v1031_v54  ;;  %v1028_v55 = vpop.xlane.xlu1 %1027 }
 0x7db   :  { %12025 = vrcp.f32 %v1028_v55 }
 0x7dd   :  { %v1150_v59 = vpop.permute.xlu0 %1149 }
 0x7de   :  { %v1152_v61 = vpop.permute.xlu1 %1151 }
 0x7e1   :  { %v1154_v62 = vpop.permute.xlu0 %1153 }
 0x7e2   :  { %v1156_v63 = vpop.permute.xlu1 %1155 }
 0x7e4   :  { %v12024_v56 = vpop.eup %12023 }
 0x7e5   :  { %v12026_v57 = vpop.eup %12025  ;;  %v1039_v60 = vmul.f32 %v12024_v56, %v12016_v23 }
 0x7e6   :  { %v1037_v58 = vmul.f32 %v12026_v57, %v12018_v25 }
 0x7e8   :  { %10178 = vmatprep.mubr.msk.f32.mxu1 %vm514_vm0, %v1037_v58 }
 0x7e9   :  { %10179 = vmatmul.mubr.msk.f32.gmra.mrb[6].mxu1 %vm514_vm0, %v1039_v60 }
 0x7ea   :  { %10189 = vmatprep.mubr.msk.f32.mxu1 %vm624_vm1, %v1150_v59 }
 0x7ed   :  { %10190 = vmatmul.mubr.msk.f32.vlgmr.msra.gmra.mrb[8].mxu1 %vm624_vm1, %v1152_v61 }
 0x7ee   :  { %10192 = vmatprep.mubr.msk.f32.mxu1 %vm624_vm1, %v1154_v62 }
 0x7f1   :  { %10193 = vmatmul.mubr.msk.f32.gmra.mrb[10].mxu1 %vm624_vm1, %v1156_v63 }
 0x887   :  { %v13629_v0 = vpop.f32.mrb[4].mxu1 }
 0x888   :  { %v13631_v1 = vpop.f32.mrb[5].mxu1 }
 0x8bc   :  { %v13633_v2 = vpop.f32.mrb[6].mxu1 }
 0x8bd   :  { %v13635_v3 = vpop.f32.mrb[7].mxu1 }
 0x8c0   :  { %v10191_v4 = vpop.f32.mrb[8].mxu1 }
 0x8c1   :  { %v1253_v5 = vadd.f32 %v10191_v4, %v13525_v32  ;;  %v1247_v6 = vpop.f32.mrb[9].mxu1 }
 0x8c2   :  { %v1248_v7 = vadd.f32 %v1247_v6, %v13522_v30 }
 0x8c3   :  { %v1269_v8 = vsel %vm514_vm0, %v1253_v5, -inf }
 0x8c4   :  { %1270 = vmax.xlane.f32.xlu1 %v1269_v8  ;;  %v10194_v9 = vpop.f32.mrb[10].mxu1  ;;  %v1266_v10 = vsel %vm514_vm0, %v1248_v7, -inf }
 0x8c5   :  { %v1257_v11 = vpop.f32.mrb[11].mxu1  ;;  %1267 = vmax.xlane.f32.xlu0 %v1266_v10  ;;  %v1263_v16 = vadd.f32 %v10194_v9, %v13534_v39 }
 0x8c6   :  { %v1258_v13 = vadd.f32 %v1257_v11, %v13529_v35 }
 0x8c7   :  { %v1275_v21 = vsel %vm514_vm0, %v1263_v16, -inf }
 0x8c8   :  { %v1272_v18 = vsel %vm514_vm0, %v1258_v13, -inf }
 0x8c9   :  { %1273 = vmax.xlane.f32.xlu0 %v1272_v18 }
 0x8cd   :  { %1276 = vmax.xlane.f32.xlu0 %v1275_v21 }
 0x8d5   :  { %11666 = vrot.lane.b32.xlu1 %v13487_v15, %s13050_s17 }
 0x8d9   :  { %11676 = vrot.lane.b32.xlu1 %v13487_v15, %s13051_s7 }
 0x951   :  { %v1271_v22 = vpop.xlane.xlu1 %1270 }
 0x952   :  { %v1279_v23 = vsub.f32 %v1253_v5, %v1271_v22  ;;  %v1268_v25 = vpop.xlane.xlu0 %1267 }
 0x953   :  { %v1278_v26 = vsub.f32 %v1248_v7, %v1268_v25 }
 0x954   :  { %v1284_v27 = vmul.f32 1.442695, %v1279_v23 }
 0x955   :  { %v1282_v28 = vmul.f32 1.442695, %v1278_v26  ;;  %v11667_v29 = vpop.permute.xlu1 %11666 }
 0x956   :  { %12027 = vpow2.f32 %v1284_v27  ;;  %v11669_v31 = vunpack.i.h.bf16 %v11667_v29  ;;  %v11668_v33 = vunpack.i.l.bf16 %v11667_v29  ;;  %v1274_v41 = vpop.xlane.xlu0 %1273 }
 0x957   :  { %12029 = vpow2.f32 %v1282_v28  ;;  %v1280_v44 = vsub.f32 %v1258_v13, %v1274_v41 }
 0x958   :  { %v10987_v34 = vpack.c.bf16 %v11669_v31, %v11668_v33 }
 0x959   :  { %v1286_v50 = vmul.f32 1.442695, %v1280_v44  ;;  %v11677_v55 = vpop.permute.xlu1 %11676 }
 0x95a   :  { %10988 = vmatprep.subr.bf16.mxu0 %v10987_v34  ;;  %v1277_v42 = vpop.xlane.xlu0 %1276  ;;  %v11679_v59 = vunpack.i.h.bf16 %v11677_v55  ;;  %v11678_v60 = vunpack.i.l.bf16 %v11677_v55 }
 0x95b   :  { %10990 = vmatpush3.bf16.msra.mxu0 %v10987_v34  ;;  %v1281_v43 = vsub.f32 %v1263_v16, %v1277_v42 }
 0x95c   :  { %v10995_v63 = vpack.c.bf16 %v11679_v59, %v11678_v60 }
 0x95d   :  { %v1288_v49 = vmul.f32 1.442695, %v1281_v43 }
 0x95f   :  { %12031 = vpow2.f32 %v1288_v49 }
 0x960   :  { %v12028_v36 = vpop.eup %12027  ;;  %12033 = vpow2.f32 %v1286_v50 }
 0x961   :  { %v12030_v37 = vpop.eup %12029  ;;  %v1293_v38 = vsel %vm514_vm0, %v12028_v36, 0.0 }
 0x962   :  { %1294 = vadd.xlane.f32.xlu0 %v1293_v38  ;;  %v1290_v40 = vsel %vm514_vm0, %v12030_v37, 0.0 }
 0x963   :  { %1291 = vadd.xlane.f32.xlu1 %v1290_v40 }
 0x969   :  { %v12032_v51 = vpop.eup %12031 }
 0x96a   :  { %v12034_v52 = vpop.eup %12033  ;;  %v1299_v53 = vsel %vm514_vm0, %v12032_v51, 0.0 }
 0x96b   :  { %v1296_v54 = vsel %vm514_vm0, %v12034_v52, 0.0 }
 0x974   :  { %11681 = vrot.lane.b32.xlu1 %v13497_v20, %s13051_s7 }
 0x978   :  { %11671 = vrot.lane.b32.xlu0 %v13497_v20, %s13050_s17 }
 0x997   :  { %1300 = vadd.xlane.f32.xlu0 %v1299_v53 }
 0x998   :  { %1297 = vadd.xlane.f32.xlu1 %v1296_v54 }
 0x9a9   :  { %1421 = vrot.lane.b32.xlu1 %v13479_v12, %s13052_s25 }
 0x9ad   :  { %1425 = vrot.lane.b32.xlu1 %v13489_v17, %s13052_s25  ;;  %1419 = vrot.lane.b32.xlu0 %v13481_v14, %s13052_s25 }
 0x9b1   :  { %1423 = vrot.lane.b32.xlu0 %v13493_v19, %s13052_s25 }
 0x9ef   :  { %v1295_v56 = vpop.xlane.xlu0 %1294 }
 0x9f0   :  { %12035 = vrcp.f32 %v1295_v56  ;;  %v1292_v57 = vpop.xlane.xlu1 %1291 }
 0x9f1   :  { %12037 = vrcp.f32 %v1292_v57 }
 0x9f3   :  { %v11672_v58 = vpop.permute.xlu0 %11671 }
 0x9f4   :  { %v11674_v61 = vunpack.i.h.bf16 %v11672_v58  ;;  %v11673_v62 = vunpack.i.l.bf16 %v11672_v58  ;;  %v11682_v4 = vpop.permute.xlu1 %11681 }
 0x9f5   :  { %v11684_v6 = vunpack.i.h.bf16 %v11682_v4  ;;  %v11683_v7 = vunpack.i.l.bf16 %v11682_v4 }
 0x9f6   :  { %v10991_v12 = vpack.c.bf16 %v11674_v61, %v11673_v62 }
 0x9f7   :  { %v11001_v8 = vpack.c.bf16 %v11684_v6, %v11683_v7 }
 0x9f8   :  { %10992 = vmatprep.subr.bf16.mxu0 %v10991_v12 }
 0x9f9   :  { %10994 = vmatpush3.bf16.msra.mxu0 %v10991_v12 }
 0x9fa   :  { %v12036_v17 = vpop.eup %12035  ;;  %10997 = vmatprep.subr.msk.bf16.mxu0 %vm13503_vm2, %v10995_v63 }
 0x9fb   :  { %v12038_v14 = vpop.eup %12037  ;;  %v1305_v5 = vmul.f32 %v12036_v17, %v12028_v36 }
 0x9fc   :  { %v1303_v19 = vmul.f32 %v12038_v14, %v12030_v37 }
 0x9fe   :  { %10203 = vmatprep.mubr.msk.f32.mxu0 %vm514_vm0, %v1303_v19 }
 0x9ff   :  { %10204 = vmatmul.mubr.msk.f32.vlgmr.msra.gmra.mrb[12].mxu0 %vm514_vm0, %v1305_v5 }
 0xa02   :  { %11000 = vmatpush3.bf16.xpose.msk.msra.mxu0 %vm13503_vm2, %v10995_v63 }
 0xa03   :  { %11003 = vmatprep.subr.msk.bf16.mxu0 %vm13503_vm2, %v11001_v8 }
 0xa0a   :  { %11006 = vmatpush3.bf16.xpose.msk.msra.mxu0 %vm13503_vm2, %v11001_v8 }
 0xa24   :  { %v1301_v9 = vpop.xlane.xlu0 %1300 }
 0xa25   :  { %12039 = vrcp.f32 %v1301_v9  ;;  %v1298_v10 = vpop.xlane.xlu1 %1297 }
 0xa26   :  { %12041 = vrcp.f32 %v1298_v10 }
 0xa28   :  { %v1420_v18 = vpop.permute.xlu0 %1419 }
 0xa29   :  { %v1422_v22 = vpop.permute.xlu1 %1421 }
 0xa2c   :  { %v1424_v23 = vpop.permute.xlu0 %1423 }
 0xa2d   :  { %v1426_v25 = vpop.permute.xlu1 %1425 }
 0xa2f   :  { %v12040_v11 = vpop.eup %12039 }
 0xa30   :  { %v12042_v13 = vpop.eup %12041  ;;  %v1309_v21 = vmul.f32 %v12040_v11, %v12032_v51 }
 0xa31   :  { %v1307_v16 = vmul.f32 %v12042_v13, %v12034_v52 }
 0xa33   :  { %10206 = vmatprep.mubr.msk.f32.mxu0 %vm514_vm0, %v1307_v16 }
 0xa34   :  { %10207 = vmatmul.mubr.msk.f32.gmra.mrb[14].mxu0 %vm514_vm0, %v1309_v21 }
 0xa35   :  { %10217 = vmatprep.mubr.msk.f32.mxu0 %vm624_vm1, %v1420_v18 }
 0xa38   :  { %10218 = vmatmul.mubr.msk.f32.vlgmr.msra.gmra.mrb[16].mxu0 %vm624_vm1, %v1422_v22  ;;  %v503_v22 = vld [vmem:[%s15009_s29] sm:$0xff] }
 0xa39   :  { %10220 = vmatprep.mubr.msk.f32.mxu0 %vm624_vm1, %v1424_v23  ;;  %v504_v23 = vld [vmem:[%s15009_s29 + $0x8] sm:$0xff] }
 0xa3c   :  { %10221 = vmatmul.mubr.msk.f32.gmra.mrb[18].mxu0 %vm624_vm1, %v1426_v25  ;;  %v505_v25 = vld [vmem:[%s15009_s29 + $0x10] sm:$0xff] }
 0xad2   :  { %v10205_v26 = vpop.f32.mrb[12].mxu0 }
 0xad3   :  { %v1400_v27 = vpop.f32.mrb[13].mxu0 }
 0xb07   :  { %v13681_v28 = vpop.f32.mrb[14].mxu0 }
 0xb08   :  { %v13683_v29 = vpop.f32.mrb[15].mxu0 }
 0xb0b   :  { %v10219_v31 = vpop.f32.mrb[16].mxu0 }
 0xb0c   :  { %v1523_v33 = vadd.f32 %v10219_v31, %v13525_v32  ;;  %v1517_v34 = vpop.f32.mrb[17].mxu0 }
 0xb0d   :  { %v1518_v36 = vadd.f32 %v1517_v34, %v13522_v30 }
 0xb0e   :  { %v1539_v37 = vsel %vm514_vm0, %v1523_v33, -inf }
 0xb0f   :  { %1540 = vmax.xlane.f32.xlu1 %v1539_v37  ;;  %v10222_v38 = vpop.f32.mrb[18].mxu0  ;;  %v1536_v40 = vsel %vm514_vm0, %v1518_v36, -inf }
 0xb10   :  { %v1527_v41 = vpop.f32.mrb[19].mxu0  ;;  %1537 = vmax.xlane.f32.xlu0 %v1536_v40  ;;  %v1533_v43 = vadd.f32 %v10222_v38, %v13534_v39 }
 0xb11   :  { %v1528_v42 = vadd.f32 %v1527_v41, %v13529_v35 }
 0xb12   :  { %v1545_v32 = vsel %vm514_vm0, %v1533_v43, -inf }
 0xb13   :  { %v1542_v44 = vsel %vm514_vm0, %v1528_v42, -inf }
 0xb14   :  { %1543 = vmax.xlane.f32.xlu0 %v1542_v44 }
 0xb18   :  { %1546 = vmax.xlane.f32.xlu0 %v1545_v32 }
 0xb9c   :  { %v1541_v49 = vpop.xlane.xlu1 %1540 }
 0xb9d   :  { %v1549_v30 = vsub.f32 %v1523_v33, %v1541_v49  ;;  %v1538_v50 = vpop.xlane.xlu0 %1537 }
 0xb9e   :  { %v1548_v51 = vsub.f32 %v1518_v36, %v1538_v50 }
 0xb9f   :  { %v1554_v52 = vmul.f32 1.442695, %v1549_v30 }
 0xba0   :  { %v1552_v53 = vmul.f32 1.442695, %v1548_v51 }
 0xba1   :  { %12043 = vpow2.f32 %v1554_v52  ;;  %v1544_v54 = vpop.xlane.xlu0 %1543 }
 0xba2   :  { %12045 = vpow2.f32 %v1552_v53  ;;  %v1550_v55 = vsub.f32 %v1528_v42, %v1544_v54 }
 0xba4   :  { %v1556_v56 = vmul.f32 1.442695, %v1550_v55 }
 0xba5   :  { %v1547_v35 = vpop.xlane.xlu0 %1546 }
 0xba6   :  { %12047 = vpow2.f32 %v1556_v56  ;;  %v1551_v39 = vsub.f32 %v1533_v43, %v1547_v35 }
 0xba8   :  { %v1558_v57 = vmul.f32 1.442695, %v1551_v39 }
 0xbaa   :  { %12049 = vpow2.f32 %v1558_v57 }
 0xbab   :  { %v12044_v58 = vpop.eup %12043 }
 0xbac   :  { %v12046_v59 = vpop.eup %12045  ;;  %v1563_v60 = vsel %vm514_vm0, %v12044_v58, 0.0 }
 0xbad   :  { %1564 = vadd.xlane.f32.xlu0 %v1563_v60  ;;  %v1560_v61 = vsel %vm514_vm0, %v12046_v59, 0.0 }
 0xbae   :  { %1561 = vadd.xlane.f32.xlu1 %v1560_v61 }
 0xbb0   :  { %v12048_v62 = vpop.eup %12047 }
 0xbb1   :  { %v1566_v12 = vsel %vm514_vm0, %v12048_v62, 0.0 }
 0xbb2   :  { %1567 = vadd.xlane.f32.xlu1 %v1566_v12 }
 0xbb4   :  { %v12050_v63 = vpop.eup %12049 }
 0xbb5   :  { %v1569_v17 = vsel %vm514_vm0, %v12050_v63, 0.0 }
 0xbb6   :  { %1570 = vadd.xlane.f32.xlu0 %v1569_v17 }
 0xbc3   :  { %11686 = vrot.lane.b32.xlu1 %v13487_v15, %s13053_s10 }
 0xbc7   :  { %1693 = vrot.lane.b32.xlu1 %v13631_v1, %s13030_s24 }
 0xbcb   :  { %1695 = vrot.lane.b32.xlu1 %v13629_v0, %s13030_s24 }
 0xbcc   :  { %11691 = vrot.lane.b32.xlu0 %v13497_v20, %s13053_s10 }
 0xbcf   :  { %1711 = vrot.lane.b32.xlu1 %v10205_v26, %s13016_s22  ;;  %v11015_v26 = vpack.c.bf16 %v504_v23, %v503_v22 }
 0xbd0   :  { %1709 = vrot.lane.b32.xlu0 %v1400_v27, %s13016_s22  ;;  %v506_v27 = vld [vmem:[%s15009_s29 + $0x18] sm:$0xff] }
 0xbd1   :  { %v11019_v31 = vpack.c.bf16 %v506_v27, %v505_v25 }
 0xbd3   :  { %1699 = vrot.lane.b32.xlu1 %v13633_v2, %s13030_s24 }
 0xbd4   :  { %1697 = vrot.lane.b32.xlu0 %v13635_v3, %s13030_s24 }
 0xc3a   :  { %v1565_v4 = vpop.xlane.xlu0 %1564 }
 0xc3b   :  { %v1562_v15 = vpop.xlane.xlu1 %1561 }
 0xc3c   :  { %12051 = vrcp.f32 %v1562_v15 }
 0xc3d   :  { %12053 = vrcp.f32 %v1565_v4 }
 0xc3f   :  { %v1568_v1 = vpop.xlane.xlu1 %1567 }
 0xc40   :  { %12055 = vrcp.f32 %v1568_v1 }
 0xc43   :  { %v11687_v0 = vpop.permute.xlu1 %11686  ;;  %v1571_v14 = vpop.xlane.xlu0 %1570 }
 0xc44   :  { %v11689_v19 = vunpack.i.h.bf16 %v11687_v0  ;;  %v11688_v20 = vunpack.i.l.bf16 %v11687_v0  ;;  %12057 = vrcp.f32 %v1571_v14 }
 0xc46   :  { %v12052_v5 = vpop.eup %12051  ;;  %v11007_v6 = vpack.c.bf16 %v11689_v19, %v11688_v20  ;;  %v12365_v20 = vld [vmem:[%s15005_s27 + $0x10] sm:$0xff] }
 0xc47   :  { %v11692_v7 = vpop.permute.xlu0 %11691  ;;  %v1573_v8 = vmul.f32 %v12052_v5, %v12046_v59  ;;  %v12054_v10 = vpop.eup %12053  ;;  %v9350_v59 = vld [vmem:[#allocation7] ss:$0 sm:$0xff] }
 0xc48   :  { %v11694_v9 = vunpack.i.h.bf16 %v11692_v7  ;;  %v11693_v2 = vunpack.i.l.bf16 %v11692_v7  ;;  %11008 = vmatprep.subr.bf16.mxu1 %v11007_v6  ;;  %v1575_v13 = vmul.f32 %v12054_v10, %v12044_v58  ;;  %v1694_v38 = vpop.permute.xlu1 %1693  ;;  %v12366_v7 = vld [vmem:[%s15005_s27 + $0x18] sm:$0xff] }
 0xc49   :  { %11010 = vmatpush3.bf16.msra.mxu1 %v11007_v6  ;;  %10231 = vmatprep.mubr.msk.f32.mxu1 %vm514_vm0, %v1573_v8  ;;  %v1737_v32 = vsel %vm624_vm1, %v13579_v46, %v1694_v38 }
 0xc4a   :  { %v11011_v3 = vpack.c.bf16 %v11694_v9, %v11693_v2  ;;  %v12056_v11 = vpop.eup %12055 }
 0xc4b   :  { %v1577_v18 = vmul.f32 %v12056_v11, %v12048_v62  ;;  %v1710_v42 = vpop.permute.xlu0 %1709 }
 0xc4c   :  { %11012 = vmatprep.subr.bf16.mxu1 %v11011_v3  ;;  %v1696_v40 = vpop.permute.xlu1 %1695 }
 0xc4d   :  { %11014 = vmatpush3.bf16.msra.mxu1 %v11011_v3  ;;  %v1738_v49 = vsel %vm624_vm1, %v13577_v45, %v1696_v40 }
 0xc4e   :  { %v12058_v16 = vpop.eup %12057  ;;  %11016 = vmatprep.subr.bf16.mxu1 %v11015_v26 }
 0xc4f   :  { %v1579_v21 = vmul.f32 %v12058_v16, %v12050_v63  ;;  %v1698_v44 = vpop.permute.xlu0 %1697  ;;  %v12364_v63 = vld [vmem:[%s15005_s27] sm:$0xff] }
 0xc50   :  { %10232 = vmatmul.mubr.msk.f32.vlgmr.msra.gmra.mrb[12].mxu1 %vm514_vm0, %v1575_v13  ;;  %v1712_v41 = vpop.permute.xlu1 %1711  ;;  %v1739_v46 = vsel %vm624_vm1, %v13583_v48, %v1698_v44  ;;  %v1963_v44 = vld [vmem:[%s15010_s14 + $0x10] sm:$0xff] }
 0xc51   :  { %10234 = vmatprep.mubr.msk.f32.mxu1 %vm514_vm0, %v1577_v18  ;;  %11018 = vmatpush3.bf16.msra.mxu1 %v11015_v26  ;;  %v1743_v50 = vsel %vm1741_vm3, %v1738_v49, %v1712_v41  ;;  %v1961_v41 = vld [vmem:[%s15010_s14] sm:$0xff] }
 0xc52   :  { %11020 = vmatprep.subr.bf16.mxu1 %v11019_v31  ;;  %v1966_v49 = vld [vmem:[%s15011_s19] sm:$0xff] }
 0xc54   :  { %10235 = vmatmul.mubr.msk.f32.gmra.mrb[14].mxu1 %vm514_vm0, %v1579_v21  ;;  %v1700_v43 = vpop.permute.xlu1 %1699 }
 0xc55   :  { %11022 = vmatpush3.bf16.msra.mxu1 %v11019_v31  ;;  %v1740_v55 = vsel %vm624_vm1, %v13581_v47, %v1700_v43  ;;  %v12363_v47 = vld [vmem:[%s15005_s27 + $0x8] sm:$0xff] }
 0xd23   :  { %v10233_v33 = vpop.f32.mrb[12].mxu1 }
 0xd24   :  { %1727 = vrot.lane.b32.xlu1 %v10233_v33, %s13054_s21  ;;  %v1670_v34 = vpop.f32.mrb[13].mxu1 }
 0xd25   :  { %1725 = vrot.lane.b32.xlu0 %v1670_v34, %s13054_s21 }
 0xd27   :  { %v10236_v36 = vpop.f32.mrb[14].mxu1 }
 0xd28   :  { %1715 = vrot.lane.b32.xlu1 %v13681_v28, %s13016_s22  ;;  %v1680_v37 = vpop.f32.mrb[15].mxu1 }
 0xd29   :  { %1713 = vrot.lane.b32.xlu0 %v13683_v29, %s13016_s22  ;;  %v1742_v29 = vsel %vm1741_vm3, %v1737_v32, %v1710_v42  ;;  %v1962_v42 = vld [vmem:[%s15010_s14 + $0x8] sm:$0xff]  ;;  %v1964_v32 = vld [vmem:[%s15010_s14 + $0x18] sm:$0xff] }
 0xd2a   :  { %v11023_v43 = vpack.c.bf16 %v1962_v42, %v1961_v41 }
 0xd2c   :  { %1731 = vrot.lane.b32.xlu1 %v10236_v36, %s13054_s21  ;;  %11024 = vmatprep.subr.bf16.mxu0 %v11023_v43 }
 0xd2d   :  { %1729 = vrot.lane.b32.xlu0 %v1680_v37, %s13054_s21  ;;  %11026 = vmatpush3.bf16.msra.mxu0 %v11023_v43 }
 0xd96   :  { %v1728_v28 = vpop.permute.xlu1 %1727 }
 0xd97   :  { %v1726_v30 = vpop.permute.xlu0 %1725  ;;  %v1748_v52 = vsel %vm1746_vm4, %v1743_v50, %v1728_v28  ;;  %v11027_v28 = vpack.c.bf16 %v1964_v32, %v1963_v44  ;;  %v1972_v32 = vld [vmem:[%s15011_s19 + $0x30] sm:$0xff] }
 0xd98   :  { %v1747_v51 = vsel %vm1746_vm4, %v1742_v29, %v1726_v30  ;;  %v1967_v29 = vld [vmem:[%s15011_s19 + $0x8] sm:$0xff]  ;;  %v1968_v30 = vld [vmem:[%s15011_s19 + $0x10] sm:$0xff] }
 0xd99   :  { %10245 = vmatprep.mubr.msk.f32.mxu1 %vm514_vm0, %v1747_v51  ;;  %11028 = vmatprep.subr.bf16.mxu0 %v11027_v28  ;;  %v11031_v50 = vpack.c.bf16 %v1967_v29, %v1966_v49  ;;  %v1969_v51 = vld [vmem:[%s15011_s19 + $0x18] sm:$0xff]  ;;  %v9357_v29 = vld [vmem:[#allocation8] ss:$0 sm:$0xff] }
 0xd9a   :  { %v1716_v53 = vpop.permute.xlu1 %1715  ;;  %10246 = vmatmul.mubr.msk.f32.vlgmr.msra.gmra.mrb[16].mxu1 %vm514_vm0, %v1748_v52  ;;  %11030 = vmatpush3.bf16.msra.mxu0 %v11027_v28  ;;  %v11035_v52 = vpack.c.bf16 %v1969_v51, %v1968_v30  ;;  %v1973_v28 = vld [vmem:[%s15011_s19 + $0x38] sm:$0xff] }
 0xd9b   :  { %v1714_v54 = vpop.permute.xlu0 %1713  ;;  %v1745_v39 = vsel %vm1741_vm3, %v1740_v55, %v1716_v53  ;;  %v1970_v53 = vld [vmem:[%s15011_s19 + $0x20] sm:$0xff]  ;;  %11032 = vmatprep.subr.bf16.mxu1 %v11031_v50  ;;  %v11043_v49 = vpack.c.bf16 %v1973_v28, %v1972_v32 }
 0xd9c   :  { %v1744_v56 = vsel %vm1741_vm3, %v1739_v46, %v1714_v54  ;;  %v1971_v54 = vld [vmem:[%s15011_s19 + $0x28] sm:$0xff]  ;;  %11034 = vmatpush3.bf16.msra.mxu1 %v11031_v50 }
 0xd9d   :  { %11036 = vmatprep.subr.bf16.mxu1 %v11035_v52  ;;  %v11039_v46 = vpack.c.bf16 %v1971_v54, %v1970_v53 }
 0xd9e   :  { %v1732_v45 = vpop.permute.xlu1 %1731 }
 0xd9f   :  { %v1730_v35 = vpop.permute.xlu0 %1729  ;;  %v1750_v58 = vsel %vm1746_vm4, %v1745_v39, %v1732_v45 }
 0xda0   :  { %v1749_v57 = vsel %vm1746_vm4, %v1744_v56, %v1730_v35  ;;  %11038 = vmatpush3.bf16.msra.mxu1 %v11035_v52 }
 0xda1   :  { %10248 = vmatprep.mubr.msk.f32.mxu1 %vm514_vm0, %v1749_v57  ;;  %11040 = vmatprep.subr.bf16.mxu1 %v11039_v46 }
 0xda2   :  { %10249 = vmatmul.mubr.msk.f32.gmra.mrb[18].mxu1 %vm514_vm0, %v1750_v58 }
 0xda4   :  { %11042 = vmatpush3.bf16.msra.mxu1 %v11039_v46 }
 0xda5   :  { %11044 = vmatprep.subr.bf16.mxu1 %v11043_v49 }
 0xda8   :  { %11046 = vmatpush3.bf16.msra.mxu1 %v11043_v49 }
 0xe6d   :  { %v10247_v48 = vpop.f32.mrb[16].mxu1 }
 0xe6e   :  { %v1841_v60 = vadd.f32 %v10247_v48, %v9350_v59  ;;  %v1835_v61 = vpop.f32.mrb[17].mxu1 }
 0xe6f   :  { %v1836_v62 = vadd.f32 %v9350_v59, %v1835_v61 }
 0xe70   :  { %v1857_v12 = vadd.f32 %v12363_v47, %v1841_v60 }
 0xe71   :  { %v1856_v17 = vadd.f32 %v12364_v63, %v1836_v62 }
 0xe72   :  { %v1863_v15 = vsel %vm514_vm0, %v1857_v12, 0.0 }
 0xe73   :  { %1864 = vadd.xlane.f32.xlu1 %v1863_v15  ;;  %v1860_v4 = vsel %vm514_vm0, %v1856_v17, 0.0 }
 0xe74   :  { %1861 = vadd.xlane.f32.xlu0 %v1860_v4 }
 0xe75   :  { %v10250_v1 = vpop.f32.mrb[18].mxu1 }
 0xe76   :  { %v1845_v0 = vpop.f32.mrb[19].mxu1  ;;  %v1851_v14 = vadd.f32 %v10250_v1, %v9350_v59 }
 0xe77   :  { %v1846_v19 = vadd.f32 %v9350_v59, %v1845_v0 }
 0xe78   :  { %v1859_v8 = vadd.f32 %v12366_v7, %v1851_v14  ;;  %v9355_v7 = vld [vmem:[#allocation11] ss:$0 sm:$0xff] }
 0xe79   :  { %v1858_v5 = vadd.f32 %v12365_v20, %v1846_v19 }
 0xe7a   :  { %v1869_v9 = vsel %vm514_vm0, %v1859_v8, 0.0 }
 0xe7b   :  { %v1866_v6 = vsel %vm514_vm0, %v1858_v5, 0.0 }
 0xe7c   :  { %1867 = vadd.xlane.f32.xlu0 %v1866_v6 }
 0xe80   :  { %1870 = vadd.xlane.f32.xlu0 %v1869_v9 }
 0xf00   :  { %v1865_v2 = vpop.xlane.xlu1 %1864 }
 0xf01   :  { %v1874_v3 = vmul.f32 0.03125, %v1865_v2  ;;  %v1862_v10 = vpop.xlane.xlu0 %1861 }
 0xf02   :  { %v1873_v11 = vmul.f32 0.03125, %v1862_v10 }
 0xf03   :  { %v13755_v13 = vsub.f32 %v1857_v12, %v1874_v3 }
 0xf04   :  { %v13757_v16 = vsub.f32 %v1856_v17, %v1873_v11 }
 0xf05   :  { %v1882_v18 = vmul.f32 %v13755_v13, %v13755_v13  ;;  %v1936_v10 = vmul.f32 %v9355_v7, %v13755_v13 }
 0xf06   :  { %v1881_v21 = vmul.f32 %v13757_v16, %v13757_v16 }
 0xf07   :  { %v1888_v22 = vsel %vm514_vm0, %v1882_v18, 0.0 }
 0xf08   :  { %1889 = vadd.xlane.f32.xlu0 %v1888_v22  ;;  %v1885_v23 = vsel %vm514_vm0, %v1881_v21, 0.0  ;;  %v1935_v21 = vmul.f32 %v9355_v7, %v13757_v16 }
 0xf09   :  { %1886 = vadd.xlane.f32.xlu1 %v1885_v23  ;;  %v1868_v25 = vpop.xlane.xlu0 %1867 }
 0xf0a   :  { %v1875_v26 = vmul.f32 0.03125, %v1868_v25  ;;  %v9356_v25 = vld [vmem:[#allocation13] ss:$0 sm:$0xff] }
 0xf0c   :  { %v13765_v27 = vsub.f32 %v1858_v5, %v1875_v26 }
 0xf0d   :  { %v1871_v31 = vpop.xlane.xlu0 %1870 }
 0xf0e   :  { %v1876_v33 = vmul.f32 0.03125, %v1871_v31  ;;  %v1883_v34 = vmul.f32 %v13765_v27, %v13765_v27  ;;  %v1937_v13 = vmul.f32 %v9355_v7, %v13765_v27 }
 0xf10   :  { %v13769_v36 = vsub.f32 %v1859_v8, %v1876_v33  ;;  %v1891_v37 = vsel %vm514_vm0, %v1883_v34, 0.0 }
 0xf11   :  { %1892 = vadd.xlane.f32.xlu1 %v1891_v37 }
 0xf12   :  { %v1884_v38 = vmul.f32 %v13769_v36, %v13769_v36  ;;  %v1938_v16 = vmul.f32 %v9355_v7, %v13769_v36 }
 0xf14   :  { %v1894_v40 = vsel %vm514_vm0, %v1884_v38, 0.0 }
 0xf15   :  { %1895 = vadd.xlane.f32.xlu0 %v1894_v40 }
 0xf95   :  { %v1890_v45 = vpop.xlane.xlu0 %1889 }
 0xf96   :  { %v1898_v55 = vmul.f32 0.032258064, %v1890_v45  ;;  %v1887_v56 = vpop.xlane.xlu1 %1886 }
 0xf97   :  { %v1897_v35 = vmul.f32 0.032258064, %v1887_v56 }
 0xf98   :  { %12059 = vrsqrt.f32 %v1898_v55  ;;  %vm1910_vm5 = vcmp.eq.f32.partialorder %v1898_v55, inf  ;;  %vm1912_vm6 = vcmp.eq.f32.partialorder %v1898_v55, 0.0  ;;  %v1913_v62 = vand.u32 2147483648, %v1898_v55 }
 0xf99   :  { %12061 = vrsqrt.f32 %v1897_v35  ;;  %vm1903_vm7 = vcmp.eq.f32.partialorder %v1897_v35, inf  ;;  %v1906_v63 = vand.u32 2147483648, %v1897_v35  ;;  %vm1905_vm8 = vcmp.eq.f32.partialorder %v1897_v35, 0.0 }
 0xf9e   :  { %v1893_v39 = vpop.xlane.xlu1 %1892 }
 0xf9f   :  { %v1899_v57 = vmul.f32 0.032258064, %v1893_v39 }
 0xfa1   :  { %12063 = vrsqrt.f32 %v1899_v57  ;;  %vm1917_vm9 = vcmp.eq.f32.partialorder %v1899_v57, inf  ;;  %v1920_v20 = vand.u32 2147483648, %v1899_v57  ;;  %vm1919_vm10 = vcmp.eq.f32.partialorder %v1899_v57, 0.0 }
 0xfa2   :  { %v12060_v58 = vpop.eup %12059  ;;  %v1896_v59 = vpop.xlane.xlu0 %1895 }
 0xfa3   :  { %v12062_v48 = vpop.eup %12061  ;;  %v1909_v60 = vmul.f32 %v12060_v58, %v1898_v55  ;;  %v1900_v61 = vmul.f32 0.032258064, %v1896_v59 }
 0xfa4   :  { %v1902_v47 = vmul.f32 %v12062_v48, %v1897_v35 }
 0xfa5   :  { %v1911_v12 = vsel %vm1910_vm5, %v1898_v55, %v1909_v60  ;;  %12065 = vrsqrt.f32 %v1900_v61  ;;  %vm1924_vm11 = vcmp.eq.f32.partialorder %v1900_v61, inf  ;;  %v1927_v3 = vand.u32 2147483648, %v1900_v61 }
 0xfa6   :  { %v1914_v17 = vsel %vm1912_vm6, %v1913_v62, %v1911_v12  ;;  %v1904_v15 = vsel %vm1903_vm7, %v1897_v35, %v1902_v47  ;;  %vm1926_vm12 = vcmp.eq.f32.partialorder %v1900_v61, 0.0  ;;  %v9362_v35 = vld [vmem:[#allocation10] ss:$0 sm:$0xff] }
 0xfa7   :  { %v1940_v4 = vadd.f32 1e-06, %v1914_v17  ;;  %v1907_v1 = vsel %vm1905_vm8, %v1906_v63, %v1904_v15 }
 0xfa8   :  { %v1939_v0 = vadd.f32 1e-06, %v1907_v1 }
 0xfa9   :  { %12067 = vrcp.f32 %v1940_v4 }
 0xfaa   :  { %12069 = vrcp.f32 %v1939_v0 }
 0xfab   :  { %v12064_v14 = vpop.eup %12063 }
 0xfac   :  { %v1916_v19 = vmul.f32 %v12064_v14, %v1899_v57 }
 0xfae   :  { %v1918_v5 = vsel %vm1917_vm9, %v1899_v57, %v1916_v19 }
 0xfaf   :  { %v12066_v6 = vpop.eup %12065  ;;  %v1921_v8 = vsel %vm1919_vm10, %v1920_v20, %v1918_v5 }
 0xfb0   :  { %v1923_v9 = vmul.f32 %v12066_v6, %v1900_v61  ;;  %v1941_v2 = vadd.f32 1e-06, %v1921_v8 }
 0xfb2   :  { %v1925_v11 = vsel %vm1924_vm11, %v1900_v61, %v1923_v9  ;;  %12071 = vrcp.f32 %v1941_v2 }
 0xfb3   :  { %v12068_v18 = vpop.eup %12067  ;;  %v1928_v22 = vsel %vm1926_vm12, %v1927_v3, %v1925_v11 }
 0xfb4   :  { %v12070_v23 = vpop.eup %12069  ;;  %v1946_v26 = vmul.f32 %v12068_v18, %v1936_v10  ;;  %v1942_v31 = vadd.f32 1e-06, %v1928_v22 }
 0xfb5   :  { %v1944_v33 = vmul.f32 %v12070_v23, %v1935_v21 }
 0xfb6   :  { %12073 = vrcp.f32 %v1942_v31  ;;  %v1958_v37 = vadd.f32 %v9356_v25, %v1946_v26 }
 0xfb7   :  { %v1957_v34 = vadd.f32 %v9356_v25, %v1944_v33 }
 0xfb9   :  { %10259 = vmatprep.mubr.msk.f32.mxu0 %vm514_vm0, %v1957_v34 }
 0xfba   :  { %10260 = vmatmul.mubr.msk.f32.vlgmr.msra.gmra.mrb[20].mxu0 %vm514_vm0, %v1958_v37 }
 0xfbc   :  { %v12072_v38 = vpop.eup %12071 }
 0xfbd   :  { %v1948_v40 = vmul.f32 %v12072_v38, %v1937_v13  ;;  %v9371_v38 = vld [vmem:[%s15004_s5 + $0x30] sm:$0xff] }
 0xfbf   :  { %v1959_v41 = vadd.f32 %v9356_v25, %v1948_v40  ;;  %v9372_v40 = vld [vmem:[%s15004_s5 + $0x38] sm:$0xff] }
 0xfc0   :  { %v12074_v42 = vpop.eup %12073 }
 0xfc1   :  { %10262 = vmatprep.mubr.msk.f32.mxu0 %vm514_vm0, %v1959_v41  ;;  %v1950_v43 = vmul.f32 %v12074_v42, %v1938_v16  ;;  %v11051_v16 = vpack.c.bf16 %v9372_v40, %v9371_v38 }
 0xfc3   :  { %v1960_v44 = vadd.f32 %v9356_v25, %v1950_v43 }
 0xfc5   :  { %10263 = vmatmul.mubr.msk.f32.gmra.mrb[22].mxu0 %vm514_vm0, %v1960_v44 }
0x108d   :  { %v10261_v30 = vpop.f32.mrb[20].mxu0 }
0x108e   :  { %v2065_v27 = vadd.f32 %v10261_v30, %v9357_v29  ;;  %v2059_v50 = vpop.f32.mrb[21].mxu0 }
0x108f   :  { %v2060_v51 = vadd.f32 %v9357_v29, %v2059_v50 }
0x1090   :  { %v2079_v52 = vmax.f32 %v2065_v27, 0.0 }
0x1091   :  { %v2078_v36 = vmax.f32 %v2060_v51, 0.0 }
0x1093   :  { %10281 = vmatprep.mubr.msk.f32.mxu1 %vm2088_vm13, %v2078_v36 }
0x1094   :  { %10282 = vmatmul.mubr.msk.f32.vlgmr.msra.gmra.mrb[20].mxu1 %vm2088_vm13, %v2079_v52 }
0x1098   :  { %v10264_v53 = vpop.f32.mrb[22].mxu0 }
0x1099   :  { %v2075_v54 = vadd.f32 %v10264_v53, %v9357_v29  ;;  %v2069_v46 = vpop.f32.mrb[23].mxu0 }
0x109a   :  { %v2070_v45 = vadd.f32 %v9357_v29, %v2069_v46 }
0x109b   :  { %v2081_v56 = vmax.f32 %v2075_v54, 0.0 }
0x109c   :  { %v2080_v55 = vmax.f32 %v2070_v45, 0.0 }
0x109e   :  { %10284 = vmatprep.mubr.msk.f32.mxu1 %vm2088_vm13, %v2080_v55 }
0x109f   :  { %10285 = vmatmul.mubr.msk.f32.gmra.mrb[22].mxu1 %vm2088_vm13, %v2081_v56 }
0x1167   :  { %v10283_v39 = vpop.f32.mrb[20].mxu1 }
0x1168   :  { %v2173_v57 = vadd.f32 %v10283_v39, %v9362_v35  ;;  %v2167_v58 = vpop.f32.mrb[21].mxu1 }
0x1169   :  { %v2168_v59 = vadd.f32 %v9362_v35, %v2167_v58  ;;  %v9367_v58 = vld [vmem:[#allocation14] ss:$0 sm:$0xff] }
0x116a   :  { %v2189_v48 = vadd.f32 %v2173_v57, %v1958_v37  ;;  %v9370_v37 = vld [vmem:[%s15004_s5 + $0x28] sm:$0xff] }
0x116b   :  { %v2188_v60 = vadd.f32 %v2168_v59, %v1957_v34  ;;  %v9369_v34 = vld [vmem:[%s15004_s5 + $0x20] sm:$0xff] }
0x116c   :  { %v2195_v61 = vsel %vm514_vm0, %v2189_v48, 0.0  ;;  %v11047_v13 = vpack.c.bf16 %v9370_v37, %v9369_v34 }
0x116d   :  { %2196 = vadd.xlane.f32.xlu0 %v2195_v61  ;;  %v2192_v62 = vsel %vm514_vm0, %v2188_v60, 0.0 }
0x116e   :  { %2193 = vadd.xlane.f32.xlu1 %v2192_v62  ;;  %11048 = vmatprep.subr.bf16.mxu0 %v11047_v13 }
0x116f   :  { %11050 = vmatpush3.bf16.msra.mxu0 %v11047_v13 }
0x1170   :  { %11052 = vmatprep.subr.bf16.mxu0 %v11051_v16 }
0x1172   :  { %v10286_v47 = vpop.f32.mrb[22].mxu1 }
0x1173   :  { %v2183_v12 = vadd.f32 %v10286_v47, %v9362_v35  ;;  %v2177_v63 = vpop.f32.mrb[23].mxu1  ;;  %11054 = vmatpush3.bf16.msra.mxu0 %v11051_v16 }
0x1174   :  { %v2178_v17 = vadd.f32 %v9362_v35, %v2177_v63 }
0x1175   :  { %v2191_v15 = vadd.f32 %v2183_v12, %v1960_v44 }
0x1176   :  { %v2190_v4 = vadd.f32 %v2178_v17, %v1959_v41 }
0x1177   :  { %v2201_v1 = vsel %vm514_vm0, %v2191_v15, 0.0 }
0x1178   :  { %2202 = vadd.xlane.f32.xlu0 %v2201_v1  ;;  %v2198_v0 = vsel %vm514_vm0, %v2190_v4, 0.0 }
0x1179   :  { %2199 = vadd.xlane.f32.xlu1 %v2198_v0 }
0x11fa   :  { %v2197_v14 = vpop.xlane.xlu0 %2196 }
0x11fb   :  { %v2205_v19 = vmul.f32 0.03125, %v2197_v14  ;;  %v2194_v20 = vpop.xlane.xlu1 %2193  ;;  %v9368_v14 = vld [vmem:[#allocation16] ss:$0 sm:$0xff] }
0x11fc   :  { %v2204_v5 = vmul.f32 0.03125, %v2194_v20 }
0x11fd   :  { %v13803_v6 = vsub.f32 %v2189_v48, %v2205_v19 }
0x11fe   :  { %v13805_v7 = vsub.f32 %v2188_v60, %v2204_v5 }
0x11ff   :  { %v2213_v8 = vmul.f32 %v13803_v6, %v13803_v6  ;;  %v2267_v12 = vmul.f32 %v9367_v58, %v13803_v6 }
0x1200   :  { %v2212_v9 = vmul.f32 %v13805_v7, %v13805_v7 }
0x1201   :  { %v2219_v2 = vsel %vm514_vm0, %v2213_v8, 0.0 }
0x1202   :  { %2220 = vadd.xlane.f32.xlu0 %v2219_v2  ;;  %v2216_v3 = vsel %vm514_vm0, %v2212_v9, 0.0 }
0x1203   :  { %2217 = vadd.xlane.f32.xlu1 %v2216_v3 }
0x1205   :  { %v2203_v10 = vpop.xlane.xlu0 %2202 }
0x1206   :  { %v2207_v11 = vmul.f32 0.03125, %v2203_v10  ;;  %v2200_v18 = vpop.xlane.xlu1 %2199 }
0x1207   :  { %v2206_v21 = vmul.f32 0.03125, %v2200_v18 }
0x1208   :  { %v13813_v22 = vsub.f32 %v2191_v15, %v2207_v11 }
0x1209   :  { %v13815_v23 = vsub.f32 %v2190_v4, %v2206_v21  ;;  %v2266_v4 = vmul.f32 %v9367_v58, %v13805_v7  ;;  %v9377_v21 = vld [vmem:[#allocation5 + $0x1] ss:$0 sm:$0xff] }
0x120a   :  { %v2215_v25 = vmul.f32 %v13813_v22, %v13813_v22  ;;  %v2269_v6 = vmul.f32 %v9367_v58, %v13813_v22 }
0x120b   :  { %v2214_v26 = vmul.f32 %v13815_v23, %v13815_v23  ;;  %v2268_v9 = vmul.f32 %v9367_v58, %v13815_v23 }
0x120c   :  { %v2225_v31 = vsel %vm514_vm0, %v2215_v25, 0.0 }
0x120d   :  { %2226 = vadd.xlane.f32.xlu0 %v2225_v31  ;;  %v2222_v33 = vsel %vm514_vm0, %v2214_v26, 0.0 }
0x120e   :  { %2223 = vadd.xlane.f32.xlu1 %v2222_v33 }
0x128f   :  { %v2221_v41 = vpop.xlane.xlu0 %2220 }
0x1290   :  { %v2229_v42 = vmul.f32 0.032258064, %v2221_v41  ;;  %v2218_v43 = vpop.xlane.xlu1 %2217 }
0x1291   :  { %v2228_v44 = vmul.f32 0.032258064, %v2218_v43 }
0x1292   :  { %12075 = vrsqrt.f32 %v2229_v42  ;;  %vm2241_vm14 = vcmp.eq.f32.partialorder %v2229_v42, inf  ;;  %v2244_v51 = vand.u32 2147483648, %v2229_v42  ;;  %vm2243_vm15 = vcmp.eq.f32.partialorder %v2229_v42, 0.0 }
0x1293   :  { %12077 = vrsqrt.f32 %v2228_v44  ;;  %vm2234_vm5 = vcmp.eq.f32.partialorder %v2228_v44, inf  ;;  %v2237_v53 = vand.u32 2147483648, %v2228_v44  ;;  %vm2236_vm6 = vcmp.eq.f32.partialorder %v2228_v44, 0.0 }
0x129a   :  { %v2227_v32 = vpop.xlane.xlu0 %2226 }
0x129b   :  { %v2231_v28 = vmul.f32 0.032258064, %v2227_v32  ;;  %v2224_v49 = vpop.xlane.xlu1 %2223 }
0x129c   :  { %v12076_v29 = vpop.eup %12075  ;;  %v2230_v30 = vmul.f32 0.032258064, %v2224_v49 }
0x129d   :  { %v12078_v27 = vpop.eup %12077  ;;  %v2240_v50 = vmul.f32 %v12076_v29, %v2229_v42  ;;  %12079 = vrsqrt.f32 %v2231_v28  ;;  %vm2255_vm7 = vcmp.eq.f32.partialorder %v2231_v28, inf  ;;  %v2258_v59 = vand.u32 2147483648, %v2231_v28  ;;  %v13884_v29 = vld [vmem:[%s15006_s13 + $0x8] sm:$0xff] }
0x129e   :  { %v2233_v36 = vmul.f32 %v12078_v27, %v2228_v44  ;;  %12081 = vrsqrt.f32 %v2230_v30  ;;  %vm2257_vm8 = vcmp.eq.f32.partialorder %v2231_v28, 0.0  ;;  %vm2248_vm9 = vcmp.eq.f32.partialorder %v2230_v30, inf }
0x129f   :  { %v2242_v52 = vsel %vm2241_vm14, %v2229_v42, %v2240_v50  ;;  %v2251_v61 = vand.u32 2147483648, %v2230_v30  ;;  %vm2250_vm10 = vcmp.eq.f32.partialorder %v2230_v30, 0.0  ;;  %v13888_v50 = vld [vmem:[%s15006_s13] sm:$0xff] }
0x12a0   :  { %v2245_v54 = vsel %vm2243_vm15, %v2244_v51, %v2242_v52  ;;  %v2235_v46 = vsel %vm2234_vm5, %v2228_v44, %v2233_v36 }
0x12a1   :  { %v2271_v45 = vadd.f32 1e-06, %v2245_v54  ;;  %v2238_v55 = vsel %vm2236_vm6, %v2237_v53, %v2235_v46  ;;  %v13894_v54 = vld [vmem:[%s15006_s13 + $0x18] sm:$0xff] }
0x12a2   :  { %v2270_v56 = vadd.f32 1e-06, %v2238_v55 }
0x12a3   :  { %12083 = vrcp.f32 %v2271_v45 }
0x12a4   :  { %12085 = vrcp.f32 %v2270_v56  ;;  %v13901_v56 = vld [vmem:[%s15006_s13 + $0x10] sm:$0xff] }
0x12a7   :  { %v12080_v35 = vpop.eup %12079 }
0x12a8   :  { %v12082_v39 = vpop.eup %12081  ;;  %v2254_v57 = vmul.f32 %v12080_v35, %v2231_v28 }
0x12a9   :  { %v2247_v48 = vmul.f32 %v12082_v39, %v2230_v30 }
0x12aa   :  { %v2256_v60 = vsel %vm2255_vm7, %v2231_v28, %v2254_v57 }
0x12ab   :  { %v2249_v62 = vsel %vm2248_vm9, %v2230_v30, %v2247_v48  ;;  %v2259_v47 = vsel %vm2257_vm8, %v2258_v59, %v2256_v60 }
0x12ac   :  { %v2252_v63 = vsel %vm2250_vm10, %v2251_v61, %v2249_v62  ;;  %v2273_v17 = vadd.f32 1e-06, %v2259_v47 }
0x12ad   :  { %v12084_v15 = vpop.eup %12083  ;;  %v2272_v1 = vadd.f32 1e-06, %v2252_v63 }
0x12ae   :  { %v12086_v0 = vpop.eup %12085  ;;  %v2277_v19 = vmul.f32 %v12084_v15, %v2267_v12  ;;  %12087 = vrcp.f32 %v2273_v17 }
0x12af   :  { %v2275_v20 = vmul.f32 %v12086_v0, %v2266_v4  ;;  %12089 = vrcp.f32 %v2272_v1 }
0x12b0   :  { %v13831_v8 = vadd.f32 %v9368_v14, %v2277_v19 }
0x12b1   :  { %v13829_v5 = vadd.f32 %v9368_v14, %v2275_v20 }
0x12b3   :  { %10295 = vmatprep.mubr.msk.f32.mxu0 %vm514_vm0, %v13829_v5 }
0x12b4   :  { %10296 = vmatmul.mubr.msk.f32.vlgmr.msra.gmra.mrb[24].mxu0 %vm514_vm0, %v13831_v8 }
0x12b8   :  { %v12088_v7 = vpop.eup %12087 }
0x12b9   :  { %v12090_v2 = vpop.eup %12089  ;;  %v2281_v3 = vmul.f32 %v12088_v7, %v2269_v6 }
0x12ba   :  { %v2279_v10 = vmul.f32 %v12090_v2, %v2268_v9 }
0x12bb   :  { %v13841_v18 = vadd.f32 %v9368_v14, %v2281_v3 }
0x12bc   :  { %v13839_v11 = vadd.f32 %v9368_v14, %v2279_v10 }
0x12be   :  { %10298 = vmatprep.mubr.msk.f32.mxu0 %vm514_vm0, %v13839_v11 }
0x12bf   :  { %10299 = vmatmul.mubr.msk.f32.gmra.mrb[26].mxu0 %vm514_vm0, %v13841_v18 }
0x1387   :  { %v10297_v25 = vpop.f32.mrb[24].mxu0 }
0x1388   :  { %v13847_v26 = vadd.f32 %v10297_v25, %v9377_v21  ;;  %v2390_v22 = vpop.f32.mrb[25].mxu0 }
0x1389   :  { %v13849_v31 = vadd.f32 %v9377_v21, %v2390_v22 }
0x138b   :  { %10309 = vmatprep.mubr.msk.f32.mxu0 %vm624_vm1, %v13849_v31  ;;  %v13855_v23 = vpack.i.bf16 %v13847_v26, %v13849_v31 }
0x138d   :  { %11696 = vrot.lane.b32.xlu1 %v13855_v23, %s13043_s23 }
0x1392   :  { %v10300_v33 = vpop.f32.mrb[26].mxu0 }
0x1393   :  { %v13859_v34 = vadd.f32 %v10300_v33, %v9377_v21  ;;  %v2400_v37 = vpop.f32.mrb[27].mxu0 }
0x1394   :  { %v13861_v13 = vadd.f32 %v9377_v21, %v2400_v37 }
0x1396   :  { %v13865_v38 = vpack.i.bf16 %v13859_v34, %v13861_v13 }
0x1398   :  { %11701 = vrot.lane.b32.xlu0 %v13865_v38, %s13043_s23 }
0x13ff   :  { %v11697_v40 = vpop.permute.xlu1 %11696 }
0x1400   :  { %v11699_v16 = vunpack.i.h.bf16 %v11697_v40  ;;  %v11698_v41 = vunpack.i.l.bf16 %v11697_v40 }
0x1402   :  { %v11055_v42 = vpack.c.bf16 %v11699_v16, %v11698_v41 }
0x1404   :  { %11057 = vmatprep.subr.msk.bf16.mxu0 %vm13503_vm2, %v11055_v42 }
0x1405   :  { %11060 = vmatpush3.bf16.xpose.msk.msra.mxu0 %vm13503_vm2, %v11055_v42 }
0x140a   :  { %v11702_v43 = vpop.permute.xlu0 %11701 }
0x140b   :  { %v11704_v44 = vunpack.i.h.bf16 %v11702_v43  ;;  %v11703_v32 = vunpack.i.l.bf16 %v11702_v43 }
0x140d   :  { %v11061_v28 = vpack.c.bf16 %v11704_v44, %v11703_v32 }
0x140f   :  { %11063 = vmatprep.subr.msk.bf16.mxu0 %vm13503_vm2, %v11061_v28 }
0x1410   :  { %11066 = vmatpush3.bf16.xpose.msk.msra.mxu0 %vm13503_vm2, %v11061_v28 }
0x1417   :  { %10310 = vmatmul.mubr.msk.f32.vlgmr.msra.gmra.mrb[28].mxu0 %vm624_vm1, %v13847_v26 }
0x1418   :  { %10312 = vmatprep.mubr.msk.f32.mxu0 %vm624_vm1, %v13861_v13 }
0x141b   :  { %10313 = vmatmul.mubr.msk.f32.gmra.mrb[30].mxu0 %vm624_vm1, %v13859_v34 }
0x14ea   :  { %v10311_v49 = vpop.f32.mrb[28].mxu0 }
0x14eb   :  { %v2509_v30 = vadd.f32 %v13884_v29, %v10311_v49  ;;  %v2503_v27 = vpop.f32.mrb[29].mxu0 }
0x14ec   :  { %v2504_v51 = vadd.f32 %v13888_v50, %v2503_v27 }
0x14ed   :  { %v2525_v36 = vsel %vm514_vm0, %v2509_v30, -inf }
0x14ee   :  { %2526 = vmax.xlane.f32.xlu0 %v2525_v36  ;;  %v10314_v52 = vpop.f32.mrb[30].mxu0  ;;  %v2522_v53 = vsel %vm514_vm0, %v2504_v51, -inf }
0x14ef   :  { %v2519_v46 = vadd.f32 %v13894_v54, %v10314_v52  ;;  %v2513_v45 = vpop.f32.mrb[31].mxu0  ;;  %2523 = vmax.xlane.f32.xlu1 %v2522_v53 }
0x14f0   :  { %v2514_v35 = vadd.f32 %v13901_v56, %v2513_v45 }
0x14f1   :  { %v2531_v55 = vsel %vm514_vm0, %v2519_v46, -inf }
0x14f2   :  { %2532 = vmax.xlane.f32.xlu0 %v2531_v55  ;;  %v2528_v39 = vsel %vm514_vm0, %v2514_v35, -inf }
0x1500   :  { %11706 = vrot.lane.b32.xlu1 %v13855_v23, %s13044_s6 }
0x1524   :  { %2529 = vmax.xlane.f32.xlu1 %v2528_v39 }
0x1535   :  { %11716 = vrot.lane.b32.xlu1 %v13855_v23, %s13045_s28 }
0x157b   :  { %v2527_v57 = vpop.xlane.xlu0 %2526 }
0x157c   :  { %v2535_v58 = vsub.f32 %v2509_v30, %v2527_v57  ;;  %v2524_v59 = vpop.xlane.xlu1 %2523 }
0x157d   :  { %v2534_v48 = vsub.f32 %v2504_v51, %v2524_v59 }
0x157e   :  { %v2540_v60 = vmul.f32 1.442695, %v2535_v58 }
0x157f   :  { %v2538_v61 = vmul.f32 1.442695, %v2534_v48  ;;  %v2533_v0 = vpop.xlane.xlu0 %2532 }
0x1580   :  { %12091 = vpow2.f32 %v2540_v60  ;;  %v11707_v62 = vpop.permute.xlu1 %11706  ;;  %v2537_v14 = vsub.f32 %v2519_v46, %v2533_v0 }
0x1581   :  { %12093 = vpow2.f32 %v2538_v61  ;;  %v11709_v47 = vunpack.i.h.bf16 %v11707_v62  ;;  %v11708_v12 = vunpack.i.l.bf16 %v11707_v62 }
0x1582   :  { %v2544_v19 = vmul.f32 1.442695, %v2537_v14 }
0x1583   :  { %v11067_v63 = vpack.c.bf16 %v11709_v47, %v11708_v12 }
0x1584   :  { %12095 = vpow2.f32 %v2544_v19 }
0x1585   :  { %11068 = vmatprep.subr.bf16.mxu1 %v11067_v63 }
0x1586   :  { %11070 = vmatpush3.bf16.msra.mxu1 %v11067_v63 }
0x158a   :  { %v12092_v17 = vpop.eup %12091 }
0x158b   :  { %v12094_v15 = vpop.eup %12093  ;;  %v2549_v4 = vsel %vm514_vm0, %v12092_v17, 0.0 }
0x158c   :  { %2550 = vadd.xlane.f32.xlu0 %v2549_v4  ;;  %v2546_v1 = vsel %vm514_vm0, %v12094_v15, 0.0 }
0x158d   :  { %2547 = vadd.xlane.f32.xlu1 %v2546_v1 }
0x158e   :  { %v12096_v9 = vpop.eup %12095 }
0x158f   :  { %v2555_v3 = vsel %vm514_vm0, %v12096_v9, 0.0 }
0x159e   :  { %11721 = vrot.lane.b32.xlu1 %v13865_v38, %s13045_s28 }
0x15a2   :  { %11711 = vrot.lane.b32.xlu0 %v13865_v38, %s13044_s6 }
0x15b1   :  { %v2530_v20 = vpop.xlane.xlu1 %2529 }
0x15b2   :  { %v2536_v6 = vsub.f32 %v2514_v35, %v2530_v20 }
0x15b4   :  { %v2542_v7 = vmul.f32 1.442695, %v2536_v6 }
0x15b5   :  { %v11717_v21 = vpop.permute.xlu1 %11716 }
0x15b6   :  { %12097 = vpow2.f32 %v2542_v7  ;;  %v11719_v37 = vunpack.i.h.bf16 %v11717_v21  ;;  %v11718_v40 = vunpack.i.l.bf16 %v11717_v21 }
0x15b8   :  { %v11075_v43 = vpack.c.bf16 %v11719_v37, %v11718_v40 }
0x15c0   :  { %v12098_v2 = vpop.eup %12097 }
0x15c1   :  { %2556 = vadd.xlane.f32.xlu0 %v2555_v3  ;;  %v2552_v10 = vsel %vm514_vm0, %v12098_v2, 0.0 }
0x15c2   :  { %2553 = vadd.xlane.f32.xlu1 %v2552_v10 }
0x15d3   :  { %2677 = vrot.lane.b32.xlu1 %v13847_v26, %s13046_s20 }
0x15d7   :  { %2675 = vrot.lane.b32.xlu0 %v13849_v31, %s13046_s20  ;;  %2681 = vrot.lane.b32.xlu1 %v13859_v34, %s13046_s20 }
0x15db   :  { %2679 = vrot.lane.b32.xlu0 %v13861_v13, %s13046_s20 }
0x1619   :  { %v2551_v25 = vpop.xlane.xlu0 %2550 }
0x161a   :  { %12099 = vrcp.f32 %v2551_v25  ;;  %v2548_v22 = vpop.xlane.xlu1 %2547 }
0x161b   :  { %12101 = vrcp.f32 %v2548_v22 }
0x161d   :  { %v11712_v33 = vpop.permute.xlu0 %11711 }
0x161e   :  { %v11714_v16 = vunpack.i.h.bf16 %v11712_v33  ;;  %v11713_v41 = vunpack.i.l.bf16 %v11712_v33  ;;  %v11722_v32 = vpop.permute.xlu1 %11721 }
0x161f   :  { %v11724_v27 = vunpack.i.h.bf16 %v11722_v32  ;;  %v11723_v51 = vunpack.i.l.bf16 %v11722_v32 }
0x1620   :  { %v11071_v42 = vpack.c.bf16 %v11714_v16, %v11713_v41 }
0x1621   :  { %v11081_v36 = vpack.c.bf16 %v11724_v27, %v11723_v51 }
0x1622   :  { %11072 = vmatprep.subr.bf16.mxu1 %v11071_v42 }
0x1623   :  { %11074 = vmatpush3.bf16.msra.mxu1 %v11071_v42 }
0x1624   :  { %v12100_v44 = vpop.eup %12099  ;;  %11077 = vmatprep.subr.msk.bf16.mxu1 %vm13503_vm2, %v11075_v43 }
0x1625   :  { %v12102_v28 = vpop.eup %12101  ;;  %v2561_v30 = vmul.f32 %v12100_v44, %v12092_v17 }
0x1626   :  { %v2559_v49 = vmul.f32 %v12102_v28, %v12094_v15 }
0x1628   :  { %10323 = vmatprep.mubr.msk.f32.mxu1 %vm514_vm0, %v2559_v49 }
0x1629   :  { %10324 = vmatmul.mubr.msk.f32.vlgmr.msra.gmra.mrb[24].mxu1 %vm514_vm0, %v2561_v30 }
0x162c   :  { %11080 = vmatpush3.bf16.xpose.msk.msra.mxu1 %vm13503_vm2, %v11075_v43 }
0x162d   :  { %11083 = vmatprep.subr.msk.bf16.mxu1 %vm13503_vm2, %v11081_v36 }
0x1634   :  { %11086 = vmatpush3.bf16.xpose.msk.msra.mxu1 %vm13503_vm2, %v11081_v36 }
0x164e   :  { %v2557_v52 = vpop.xlane.xlu0 %2556 }
0x164f   :  { %12103 = vrcp.f32 %v2557_v52  ;;  %v2554_v53 = vpop.xlane.xlu1 %2553 }
0x1650   :  { %12105 = vrcp.f32 %v2554_v53 }
0x1652   :  { %v2676_v35 = vpop.permute.xlu0 %2675 }
0x1653   :  { %v2678_v57 = vpop.permute.xlu1 %2677 }
0x1656   :  { %v2680_v58 = vpop.permute.xlu0 %2679 }
0x1657   :  { %v2682_v59 = vpop.permute.xlu1 %2681 }
0x1659   :  { %v12104_v46 = vpop.eup %12103 }
0x165a   :  { %v12106_v45 = vpop.eup %12105  ;;  %v2565_v39 = vmul.f32 %v12104_v46, %v12096_v9 }
0x165b   :  { %v2563_v55 = vmul.f32 %v12106_v45, %v12098_v2 }
0x165d   :  { %10326 = vmatprep.mubr.msk.f32.mxu1 %vm514_vm0, %v2563_v55 }
0x165e   :  { %10327 = vmatmul.mubr.msk.f32.gmra.mrb[26].mxu1 %vm514_vm0, %v2565_v39 }
0x165f   :  { %10337 = vmatprep.mubr.msk.f32.mxu1 %vm624_vm1, %v2676_v35 }
0x1662   :  { %10338 = vmatmul.mubr.msk.f32.vlgmr.msra.gmra.mrb[28].mxu1 %vm624_vm1, %v2678_v57 }
0x1663   :  { %10340 = vmatprep.mubr.msk.f32.mxu1 %vm624_vm1, %v2680_v58 }
0x1666   :  { %10341 = vmatmul.mubr.msk.f32.gmra.mrb[30].mxu1 %vm624_vm1, %v2682_v59 }
0x16fc   :  { %v13939_v48 = vpop.f32.mrb[24].mxu1 }
0x16fd   :  { %v13941_v60 = vpop.f32.mrb[25].mxu1 }
0x1731   :  { %v13943_v61 = vpop.f32.mrb[26].mxu1 }
0x1732   :  { %v13945_v62 = vpop.f32.mrb[27].mxu1 }
0x1735   :  { %v10339_v47 = vpop.f32.mrb[28].mxu1 }
0x1736   :  { %v2779_v12 = vadd.f32 %v13884_v29, %v10339_v47  ;;  %v2773_v63 = vpop.f32.mrb[29].mxu1 }
0x1737   :  { %v2774_v17 = vadd.f32 %v13888_v50, %v2773_v63 }
0x1738   :  { %v2795_v15 = vsel %vm514_vm0, %v2779_v12, -inf }
0x1739   :  { %2796 = vmax.xlane.f32.xlu1 %v2795_v15  ;;  %v10342_v4 = vpop.f32.mrb[30].mxu1  ;;  %v2792_v1 = vsel %vm514_vm0, %v2774_v17, -inf }
0x173a   :  { %v2783_v0 = vpop.f32.mrb[31].mxu1  ;;  %2793 = vmax.xlane.f32.xlu0 %v2792_v1  ;;  %v2789_v19 = vadd.f32 %v13894_v54, %v10342_v4 }
0x173b   :  { %v2784_v14 = vadd.f32 %v13901_v56, %v2783_v0 }
0x173c   :  { %v2801_v6 = vsel %vm514_vm0, %v2789_v19, -inf }
0x173d   :  { %v2798_v20 = vsel %vm514_vm0, %v2784_v14, -inf }
0x173e   :  { %2799 = vmax.xlane.f32.xlu0 %v2798_v20 }
0x1742   :  { %2802 = vmax.xlane.f32.xlu0 %v2801_v6 }
0x174a   :  { %11726 = vrot.lane.b32.xlu1 %v13855_v23, %s13047_s1 }
0x174e   :  { %11736 = vrot.lane.b32.xlu1 %v13855_v23, %s13048_s30 }
0x17c6   :  { %v2797_v7 = vpop.xlane.xlu1 %2796 }
0x17c7   :  { %v2805_v9 = vsub.f32 %v2779_v12, %v2797_v7  ;;  %v2794_v2 = vpop.xlane.xlu0 %2793 }
0x17c8   :  { %v2804_v3 = vsub.f32 %v2774_v17, %v2794_v2 }
0x17c9   :  { %v2810_v10 = vmul.f32 1.442695, %v2805_v9 }
0x17ca   :  { %v2808_v21 = vmul.f32 1.442695, %v2804_v3  ;;  %v11727_v25 = vpop.permute.xlu1 %11726 }
0x17cb   :  { %12107 = vpow2.f32 %v2810_v10  ;;  %v11729_v22 = vunpack.i.h.bf16 %v11727_v25  ;;  %v11728_v33 = vunpack.i.l.bf16 %v11727_v25  ;;  %v2800_v43 = vpop.xlane.xlu0 %2799 }
0x17cc   :  { %12109 = vpow2.f32 %v2808_v21  ;;  %v2806_v28 = vsub.f32 %v2784_v14, %v2800_v43 }
0x17cd   :  { %v11087_v37 = vpack.c.bf16 %v11729_v22, %v11728_v33 }
0x17ce   :  { %v2812_v30 = vmul.f32 1.442695, %v2806_v28  ;;  %v11737_v53 = vpop.permute.xlu1 %11736 }
0x17cf   :  { %11088 = vmatprep.subr.bf16.mxu0 %v11087_v37  ;;  %v2803_v44 = vpop.xlane.xlu0 %2802  ;;  %v11739_v35 = vunpack.i.h.bf16 %v11737_v53  ;;  %v11738_v39 = vunpack.i.l.bf16 %v11737_v53 }
0x17d0   :  { %11090 = vmatpush3.bf16.msra.mxu0 %v11087_v37  ;;  %v2807_v32 = vsub.f32 %v2789_v19, %v2803_v44 }
0x17d1   :  { %v11095_v47 = vpack.c.bf16 %v11739_v35, %v11738_v39 }
0x17d2   :  { %v2814_v49 = vmul.f32 1.442695, %v2807_v32 }
0x17d4   :  { %12111 = vpow2.f32 %v2814_v49 }
0x17d5   :  { %v12108_v40 = vpop.eup %12107  ;;  %12113 = vpow2.f32 %v2812_v30 }
0x17d6   :  { %v12110_v16 = vpop.eup %12109  ;;  %v2819_v41 = vsel %vm514_vm0, %v12108_v40, 0.0 }
0x17d7   :  { %2820 = vadd.xlane.f32.xlu0 %v2819_v41  ;;  %v2816_v42 = vsel %vm514_vm0, %v12110_v16, 0.0 }
0x17d8   :  { %2817 = vadd.xlane.f32.xlu1 %v2816_v42 }
0x17de   :  { %v12112_v27 = vpop.eup %12111 }
0x17df   :  { %v12114_v51 = vpop.eup %12113  ;;  %v2825_v36 = vsel %vm514_vm0, %v12112_v27, 0.0 }
0x17e0   :  { %v2822_v52 = vsel %vm514_vm0, %v12114_v51, 0.0 }
0x17e9   :  { %11741 = vrot.lane.b32.xlu1 %v13865_v38, %s13048_s30 }
0x17ed   :  { %11731 = vrot.lane.b32.xlu0 %v13865_v38, %s13047_s1 }
0x180c   :  { %2826 = vadd.xlane.f32.xlu0 %v2825_v36 }
0x180d   :  { %2823 = vadd.xlane.f32.xlu1 %v2822_v52 }
0x181e   :  { %2947 = vrot.lane.b32.xlu1 %v13847_v26, %s13049_s2 }
0x1822   :  { %2951 = vrot.lane.b32.xlu1 %v13859_v34, %s13049_s2  ;;  %2945 = vrot.lane.b32.xlu0 %v13849_v31, %s13049_s2 }
0x1826   :  { %2949 = vrot.lane.b32.xlu0 %v13861_v13, %s13049_s2 }
0x1864   :  { %v2821_v46 = vpop.xlane.xlu0 %2820 }
0x1865   :  { %12115 = vrcp.f32 %v2821_v46  ;;  %v2818_v45 = vpop.xlane.xlu1 %2817 }
0x1866   :  { %12117 = vrcp.f32 %v2818_v45 }
0x1868   :  { %v11732_v55 = vpop.permute.xlu0 %11731 }
0x1869   :  { %v11734_v57 = vunpack.i.h.bf16 %v11732_v55  ;;  %v11733_v58 = vunpack.i.l.bf16 %v11732_v55  ;;  %v11742_v63 = vpop.permute.xlu1 %11741 }
0x186a   :  { %v11744_v1 = vunpack.i.h.bf16 %v11742_v63  ;;  %v11743_v0 = vunpack.i.l.bf16 %v11742_v63 }
0x186b   :  { %v11091_v59 = vpack.c.bf16 %v11734_v57, %v11733_v58 }
0x186c   :  { %v11101_v14 = vpack.c.bf16 %v11744_v1, %v11743_v0 }
0x186d   :  { %11092 = vmatprep.subr.bf16.mxu0 %v11091_v59 }
0x186e   :  { %11094 = vmatpush3.bf16.msra.mxu0 %v11091_v59 }
0x186f   :  { %v12116_v12 = vpop.eup %12115  ;;  %11097 = vmatprep.subr.msk.bf16.mxu0 %vm13503_vm2, %v11095_v47 }
0x1870   :  { %v12118_v17 = vpop.eup %12117  ;;  %v2831_v4 = vmul.f32 %v12116_v12, %v12108_v40 }
0x1871   :  { %v2829_v15 = vmul.f32 %v12118_v17, %v12110_v16 }
0x1873   :  { %10351 = vmatprep.mubr.msk.f32.mxu0 %vm514_vm0, %v2829_v15 }
0x1874   :  { %10352 = vmatmul.mubr.msk.f32.vlgmr.msra.gmra.mrb[32].mxu0 %vm514_vm0, %v2831_v4 }
0x1877   :  { %11100 = vmatpush3.bf16.xpose.msk.msra.mxu0 %vm13503_vm2, %v11095_v47 }
0x1878   :  { %11103 = vmatprep.subr.msk.bf16.mxu0 %vm13503_vm2, %v11101_v14 }
0x187f   :  { %11106 = vmatpush3.bf16.xpose.msk.msra.mxu0 %vm13503_vm2, %v11101_v14 }
0x1899   :  { %v2827_v19 = vpop.xlane.xlu0 %2826 }
0x189a   :  { %12119 = vrcp.f32 %v2827_v19  ;;  %v2824_v20 = vpop.xlane.xlu1 %2823 }
0x189b   :  { %12121 = vrcp.f32 %v2824_v20 }
0x189d   :  { %v2946_v2 = vpop.permute.xlu0 %2945 }
0x189e   :  { %v2948_v10 = vpop.permute.xlu1 %2947 }
0x18a1   :  { %v2950_v21 = vpop.permute.xlu0 %2949 }
0x18a2   :  { %v2952_v25 = vpop.permute.xlu1 %2951 }
0x18a4   :  { %v12120_v6 = vpop.eup %12119 }
0x18a5   :  { %v12122_v7 = vpop.eup %12121  ;;  %v2835_v3 = vmul.f32 %v12120_v6, %v12112_v27 }
0x18a6   :  { %v2833_v9 = vmul.f32 %v12122_v7, %v12114_v51 }
0x18a8   :  { %10354 = vmatprep.mubr.msk.f32.mxu0 %vm514_vm0, %v2833_v9 }
0x18a9   :  { %10355 = vmatmul.mubr.msk.f32.gmra.mrb[34].mxu0 %vm514_vm0, %v2835_v3 }
0x18aa   :  { %10365 = vmatprep.mubr.msk.f32.mxu0 %vm624_vm1, %v2946_v2 }
0x18ad   :  { %10366 = vmatmul.mubr.msk.f32.vlgmr.msra.gmra.mrb[36].mxu0 %vm624_vm1, %v2948_v10 }
0x18ae   :  { %10368 = vmatprep.mubr.msk.f32.mxu0 %vm624_vm1, %v2950_v21 }
0x18b1   :  { %10369 = vmatmul.mubr.msk.f32.gmra.mrb[38].mxu0 %vm624_vm1, %v2952_v25 }
0x1947   :  { %v13991_v22 = vpop.f32.mrb[32].mxu0 }
0x1948   :  { %v13993_v33 = vpop.f32.mrb[33].mxu0 }
0x197c   :  { %v13995_v37 = vpop.f32.mrb[34].mxu0 }
0x197d   :  { %v13997_v40 = vpop.f32.mrb[35].mxu0 }
0x1980   :  { %v10367_v16 = vpop.f32.mrb[36].mxu0 }
0x1981   :  { %v3049_v41 = vadd.f32 %v13884_v29, %v10367_v16  ;;  %v3043_v42 = vpop.f32.mrb[37].mxu0 }
0x1982   :  { %v3044_v43 = vadd.f32 %v13888_v50, %v3043_v42 }
0x1983   :  { %v3065_v44 = vsel %vm514_vm0, %v3049_v41, -inf }
0x1984   :  { %3066 = vmax.xlane.f32.xlu1 %v3065_v44  ;;  %v10370_v32 = vpop.f32.mrb[38].mxu0  ;;  %v3062_v28 = vsel %vm514_vm0, %v3044_v43, -inf }
0x1985   :  { %v3053_v49 = vpop.f32.mrb[39].mxu0  ;;  %3063 = vmax.xlane.f32.xlu0 %v3062_v28  ;;  %v3059_v27 = vadd.f32 %v13894_v54, %v10370_v32 }
0x1986   :  { %v3054_v30 = vadd.f32 %v13901_v56, %v3053_v49 }
0x1987   :  { %v3071_v36 = vsel %vm514_vm0, %v3059_v27, -inf }
0x1988   :  { %v3068_v51 = vsel %vm514_vm0, %v3054_v30, -inf }
0x1989   :  { %3069 = vmax.xlane.f32.xlu0 %v3068_v51 }
0x198d   :  { %3072 = vmax.xlane.f32.xlu0 %v3071_v36 }
0x1995   :  { %11746 = vrot.lane.b32.xlu1 %v13855_v23, %s13050_s17 }
0x1999   :  { %11756 = vrot.lane.b32.xlu1 %v13855_v23, %s13051_s7 }
0x199d   :  { %11761 = vrot.lane.b32.xlu1 %v13865_v38, %s13051_s7 }
0x1a11   :  { %v3067_v52 = vpop.xlane.xlu1 %3066 }
0x1a12   :  { %v3075_v53 = vsub.f32 %v3049_v41, %v3067_v52  ;;  %v3064_v46 = vpop.xlane.xlu0 %3063 }
0x1a13   :  { %v3074_v45 = vsub.f32 %v3044_v43, %v3064_v46 }
0x1a14   :  { %v3080_v55 = vmul.f32 1.442695, %v3075_v53 }
0x1a15   :  { %v3078_v35 = vmul.f32 1.442695, %v3074_v45  ;;  %v11747_v39 = vpop.permute.xlu1 %11746 }
0x1a16   :  { %12123 = vpow2.f32 %v3080_v55  ;;  %v11749_v57 = vunpack.i.h.bf16 %v11747_v39  ;;  %v11748_v58 = vunpack.i.l.bf16 %v11747_v39  ;;  %v3070_v15 = vpop.xlane.xlu0 %3069 }
0x1a17   :  { %12125 = vpow2.f32 %v3078_v35  ;;  %v3076_v0 = vsub.f32 %v3054_v30, %v3070_v15 }
0x1a18   :  { %v11107_v59 = vpack.c.bf16 %v11749_v57, %v11748_v58 }
0x1a19   :  { %v3082_v19 = vmul.f32 1.442695, %v3076_v0 }
0x1a1a   :  { %11108 = vmatprep.subr.bf16.mxu1 %v11107_v59  ;;  %v3073_v4 = vpop.xlane.xlu0 %3072 }
0x1a1b   :  { %11110 = vmatpush3.bf16.msra.mxu1 %v11107_v59  ;;  %v3077_v1 = vsub.f32 %v3059_v27, %v3073_v4 }
0x1a1d   :  { %v3084_v14 = vmul.f32 1.442695, %v3077_v1 }
0x1a1f   :  { %12127 = vpow2.f32 %v3084_v14 }
0x1a20   :  { %v12124_v47 = vpop.eup %12123  ;;  %12129 = vpow2.f32 %v3082_v19 }
0x1a21   :  { %v12126_v12 = vpop.eup %12125  ;;  %v3089_v63 = vsel %vm514_vm0, %v12124_v47, 0.0 }
0x1a22   :  { %3090 = vadd.xlane.f32.xlu0 %v3089_v63  ;;  %v3086_v17 = vsel %vm514_vm0, %v12126_v12, 0.0 }
0x1a23   :  { %3087 = vadd.xlane.f32.xlu1 %v3086_v17 }
0x1a29   :  { %v12128_v20 = vpop.eup %12127 }
0x1a2a   :  { %v12130_v6 = vpop.eup %12129  ;;  %v3095_v7 = vsel %vm514_vm0, %v12128_v20, 0.0 }
0x1a2b   :  { %v3092_v9 = vsel %vm514_vm0, %v12130_v6, 0.0 }
0x1a34   :  { %3217 = vrot.lane.b32.xlu1 %v13847_v26, %s13052_s25  ;;  %v11757_v26 = vpop.permute.xlu1 %11756 }
0x1a35   :  { %v11759_v25 = vunpack.i.h.bf16 %v11757_v26  ;;  %v11758_v16 = vunpack.i.l.bf16 %v11757_v26 }
0x1a37   :  { %v11115_v44 = vpack.c.bf16 %v11759_v25, %v11758_v16 }
0x1a38   :  { %11751 = vrot.lane.b32.xlu0 %v13865_v38, %s13050_s17  ;;  %v11762_v2 = vpop.permute.xlu1 %11761 }
0x1a39   :  { %v11764_v32 = vunpack.i.h.bf16 %v11762_v2  ;;  %v11763_v28 = vunpack.i.l.bf16 %v11762_v2 }
0x1a3b   :  { %v11121_v30 = vpack.c.bf16 %v11764_v32, %v11763_v28 }
0x1a57   :  { %3096 = vadd.xlane.f32.xlu0 %v3095_v7 }
0x1a58   :  { %3093 = vadd.xlane.f32.xlu1 %v3092_v9 }
0x1a69   :  { %3221 = vrot.lane.b32.xlu1 %v13859_v34, %s13052_s25 }
0x1a6d   :  { %3215 = vrot.lane.b32.xlu0 %v13849_v31, %s13052_s25 }
0x1a71   :  { %3219 = vrot.lane.b32.xlu0 %v13861_v13, %s13052_s25 }
0x1aaf   :  { %v3091_v3 = vpop.xlane.xlu0 %3090 }
0x1ab0   :  { %12131 = vrcp.f32 %v3091_v3  ;;  %v3088_v10 = vpop.xlane.xlu1 %3087 }
0x1ab1   :  { %12133 = vrcp.f32 %v3088_v10 }
0x1ab3   :  { %v11752_v21 = vpop.permute.xlu0 %11751 }
0x1ab4   :  { %v11754_v41 = vunpack.i.h.bf16 %v11752_v21  ;;  %v11753_v42 = vunpack.i.l.bf16 %v11752_v21  ;;  %v3218_v27 = vpop.permute.xlu1 %3217 }
0x1ab6   :  { %v11111_v43 = vpack.c.bf16 %v11754_v41, %v11753_v42 }
0x1ab8   :  { %11112 = vmatprep.subr.bf16.mxu1 %v11111_v43 }
0x1ab9   :  { %11114 = vmatpush3.bf16.msra.mxu1 %v11111_v43 }
0x1aba   :  { %v12132_v34 = vpop.eup %12131  ;;  %11117 = vmatprep.subr.msk.bf16.mxu1 %vm13503_vm2, %v11115_v44 }
0x1abb   :  { %v12134_v31 = vpop.eup %12133  ;;  %v3101_v49 = vmul.f32 %v12132_v34, %v12124_v47 }
0x1abc   :  { %v3099_v13 = vmul.f32 %v12134_v31, %v12126_v12 }
0x1abe   :  { %10379 = vmatprep.mubr.msk.f32.mxu1 %vm514_vm0, %v3099_v13 }
0x1abf   :  { %10380 = vmatmul.mubr.msk.f32.vlgmr.msra.gmra.mrb[32].mxu1 %vm514_vm0, %v3101_v49 }
0x1ac2   :  { %11120 = vmatpush3.bf16.xpose.msk.msra.mxu1 %vm13503_vm2, %v11115_v44 }
0x1ac3   :  { %11123 = vmatprep.subr.msk.bf16.mxu1 %vm13503_vm2, %v11121_v30 }
0x1aca   :  { %11126 = vmatpush3.bf16.xpose.msk.msra.mxu1 %vm13503_vm2, %v11121_v30 }
0x1ae4   :  { %v3097_v51 = vpop.xlane.xlu0 %3096 }
0x1ae5   :  { %12135 = vrcp.f32 %v3097_v51  ;;  %v3094_v36 = vpop.xlane.xlu1 %3093 }
0x1ae6   :  { %12137 = vrcp.f32 %v3094_v36 }
0x1ae8   :  { %v3216_v45 = vpop.permute.xlu0 %3215 }
0x1ae9   :  { %v3222_v39 = vpop.permute.xlu1 %3221 }
0x1aec   :  { %v3220_v35 = vpop.permute.xlu0 %3219 }
0x1aef   :  { %v12136_v52 = vpop.eup %12135 }
0x1af0   :  { %v12138_v53 = vpop.eup %12137  ;;  %v3105_v55 = vmul.f32 %v12136_v52, %v12128_v20 }
0x1af1   :  { %v3103_v46 = vmul.f32 %v12138_v53, %v12130_v6 }
0x1af3   :  { %10382 = vmatprep.mubr.msk.f32.mxu1 %vm514_vm0, %v3103_v46 }
0x1af4   :  { %10383 = vmatmul.mubr.msk.f32.gmra.mrb[34].mxu1 %vm514_vm0, %v3105_v55 }
0x1af5   :  { %10393 = vmatprep.mubr.msk.f32.mxu1 %vm624_vm1, %v3216_v45 }
0x1af8   :  { %10394 = vmatmul.mubr.msk.f32.vlgmr.msra.gmra.mrb[36].mxu1 %vm624_vm1, %v3218_v27 }
0x1af9   :  { %10396 = vmatprep.mubr.msk.f32.mxu1 %vm624_vm1, %v3220_v35 }
0x1afc   :  { %10397 = vmatmul.mubr.msk.f32.gmra.mrb[38].mxu1 %vm624_vm1, %v3222_v39 }
0x1b92   :  { %v10381_v57 = vpop.f32.mrb[32].mxu1 }
0x1b93   :  { %v3196_v58 = vpop.f32.mrb[33].mxu1 }
0x1bc7   :  { %v10384_v59 = vpop.f32.mrb[34].mxu1 }
0x1bc8   :  { %v3206_v47 = vpop.f32.mrb[35].mxu1 }
0x1bcb   :  { %v10395_v12 = vpop.f32.mrb[36].mxu1 }
0x1bcc   :  { %v3319_v63 = vadd.f32 %v13884_v29, %v10395_v12  ;;  %v3313_v17 = vpop.f32.mrb[37].mxu1 }
0x1bcd   :  { %v3314_v15 = vadd.f32 %v13888_v50, %v3313_v17 }
0x1bce   :  { %v3335_v4 = vsel %vm514_vm0, %v3319_v63, -inf }
0x1bcf   :  { %3336 = vmax.xlane.f32.xlu1 %v3335_v4  ;;  %v10398_v1 = vpop.f32.mrb[38].mxu1  ;;  %v3332_v0 = vsel %vm514_vm0, %v3314_v15, -inf }
0x1bd0   :  { %v3323_v14 = vpop.f32.mrb[39].mxu1  ;;  %3333 = vmax.xlane.f32.xlu0 %v3332_v0  ;;  %v3329_v20 = vadd.f32 %v13894_v54, %v10398_v1 }
0x1bd1   :  { %v3324_v19 = vadd.f32 %v13901_v56, %v3323_v14 }
0x1bd2   :  { %v3341_v29 = vsel %vm514_vm0, %v3329_v20, -inf }
0x1bd3   :  { %v3338_v6 = vsel %vm514_vm0, %v3324_v19, -inf }
0x1bd4   :  { %3339 = vmax.xlane.f32.xlu0 %v3338_v6 }
0x1bd8   :  { %3342 = vmax.xlane.f32.xlu0 %v3341_v29 }
0x1c5c   :  { %v3337_v7 = vpop.xlane.xlu1 %3336 }
0x1c5d   :  { %v3345_v50 = vsub.f32 %v3319_v63, %v3337_v7  ;;  %v3334_v9 = vpop.xlane.xlu0 %3333  ;;  %v9376_v63 = vld [vmem:[%s15009_s29 + $0x38] sm:$0xff] }
0x1c5e   :  { %v3344_v26 = vsub.f32 %v3314_v15, %v3334_v9 }
0x1c5f   :  { %v3350_v2 = vmul.f32 1.442695, %v3345_v50 }
0x1c60   :  { %v3348_v3 = vmul.f32 1.442695, %v3344_v26 }
0x1c61   :  { %12139 = vpow2.f32 %v3350_v2  ;;  %v3340_v10 = vpop.xlane.xlu0 %3339 }
0x1c62   :  { %12141 = vpow2.f32 %v3348_v3  ;;  %v3346_v21 = vsub.f32 %v3324_v19, %v3340_v10 }
0x1c64   :  { %v3352_v25 = vmul.f32 1.442695, %v3346_v21 }
0x1c65   :  { %v3343_v56 = vpop.xlane.xlu0 %3342 }
0x1c66   :  { %12143 = vpow2.f32 %v3352_v25  ;;  %v3347_v54 = vsub.f32 %v3329_v20, %v3343_v56 }
0x1c68   :  { %v3354_v16 = vmul.f32 1.442695, %v3347_v54 }
0x1c6a   :  { %12145 = vpow2.f32 %v3354_v16 }
0x1c6b   :  { %v12140_v41 = vpop.eup %12139 }
0x1c6c   :  { %v12142_v42 = vpop.eup %12141  ;;  %v3359_v43 = vsel %vm514_vm0, %v12140_v41, 0.0 }
0x1c6d   :  { %3360 = vadd.xlane.f32.xlu0 %v3359_v43  ;;  %v3356_v44 = vsel %vm514_vm0, %v12142_v42, 0.0 }
0x1c6e   :  { %3357 = vadd.xlane.f32.xlu1 %v3356_v44 }
0x1c70   :  { %v12144_v34 = vpop.eup %12143 }
0x1c71   :  { %v3362_v31 = vsel %vm514_vm0, %v12144_v34, 0.0 }
0x1c72   :  { %3363 = vadd.xlane.f32.xlu1 %v3362_v31 }
0x1c74   :  { %v12146_v13 = vpop.eup %12145 }
0x1c75   :  { %v3365_v32 = vsel %vm514_vm0, %v12146_v13, 0.0 }
0x1c76   :  { %3366 = vadd.xlane.f32.xlu0 %v3365_v32 }
0x1c83   :  { %11766 = vrot.lane.b32.xlu1 %v13855_v23, %s13053_s10 }
0x1c87   :  { %3489 = vrot.lane.b32.xlu1 %v13993_v33, %s13030_s24 }
0x1c8b   :  { %3491 = vrot.lane.b32.xlu1 %v13991_v22, %s13030_s24 }
0x1c8c   :  { %11771 = vrot.lane.b32.xlu0 %v13865_v38, %s13053_s10 }
0x1c8f   :  { %3507 = vrot.lane.b32.xlu1 %v10381_v57, %s13016_s22 }
0x1c90   :  { %3505 = vrot.lane.b32.xlu0 %v3196_v58, %s13016_s22  ;;  %v9373_v58 = vld [vmem:[%s15009_s29 + $0x20] sm:$0xff] }
0x1c93   :  { %3495 = vrot.lane.b32.xlu1 %v13995_v37, %s13030_s24 }
0x1c94   :  { %3493 = vrot.lane.b32.xlu0 %v13997_v40, %s13030_s24 }
0x1c97   :  { %3511 = vrot.lane.b32.xlu1 %v10384_v59, %s13016_s22  ;;  %v9374_v59 = vld [vmem:[%s15009_s29 + $0x28] sm:$0xff] }
0x1c98   :  { %3509 = vrot.lane.b32.xlu0 %v3206_v47, %s13016_s22  ;;  %v9375_v47 = vld [vmem:[%s15009_s29 + $0x30] sm:$0xff]  ;;  %v11135_v12 = vpack.c.bf16 %v9374_v59, %v9373_v58 }
0x1c99   :  { %v11139_v17 = vpack.c.bf16 %v9376_v63, %v9375_v47 }
0x1cfa   :  { %v3361_v22 = vpop.xlane.xlu0 %3360 }
0x1cfb   :  { %v3358_v23 = vpop.xlane.xlu1 %3357 }
0x1cfc   :  { %12147 = vrcp.f32 %v3358_v23 }
0x1cfd   :  { %12149 = vrcp.f32 %v3361_v22 }
0x1cff   :  { %v3364_v33 = vpop.xlane.xlu1 %3363 }
0x1d00   :  { %12151 = vrcp.f32 %v3364_v33 }
0x1d03   :  { %v11767_v38 = vpop.permute.xlu1 %11766  ;;  %v3367_v28 = vpop.xlane.xlu0 %3366 }
0x1d04   :  { %v11769_v49 = vunpack.i.h.bf16 %v11767_v38  ;;  %v11768_v30 = vunpack.i.l.bf16 %v11767_v38  ;;  %12153 = vrcp.f32 %v3367_v28 }
0x1d06   :  { %v12148_v27 = vpop.eup %12147  ;;  %v11127_v37 = vpack.c.bf16 %v11769_v49, %v11768_v30 }
0x1d07   :  { %v11772_v51 = vpop.permute.xlu0 %11771  ;;  %v3369_v36 = vmul.f32 %v12148_v27, %v12142_v42  ;;  %v12150_v46 = vpop.eup %12149 }
0x1d08   :  { %v11774_v40 = vunpack.i.h.bf16 %v11772_v51  ;;  %v11773_v52 = vunpack.i.l.bf16 %v11772_v51  ;;  %11128 = vmatprep.subr.bf16.mxu0 %v11127_v37  ;;  %v3371_v55 = vmul.f32 %v12150_v46, %v12140_v41  ;;  %v3490_v14 = vpop.permute.xlu1 %3489 }
0x1d09   :  { %11130 = vmatpush3.bf16.msra.mxu0 %v11127_v37  ;;  %10407 = vmatprep.mubr.msk.f32.mxu0 %vm514_vm0, %v3369_v36  ;;  %v3533_v26 = vsel %vm624_vm1, %v13941_v60, %v3490_v14  ;;  %v9439_v14 = vld [vmem:[%s15010_s14 + $0x30] sm:$0xff] }
0x1d0a   :  { %v11131_v53 = vpack.c.bf16 %v11774_v40, %v11773_v52  ;;  %v12152_v45 = vpop.eup %12151 }
0x1d0b   :  { %v3373_v39 = vmul.f32 %v12152_v45, %v12144_v34  ;;  %v3506_v6 = vpop.permute.xlu0 %3505 }
0x1d0c   :  { %11132 = vmatprep.subr.bf16.mxu0 %v11131_v53  ;;  %v3492_v19 = vpop.permute.xlu1 %3491  ;;  %v3537_v10 = vsel %vm1741_vm3, %v3533_v26, %v3506_v6  ;;  %v9442_v26 = vld [vmem:[%s15011_s19 + $0x48] sm:$0xff] }
0x1d0d   :  { %11134 = vmatpush3.bf16.msra.mxu0 %v11131_v53  ;;  %v3534_v3 = vsel %vm624_vm1, %v13939_v48, %v3492_v19 }
0x1d0e   :  { %v12154_v35 = vpop.eup %12153  ;;  %11136 = vmatprep.subr.bf16.mxu0 %v11135_v12 }
0x1d0f   :  { %v3375_v57 = vmul.f32 %v12154_v35, %v12146_v13  ;;  %v3494_v7 = vpop.permute.xlu0 %3493 }
0x1d10   :  { %10408 = vmatmul.mubr.msk.f32.vlgmr.msra.gmra.mrb[40].mxu0 %vm514_vm0, %v3371_v55  ;;  %v3508_v20 = vpop.permute.xlu1 %3507  ;;  %v3535_v16 = vsel %vm624_vm1, %v13945_v62, %v3494_v7  ;;  %v9430_v62 = vld [vmem:[#allocation7 + $0x1] ss:$0 sm:$0xff]  ;;  %v4093_v7 = vld [vmem:[%s15012_s0 + $0x8] sm:$0xff] }
0x1d11   :  { %10410 = vmatprep.mubr.msk.f32.mxu0 %vm514_vm0, %v3373_v39  ;;  %11138 = vmatpush3.bf16.msra.mxu0 %v11135_v12  ;;  %v3538_v25 = vsel %vm1741_vm3, %v3534_v3, %v3508_v20  ;;  %v9440_v20 = vld [vmem:[%s15010_s14 + $0x38] sm:$0xff] }
0x1d12   :  { %11140 = vmatprep.subr.bf16.mxu0 %v11139_v17  ;;  %v11147_v6 = vpack.c.bf16 %v9440_v20, %v9439_v14 }
0x1d13   :  { %v3510_v9 = vpop.permute.xlu0 %3509 }
0x1d14   :  { %10411 = vmatmul.mubr.msk.f32.gmra.mrb[42].mxu0 %vm514_vm0, %v3375_v57  ;;  %v3496_v29 = vpop.permute.xlu1 %3495  ;;  %v3539_v41 = vsel %vm1741_vm3, %v3535_v16, %v3510_v9  ;;  %v9441_v9 = vld [vmem:[%s15011_s19 + $0x40] sm:$0xff] }
0x1d15   :  { %11142 = vmatpush3.bf16.msra.mxu0 %v11139_v17  ;;  %v3536_v48 = vsel %vm624_vm1, %v13943_v61, %v3496_v29  ;;  %v4092_v29 = vld [vmem:[%s15012_s0] sm:$0xff]  ;;  %v11151_v3 = vpack.c.bf16 %v9442_v26, %v9441_v9 }
0x1d16   :  { %v14167_v26 = vld [vmem:[#allocation2] sm:$0xff] }
0x1d17   :  { %11152 = vmatprep.subr.bf16.mxu0 %v11151_v3 }
0x1d18   :  { %v3512_v50 = vpop.permute.xlu1 %3511 }
0x1d19   :  { %v3540_v43 = vsel %vm1741_vm3, %v3536_v48, %v3512_v50  ;;  %v14137_v50 = vpack.c.bf16 %v4093_v7, %v4092_v29 }
0x1de3   :  { %v10409_v15 = vpop.f32.mrb[40].mxu0 }
0x1de4   :  { %3523 = vrot.lane.b32.xlu1 %v10409_v15, %s13054_s21  ;;  %v3466_v4 = vpop.f32.mrb[41].mxu0 }
0x1de5   :  { %3521 = vrot.lane.b32.xlu0 %v3466_v4, %s13054_s21 }
0x1de7   :  { %v10412_v1 = vpop.f32.mrb[42].mxu0 }
0x1de8   :  { %3527 = vrot.lane.b32.xlu1 %v10412_v1, %s13054_s21  ;;  %v3476_v0 = vpop.f32.mrb[43].mxu0  ;;  %v9437_v1 = vld [vmem:[%s15010_s14 + $0x20] sm:$0xff] }
0x1de9   :  { %3525 = vrot.lane.b32.xlu0 %v3476_v0, %s13054_s21  ;;  %v9438_v0 = vld [vmem:[%s15010_s14 + $0x28] sm:$0xff] }
0x1dea   :  { %v11143_v19 = vpack.c.bf16 %v9438_v0, %v9437_v1  ;;  %v4095_v1 = vld [vmem:[%s15012_s0 + $0x18] sm:$0xff] }
0x1dec   :  { %11144 = vmatprep.subr.bf16.mxu1 %v11143_v19 }
0x1ded   :  { %11146 = vmatpush3.bf16.msra.mxu1 %v11143_v19 }
0x1dee   :  { %11148 = vmatprep.subr.bf16.mxu1 %v11147_v6 }
0x1df1   :  { %11150 = vmatpush3.bf16.msra.mxu1 %v11147_v6 }
0x1df2   :  { %11168 = vmatprep.subr.bf16.mxu1 %v14137_v50 }
0x1e56   :  { %v3524_v2 = vpop.permute.xlu1 %3523 }
0x1e57   :  { %v3522_v21 = vpop.permute.xlu0 %3521  ;;  %v3542_v54 = vsel %vm1746_vm4, %v3538_v25, %v3524_v2  ;;  %v9443_v2 = vld [vmem:[%s15011_s19 + $0x50] sm:$0xff]  ;;  %v9445_v25 = vld [vmem:[%s15011_s19 + $0x60] sm:$0xff] }
0x1e58   :  { %v3541_v56 = vsel %vm1746_vm4, %v3537_v10, %v3522_v21  ;;  %v9444_v10 = vld [vmem:[%s15011_s19 + $0x58] sm:$0xff] }
0x1e59   :  { %10421 = vmatprep.mubr.msk.f32.mxu0 %vm514_vm0, %v3541_v56  ;;  %v11155_v21 = vpack.c.bf16 %v9444_v10, %v9443_v2  ;;  %v9446_v56 = vld [vmem:[%s15011_s19 + $0x68] sm:$0xff]  ;;  %v9448_v2 = vld [vmem:[%s15011_s19 + $0x78] sm:$0xff]  ;;  %v9449_v10 = vld [vmem:[#allocation8 + $0x1] ss:$0 sm:$0xff] }
0x1e5a   :  { %10422 = vmatmul.mubr.msk.f32.vlgmr.msra.gmra.mrb[44].mxu0 %vm514_vm0, %v3542_v54  ;;  %v3528_v60 = vpop.permute.xlu1 %3527  ;;  %v11159_v54 = vpack.c.bf16 %v9446_v56, %v9445_v25 }
0x1e5b   :  { %v3526_v42 = vpop.permute.xlu0 %3525  ;;  %v3544_v34 = vsel %vm1746_vm4, %v3540_v43, %v3528_v60  ;;  %11154 = vmatpush3.bf16.msra.mxu0 %v11151_v3 }
0x1e5c   :  { %v3543_v44 = vsel %vm1746_vm4, %v3539_v41, %v3526_v42  ;;  %11156 = vmatprep.subr.bf16.mxu0 %v11155_v21 }
0x1e5d   :  { %10424 = vmatprep.mubr.msk.f32.mxu0 %vm514_vm0, %v3543_v44 }
0x1e5e   :  { %10425 = vmatmul.mubr.msk.f32.gmra.mrb[46].mxu0 %vm514_vm0, %v3544_v34 }
0x1e5f   :  { %11158 = vmatpush3.bf16.msra.mxu0 %v11155_v21 }
0x1e60   :  { %11160 = vmatprep.subr.bf16.mxu0 %v11159_v54 }
0x1e63   :  { %11162 = vmatpush3.bf16.msra.mxu0 %v11159_v54 }
0x1f2d   :  { %v10423_v31 = vpop.f32.mrb[44].mxu0 }
0x1f2e   :  { %v3635_v13 = vadd.f32 %v10423_v31, %v9430_v62  ;;  %v3629_v32 = vpop.f32.mrb[45].mxu0 }
0x1f2f   :  { %v3630_v23 = vadd.f32 %v9430_v62, %v3629_v32 }
0x1f30   :  { %v3653_v61 = vadd.f32 %v3635_v13, %v13831_v8 }
0x1f31   :  { %v3652_v22 = vadd.f32 %v3630_v23, %v13829_v5  ;;  %v10426_v33 = vpop.f32.mrb[46].mxu0 }
0x1f32   :  { %v3639_v38 = vpop.f32.mrb[47].mxu0  ;;  %v3659_v28 = vsel %vm514_vm0, %v3653_v61, 0.0  ;;  %v3645_v49 = vadd.f32 %v10426_v33, %v9430_v62 }
0x1f33   :  { %v3640_v30 = vadd.f32 %v9430_v62, %v3639_v38  ;;  %3660 = vadd.xlane.f32.xlu1 %v3659_v28  ;;  %v3656_v27 = vsel %vm514_vm0, %v3652_v22, 0.0 }
0x1f34   :  { %3657 = vadd.xlane.f32.xlu0 %v3656_v27  ;;  %v3655_v51 = vadd.f32 %v3645_v49, %v13841_v18 }
0x1f35   :  { %v3654_v37 = vadd.f32 %v3640_v30, %v13839_v11 }
0x1f36   :  { %v3665_v8 = vsel %vm514_vm0, %v3655_v51, 0.0 }
0x1f37   :  { %v3662_v36 = vsel %vm514_vm0, %v3654_v37, 0.0 }
0x1f38   :  { %3663 = vadd.xlane.f32.xlu0 %v3662_v36 }
0x1f3c   :  { %3666 = vadd.xlane.f32.xlu0 %v3665_v8 }
0x1fc0   :  { %v3661_v5 = vpop.xlane.xlu1 %3660 }
0x1fc1   :  { %v3669_v40 = vmul.f32 0.03125, %v3661_v5  ;;  %v3658_v52 = vpop.xlane.xlu0 %3657 }
0x1fc2   :  { %v3668_v53 = vmul.f32 0.03125, %v3658_v52 }
0x1fc3   :  { %v14111_v46 = vsub.f32 %v3653_v61, %v3669_v40 }
0x1fc4   :  { %v14113_v45 = vsub.f32 %v3652_v22, %v3668_v53 }
0x1fc5   :  { %v3664_v55 = vpop.xlane.xlu0 %3663  ;;  %v3677_v11 = vmul.f32 %v14111_v46, %v14111_v46 }
0x1fc6   :  { %v3670_v35 = vmul.f32 0.03125, %v3664_v55  ;;  %v3676_v18 = vmul.f32 %v14113_v45, %v14113_v45 }
0x1fc7   :  { %v3683_v39 = vsel %vm514_vm0, %v3677_v11, 0.0  ;;  %v9435_v11 = vld [vmem:[#allocation11 + $0x1] ss:$0 sm:$0xff] }
0x1fc8   :  { %v14120_v57 = vsub.f32 %v3654_v37, %v3670_v35  ;;  %3684 = vadd.xlane.f32.xlu0 %v3683_v39  ;;  %v3680_v58 = vsel %vm514_vm0, %v3676_v18, 0.0  ;;  %v3731_v39 = vmul.f32 %v9435_v11, %v14111_v46 }
0x1fc9   :  { %3681 = vadd.xlane.f32.xlu1 %v3680_v58  ;;  %v3667_v59 = vpop.xlane.xlu0 %3666 }
0x1fca   :  { %v3671_v47 = vmul.f32 0.03125, %v3667_v59  ;;  %v3678_v12 = vmul.f32 %v14120_v57, %v14120_v57  ;;  %v3730_v59 = vmul.f32 %v9435_v11, %v14113_v45  ;;  %v3732_v0 = vmul.f32 %v9435_v11, %v14120_v57 }
0x1fcc   :  { %v14125_v63 = vsub.f32 %v3655_v51, %v3671_v47  ;;  %v3686_v17 = vsel %vm514_vm0, %v3678_v12, 0.0  ;;  %v9436_v12 = vld [vmem:[#allocation13 + $0x1] ss:$0 sm:$0xff] }
0x1fcd   :  { %3687 = vadd.xlane.f32.xlu1 %v3686_v17 }
0x1fce   :  { %v3679_v15 = vmul.f32 %v14125_v63, %v14125_v63  ;;  %v3733_v45 = vmul.f32 %v9435_v11, %v14125_v63  ;;  %v14173_v63 = vld [vmem:[#allocation2 + $0x8] sm:$0xff] }
0x1fd0   :  { %v3689_v4 = vsel %vm514_vm0, %v3679_v15, 0.0 }
0x1fd1   :  { %3690 = vadd.xlane.f32.xlu0 %v3689_v4  ;;  %v4094_v4 = vld [vmem:[%s15012_s0 + $0x10] sm:$0xff] }
0x1fd2   :  { %v11171_v6 = vpack.c.bf16 %v4095_v1, %v4094_v4 }
0x2055   :  { %v3685_v16 = vpop.xlane.xlu0 %3684 }
0x2056   :  { %v3693_v60 = vmul.f32 0.032258064, %v3685_v16  ;;  %v3682_v48 = vpop.xlane.xlu1 %3681 }
0x2057   :  { %v3692_v41 = vmul.f32 0.032258064, %v3682_v48 }
0x2058   :  { %12155 = vrsqrt.f32 %v3693_v60  ;;  %vm3705_vm11 = vcmp.eq.f32.partialorder %v3693_v60, inf  ;;  %v3708_v32 = vand.u32 2147483648, %v3693_v60  ;;  %vm3707_vm12 = vcmp.eq.f32.partialorder %v3693_v60, 0.0 }
0x2059   :  { %12157 = vrsqrt.f32 %v3692_v41  ;;  %vm3698_vm14 = vcmp.eq.f32.partialorder %v3692_v41, inf  ;;  %v3701_v22 = vand.u32 2147483648, %v3692_v41  ;;  %vm3700_vm15 = vcmp.eq.f32.partialorder %v3692_v41, 0.0 }
0x205a   :  { %v3688_v42 = vpop.xlane.xlu1 %3687 }
0x205b   :  { %v3694_v43 = vmul.f32 0.032258064, %v3688_v42 }
0x205d   :  { %12159 = vrsqrt.f32 %v3694_v43  ;;  %vm3712_vm5 = vcmp.eq.f32.partialorder %v3694_v43, inf  ;;  %v3715_v51 = vand.u32 2147483648, %v3694_v43  ;;  %vm3714_vm6 = vcmp.eq.f32.partialorder %v3694_v43, 0.0 }
0x205e   :  { %v3691_v44 = vpop.xlane.xlu0 %3690 }
0x205f   :  { %v3695_v34 = vmul.f32 0.032258064, %v3691_v44  ;;  %v9461_v44 = vld [vmem:[#allocation17] ss:$0 sm:$0xff] }
0x2061   :  { %12161 = vrsqrt.f32 %v3695_v34  ;;  %vm3719_vm7 = vcmp.eq.f32.partialorder %v3695_v34, inf  ;;  %v3722_v53 = vand.u32 2147483648, %v3695_v34  ;;  %vm3721_vm8 = vcmp.eq.f32.partialorder %v3695_v34, 0.0 }
0x2062   :  { %v12156_v62 = vpop.eup %12155 }
0x2063   :  { %v12158_v31 = vpop.eup %12157  ;;  %v3704_v13 = vmul.f32 %v12156_v62, %v3693_v60 }
0x2064   :  { %v3697_v23 = vmul.f32 %v12158_v31, %v3692_v41 }
0x2065   :  { %v3706_v61 = vsel %vm3705_vm11, %v3693_v60, %v3704_v13 }
0x2066   :  { %v3709_v33 = vsel %vm3707_vm12, %v3708_v32, %v3706_v61  ;;  %v3699_v38 = vsel %vm3698_vm14, %v3692_v41, %v3697_v23 }
0x2067   :  { %v12160_v28 = vpop.eup %12159  ;;  %v3735_v49 = vadd.f32 1e-06, %v3709_v33  ;;  %v3702_v30 = vsel %vm3700_vm15, %v3701_v22, %v3699_v38 }
0x2068   :  { %v3711_v27 = vmul.f32 %v12160_v28, %v3694_v43  ;;  %v3734_v37 = vadd.f32 1e-06, %v3702_v30 }
0x2069   :  { %12163 = vrcp.f32 %v3735_v49 }
0x206a   :  { %v3713_v36 = vsel %vm3712_vm5, %v3694_v43, %v3711_v27  ;;  %12165 = vrcp.f32 %v3734_v37 }
0x206b   :  { %v12162_v8 = vpop.eup %12161  ;;  %v3716_v5 = vsel %vm3714_vm6, %v3715_v51, %v3713_v36 }
0x206c   :  { %v3718_v40 = vmul.f32 %v12162_v8, %v3695_v34  ;;  %v3736_v52 = vadd.f32 1e-06, %v3716_v5  ;;  %v14214_v8 = vld [vmem:[%s15013_s15 + $0x8] sm:$0xff]  ;;  %v14217_v5 = vld [vmem:[%s15013_s15] sm:$0xff] }
0x206e   :  { %v3720_v55 = vsel %vm3719_vm7, %v3695_v34, %v3718_v40  ;;  %12167 = vrcp.f32 %v3736_v52 }
0x206f   :  { %v3723_v35 = vsel %vm3721_vm8, %v3722_v53, %v3720_v55 }
0x2070   :  { %v3737_v18 = vadd.f32 1e-06, %v3723_v35 }
0x2072   :  { %12169 = vrcp.f32 %v3737_v18 }
0x2073   :  { %v12164_v58 = vpop.eup %12163 }
0x2074   :  { %v12166_v47 = vpop.eup %12165  ;;  %v3741_v17 = vmul.f32 %v12164_v58, %v3731_v39 }
0x2075   :  { %v3739_v15 = vmul.f32 %v12166_v47, %v3730_v59 }
0x2076   :  { %v14153_v20 = vadd.f32 %v9436_v12, %v3741_v17 }
0x2077   :  { %v14151_v14 = vadd.f32 %v9436_v12, %v3739_v15 }
0x2078   :  { %v12168_v19 = vpop.eup %12167 }
0x2079   :  { %10435 = vmatprep.mubr.msk.f32.mxu1 %vm514_vm0, %v14151_v14  ;;  %v3743_v46 = vmul.f32 %v12168_v19, %v3732_v0 }
0x207a   :  { %10436 = vmatmul.mubr.msk.f32.vlgmr.msra.gmra.mrb[40].mxu1 %vm514_vm0, %v14153_v20 }
0x207b   :  { %v14160_v29 = vadd.f32 %v9436_v12, %v3743_v46  ;;  %11170 = vmatpush3.bf16.msra.mxu1 %v14137_v50  ;;  %v9447_v50 = vld [vmem:[%s15011_s19 + $0x70] sm:$0xff] }
0x207c   :  { %v12170_v57 = vpop.eup %12169  ;;  %11172 = vmatprep.subr.bf16.mxu1 %v11171_v6  ;;  %v11163_v3 = vpack.c.bf16 %v9448_v2, %v9447_v50 }
0x207d   :  { %10438 = vmatprep.mubr.msk.f32.mxu1 %vm514_vm0, %v14160_v29  ;;  %v3745_v7 = vmul.f32 %v12170_v57, %v3733_v45 }
0x207e   :  { %11164 = vmatprep.subr.bf16.mxu0 %v11163_v3 }
0x207f   :  { %v14165_v9 = vadd.f32 %v9436_v12, %v3745_v7  ;;  %11174 = vmatpush3.bf16.msra.mxu1 %v11171_v6  ;;  %11166 = vmatpush3.bf16.msra.mxu0 %v11163_v3 }
0x2081   :  { %10439 = vmatmul.mubr.msk.f32.gmra.mrb[42].mxu1 %vm514_vm0, %v14165_v9 }
0x2082   :  { %10471 = vmatprep.mubr.msk.f32.mxu1 %vm514_vm0, %v14167_v26 }
0x2085   :  { %10472 = vmatmul.mubr.msk.f32.vlgmr.msra.gmra.mrb[44].mxu1 %vm514_vm0, %v14173_v63 }
0x214d   :  { %v10437_v21 = vpop.f32.mrb[40].mxu1 }
0x214e   :  { %v3864_v25 = vadd.f32 %v10437_v21, %v9449_v10  ;;  %v3858_v56 = vpop.f32.mrb[41].mxu1 }
0x214f   :  { %v3859_v54 = vadd.f32 %v9449_v10, %v3858_v56 }
0x2150   :  { %v3878_v60 = vmax.f32 %v3864_v25, 0.0 }
0x2151   :  { %v3877_v16 = vmax.f32 %v3859_v54, 0.0 }
0x2153   :  { %10457 = vmatprep.mubr.msk.f32.mxu0 %vm2088_vm13, %v3877_v16 }
0x2154   :  { %v10440_v48 = vpop.f32.mrb[42].mxu1  ;;  %10458 = vmatmul.mubr.msk.f32.vlgmr.msra.gmra.mrb[48].mxu0 %vm2088_vm13, %v3878_v60 }
0x2155   :  { %v3874_v41 = vadd.f32 %v10440_v48, %v9449_v10  ;;  %v3868_v42 = vpop.f32.mrb[43].mxu1 }
0x2156   :  { %v3869_v43 = vadd.f32 %v9449_v10, %v3868_v42 }
0x2157   :  { %v3880_v31 = vmax.f32 %v3874_v41, 0.0 }
0x2158   :  { %v3879_v34 = vmax.f32 %v3869_v43, 0.0  ;;  %v10473_v62 = vpop.f32.mrb[44].mxu1 }
0x2159   :  { %v14181_v13 = vadd.f32 %v10473_v62, %v9461_v44  ;;  %v4180_v32 = vpop.f32.mrb[45].mxu1 }
0x215a   :  { %v14183_v23 = vadd.f32 %v9461_v44, %v4180_v32  ;;  %10460 = vmatprep.mubr.msk.f32.mxu0 %vm2088_vm13, %v3879_v34 }
0x215b   :  { %10461 = vmatmul.mubr.msk.f32.gmra.mrb[50].mxu0 %vm2088_vm13, %v3880_v31 }
0x215c   :  { %4387 = vrot.lane.b32.xlu0 %v14183_v23, %s13046_s20  ;;  %10478 = vmatprep.mubr.msk.f32.mxu1 %vm624_vm1, %v14183_v23  ;;  %v14193_v61 = vpack.i.bf16 %v14181_v13, %v14183_v23 }
0x215e   :  { %11776 = vrot.lane.b32.xlu1 %v14193_v61, %s13045_s28 }
0x2162   :  { %4389 = vrot.lane.b32.xlu1 %v14181_v13, %s13046_s20 }
0x21ce   :  { %v4388_v22 = vpop.permute.xlu0 %4387 }
0x21cf   :  { %10492 = vmatprep.mubr.msk.f32.mxu0 %vm624_vm1, %v4388_v22 }
0x21d0   :  { %v11777_v33 = vpop.permute.xlu1 %11776 }
0x21d1   :  { %v11779_v38 = vunpack.i.h.bf16 %v11777_v33  ;;  %v11778_v28 = vunpack.i.l.bf16 %v11777_v33 }
0x21d3   :  { %v11185_v49 = vpack.c.bf16 %v11779_v38, %v11778_v28 }
0x21d4   :  { %v4390_v30 = vpop.permute.xlu1 %4389 }
0x21d5   :  { %11187 = vmatprep.subr.msk.bf16.mxu0 %vm13503_vm2, %v11185_v49 }
0x21d6   :  { %11190 = vmatpush3.bf16.xpose.msk.msra.mxu0 %vm13503_vm2, %v11185_v49 }
0x21dd   :  { %10493 = vmatmul.mubr.msk.f32.vlgmr.msra.gmra.mrb[52].mxu0 %vm624_vm1, %v4390_v30 }
0x2227   :  { %v14205_v27 = vpop.f32.mrb[48].mxu0 }
0x2228   :  { %v14207_v37 = vpop.f32.mrb[49].mxu0 }
0x222e   :  { %v14209_v51 = vpop.f32.mrb[50].mxu0 }
0x222f   :  { %v14211_v36 = vpop.f32.mrb[51].mxu0 }
0x22b0   :  { %v10494_v40 = vpop.f32.mrb[52].mxu0 }
0x22b1   :  { %v4475_v52 = vadd.f32 %v10494_v40, %v14214_v8  ;;  %v4469_v53 = vpop.f32.mrb[53].mxu0 }
0x22b2   :  { %v4470_v55 = vadd.f32 %v4469_v53, %v14217_v5 }
0x22b3   :  { %v4481_v11 = vsel %vm1741_vm3, %v4475_v52, -inf }
0x22b4   :  { %4482 = vmax.xlane.f32.xlu0 %v4481_v11  ;;  %v4478_v35 = vsel %vm1741_vm3, %v4470_v55, -inf }
0x22b5   :  { %4479 = vmax.xlane.f32.xlu1 %v4478_v35 }
0x2341   :  { %v4483_v18 = vpop.xlane.xlu0 %4482 }
0x2342   :  { %v4485_v39 = vsub.f32 %v4475_v52, %v4483_v18  ;;  %v4480_v58 = vpop.xlane.xlu1 %4479 }
0x2343   :  { %v4484_v59 = vsub.f32 %v4470_v55, %v4480_v58 }
0x2344   :  { %v4488_v47 = vmul.f32 1.442695, %v4485_v39 }
0x2345   :  { %v4486_v12 = vmul.f32 1.442695, %v4484_v59 }
0x2346   :  { %12171 = vpow2.f32 %v4488_v47 }
0x2347   :  { %12173 = vpow2.f32 %v4486_v12 }
0x2350   :  { %v12172_v17 = vpop.eup %12171 }
0x2351   :  { %v12174_v15 = vpop.eup %12173  ;;  %v4493_v4 = vsel %vm1741_vm3, %v12172_v17, 0.0 }
0x2352   :  { %4494 = vadd.xlane.f32.xlu1 %v4493_v4  ;;  %v4490_v1 = vsel %vm1741_vm3, %v12174_v15, 0.0 }
0x2353   :  { %4491 = vadd.xlane.f32.xlu0 %v4490_v1 }
0x2363   :  { %11786 = vrot.lane.b32.xlu1 %v14193_v61, %s13047_s1 }
0x2367   :  { %11791 = vrot.lane.b32.xlu1 %v14193_v61, %s13048_s30 }
0x2369   :  { %11781 = vrot.lane.b32.xlu0 %v14193_v61, %s13043_s23 }
0x236b   :  { %4589 = vrot.lane.b32.xlu1 %v14181_v13, %s13049_s2 }
0x236d   :  { %4587 = vrot.lane.b32.xlu0 %v14183_v23, %s13049_s2 }
0x23df   :  { %v4495_v0 = vpop.xlane.xlu1 %4494 }
0x23e0   :  { %12175 = vrcp.f32 %v4495_v0  ;;  %v4492_v19 = vpop.xlane.xlu0 %4491 }
0x23e1   :  { %12177 = vrcp.f32 %v4492_v19 }
0x23e3   :  { %v11787_v6 = vpop.permute.xlu1 %11786 }
0x23e4   :  { %v11789_v46 = vunpack.i.h.bf16 %v11787_v6  ;;  %v11788_v45 = vunpack.i.l.bf16 %v11787_v6  ;;  %v11782_v57 = vpop.permute.xlu0 %11781 }
0x23e5   :  { %v11784_v7 = vunpack.i.h.bf16 %v11782_v57  ;;  %v11783_v50 = vunpack.i.l.bf16 %v11782_v57 }
0x23e6   :  { %v11191_v2 = vpack.c.bf16 %v11789_v46, %v11788_v45 }
0x23e7   :  { %v11175_v3 = vpack.c.bf16 %v11784_v7, %v11783_v50  ;;  %v11792_v10 = vpop.permute.xlu1 %11791 }
0x23e8   :  { %v11794_v21 = vunpack.i.h.bf16 %v11792_v10  ;;  %v11793_v25 = vunpack.i.l.bf16 %v11792_v10  ;;  %11192 = vmatprep.subr.bf16.mxu0 %v11191_v2  ;;  %v4588_v41 = vpop.permute.xlu0 %4587 }
0x23e9   :  { %11177 = vmatprep.subr.msk.bf16.mxu1 %vm13503_vm2, %v11175_v3  ;;  %11194 = vmatpush3.bf16.msra.mxu0 %v11191_v2 }
0x23ea   :  { %v12176_v56 = vpop.eup %12175  ;;  %v11195_v54 = vpack.c.bf16 %v11794_v21, %v11793_v25  ;;  %11180 = vmatpush3.bf16.xpose.msk.msra.mxu1 %vm13503_vm2, %v11175_v3 }
0x23eb   :  { %v12178_v16 = vpop.eup %12177  ;;  %v4499_v48 = vmul.f32 %v12176_v56, %v12172_v17  ;;  %v4590_v42 = vpop.permute.xlu1 %4589 }
0x23ec   :  { %11197 = vmatprep.subr.msk.bf16.mxu0 %vm13503_vm2, %v11195_v54  ;;  %v4497_v60 = vmul.f32 %v12178_v16, %v12174_v15 }
0x23ee   :  { %10499 = vmatprep.mubr.msk.f32.mxu0 %vm1741_vm3, %v4497_v60 }
0x23ef   :  { %10500 = vmatmul.mubr.msk.f32.vlgmr.msra.gmra.mrb[54].mxu0 %vm1741_vm3, %v4499_v48 }
0x23f0   :  { %10506 = vmatprep.mubr.msk.f32.mxu0 %vm624_vm1, %v4588_v41 }
0x23f1   :  { %10479 = vmatmul.mubr.msk.f32.vlgmr.msra.gmra.mrb[46].mxu1 %vm624_vm1, %v14181_v13 }
0x23f2   :  { %11200 = vmatpush3.bf16.xpose.msk.msra.mxu0 %vm13503_vm2, %v11195_v54 }
0x23f9   :  { %10507 = vmatmul.mubr.msk.f32.vlgmr.msra.gmra.mrb[56].mxu0 %vm624_vm1, %v4590_v42 }
0x24c2   :  { %v14249_v43 = vpop.f32.mrb[54].mxu0 }
0x24c3   :  { %v14251_v44 = vpop.f32.mrb[55].mxu0 }
0x24c4   :  { %v10480_v34 = vpop.f32.mrb[46].mxu1 }
0x24c5   :  { %v4275_v62 = vadd.f32 %v10480_v34, %v14214_v8  ;;  %v4269_v31 = vpop.f32.mrb[47].mxu1 }
0x24c6   :  { %v4270_v32 = vadd.f32 %v4269_v31, %v14217_v5 }
0x24c7   :  { %v4281_v22 = vsel %vm1741_vm3, %v4275_v62, -inf }
0x24c8   :  { %4282 = vmax.xlane.f32.xlu1 %v4281_v22  ;;  %v4278_v33 = vsel %vm1741_vm3, %v4270_v32, -inf }
0x24c9   :  { %4279 = vmax.xlane.f32.xlu0 %v4278_v33 }
0x24cc   :  { %v10508_v38 = vpop.f32.mrb[56].mxu0 }
0x24cd   :  { %v4669_v28 = vpop.f32.mrb[57].mxu0  ;;  %v4675_v30 = vadd.f32 %v10508_v38, %v14214_v8 }
0x24ce   :  { %v4670_v49 = vadd.f32 %v4669_v28, %v14217_v5 }
0x24cf   :  { %v4681_v52 = vsel %vm1741_vm3, %v4675_v30, -inf }
0x24d0   :  { %v4678_v40 = vsel %vm1741_vm3, %v4670_v49, -inf }
0x24d1   :  { %4679 = vmax.xlane.f32.xlu0 %v4678_v40 }
0x24d5   :  { %4682 = vmax.xlane.f32.xlu0 %v4681_v52 }
0x2555   :  { %v4283_v53 = vpop.xlane.xlu1 %4282 }
0x2556   :  { %v4285_v55 = vsub.f32 %v4275_v62, %v4283_v53  ;;  %v4280_v11 = vpop.xlane.xlu0 %4279 }
0x2557   :  { %v4284_v35 = vsub.f32 %v4270_v32, %v4280_v11 }
0x2558   :  { %v4288_v18 = vmul.f32 1.442695, %v4285_v55 }
0x2559   :  { %v4286_v39 = vmul.f32 1.442695, %v4284_v35 }
0x255a   :  { %12179 = vpow2.f32 %v4288_v18 }
0x255b   :  { %12181 = vpow2.f32 %v4286_v39 }
0x255e   :  { %v4680_v58 = vpop.xlane.xlu0 %4679 }
0x255f   :  { %v4684_v6 = vsub.f32 %v4670_v49, %v4680_v58 }
0x2561   :  { %v4686_v46 = vmul.f32 1.442695, %v4684_v6 }
0x2562   :  { %v4683_v59 = vpop.xlane.xlu0 %4682 }
0x2563   :  { %v4685_v47 = vsub.f32 %v4675_v30, %v4683_v59 }
0x2564   :  { %v12180_v12 = vpop.eup %12179 }
0x2565   :  { %v12182_v17 = vpop.eup %12181  ;;  %v4688_v15 = vmul.f32 1.442695, %v4685_v47  ;;  %v4293_v4 = vsel %vm1741_vm3, %v12180_v12, 0.0 }
0x2566   :  { %4294 = vadd.xlane.f32.xlu0 %v4293_v4  ;;  %v4290_v1 = vsel %vm1741_vm3, %v12182_v17, 0.0 }
0x2567   :  { %12183 = vpow2.f32 %v4688_v15  ;;  %4291 = vadd.xlane.f32.xlu1 %v4290_v1 }
0x2568   :  { %12185 = vpow2.f32 %v4686_v46 }
0x2571   :  { %v12184_v0 = vpop.eup %12183 }
0x2572   :  { %v4693_v19 = vsel %vm1741_vm3, %v12184_v0, 0.0  ;;  %v12186_v45 = vpop.eup %12185 }
0x2573   :  { %4694 = vadd.xlane.f32.xlu0 %v4693_v19  ;;  %v4690_v57 = vsel %vm1741_vm3, %v12186_v45, 0.0 }
0x2578   :  { %11796 = vrot.lane.b32.xlu1 %v14193_v61, %s13044_s6 }
0x257c   :  { %11806 = vrot.lane.b32.xlu1 %v14193_v61, %s13051_s7 }
0x2589   :  { %11801 = vrot.lane.b32.xlu0 %v14193_v61, %s13050_s17 }
0x258d   :  { %4789 = vrot.lane.b32.xlu0 %v14181_v13, %s13052_s25 }
0x25a0   :  { %4691 = vadd.xlane.f32.xlu1 %v4690_v57 }
0x25b1   :  { %4787 = vrot.lane.b32.xlu1 %v14183_v23, %s13052_s25 }
0x25f3   :  { %v4295_v7 = vpop.xlane.xlu0 %4294 }
0x25f4   :  { %12187 = vrcp.f32 %v4295_v7  ;;  %v4292_v50 = vpop.xlane.xlu1 %4291 }
0x25f5   :  { %12189 = vrcp.f32 %v4292_v50 }
0x25f8   :  { %v11797_v2 = vpop.permute.xlu1 %11796 }
0x25f9   :  { %v11799_v3 = vunpack.i.h.bf16 %v11797_v2  ;;  %v11798_v10 = vunpack.i.l.bf16 %v11797_v2 }
0x25fb   :  { %v11181_v21 = vpack.c.bf16 %v11799_v3, %v11798_v10  ;;  %v4097_v3 = vld [vmem:[%s15014_s16] sm:$0xff]  ;;  %v4098_v10 = vld [vmem:[%s15014_s16 + $0x8] sm:$0xff] }
0x25fc   :  { %v11807_v60 = vpop.permute.xlu1 %11806 }
0x25fd   :  { %11182 = vmatprep.subr.bf16.mxu1 %v11181_v21  ;;  %v11809_v48 = vunpack.i.h.bf16 %v11807_v60  ;;  %v11808_v41 = vunpack.i.l.bf16 %v11807_v60  ;;  %v9454_v60 = vld [vmem:[#allocation10 + $0x1] ss:$0 sm:$0xff] }
0x25fe   :  { %v12188_v25 = vpop.eup %12187  ;;  %11184 = vmatpush3.bf16.msra.mxu1 %v11181_v21  ;;  %v4099_v21 = vld [vmem:[%s15014_s16 + $0x10] sm:$0xff] }
0x25ff   :  { %v12190_v13 = vpop.eup %12189  ;;  %v4299_v16 = vmul.f32 %v12188_v25, %v12180_v12  ;;  %v11205_v31 = vpack.c.bf16 %v11809_v48, %v11808_v41  ;;  %v11215_v25 = vpack.c.bf16 %v4098_v10, %v4097_v3  ;;  %v3971_v48 = vadd.f32 %v14205_v27, %v9454_v60  ;;  %v5170_v3 = vld [vmem:[#allocation22 + $0x8] sm:$0xff]  ;;  %v5171_v10 = vld [vmem:[#allocation22 + $0x10] sm:$0xff] }
0x2600   :  { %v4695_v56 = vpop.xlane.xlu0 %4694  ;;  %v4297_v54 = vmul.f32 %v12190_v13, %v12182_v17  ;;  %v4100_v13 = vld [vmem:[%s15014_s16 + $0x18] sm:$0xff] }
0x2601   :  { %12191 = vrcp.f32 %v4695_v56  ;;  %v11219_v56 = vpack.c.bf16 %v4100_v13, %v4099_v21 }
0x2602   :  { %10485 = vmatprep.mubr.msk.f32.mxu1 %vm1741_vm3, %v4297_v54 }
0x2603   :  { %10486 = vmatmul.mubr.msk.f32.vlgmr.msra.gmra.mrb[48].mxu1 %vm1741_vm3, %v4299_v16 }
0x2604   :  { %v11802_v23 = vpop.permute.xlu0 %11801 }
0x2605   :  { %v11804_v42 = vunpack.i.h.bf16 %v11802_v23  ;;  %v11803_v34 = vunpack.i.l.bf16 %v11802_v23  ;;  %v3966_v23 = vadd.f32 %v9454_v60, %v14207_v37 }
0x2607   :  { %v11201_v62 = vpack.c.bf16 %v11804_v42, %v11803_v34  ;;  %v3988_v41 = vadd.f32 %v3966_v23, %v14151_v14  ;;  %v3976_v42 = vadd.f32 %v9454_v60, %v14211_v36  ;;  %v3989_v34 = vadd.f32 %v3971_v48, %v14153_v20 }
0x2608   :  { %v4790_v30 = vpop.permute.xlu0 %4789 }
0x2609   :  { %11202 = vmatprep.subr.bf16.mxu1 %v11201_v62 }
0x260a   :  { %11204 = vmatpush3.bf16.msra.mxu1 %v11201_v62  ;;  %v3981_v62 = vadd.f32 %v14209_v51, %v9454_v60 }
0x260b   :  { %11207 = vmatprep.subr.msk.bf16.mxu1 %vm13503_vm2, %v11205_v31  ;;  %v12192_v22 = vpop.eup %12191 }
0x260c   :  { %v4699_v28 = vmul.f32 %v12192_v22, %v12184_v0  ;;  %v3991_v22 = vadd.f32 %v3981_v62, %v14165_v9 }
0x260e   :  { %v4001_v14 = vsel %vm514_vm0, %v3991_v22, 0.0 }
0x262d   :  { %v4692_v32 = vpop.xlane.xlu1 %4691 }
0x262e   :  { %12193 = vrcp.f32 %v4692_v32  ;;  %v3992_v32 = vsel %vm514_vm0, %v3988_v41, 0.0 }
0x2631   :  { %v4788_v49 = vpop.permute.xlu1 %4787 }
0x2638   :  { %v12194_v33 = vpop.eup %12193 }
0x2639   :  { %v4697_v38 = vmul.f32 %v12194_v33, %v12186_v45  ;;  %v3995_v33 = vsel %vm514_vm0, %v3989_v34, 0.0 }
0x263b   :  { %10513 = vmatprep.mubr.msk.f32.mxu1 %vm1741_vm3, %v4697_v38 }
0x263c   :  { %10514 = vmatmul.mubr.msk.f32.vlgmr.msra.gmra.mrb[50].mxu1 %vm1741_vm3, %v4699_v28 }
0x263d   :  { %11210 = vmatpush3.bf16.xpose.msk.msra.mxu1 %vm13503_vm2, %v11205_v31  ;;  %10520 = vmatprep.mubr.msk.f32.mxu1 %vm624_vm1, %v4788_v49  ;;  %v3990_v31 = vadd.f32 %v3976_v42, %v14160_v29 }
0x263f   :  { %v3998_v37 = vsel %vm514_vm0, %v3990_v31, 0.0 }
0x2644   :  { %10521 = vmatmul.mubr.msk.f32.vlgmr.msra.gmra.mrb[52].mxu1 %vm624_vm1, %v4790_v30 }
0x26d6   :  { %v14285_v40 = vpop.f32.mrb[48].mxu1 }
0x26d7   :  { %v14287_v52 = vpop.f32.mrb[49].mxu1 }
0x270f   :  { %v10515_v53 = vpop.f32.mrb[50].mxu1 }
0x2710   :  { %v4778_v55 = vpop.f32.mrb[51].mxu1 }
0x2717   :  { %v10522_v11 = vpop.f32.mrb[52].mxu1 }
0x2718   :  { %v4875_v35 = vadd.f32 %v10522_v11, %v14214_v8  ;;  %v4869_v18 = vpop.f32.mrb[53].mxu1 }
0x2719   :  { %v4870_v39 = vadd.f32 %v4869_v18, %v14217_v5 }
0x271a   :  { %v4881_v58 = vsel %vm1741_vm3, %v4875_v35, -inf }
0x271b   :  { %4882 = vmax.xlane.f32.xlu0 %v4881_v58  ;;  %v4878_v59 = vsel %vm1741_vm3, %v4870_v39, -inf }
0x271c   :  { %4879 = vmax.xlane.f32.xlu1 %v4878_v59 }
0x27a8   :  { %v4883_v47 = vpop.xlane.xlu0 %4882 }
0x27a9   :  { %v4885_v12 = vsub.f32 %v4875_v35, %v4883_v47  ;;  %v4880_v17 = vpop.xlane.xlu1 %4879 }
0x27aa   :  { %v4884_v15 = vsub.f32 %v4870_v39, %v4880_v17 }
0x27ab   :  { %v4888_v4 = vmul.f32 1.442695, %v4885_v12 }
0x27ac   :  { %v4886_v1 = vmul.f32 1.442695, %v4884_v15 }
0x27ad   :  { %12195 = vpow2.f32 %v4888_v4 }
0x27ae   :  { %12197 = vpow2.f32 %v4886_v1 }
0x27b7   :  { %v12196_v0 = vpop.eup %12195 }
0x27b8   :  { %v12198_v19 = vpop.eup %12197  ;;  %v4893_v8 = vsel %vm1741_vm3, %v12196_v0, 0.0 }
0x27b9   :  { %4894 = vadd.xlane.f32.xlu1 %v4893_v8  ;;  %v4890_v5 = vsel %vm1741_vm3, %v12198_v19, 0.0 }
0x27ba   :  { %4891 = vadd.xlane.f32.xlu0 %v4890_v5 }
0x27ca   :  { %4989 = vrot.lane.b32.xlu1 %v14251_v44, %s13030_s24 }
0x27ce   :  { %4991 = vrot.lane.b32.xlu1 %v14249_v43, %s13030_s24 }
0x27d0   :  { %11811 = vrot.lane.b32.xlu0 %v14193_v61, %s13053_s10 }
0x27d2   :  { %4999 = vrot.lane.b32.xlu1 %v10515_v53, %s13016_s22 }
0x27d4   :  { %4997 = vrot.lane.b32.xlu0 %v4778_v55, %s13016_s22 }
0x2846   :  { %v4895_v6 = vpop.xlane.xlu1 %4894 }
0x2847   :  { %12199 = vrcp.f32 %v4895_v6  ;;  %v4892_v46 = vpop.xlane.xlu0 %4891 }
0x2848   :  { %12201 = vrcp.f32 %v4892_v46 }
0x284a   :  { %v4990_v27 = vpop.permute.xlu1 %4989 }
0x284b   :  { %v11812_v45 = vpop.permute.xlu0 %11811  ;;  %v5011_v29 = vsel %vm624_vm1, %v14287_v52, %v4990_v27 }
0x284c   :  { %v11814_v44 = vunpack.i.h.bf16 %v11812_v45  ;;  %v11813_v57 = vunpack.i.l.bf16 %v11812_v45 }
0x284e   :  { %v11211_v7 = vpack.c.bf16 %v11814_v44, %v11813_v57  ;;  %v4992_v20 = vpop.permute.xlu1 %4991 }
0x284f   :  { %v4998_v51 = vpop.permute.xlu0 %4997  ;;  %v5012_v9 = vsel %vm624_vm1, %v14285_v40, %v4992_v20  ;;  %v9488_v40 = vld [vmem:[#allocation19] ss:$0 sm:$0xff] }
0x2850   :  { %11212 = vmatprep.subr.bf16.mxu0 %v11211_v7  ;;  %v5013_v28 = vsel %vm1741_vm3, %v5011_v29, %v4998_v51 }
0x2851   :  { %v12200_v43 = vpop.eup %12199  ;;  %11214 = vmatpush3.bf16.msra.mxu0 %v11211_v7 }
0x2852   :  { %v12202_v61 = vpop.eup %12201  ;;  %v4899_v2 = vmul.f32 %v12200_v43, %v12196_v0  ;;  %11216 = vmatprep.subr.bf16.mxu0 %v11215_v25  ;;  %v5000_v36 = vpop.permute.xlu1 %4999 }
0x2853   :  { %v4897_v50 = vmul.f32 %v12202_v61, %v12198_v19  ;;  %v5014_v30 = vsel %vm1741_vm3, %v5012_v9, %v5000_v36 }
0x2855   :  { %10527 = vmatprep.mubr.msk.f32.mxu0 %vm1741_vm3, %v4897_v50 }
0x2856   :  { %10528 = vmatmul.mubr.msk.f32.vlgmr.msra.gmra.mrb[58].mxu0 %vm1741_vm3, %v4899_v2  ;;  %v5169_v2 = vld [vmem:[#allocation22] sm:$0xff] }
0x2857   :  { %11218 = vmatpush3.bf16.msra.mxu0 %v11215_v25  ;;  %v11231_v21 = vpack.c.bf16 %v5170_v3, %v5169_v2  ;;  %v5172_v25 = vld [vmem:[#allocation22 + $0x18] sm:$0xff] }
0x2858   :  { %11220 = vmatprep.subr.bf16.mxu0 %v11219_v56  ;;  %v11235_v13 = vpack.c.bf16 %v5172_v25, %v5171_v10  ;;  %v5166_v25 = vld [vmem:[%s15015_s18 + $0x10] sm:$0xff] }
0x285b   :  { %11222 = vmatpush3.bf16.msra.mxu0 %v11219_v56 }
0x285c   :  { %11232 = vmatprep.subr.bf16.mxu0 %v11231_v21 }
0x2929   :  { %v10529_v54 = vpop.f32.mrb[58].mxu0 }
0x292a   :  { %5007 = vrot.lane.b32.xlu1 %v10529_v54, %s13054_s21  ;;  %v4978_v16 = vpop.f32.mrb[59].mxu0 }
0x292b   :  { %5005 = vrot.lane.b32.xlu0 %v4978_v16, %s13054_s21 }
0x294a   :  { %3993 = vadd.xlane.f32.xlu0 %v3992_v32 }
0x294e   :  { %3996 = vadd.xlane.f32.xlu1 %v3995_v33  ;;  %3999 = vadd.xlane.f32.xlu0 %v3998_v37 }
0x2952   :  { %4002 = vadd.xlane.f32.xlu0 %v4001_v14 }
0x299c   :  { %v5008_v38 = vpop.permute.xlu1 %5007 }
0x299d   :  { %v5006_v49 = vpop.permute.xlu0 %5005  ;;  %v5016_v55 = vsel %vm1746_vm4, %v5014_v30, %v5008_v38 }
0x299e   :  { %v5015_v53 = vsel %vm1746_vm4, %v5013_v28, %v5006_v49 }
0x299f   :  { %10538 = vmatprep.mubr.msk.f32.mxu0 %vm514_vm0, %v5015_v53 }
0x29a0   :  { %10539 = vmatmul.mubr.msk.f32.vlgmr.msra.gmra.mrb[60].mxu0 %vm514_vm0, %v5016_v55 }
0x29a1   :  { %11234 = vmatpush3.bf16.msra.mxu0 %v11231_v21  ;;  %v5165_v21 = vld [vmem:[%s15015_s18 + $0x8] sm:$0xff] }
0x29a2   :  { %11236 = vmatprep.subr.bf16.mxu0 %v11235_v13 }
0x29a5   :  { %11238 = vmatpush3.bf16.msra.mxu0 %v11235_v13 }
0x29d7   :  { %v3994_v11 = vpop.xlane.xlu0 %3993 }
0x29d8   :  { %v4004_v39 = vmul.f32 0.03125, %v3994_v11 }
0x29da   :  { %v14335_v4 = vsub.f32 %v3988_v41, %v4004_v39 }
0x29db   :  { %v4000_v35 = vpop.xlane.xlu0 %3999  ;;  %v3997_v52 = vpop.xlane.xlu1 %3996 }
0x29dc   :  { %v4005_v18 = vmul.f32 0.03125, %v3997_v52  ;;  %v4006_v1 = vmul.f32 0.03125, %v4000_v35  ;;  %v4012_v57 = vmul.f32 %v14335_v4, %v14335_v4 }
0x29de   :  { %v14333_v47 = vsub.f32 %v3989_v34, %v4005_v18  ;;  %v14344_v45 = vsub.f32 %v3990_v31, %v4006_v1  ;;  %v4016_v7 = vsel %vm514_vm0, %v4012_v57, 0.0  ;;  %v9460_v57 = vld [vmem:[#allocation16 + $0x1] ss:$0 sm:$0xff] }
0x29df   :  { %v4003_v58 = vpop.xlane.xlu0 %4002 }
0x29e0   :  { %v4007_v12 = vmul.f32 0.03125, %v4003_v58  ;;  %v4013_v46 = vmul.f32 %v14333_v47, %v14333_v47  ;;  %v4014_v43 = vmul.f32 %v14344_v45, %v14344_v45 }
0x29e2   :  { %v14339_v5 = vsub.f32 %v3991_v22, %v4007_v12  ;;  %v4022_v50 = vsel %vm514_vm0, %v4014_v43, 0.0 }
0x2a73   :  { %v10540_v59 = vpop.f32.mrb[60].mxu0 }
0x2a74   :  { %v5101_v17 = vadd.f32 %v10540_v59, %v9488_v40  ;;  %v5095_v15 = vpop.f32.mrb[61].mxu0 }
0x2a75   :  { %v5096_v0 = vadd.f32 %v9488_v40, %v5095_v15 }
0x2a76   :  { %v5107_v19 = vadd.f32 %v5101_v17, %v14173_v63  ;;  %v4019_v63 = vsel %vm514_vm0, %v4013_v46, 0.0 }
0x2a77   :  { %v5106_v8 = vadd.f32 %v5096_v0, %v14167_v26  ;;  %v4015_v26 = vmul.f32 %v14339_v5, %v14339_v5 }
0x2a78   :  { %v5111_v6 = vsel %vm514_vm0, %v5107_v19, 0.0 }
0x2a79   :  { %5112 = vadd.xlane.f32.xlu0 %v5111_v6  ;;  %v5108_v44 = vsel %vm514_vm0, %v5106_v8, 0.0  ;;  %v4025_v61 = vsel %vm514_vm0, %v4015_v26, 0.0 }
0x2a7a   :  { %5109 = vadd.xlane.f32.xlu1 %v5108_v44 }
0x2a7d   :  { %4020 = vadd.xlane.f32.xlu0 %v4019_v63 }
0x2a7e   :  { %4017 = vadd.xlane.f32.xlu1 %v4016_v7 }
0x2a81   :  { %4026 = vadd.xlane.f32.xlu0 %v4025_v61 }
0x2a82   :  { %4023 = vadd.xlane.f32.xlu1 %v4022_v50 }
0x2b06   :  { %v5113_v56 = vpop.xlane.xlu0 %5112 }
0x2b07   :  { %v5115_v54 = vmul.f32 0.03125, %v5113_v56  ;;  %v5110_v16 = vpop.xlane.xlu1 %5109 }
0x2b08   :  { %v5114_v60 = vmul.f32 0.03125, %v5110_v16 }
0x2b09   :  { %v14357_v23 = vsub.f32 %v5107_v19, %v5115_v54  ;;  %v5167_v54 = vld [vmem:[%s15015_s18 + $0x18] sm:$0xff] }
0x2b0a   :  { %v14359_v48 = vsub.f32 %v5106_v8, %v5114_v60  ;;  %v4021_v41 = vpop.xlane.xlu0 %4020  ;;  %v9459_v8 = vld [vmem:[#allocation14 + $0x1] ss:$0 sm:$0xff]  ;;  %v11227_v16 = vpack.c.bf16 %v5167_v54, %v5166_v25 }
0x2b0b   :  { %v4029_v42 = vmul.f32 0.032258064, %v4021_v41  ;;  %v4018_v34 = vpop.xlane.xlu1 %4017  ;;  %v5119_v62 = vmul.f32 %v14357_v23, %v14357_v23  ;;  %v4067_v6 = vmul.f32 %v9459_v8, %v14333_v47  ;;  %v4066_v44 = vmul.f32 %v9459_v8, %v14335_v4 }
0x2b0c   :  { %v4028_v31 = vmul.f32 0.032258064, %v4018_v34  ;;  %v5118_v32 = vmul.f32 %v14359_v48, %v14359_v48  ;;  %v4069_v43 = vmul.f32 %v9459_v8, %v14339_v5  ;;  %v4068_v2 = vmul.f32 %v9459_v8, %v14344_v45  ;;  %v5164_v45 = vld [vmem:[%s15015_s18] sm:$0xff] }
0x2b0d   :  { %12203 = vrsqrt.f32 %v4029_v42  ;;  %v5123_v33 = vsel %vm514_vm0, %v5119_v62, 0.0  ;;  %vm4041_vm9 = vcmp.eq.f32.partialorder %v4029_v42, inf  ;;  %v4044_v38 = vand.u32 2147483648, %v4029_v42  ;;  %v9493_v8 = vld [vmem:[#allocation20] ss:$0 sm:$0xff] }
0x2b0e   :  { %12205 = vrsqrt.f32 %v4028_v31  ;;  %v4027_v22 = vpop.xlane.xlu0 %4026  ;;  %v5120_v14 = vsel %vm514_vm0, %v5118_v32, 0.0  ;;  %5124 = vadd.xlane.f32.xlu0 %v5123_v33  ;;  %vm4043_vm10 = vcmp.eq.f32.partialorder %v4029_v42, 0.0  ;;  %vm4034_vm11 = vcmp.eq.f32.partialorder %v4028_v31, inf }
0x2b0f   :  { %v4031_v37 = vmul.f32 0.032258064, %v4027_v22  ;;  %v4024_v27 = vpop.xlane.xlu1 %4023  ;;  %5121 = vadd.xlane.f32.xlu1 %v5120_v14  ;;  %v4037_v49 = vand.u32 2147483648, %v4028_v31  ;;  %vm4036_vm12 = vcmp.eq.f32.partialorder %v4028_v31, 0.0  ;;  %v11223_v56 = vpack.c.bf16 %v5165_v21, %v5164_v45 }
0x2b10   :  { %v4030_v20 = vmul.f32 0.032258064, %v4024_v27 }
0x2b11   :  { %12207 = vrsqrt.f32 %v4031_v37  ;;  %vm4055_vm14 = vcmp.eq.f32.partialorder %v4031_v37, inf  ;;  %vm4057_vm15 = vcmp.eq.f32.partialorder %v4031_v37, 0.0  ;;  %v4058_v39 = vand.u32 2147483648, %v4031_v37  ;;  %11224 = vmatprep.subr.bf16.mxu1 %v11223_v56 }
0x2b12   :  { %12209 = vrsqrt.f32 %v4030_v20  ;;  %vm4048_vm5 = vcmp.eq.f32.partialorder %v4030_v20, inf  ;;  %v4051_v12 = vand.u32 2147483648, %v4030_v20  ;;  %vm4050_vm6 = vcmp.eq.f32.partialorder %v4030_v20, 0.0  ;;  %11226 = vmatpush3.bf16.msra.mxu1 %v11223_v56 }
0x2b13   :  { %11228 = vmatprep.subr.bf16.mxu1 %v11227_v16 }
0x2b16   :  { %11230 = vmatpush3.bf16.msra.mxu1 %v11227_v16 }
0x2b17   :  { %v12204_v36 = vpop.eup %12203 }
0x2b18   :  { %v12206_v51 = vpop.eup %12205  ;;  %v4040_v29 = vmul.f32 %v12204_v36, %v4029_v42 }
0x2b19   :  { %v4033_v9 = vmul.f32 %v12206_v51, %v4028_v31 }
0x2b1a   :  { %v4042_v28 = vsel %vm4041_vm9, %v4029_v42, %v4040_v29 }
0x2b1b   :  { %v12208_v30 = vpop.eup %12207  ;;  %v4045_v53 = vsel %vm4043_vm10, %v4044_v38, %v4042_v28  ;;  %v4035_v55 = vsel %vm4034_vm11, %v4028_v31, %v4033_v9  ;;  %v9491_v38 = vld [vmem:[#allocation31] ss:$0 sm:$0xff] }
0x2b1c   :  { %v12210_v11 = vpop.eup %12209  ;;  %v4071_v35 = vadd.f32 1e-06, %v4045_v53  ;;  %v4054_v52 = vmul.f32 %v12208_v30, %v4031_v37  ;;  %v4038_v18 = vsel %vm4036_vm12, %v4037_v49, %v4035_v55  ;;  %v5149_v9 = vmul.f32 %v9491_v38, %v14357_v23  ;;  %v9492_v53 = vld [vmem:[#allocation32] ss:$0 sm:$0xff] }
0x2b1d   :  { %v4047_v58 = vmul.f32 %v12210_v11, %v4030_v20  ;;  %v4070_v40 = vadd.f32 1e-06, %v4038_v18  ;;  %v5148_v49 = vmul.f32 %v9491_v38, %v14359_v48  ;;  %v9496_v18 = vld [vmem:[#allocation23] ss:$0 sm:$0xff] }
0x2b1e   :  { %12211 = vrcp.f32 %v4071_v35  ;;  %v4056_v59 = vsel %vm4055_vm14, %v4031_v37, %v4054_v52 }
0x2b1f   :  { %v4049_v17 = vsel %vm4048_vm5, %v4030_v20, %v4047_v58  ;;  %12213 = vrcp.f32 %v4070_v40  ;;  %v4059_v15 = vsel %vm4057_vm15, %v4058_v39, %v4056_v59 }
0x2b20   :  { %v4052_v1 = vsel %vm4050_vm6, %v4051_v12, %v4049_v17  ;;  %v4073_v0 = vadd.f32 1e-06, %v4059_v15 }
0x2b21   :  { %v4072_v19 = vadd.f32 1e-06, %v4052_v1 }
0x2b22   :  { %12215 = vrcp.f32 %v4073_v0 }
0x2b23   :  { %12217 = vrcp.f32 %v4072_v19 }
0x2b28   :  { %v12212_v46 = vpop.eup %12211 }
0x2b29   :  { %v12214_v63 = vpop.eup %12213  ;;  %v4077_v26 = vmul.f32 %v12212_v46, %v4067_v6 }
0x2b2a   :  { %v4075_v7 = vmul.f32 %v12214_v63, %v4066_v44  ;;  %v14430_v63 = vld [vmem:[%s15016_s9 + $0x8] sm:$0xff] }
0x2b2b   :  { %v14370_v61 = vadd.f32 %v9460_v57, %v4077_v26  ;;  %v14433_v26 = vld [vmem:[%s15016_s9] sm:$0xff] }
0x2b2c   :  { %v12216_v50 = vpop.eup %12215  ;;  %v14373_v3 = vadd.f32 %v9460_v57, %v4075_v7 }
0x2b2d   :  { %v12218_v47 = vpop.eup %12217  ;;  %9209 = vst.msk [vmem:[#allocation40 + $0x8] sm:$0xff] %vm514_vm0, %v14370_v61  ;;  %v4081_v4 = vmul.f32 %v12216_v50, %v4069_v43 }
0x2b2e   :  { %10560 = vmatprep.mubr.msk.f32.mxu0 %vm514_vm0, %v14373_v3  ;;  %9208 = vst.msk [vmem:[#allocation40] sm:$0xff] %vm514_vm0, %v14373_v3  ;;  %v4079_v5 = vmul.f32 %v12218_v47, %v4068_v2 }
0x2b2f   :  { %10561 = vmatmul.mubr.msk.f32.vlgmr.msra.gmra.mrb[62].mxu0 %vm514_vm0, %v14370_v61  ;;  %v14383_v10 = vadd.f32 %v9460_v57, %v4081_v4 }
0x2b30   :  { %v14388_v13 = vadd.f32 %v9460_v57, %v4079_v5 }
0x2b31   :  { %9211 = vst.msk [vmem:[#allocation40 + $0x18] sm:$0xff] %vm514_vm0, %v14383_v10 }
0x2b32   :  { %10563 = vmatprep.mubr.msk.f32.mxu0 %vm514_vm0, %v14388_v13  ;;  %9210 = vst.msk [vmem:[#allocation40 + $0x10] sm:$0xff] %vm514_vm0, %v14388_v13 }
0x2b33   :  { %10564 = vmatmul.mubr.msk.f32.gmra.mrb[64].mxu0 %vm514_vm0, %v14383_v10 }
0x2b9b   :  { %v5125_v60 = vpop.xlane.xlu0 %5124 }
0x2b9c   :  { %v5122_v41 = vpop.xlane.xlu1 %5121  ;;  %v5127_v42 = vmul.f32 0.032258064, %v5125_v60 }
0x2b9d   :  { %v5126_v34 = vmul.f32 0.032258064, %v5122_v41 }
0x2b9e   :  { %12219 = vrsqrt.f32 %v5127_v42  ;;  %vm5137_vm7 = vcmp.eq.f32.partialorder %v5127_v42, inf  ;;  %v5140_v22 = vand.u32 2147483648, %v5127_v42  ;;  %vm5139_vm8 = vcmp.eq.f32.partialorder %v5127_v42, 0.0 }
0x2b9f   :  { %12221 = vrsqrt.f32 %v5126_v34  ;;  %vm5130_vm9 = vcmp.eq.f32.partialorder %v5126_v34, inf  ;;  %v5133_v14 = vand.u32 2147483648, %v5126_v34  ;;  %vm5132_vm10 = vcmp.eq.f32.partialorder %v5126_v34, 0.0 }
0x2ba8   :  { %v12220_v62 = vpop.eup %12219 }
0x2ba9   :  { %v12222_v31 = vpop.eup %12221  ;;  %v5136_v32 = vmul.f32 %v12220_v62, %v5127_v42 }
0x2baa   :  { %v5129_v33 = vmul.f32 %v12222_v31, %v5126_v34 }
0x2bab   :  { %v5138_v37 = vsel %vm5137_vm7, %v5127_v42, %v5136_v32 }
0x2bac   :  { %v5141_v27 = vsel %vm5139_vm8, %v5140_v22, %v5138_v37  ;;  %v5131_v20 = vsel %vm5130_vm9, %v5126_v34, %v5129_v33 }
0x2bad   :  { %v5151_v36 = vadd.f32 1e-06, %v5141_v27  ;;  %v5134_v51 = vsel %vm5132_vm10, %v5133_v14, %v5131_v20 }
0x2bae   :  { %v5150_v29 = vadd.f32 1e-06, %v5134_v51 }
0x2baf   :  { %12223 = vrcp.f32 %v5151_v36 }
0x2bb0   :  { %12225 = vrcp.f32 %v5150_v29 }
0x2bb9   :  { %v12224_v28 = vpop.eup %12223 }
0x2bba   :  { %v12226_v30 = vpop.eup %12225  ;;  %v5155_v55 = vmul.f32 %v12224_v28, %v5149_v9 }
0x2bbb   :  { %v5153_v11 = vmul.f32 %v12226_v30, %v5148_v49 }
0x2bbc   :  { %v14403_v52 = vadd.f32 %v9492_v53, %v5155_v55 }
0x2bbd   :  { %v14401_v35 = vadd.f32 %v9492_v53, %v5153_v11 }
0x2bbf   :  { %10549 = vmatprep.mubr.msk.f32.mxu1 %vm514_vm0, %v14401_v35 }
0x2bc0   :  { %10550 = vmatmul.mubr.msk.f32.vlgmr.msra.gmra.mrb[54].mxu1 %vm514_vm0, %v14403_v52 }
0x2c02   :  { %v10562_v39 = vpop.f32.mrb[62].mxu0 }
0x2c03   :  { %v5356_v23 = vadd.f32 %v10562_v39, %v9496_v18  ;;  %v5350_v58 = vpop.f32.mrb[63].mxu0 }
0x2c04   :  { %v5351_v40 = vadd.f32 %v9496_v18, %v5350_v58 }
0x2c06   :  { %v10565_v48 = vpop.f32.mrb[64].mxu0  ;;  %v11239_v59 = vpack.c.bf16 %v5356_v23, %v5351_v40  ;;  %v14409_v12 = vpack.i.bf16 %v5356_v23, %v5351_v40 }
0x2c07   :  { %v5366_v17 = vadd.f32 %v10565_v48, %v9496_v18  ;;  %v5360_v15 = vpop.f32.mrb[65].mxu0 }
0x2c08   :  { %v5361_v1 = vadd.f32 %v9496_v18, %v5360_v15  ;;  %11241 = vmatprep.subr.msk.bf16.mxu1 %vm13503_vm2, %v11239_v59 }
0x2c09   :  { %11244 = vmatpush3.bf16.xpose.msk.msra.mxu1 %vm13503_vm2, %v11239_v59 }
0x2c0a   :  { %v11245_v0 = vpack.c.bf16 %v5366_v17, %v5361_v1  ;;  %v14415_v19 = vpack.i.bf16 %v5366_v17, %v5361_v1 }
0x2c0c   :  { %11247 = vmatprep.subr.msk.bf16.mxu1 %vm13503_vm2, %v11245_v0 }
0x2c11   :  { %11250 = vmatpush3.bf16.xpose.msk.msra.mxu1 %vm13503_vm2, %v11245_v0 }
0x2c93   :  { %v10551_v6 = vpop.f32.mrb[54].mxu1 }
0x2c94   :  { %v5257_v46 = vpop.f32.mrb[55].mxu1  ;;  %v14423_v57 = vadd.f32 %v10551_v6, %v9493_v8 }
0x2c95   :  { %v14421_v44 = vadd.f32 %v9493_v8, %v5257_v46 }
0x2c97   :  { %10574 = vmatprep.mubr.msk.f32.mxu1 %vm624_vm1, %v14421_v44 }
0x2c98   :  { %10575 = vmatmul.mubr.msk.f32.vlgmr.msra.gmra.mrb[56].mxu1 %vm624_vm1, %v14423_v57 }
0x2d6b   :  { %v10576_v7 = vpop.f32.mrb[56].mxu1 }
0x2d6c   :  { %v5459_v43 = vadd.f32 %v10576_v7, %v14430_v63  ;;  %v5453_v50 = vpop.f32.mrb[57].mxu1 }
0x2d6d   :  { %v5454_v2 = vadd.f32 %v5453_v50, %v14433_v26 }
0x2d6e   :  { %v5465_v47 = vsel %vm514_vm0, %v5459_v43, -inf }
0x2d6f   :  { %5466 = vmax.xlane.f32.xlu0 %v5465_v47  ;;  %v5462_v4 = vsel %vm514_vm0, %v5454_v2, -inf }
0x2d70   :  { %5463 = vmax.xlane.f32.xlu1 %v5462_v4 }
0x2d81   :  { %11816 = vrot.lane.b32.xlu1 %v14409_v12, %s13043_s23 }
0x2d85   :  { %11826 = vrot.lane.b32.xlu1 %v14409_v12, %s13046_s20 }
0x2dfc   :  { %v5467_v5 = vpop.xlane.xlu0 %5466 }
0x2dfd   :  { %v5469_v45 = vsub.f32 %v5459_v43, %v5467_v5  ;;  %v5464_v21 = vpop.xlane.xlu1 %5463 }
0x2dfe   :  { %v5468_v25 = vsub.f32 %v5454_v2, %v5464_v21 }
0x2dff   :  { %v5472_v56 = vmul.f32 1.442695, %v5469_v45 }
0x2e00   :  { %v5470_v54 = vmul.f32 1.442695, %v5468_v25 }
0x2e01   :  { %12227 = vpow2.f32 %v5472_v56  ;;  %v11817_v16 = vpop.permute.xlu1 %11816 }
0x2e02   :  { %12229 = vpow2.f32 %v5470_v54  ;;  %v11819_v60 = vunpack.i.h.bf16 %v11817_v16  ;;  %v11818_v41 = vunpack.i.l.bf16 %v11817_v16 }
0x2e04   :  { %v11251_v42 = vpack.c.bf16 %v11819_v60, %v11818_v41 }
0x2e05   :  { %v11827_v22 = vpop.permute.xlu1 %11826 }
0x2e06   :  { %11252 = vmatprep.subr.bf16.mxu0 %v11251_v42  ;;  %v11829_v27 = vunpack.i.h.bf16 %v11827_v22  ;;  %v11828_v20 = vunpack.i.l.bf16 %v11827_v22 }
0x2e07   :  { %11254 = vmatpush3.bf16.msra.mxu0 %v11251_v42 }
0x2e08   :  { %v11259_v38 = vpack.c.bf16 %v11829_v27, %v11828_v20 }
0x2e0b   :  { %v12228_v34 = vpop.eup %12227 }
0x2e0c   :  { %v12230_v62 = vpop.eup %12229  ;;  %v5477_v31 = vsel %vm514_vm0, %v12228_v34, 0.0 }
0x2e0d   :  { %5478 = vadd.xlane.f32.xlu0 %v5477_v31  ;;  %v5474_v32 = vsel %vm514_vm0, %v12230_v62, 0.0 }
0x2e0e   :  { %5475 = vadd.xlane.f32.xlu1 %v5474_v32 }
0x2e1f   :  { %11831 = vrot.lane.b32.xlu1 %v14415_v19, %s13046_s20 }
0x2e23   :  { %11821 = vrot.lane.b32.xlu0 %v14415_v19, %s13043_s23  ;;  %5579 = vrot.lane.b32.xlu1 %v14423_v57, %s13046_s20 }
0x2e27   :  { %5577 = vrot.lane.b32.xlu0 %v14421_v44, %s13046_s20 }
0x2e9a   :  { %v5479_v33 = vpop.xlane.xlu0 %5478 }
0x2e9b   :  { %12231 = vrcp.f32 %v5479_v33  ;;  %v5476_v37 = vpop.xlane.xlu1 %5475 }
0x2e9c   :  { %12233 = vrcp.f32 %v5476_v37 }
0x2e9e   :  { %v11822_v14 = vpop.permute.xlu0 %11821 }
0x2e9f   :  { %v11824_v36 = vunpack.i.h.bf16 %v11822_v14  ;;  %v11823_v51 = vunpack.i.l.bf16 %v11822_v14  ;;  %v11832_v28 = vpop.permute.xlu1 %11831 }
0x2ea0   :  { %v11834_v55 = vunpack.i.h.bf16 %v11832_v28  ;;  %v11833_v11 = vunpack.i.l.bf16 %v11832_v28 }
0x2ea1   :  { %v11255_v29 = vpack.c.bf16 %v11824_v36, %v11823_v51 }
0x2ea2   :  { %v5578_v18 = vpop.permute.xlu0 %5577  ;;  %v11265_v39 = vpack.c.bf16 %v11834_v55, %v11833_v11 }
0x2ea3   :  { %11256 = vmatprep.subr.bf16.mxu0 %v11255_v29  ;;  %v5580_v23 = vpop.permute.xlu1 %5579 }
0x2ea4   :  { %11258 = vmatpush3.bf16.msra.mxu0 %v11255_v29 }
0x2ea5   :  { %v12232_v9 = vpop.eup %12231  ;;  %11261 = vmatprep.subr.msk.bf16.mxu0 %vm13503_vm2, %v11259_v38 }
0x2ea6   :  { %v12234_v49 = vpop.eup %12233  ;;  %v5483_v53 = vmul.f32 %v12232_v9, %v12228_v34 }
0x2ea7   :  { %v5481_v30 = vmul.f32 %v12234_v49, %v12230_v62 }
0x2ea9   :  { %10585 = vmatprep.mubr.msk.f32.mxu0 %vm514_vm0, %v5481_v30 }
0x2eaa   :  { %10586 = vmatmul.mubr.msk.f32.vlgmr.msra.gmra.mrb[66].mxu0 %vm514_vm0, %v5483_v53 }
0x2eab   :  { %10596 = vmatprep.mubr.msk.f32.mxu0 %vm624_vm1, %v5578_v18 }
0x2ead   :  { %11264 = vmatpush3.bf16.xpose.msk.msra.mxu0 %vm13503_vm2, %v11259_v38 }
0x2eae   :  { %11267 = vmatprep.subr.msk.bf16.mxu0 %vm13503_vm2, %v11265_v39 }
0x2eb5   :  { %11270 = vmatpush3.bf16.xpose.msk.msra.mxu0 %vm13503_vm2, %v11265_v39 }
0x2ebc   :  { %10597 = vmatmul.mubr.msk.f32.vlgmr.msra.gmra.mrb[68].mxu0 %vm624_vm1, %v5580_v23 }
0x2f7d   :  { %v14465_v58 = vpop.f32.mrb[66].mxu0 }
0x2f7e   :  { %v14467_v40 = vpop.f32.mrb[67].mxu0 }
0x2f8f   :  { %v10598_v48 = vpop.f32.mrb[68].mxu0 }
0x2f90   :  { %v5673_v59 = vadd.f32 %v10598_v48, %v14430_v63  ;;  %v5667_v17 = vpop.f32.mrb[69].mxu0 }
0x2f91   :  { %v5668_v15 = vadd.f32 %v5667_v17, %v14433_v26 }
0x2f92   :  { %v5679_v1 = vsel %vm514_vm0, %v5673_v59, -inf }
0x2f93   :  { %5680 = vmax.xlane.f32.xlu1 %v5679_v1  ;;  %v5676_v0 = vsel %vm514_vm0, %v5668_v15, -inf }
0x2f94   :  { %5677 = vmax.xlane.f32.xlu0 %v5676_v0 }
0x2fa4   :  { %11836 = vrot.lane.b32.xlu1 %v14409_v12, %s13045_s28 }
0x2fa8   :  { %11846 = vrot.lane.b32.xlu1 %v14409_v12, %s13049_s2 }
0x2fac   :  { %11851 = vrot.lane.b32.xlu1 %v14415_v19, %s13049_s2 }
0x2fb0   :  { %5793 = vrot.lane.b32.xlu1 %v14423_v57, %s13049_s2 }
0x3020   :  { %v5681_v8 = vpop.xlane.xlu1 %5680 }
0x3021   :  { %v5683_v6 = vsub.f32 %v5673_v59, %v5681_v8  ;;  %v5678_v46 = vpop.xlane.xlu0 %5677 }
0x3022   :  { %v5682_v7 = vsub.f32 %v5668_v15, %v5678_v46 }
0x3023   :  { %v5686_v43 = vmul.f32 1.442695, %v5683_v6 }
0x3024   :  { %v5684_v50 = vmul.f32 1.442695, %v5682_v7  ;;  %v11837_v2 = vpop.permute.xlu1 %11836 }
0x3025   :  { %12235 = vpow2.f32 %v5686_v43  ;;  %v11839_v47 = vunpack.i.h.bf16 %v11837_v2  ;;  %v11838_v4 = vunpack.i.l.bf16 %v11837_v2 }
0x3026   :  { %12237 = vpow2.f32 %v5684_v50 }
0x3027   :  { %v11271_v5 = vpack.c.bf16 %v11839_v47, %v11838_v4 }
0x3028   :  { %v11847_v60 = vpop.permute.xlu1 %11846 }
0x3029   :  { %11272 = vmatprep.subr.bf16.mxu1 %v11271_v5  ;;  %v11849_v42 = vunpack.i.h.bf16 %v11847_v60  ;;  %v11848_v34 = vunpack.i.l.bf16 %v11847_v60 }
0x302a   :  { %11274 = vmatpush3.bf16.msra.mxu1 %v11271_v5 }
0x302b   :  { %v11279_v22 = vpack.c.bf16 %v11849_v42, %v11848_v34 }
0x302c   :  { %v11852_v14 = vpop.permute.xlu1 %11851 }
0x302d   :  { %v11854_v36 = vunpack.i.h.bf16 %v11852_v14  ;;  %v11853_v51 = vunpack.i.l.bf16 %v11852_v14 }
0x302f   :  { %v12236_v45 = vpop.eup %12235  ;;  %v11285_v38 = vpack.c.bf16 %v11854_v36, %v11853_v51 }
0x3030   :  { %v5691_v21 = vsel %vm514_vm0, %v12236_v45, 0.0  ;;  %v12238_v25 = vpop.eup %12237  ;;  %v5794_v9 = vpop.permute.xlu1 %5793 }
0x3031   :  { %5692 = vadd.xlane.f32.xlu0 %v5691_v21  ;;  %v5688_v56 = vsel %vm514_vm0, %v12238_v25, 0.0 }
0x3035   :  { %5689 = vadd.xlane.f32.xlu0 %v5688_v56 }
0x304b   :  { %11841 = vrot.lane.b32.xlu0 %v14415_v19, %s13045_s28 }
0x304f   :  { %5791 = vrot.lane.b32.xlu0 %v14421_v44, %s13049_s2 }
0x30be   :  { %v5693_v54 = vpop.xlane.xlu0 %5692 }
0x30bf   :  { %12239 = vrcp.f32 %v5693_v54 }
0x30c2   :  { %v5690_v16 = vpop.xlane.xlu0 %5689 }
0x30c3   :  { %12241 = vrcp.f32 %v5690_v16 }
0x30c6   :  { %v11842_v41 = vpop.permute.xlu0 %11841 }
0x30c7   :  { %v11844_v62 = vunpack.i.h.bf16 %v11842_v41  ;;  %v11843_v31 = vunpack.i.l.bf16 %v11842_v41 }
0x30c9   :  { %v11275_v32 = vpack.c.bf16 %v11844_v62, %v11843_v31  ;;  %v12240_v33 = vpop.eup %12239 }
0x30ca   :  { %v5697_v20 = vmul.f32 %v12240_v33, %v12236_v45  ;;  %v5792_v29 = vpop.permute.xlu0 %5791 }
0x30cb   :  { %11276 = vmatprep.subr.bf16.mxu1 %v11275_v32 }
0x30cc   :  { %11278 = vmatpush3.bf16.msra.mxu1 %v11275_v32 }
0x30cd   :  { %v12242_v37 = vpop.eup %12241  ;;  %11281 = vmatprep.subr.msk.bf16.mxu1 %vm13503_vm2, %v11279_v22 }
0x30ce   :  { %v5695_v27 = vmul.f32 %v12242_v37, %v12238_v25 }
0x30d0   :  { %10607 = vmatprep.mubr.msk.f32.mxu1 %vm514_vm0, %v5695_v27 }
0x30d1   :  { %10608 = vmatmul.mubr.msk.f32.vlgmr.msra.gmra.mrb[58].mxu1 %vm514_vm0, %v5697_v20 }
0x30d2   :  { %10618 = vmatprep.mubr.msk.f32.mxu1 %vm624_vm1, %v5792_v29 }
0x30d5   :  { %11284 = vmatpush3.bf16.xpose.msk.msra.mxu1 %vm13503_vm2, %v11279_v22 }
0x30d6   :  { %11287 = vmatprep.subr.msk.bf16.mxu1 %vm13503_vm2, %v11285_v38 }
0x30dd   :  { %11290 = vmatpush3.bf16.xpose.msk.msra.mxu1 %vm13503_vm2, %v11285_v38 }
0x30e4   :  { %10619 = vmatmul.mubr.msk.f32.vlgmr.msra.gmra.mrb[60].mxu1 %vm624_vm1, %v5794_v9 }
0x31a4   :  { %v14499_v28 = vpop.f32.mrb[58].mxu1 }
0x31a5   :  { %v14501_v49 = vpop.f32.mrb[59].mxu1 }
0x31b7   :  { %v10620_v30 = vpop.f32.mrb[60].mxu1 }
0x31b8   :  { %v5887_v53 = vadd.f32 %v10620_v30, %v14430_v63  ;;  %v5881_v55 = vpop.f32.mrb[61].mxu1 }
0x31b9   :  { %v5882_v11 = vadd.f32 %v5881_v55, %v14433_v26 }
0x31ba   :  { %v5893_v18 = vsel %vm514_vm0, %v5887_v53, -inf }
0x31bb   :  { %5894 = vmax.xlane.f32.xlu1 %v5893_v18  ;;  %v5890_v39 = vsel %vm514_vm0, %v5882_v11, -inf }
0x31bc   :  { %5891 = vmax.xlane.f32.xlu0 %v5890_v39 }
0x31cc   :  { %11856 = vrot.lane.b32.xlu1 %v14409_v12, %s13048_s30 }
0x31d0   :  { %11866 = vrot.lane.b32.xlu1 %v14409_v12, %s13052_s25 }
0x31d4   :  { %11871 = vrot.lane.b32.xlu1 %v14415_v19, %s13052_s25 }
0x31d8   :  { %6007 = vrot.lane.b32.xlu1 %v14423_v57, %s13052_s25 }
0x3248   :  { %v5895_v23 = vpop.xlane.xlu1 %5894 }
0x3249   :  { %v5897_v48 = vsub.f32 %v5887_v53, %v5895_v23  ;;  %v5892_v59 = vpop.xlane.xlu0 %5891 }
0x324a   :  { %v5896_v17 = vsub.f32 %v5882_v11, %v5892_v59 }
0x324b   :  { %v5900_v15 = vmul.f32 1.442695, %v5897_v48 }
0x324c   :  { %v5898_v1 = vmul.f32 1.442695, %v5896_v17  ;;  %v11857_v0 = vpop.permute.xlu1 %11856 }
0x324d   :  { %12243 = vpow2.f32 %v5900_v15  ;;  %v11859_v8 = vunpack.i.h.bf16 %v11857_v0  ;;  %v11858_v6 = vunpack.i.l.bf16 %v11857_v0 }
0x324e   :  { %12245 = vpow2.f32 %v5898_v1 }
0x324f   :  { %v11291_v46 = vpack.c.bf16 %v11859_v8, %v11858_v6 }
0x3250   :  { %v11867_v4 = vpop.permute.xlu1 %11866 }
0x3251   :  { %11292 = vmatprep.subr.bf16.mxu0 %v11291_v46  ;;  %v11869_v45 = vunpack.i.h.bf16 %v11867_v4  ;;  %v11868_v21 = vunpack.i.l.bf16 %v11867_v4 }
0x3252   :  { %11294 = vmatpush3.bf16.msra.mxu0 %v11291_v46 }
0x3253   :  { %v11299_v16 = vpack.c.bf16 %v11869_v45, %v11868_v21 }
0x3254   :  { %v11872_v42 = vpop.permute.xlu1 %11871 }
0x3255   :  { %v11874_v62 = vunpack.i.h.bf16 %v11872_v42  ;;  %v11873_v31 = vunpack.i.l.bf16 %v11872_v42 }
0x3257   :  { %v12244_v7 = vpop.eup %12243  ;;  %v11305_v22 = vpack.c.bf16 %v11874_v62, %v11873_v31 }
0x3258   :  { %v5905_v43 = vsel %vm514_vm0, %v12244_v7, 0.0  ;;  %v12246_v50 = vpop.eup %12245  ;;  %v6008_v33 = vpop.permute.xlu1 %6007 }
0x3259   :  { %5906 = vadd.xlane.f32.xlu0 %v5905_v43  ;;  %v5902_v57 = vsel %vm514_vm0, %v12246_v50, 0.0 }
0x325d   :  { %5903 = vadd.xlane.f32.xlu0 %v5902_v57  ;;  %v5176_v57 = vld [vmem:[#allocation25 + $0x10] sm:$0xff] }
0x3273   :  { %11861 = vrot.lane.b32.xlu0 %v14415_v19, %s13048_s30 }
0x3277   :  { %6005 = vrot.lane.b32.xlu0 %v14421_v44, %s13052_s25 }
0x32e6   :  { %v5907_v2 = vpop.xlane.xlu0 %5906 }
0x32e7   :  { %12247 = vrcp.f32 %v5907_v2 }
0x32ea   :  { %v5904_v47 = vpop.xlane.xlu0 %5903 }
0x32eb   :  { %12249 = vrcp.f32 %v5904_v47  ;;  %v5177_v47 = vld [vmem:[#allocation25 + $0x18] sm:$0xff] }
0x32ec   :  { %v11323_v4 = vpack.c.bf16 %v5177_v47, %v5176_v57 }
0x32ee   :  { %v11862_v5 = vpop.permute.xlu0 %11861 }
0x32ef   :  { %v11864_v25 = vunpack.i.h.bf16 %v11862_v5  ;;  %v11863_v56 = vunpack.i.l.bf16 %v11862_v5 }
0x32f1   :  { %v11295_v54 = vpack.c.bf16 %v11864_v25, %v11863_v56  ;;  %v12248_v60 = vpop.eup %12247 }
0x32f2   :  { %v5911_v34 = vmul.f32 %v12248_v60, %v12244_v7  ;;  %v6006_v32 = vpop.permute.xlu0 %6005 }
0x32f3   :  { %11296 = vmatprep.subr.bf16.mxu0 %v11295_v54 }
0x32f4   :  { %11298 = vmatpush3.bf16.msra.mxu0 %v11295_v54 }
0x32f5   :  { %v12250_v41 = vpop.eup %12249  ;;  %11301 = vmatprep.subr.msk.bf16.mxu0 %vm13503_vm2, %v11299_v16 }
0x32f6   :  { %v5909_v44 = vmul.f32 %v12250_v41, %v12246_v50  ;;  %v5175_v50 = vld [vmem:[#allocation25 + $0x8] sm:$0xff] }
0x32f8   :  { %10629 = vmatprep.mubr.msk.f32.mxu0 %vm514_vm0, %v5909_v44 }
0x32f9   :  { %10630 = vmatmul.mubr.msk.f32.vlgmr.msra.gmra.mrb[70].mxu0 %vm514_vm0, %v5911_v34 }
0x32fa   :  { %10640 = vmatprep.mubr.msk.f32.mxu0 %vm624_vm1, %v6006_v32  ;;  %v9533_v32 = vld [vmem:[#allocation26] ss:$0 sm:$0xff] }
0x32fd   :  { %11304 = vmatpush3.bf16.xpose.msk.msra.mxu0 %vm13503_vm2, %v11299_v16 }
0x32fe   :  { %11307 = vmatprep.subr.msk.bf16.mxu0 %vm13503_vm2, %v11305_v22 }
0x3305   :  { %11310 = vmatpush3.bf16.xpose.msk.msra.mxu0 %vm13503_vm2, %v11305_v22 }
0x330c   :  { %10641 = vmatmul.mubr.msk.f32.vlgmr.msra.gmra.mrb[72].mxu0 %vm624_vm1, %v6008_v33 }
0x33cc   :  { %v10631_v37 = vpop.f32.mrb[70].mxu0 }
0x33cd   :  { %v5996_v14 = vpop.f32.mrb[71].mxu0 }
0x33df   :  { %v10642_v27 = vpop.f32.mrb[72].mxu0 }
0x33e0   :  { %v6101_v20 = vadd.f32 %v10642_v27, %v14430_v63  ;;  %v6095_v36 = vpop.f32.mrb[73].mxu0 }
0x33e1   :  { %v6096_v51 = vadd.f32 %v6095_v36, %v14433_v26 }
0x33e2   :  { %v6107_v29 = vsel %vm514_vm0, %v6101_v20, -inf }
0x33e3   :  { %6108 = vmax.xlane.f32.xlu1 %v6107_v29  ;;  %v6104_v38 = vsel %vm514_vm0, %v6096_v51, -inf }
0x33e4   :  { %6105 = vmax.xlane.f32.xlu0 %v6104_v38 }
0x33f4   :  { %11876 = vrot.lane.b32.xlu1 %v14409_v12, %s13051_s7 }
0x33f8   :  { %6221 = vrot.lane.b32.xlu1 %v14501_v49, %s13030_s24 }
0x33fc   :  { %6223 = vrot.lane.b32.xlu1 %v14499_v28, %s13030_s24 }
0x3400   :  { %6231 = vrot.lane.b32.xlu1 %v10631_v37, %s13016_s22 }
0x3470   :  { %v6109_v63 = vpop.xlane.xlu1 %6108 }
0x3471   :  { %v6111_v9 = vsub.f32 %v6101_v20, %v6109_v63  ;;  %v6106_v26 = vpop.xlane.xlu0 %6105 }
0x3472   :  { %v6110_v30 = vsub.f32 %v6096_v51, %v6106_v26 }
0x3473   :  { %v6114_v53 = vmul.f32 1.442695, %v6111_v9 }
0x3474   :  { %v6112_v55 = vmul.f32 1.442695, %v6110_v30  ;;  %v11877_v11 = vpop.permute.xlu1 %11876 }
0x3475   :  { %12251 = vpow2.f32 %v6114_v53  ;;  %v11879_v18 = vunpack.i.h.bf16 %v11877_v11  ;;  %v11878_v39 = vunpack.i.l.bf16 %v11877_v11  ;;  %v6396_v53 = vld [vmem:[%s15017_s3] sm:$0xff]  ;;  %v6398_v11 = vld [vmem:[%s15017_s3 + $0x10] sm:$0xff] }
0x3476   :  { %12253 = vpow2.f32 %v6112_v55  ;;  %v6397_v55 = vld [vmem:[%s15017_s3 + $0x8] sm:$0xff] }
0x3477   :  { %v11311_v12 = vpack.c.bf16 %v11879_v18, %v11878_v39  ;;  %v11327_v18 = vpack.c.bf16 %v6397_v55, %v6396_v53  ;;  %v6399_v39 = vld [vmem:[%s15017_s3 + $0x18] sm:$0xff] }
0x3478   :  { %v6222_v21 = vpop.permute.xlu1 %6221 }
0x3479   :  { %11312 = vmatprep.subr.bf16.mxu1 %v11311_v12  ;;  %v6243_v16 = vsel %vm624_vm1, %v14467_v40, %v6222_v21  ;;  %11328 = vmatprep.subr.bf16.mxu0 %v11327_v18 }
0x347a   :  { %11314 = vmatpush3.bf16.msra.mxu1 %v11311_v12  ;;  %v11331_v12 = vpack.c.bf16 %v6399_v39, %v6398_v11  ;;  %11330 = vmatpush3.bf16.msra.mxu0 %v11327_v18 }
0x347c   :  { %v6224_v25 = vpop.permute.xlu1 %6223  ;;  %11332 = vmatprep.subr.bf16.mxu0 %v11331_v12 }
0x347d   :  { %v6244_v41 = vsel %vm624_vm1, %v14465_v58, %v6224_v25 }
0x347e   :  { %11334 = vmatpush3.bf16.msra.mxu0 %v11331_v12 }
0x347f   :  { %v12252_v49 = vpop.eup %12251 }
0x3480   :  { %v6119_v23 = vsel %vm514_vm0, %v12252_v49, 0.0  ;;  %v12254_v28 = vpop.eup %12253  ;;  %v6232_v56 = vpop.permute.xlu1 %6231 }
0x3481   :  { %6120 = vadd.xlane.f32.xlu0 %v6119_v23  ;;  %v6116_v48 = vsel %vm514_vm0, %v12254_v28, 0.0  ;;  %v6246_v34 = vsel %vm1741_vm3, %v6244_v41, %v6232_v56  ;;  %v6402_v23 = vld [vmem:[%s15018_s8 + $0x8] sm:$0xff]  ;;  %v9537_v41 = vld [vmem:[#allocation35] ss:$0 sm:$0xff] }
0x3485   :  { %6117 = vadd.xlane.f32.xlu0 %v6116_v48 }
0x349b   :  { %11881 = vrot.lane.b32.xlu0 %v14415_v19, %s13051_s7  ;;  %v5174_v19 = vld [vmem:[#allocation25] sm:$0xff] }
0x349c   :  { %v11319_v2 = vpack.c.bf16 %v5175_v50, %v5174_v19 }
0x349f   :  { %6229 = vrot.lane.b32.xlu0 %v5996_v14, %s13016_s22 }
0x350e   :  { %v6121_v59 = vpop.xlane.xlu0 %6120 }
0x350f   :  { %12255 = vrcp.f32 %v6121_v59  ;;  %v6404_v59 = vld [vmem:[%s15018_s8 + $0x18] sm:$0xff] }
0x3512   :  { %v6118_v17 = vpop.xlane.xlu0 %6117 }
0x3513   :  { %12257 = vrcp.f32 %v6118_v17 }
0x3516   :  { %v11882_v15 = vpop.permute.xlu0 %11881 }
0x3517   :  { %v11884_v1 = vunpack.i.h.bf16 %v11882_v15  ;;  %v11883_v0 = vunpack.i.l.bf16 %v11882_v15  ;;  %v6405_v15 = vld [vmem:[%s15018_s8 + $0x20] sm:$0xff] }
0x3519   :  { %v11315_v8 = vpack.c.bf16 %v11884_v1, %v11883_v0  ;;  %v12256_v6 = vpop.eup %12255  ;;  %v6406_v1 = vld [vmem:[%s15018_s8 + $0x28] sm:$0xff] }
0x351a   :  { %v6125_v43 = vmul.f32 %v12256_v6, %v12252_v49  ;;  %v6230_v54 = vpop.permute.xlu0 %6229  ;;  %v6401_v49 = vld [vmem:[%s15018_s8] sm:$0xff]  ;;  %v11343_v0 = vpack.c.bf16 %v6406_v1, %v6405_v15  ;;  %v9547_v15 = vld [vmem:[%s15012_s0 + $0x28] sm:$0xff]  ;;  %v9548_v1 = vld [vmem:[%s15012_s0 + $0x30] sm:$0xff] }
0x351b   :  { %11316 = vmatprep.subr.bf16.mxu1 %v11315_v8  ;;  %v6245_v42 = vsel %vm1741_vm3, %v6243_v16, %v6230_v54  ;;  %v11335_v48 = vpack.c.bf16 %v6402_v23, %v6401_v49  ;;  %v9536_v54 = vld [vmem:[#allocation34] ss:$0 sm:$0xff] }
0x351c   :  { %11318 = vmatpush3.bf16.msra.mxu1 %v11315_v8 }
0x351d   :  { %v12258_v46 = vpop.eup %12257  ;;  %11320 = vmatprep.subr.bf16.mxu1 %v11319_v2 }
0x351e   :  { %v6123_v7 = vmul.f32 %v12258_v46, %v12254_v28  ;;  %v6403_v28 = vld [vmem:[%s15018_s8 + $0x10] sm:$0xff] }
0x351f   :  { %v11339_v17 = vpack.c.bf16 %v6404_v59, %v6403_v28 }
0x3520   :  { %10651 = vmatprep.mubr.msk.f32.mxu1 %vm514_vm0, %v6123_v7 }
0x3521   :  { %10652 = vmatmul.mubr.msk.f32.vlgmr.msra.gmra.mrb[62].mxu1 %vm514_vm0, %v6125_v43 }
0x3522   :  { %11322 = vmatpush3.bf16.msra.mxu1 %v11319_v2 }
0x3523   :  { %11324 = vmatprep.subr.bf16.mxu1 %v11323_v4 }
0x3526   :  { %11326 = vmatpush3.bf16.msra.mxu1 %v11323_v4 }
0x3527   :  { %11336 = vmatprep.subr.bf16.mxu1 %v11335_v48 }
0x35f4   :  { %v10653_v5 = vpop.f32.mrb[62].mxu1 }
0x35f5   :  { %6239 = vrot.lane.b32.xlu1 %v10653_v5, %s13054_s21  ;;  %v6210_v45 = vpop.f32.mrb[63].mxu1 }
0x35f6   :  { %6237 = vrot.lane.b32.xlu0 %v6210_v45, %s13054_s21 }
0x3667   :  { %v6240_v60 = vpop.permute.xlu1 %6239 }
0x3668   :  { %v6238_v44 = vpop.permute.xlu0 %6237  ;;  %v6248_v31 = vsel %vm1746_vm4, %v6246_v34, %v6240_v60 }
0x3669   :  { %v6247_v62 = vsel %vm1746_vm4, %v6245_v42, %v6238_v44 }
0x366a   :  { %10662 = vmatprep.mubr.msk.f32.mxu1 %vm514_vm0, %v6247_v62 }
0x366b   :  { %10663 = vmatmul.mubr.msk.f32.vlgmr.msra.gmra.mrb[64].mxu1 %vm514_vm0, %v6248_v31 }
0x366c   :  { %11338 = vmatpush3.bf16.msra.mxu1 %v11335_v48 }
0x366d   :  { %11340 = vmatprep.subr.bf16.mxu1 %v11339_v17 }
0x3670   :  { %11342 = vmatpush3.bf16.msra.mxu1 %v11339_v17  ;;  %v9546_v17 = vld [vmem:[%s15012_s0 + $0x20] sm:$0xff] }
0x3671   :  { %11344 = vmatprep.subr.bf16.mxu1 %v11343_v0 }
0x3674   :  { %11346 = vmatpush3.bf16.msra.mxu1 %v11343_v0  ;;  %v11351_v0 = vpack.c.bf16 %v9547_v15, %v9546_v17 }
0x3676   :  { %11352 = vmatprep.subr.bf16.mxu0 %v11351_v0 }
0x373e   :  { %v10664_v22 = vpop.f32.mrb[64].mxu1 }
0x373f   :  { %v6333_v40 = vadd.f32 %v10664_v22, %v9533_v32  ;;  %v6327_v33 = vpop.f32.mrb[65].mxu1  ;;  %v6407_v22 = vld [vmem:[%s15018_s8 + $0x30] sm:$0xff] }
0x3740   :  { %v6328_v37 = vadd.f32 %v9533_v32, %v6327_v33 }
0x3741   :  { %v6339_v58 = vadd.f32 %v6333_v40, %v14403_v52  ;;  %v6408_v40 = vld [vmem:[%s15018_s8 + $0x38] sm:$0xff] }
0x3742   :  { %v6338_v14 = vadd.f32 %v6328_v37, %v14401_v35  ;;  %v11347_v33 = vpack.c.bf16 %v6408_v40, %v6407_v22  ;;  %v9538_v37 = vld [vmem:[#allocation28] ss:$0 sm:$0xff] }
0x3743   :  { %v6343_v27 = vsel %vm514_vm0, %v6339_v58, 0.0 }
0x3744   :  { %6344 = vadd.xlane.f32.xlu1 %v6343_v27  ;;  %v6340_v20 = vsel %vm514_vm0, %v6338_v14, 0.0  ;;  %11348 = vmatprep.subr.bf16.mxu1 %v11347_v33 }
0x3745   :  { %6341 = vadd.xlane.f32.xlu0 %v6340_v20  ;;  %11350 = vmatpush3.bf16.msra.mxu1 %v11347_v33  ;;  %v9554_v33 = vld [vmem:[#allocation17 + $0x1] ss:$0 sm:$0xff] }
0x37d1   :  { %v6345_v36 = vpop.xlane.xlu1 %6344 }
0x37d2   :  { %v6347_v51 = vmul.f32 0.03125, %v6345_v36  ;;  %v6342_v29 = vpop.xlane.xlu0 %6341 }
0x37d3   :  { %v6346_v38 = vmul.f32 0.03125, %v6342_v29  ;;  %v9541_v29 = vld [vmem:[#allocation29] ss:$0 sm:$0xff] }
0x37d4   :  { %v6349_v63 = vsub.f32 %v6339_v58, %v6347_v51 }
0x37d5   :  { %v6348_v9 = vsub.f32 %v6338_v14, %v6346_v38 }
0x37d6   :  { %v6351_v52 = vmul.f32 %v6349_v63, %v6349_v63  ;;  %v6381_v44 = vmul.f32 %v9536_v54, %v6349_v63 }
0x37d7   :  { %v6350_v26 = vmul.f32 %v6348_v9, %v6348_v9  ;;  %v6380_v16 = vmul.f32 %v9536_v54, %v6348_v9 }
0x37d8   :  { %v6355_v30 = vsel %vm514_vm0, %v6351_v52, 0.0 }
0x37d9   :  { %v6352_v35 = vsel %vm514_vm0, %v6350_v26, 0.0 }
0x37da   :  { %6353 = vadd.xlane.f32.xlu0 %v6352_v35 }
0x37de   :  { %6356 = vadd.xlane.f32.xlu0 %v6355_v30 }
0x3867   :  { %v6354_v8 = vpop.xlane.xlu0 %6353 }
0x3868   :  { %v6358_v6 = vmul.f32 0.032258064, %v6354_v8  ;;  %v9549_v8 = vld [vmem:[%s15012_s0 + $0x38] sm:$0xff] }
0x386a   :  { %12259 = vrsqrt.f32 %v6358_v6  ;;  %vm6362_vm11 = vcmp.eq.f32.partialorder %v6358_v6, inf  ;;  %v6365_v50 = vand.u32 2147483648, %v6358_v6  ;;  %vm6364_vm12 = vcmp.eq.f32.partialorder %v6358_v6, 0.0 }
0x386b   :  { %v6357_v46 = vpop.xlane.xlu0 %6356 }
0x386c   :  { %v6359_v7 = vmul.f32 0.032258064, %v6357_v46 }
0x386e   :  { %12261 = vrsqrt.f32 %v6359_v7  ;;  %vm6369_vm14 = vcmp.eq.f32.partialorder %v6359_v7, inf  ;;  %v6372_v45 = vand.u32 2147483648, %v6359_v7  ;;  %vm6371_vm15 = vcmp.eq.f32.partialorder %v6359_v7, 0.0 }
0x3874   :  { %v12260_v43 = vpop.eup %12259 }
0x3875   :  { %v6361_v19 = vmul.f32 %v12260_v43, %v6358_v6 }
0x3877   :  { %v6363_v57 = vsel %vm6362_vm11, %v6358_v6, %v6361_v19  ;;  %v11355_v6 = vpack.c.bf16 %v9549_v8, %v9548_v1 }
0x3878   :  { %v12262_v2 = vpop.eup %12261  ;;  %v6366_v47 = vsel %vm6364_vm12, %v6365_v50, %v6363_v57 }
0x3879   :  { %v6368_v4 = vmul.f32 %v12262_v2, %v6359_v7  ;;  %v6382_v5 = vadd.f32 1e-06, %v6366_v47 }
0x387b   :  { %v6370_v21 = vsel %vm6369_vm14, %v6359_v7, %v6368_v4  ;;  %12263 = vrcp.f32 %v6382_v5 }
0x387c   :  { %v6373_v25 = vsel %vm6371_vm15, %v6372_v45, %v6370_v21 }
0x387d   :  { %v6383_v56 = vadd.f32 1e-06, %v6373_v25 }
0x387f   :  { %12265 = vrcp.f32 %v6383_v56 }
0x3885   :  { %v12264_v60 = vpop.eup %12263 }
0x3886   :  { %v6385_v42 = vmul.f32 %v12264_v60, %v6380_v16  ;;  %v9544_v60 = vld [vmem:[#allocation37] ss:$0 sm:$0xff] }
0x3888   :  { %v6394_v34 = vadd.f32 %v9537_v41, %v6385_v42 }
0x3889   :  { %v12266_v62 = vpop.eup %12265 }
0x388a   :  { %v6387_v31 = vmul.f32 %v12266_v62, %v6381_v44  ;;  %10673 = vmatprep.mubr.msk.f32.mxu0 %vm514_vm0, %v6394_v34  ;;  %v9545_v62 = vld [vmem:[#allocation38] ss:$0 sm:$0xff] }
0x388c   :  { %v6395_v32 = vadd.f32 %v9537_v41, %v6387_v31 }
0x388e   :  { %10674 = vmatmul.mubr.msk.f32.vlgmr.msra.gmra.mrb[74].mxu0 %vm514_vm0, %v6395_v32 }
0x388f   :  { %11354 = vmatpush3.bf16.msra.mxu0 %v11351_v0 }
0x3890   :  { %11356 = vmatprep.subr.bf16.mxu0 %v11355_v6 }
0x3893   :  { %11358 = vmatpush3.bf16.msra.mxu0 %v11355_v6 }
0x3961   :  { %v10675_v58 = vpop.f32.mrb[74].mxu0 }
0x3962   :  { %v6494_v14 = vadd.f32 %v10675_v58, %v9538_v37  ;;  %v6488_v27 = vpop.f32.mrb[75].mxu0 }
0x3963   :  { %v6489_v20 = vadd.f32 %v9538_v37, %v6488_v27 }
0x3964   :  { %v6498_v51 = vmax.f32 %v6494_v14, 0.0 }
0x3965   :  { %v6497_v36 = vmax.f32 %v6489_v20, 0.0 }
0x3967   :  { %10692 = vmatprep.mubr.msk.f32.mxu1 %vm2088_vm13, %v6497_v36 }
0x3968   :  { %10693 = vmatmul.mubr.msk.f32.vlgmr.msra.gmra.mrb[66].mxu1 %vm2088_vm13, %v6498_v51 }
0x3a3b   :  { %v10694_v38 = vpop.f32.mrb[66].mxu1 }
0x3a3c   :  { %v6583_v63 = vadd.f32 %v10694_v38, %v9541_v29  ;;  %v6577_v9 = vpop.f32.mrb[67].mxu1 }
0x3a3d   :  { %v6578_v26 = vadd.f32 %v9541_v29, %v6577_v9 }
0x3a3e   :  { %v6589_v35 = vadd.f32 %v6583_v63, %v6395_v32 }
0x3a3f   :  { %v6588_v52 = vadd.f32 %v6578_v26, %v6394_v34 }
0x3a40   :  { %v6593_v30 = vsel %vm514_vm0, %v6589_v35, 0.0 }
0x3a41   :  { %6594 = vadd.xlane.f32.xlu0 %v6593_v30  ;;  %v6590_v53 = vsel %vm514_vm0, %v6588_v52, 0.0 }
0x3a42   :  { %6591 = vadd.xlane.f32.xlu1 %v6590_v53  ;;  %v14626_v53 = vld [vmem:[%s15013_s15] sm:$0xff] }
0x3ace   :  { %v6595_v55 = vpop.xlane.xlu0 %6594 }
0x3acf   :  { %v6597_v11 = vmul.f32 0.03125, %v6595_v55  ;;  %v6592_v18 = vpop.xlane.xlu1 %6591 }
0x3ad0   :  { %v6596_v39 = vmul.f32 0.03125, %v6592_v18 }
0x3ad1   :  { %v6599_v12 = vsub.f32 %v6589_v35, %v6597_v11  ;;  %v14630_v11 = vld [vmem:[%s15013_s15 + $0x8] sm:$0xff] }
0x3ad2   :  { %v6598_v49 = vsub.f32 %v6588_v52, %v6596_v39 }
0x3ad3   :  { %v6601_v23 = vmul.f32 %v6599_v12, %v6599_v12  ;;  %v6631_v41 = vmul.f32 %v9544_v60, %v6599_v12 }
0x3ad4   :  { %v6600_v28 = vmul.f32 %v6598_v49, %v6598_v49  ;;  %v6630_v44 = vmul.f32 %v9544_v60, %v6598_v49 }
0x3ad5   :  { %v6605_v48 = vsel %vm514_vm0, %v6601_v23, 0.0 }
0x3ad6   :  { %6606 = vadd.xlane.f32.xlu0 %v6605_v48  ;;  %v6602_v59 = vsel %vm514_vm0, %v6600_v28, 0.0 }
0x3ad7   :  { %6603 = vadd.xlane.f32.xlu1 %v6602_v59 }
0x3b63   :  { %v6607_v46 = vpop.xlane.xlu0 %6606 }
0x3b64   :  { %v6609_v7 = vmul.f32 0.032258064, %v6607_v46  ;;  %v6604_v43 = vpop.xlane.xlu1 %6603 }
0x3b65   :  { %v6608_v19 = vmul.f32 0.032258064, %v6604_v43 }
0x3b66   :  { %12267 = vrsqrt.f32 %v6609_v7  ;;  %vm6619_vm5 = vcmp.eq.f32.partialorder %v6609_v7, inf  ;;  %v6622_v47 = vand.u32 2147483648, %v6609_v7  ;;  %vm6621_vm6 = vcmp.eq.f32.partialorder %v6609_v7, 0.0 }
0x3b67   :  { %12269 = vrsqrt.f32 %v6608_v19  ;;  %vm6612_vm7 = vcmp.eq.f32.partialorder %v6608_v19, inf  ;;  %v6615_v45 = vand.u32 2147483648, %v6608_v19  ;;  %vm6614_vm8 = vcmp.eq.f32.partialorder %v6608_v19, 0.0 }
0x3b70   :  { %v12268_v50 = vpop.eup %12267 }
0x3b71   :  { %v12270_v57 = vpop.eup %12269  ;;  %v6618_v2 = vmul.f32 %v12268_v50, %v6609_v7 }
0x3b72   :  { %v6611_v4 = vmul.f32 %v12270_v57, %v6608_v19 }
0x3b73   :  { %v6620_v5 = vsel %vm6619_vm5, %v6609_v7, %v6618_v2 }
0x3b74   :  { %v6623_v21 = vsel %vm6621_vm6, %v6622_v47, %v6620_v5  ;;  %v6613_v25 = vsel %vm6612_vm7, %v6608_v19, %v6611_v4 }
0x3b75   :  { %v6633_v56 = vadd.f32 1e-06, %v6623_v21  ;;  %v6616_v54 = vsel %vm6614_vm8, %v6615_v45, %v6613_v25 }
0x3b76   :  { %v6632_v16 = vadd.f32 1e-06, %v6616_v54 }
0x3b77   :  { %12271 = vrcp.f32 %v6633_v56 }
0x3b78   :  { %12273 = vrcp.f32 %v6632_v16 }
0x3b81   :  { %v12272_v42 = vpop.eup %12271 }
0x3b82   :  { %v12274_v34 = vpop.eup %12273  ;;  %v6637_v31 = vmul.f32 %v12272_v42, %v6631_v41 }
0x3b83   :  { %v6635_v32 = vmul.f32 %v12274_v34, %v6630_v44 }
0x3b84   :  { %v14595_v40 = vadd.f32 %v9545_v62, %v6637_v31 }
0x3b85   :  { %v14593_v22 = vadd.f32 %v9545_v62, %v6635_v32 }
0x3b87   :  { %10703 = vmatprep.mubr.msk.f32.mxu0 %vm514_vm0, %v14593_v22 }
0x3b88   :  { %10704 = vmatmul.mubr.msk.f32.vlgmr.msra.gmra.mrb[76].mxu0 %vm514_vm0, %v14595_v40 }
0x3c5b   :  { %v10705_v37 = vpop.f32.mrb[76].mxu0 }
0x3c5c   :  { %v14601_v58 = vadd.f32 %v10705_v37, %v9554_v33  ;;  %v6738_v14 = vpop.f32.mrb[77].mxu0 }
0x3c5d   :  { %v14603_v27 = vadd.f32 %v9554_v33, %v6738_v14 }
0x3c5f   :  { %10710 = vmatprep.mubr.msk.f32.mxu0 %vm624_vm1, %v14603_v27  ;;  %v14609_v20 = vpack.i.bf16 %v14601_v58, %v14603_v27 }
0x3c61   :  { %11886 = vrot.lane.b32.xlu1 %v14609_v20, %s13043_s23 }
0x3c65   :  { %11891 = vrot.lane.b32.xlu1 %v14609_v20, %s13044_s6 }
0x3c69   :  { %6945 = vrot.lane.b32.xlu1 %v14603_v27, %s13046_s20 }
0x3c6d   :  { %6947 = vrot.lane.b32.xlu1 %v14601_v58, %s13046_s20 }
0x3cd3   :  { %v11887_v36 = vpop.permute.xlu1 %11886 }
0x3cd4   :  { %v11889_v51 = vunpack.i.h.bf16 %v11887_v36  ;;  %v11888_v29 = vunpack.i.l.bf16 %v11887_v36 }
0x3cd6   :  { %v11359_v38 = vpack.c.bf16 %v11889_v51, %v11888_v29 }
0x3cd7   :  { %v11892_v63 = vpop.permute.xlu1 %11891 }
0x3cd8   :  { %v11894_v9 = vunpack.i.h.bf16 %v11892_v63  ;;  %v11893_v26 = vunpack.i.l.bf16 %v11892_v63  ;;  %11361 = vmatprep.subr.msk.bf16.mxu0 %vm13503_vm2, %v11359_v38 }
0x3cd9   :  { %11364 = vmatpush3.bf16.xpose.msk.msra.mxu0 %vm13503_vm2, %v11359_v38 }
0x3cda   :  { %v11365_v35 = vpack.c.bf16 %v11894_v9, %v11893_v26 }
0x3cdb   :  { %v6946_v5 = vpop.permute.xlu1 %6945 }
0x3cdc   :  { %11366 = vmatprep.subr.bf16.mxu1 %v11365_v35 }
0x3cdd   :  { %11368 = vmatpush3.bf16.msra.mxu1 %v11365_v35 }
0x3cdf   :  { %v6948_v45 = vpop.permute.xlu1 %6947 }
0x3ce0   :  { %10711 = vmatmul.mubr.msk.f32.vlgmr.msra.gmra.mrb[78].mxu0 %vm624_vm1, %v14601_v58 }
0x3db3   :  { %v10712_v52 = vpop.f32.mrb[78].mxu0 }
0x3db4   :  { %v6827_v30 = vpop.f32.mrb[79].mxu0  ;;  %v6833_v18 = vadd.f32 %v14630_v11, %v10712_v52 }
0x3db5   :  { %v6828_v55 = vadd.f32 %v14626_v53, %v6827_v30 }
0x3db6   :  { %v6839_v12 = vsel %vm1741_vm3, %v6833_v18, -inf }
0x3db7   :  { %v6836_v39 = vsel %vm1741_vm3, %v6828_v55, -inf }
0x3db8   :  { %6837 = vmax.xlane.f32.xlu0 %v6836_v39 }
0x3dbc   :  { %6840 = vmax.xlane.f32.xlu0 %v6839_v12 }
0x3e45   :  { %v6838_v49 = vpop.xlane.xlu0 %6837 }
0x3e46   :  { %v6842_v23 = vsub.f32 %v6828_v55, %v6838_v49 }
0x3e48   :  { %v6844_v59 = vmul.f32 1.442695, %v6842_v23 }
0x3e49   :  { %v6841_v28 = vpop.xlane.xlu0 %6840 }
0x3e4a   :  { %v6843_v48 = vsub.f32 %v6833_v18, %v6841_v28 }
0x3e4c   :  { %v6846_v17 = vmul.f32 1.442695, %v6843_v48 }
0x3e4e   :  { %12275 = vpow2.f32 %v6846_v17 }
0x3e4f   :  { %12277 = vpow2.f32 %v6844_v59 }
0x3e58   :  { %v12276_v15 = vpop.eup %12275 }
0x3e59   :  { %v6851_v1 = vsel %vm1741_vm3, %v12276_v15, 0.0  ;;  %v12278_v0 = vpop.eup %12277 }
0x3e5a   :  { %6852 = vadd.xlane.f32.xlu0 %v6851_v1  ;;  %v6848_v8 = vsel %vm1741_vm3, %v12278_v0, 0.0 }
0x3e5e   :  { %6849 = vadd.xlane.f32.xlu0 %v6848_v8 }
0x3e74   :  { %11896 = vrot.lane.b32.xlu0 %v14609_v20, %s13045_s28 }
0x3ee7   :  { %v6853_v6 = vpop.xlane.xlu0 %6852 }
0x3ee8   :  { %12279 = vrcp.f32 %v6853_v6 }
0x3eeb   :  { %v6850_v46 = vpop.xlane.xlu0 %6849 }
0x3eec   :  { %12281 = vrcp.f32 %v6850_v46 }
0x3eef   :  { %v11897_v7 = vpop.permute.xlu0 %11896 }
0x3ef0   :  { %v11899_v43 = vunpack.i.h.bf16 %v11897_v7  ;;  %v11898_v19 = vunpack.i.l.bf16 %v11897_v7 }
0x3ef2   :  { %v11369_v50 = vpack.c.bf16 %v11899_v43, %v11898_v19  ;;  %v12280_v57 = vpop.eup %12279 }
0x3ef3   :  { %v6857_v4 = vmul.f32 %v12280_v57, %v12276_v15 }
0x3ef4   :  { %11371 = vmatprep.subr.msk.bf16.mxu1 %vm13503_vm2, %v11369_v50 }
0x3ef6   :  { %v12282_v2 = vpop.eup %12281 }
0x3ef7   :  { %v6855_v47 = vmul.f32 %v12282_v2, %v12278_v0 }
0x3ef9   :  { %10717 = vmatprep.mubr.msk.f32.mxu1 %vm1741_vm3, %v6855_v47 }
0x3efa   :  { %10718 = vmatmul.mubr.msk.f32.vlgmr.msra.gmra.mrb[68].mxu1 %vm1741_vm3, %v6857_v4 }
0x3efb   :  { %11374 = vmatpush3.bf16.xpose.msk.msra.mxu1 %vm13503_vm2, %v11369_v50  ;;  %10724 = vmatprep.mubr.msk.f32.mxu1 %vm624_vm1, %v6946_v5 }
0x3f02   :  { %10725 = vmatmul.mubr.msk.f32.vlgmr.msra.gmra.mrb[70].mxu1 %vm624_vm1, %v6948_v45 }
0x3fcd   :  { %v14647_v21 = vpop.f32.mrb[68].mxu1 }
0x3fce   :  { %v14649_v25 = vpop.f32.mrb[69].mxu1 }
0x3fd5   :  { %v10726_v56 = vpop.f32.mrb[70].mxu1 }
0x3fd6   :  { %v7033_v54 = vadd.f32 %v14630_v11, %v10726_v56  ;;  %v7027_v16 = vpop.f32.mrb[71].mxu1 }
0x3fd7   :  { %v7028_v60 = vadd.f32 %v14626_v53, %v7027_v16 }
0x3fd8   :  { %v7039_v41 = vsel %vm1741_vm3, %v7033_v54, -inf }
0x3fd9   :  { %7040 = vmax.xlane.f32.xlu0 %v7039_v41  ;;  %v7036_v42 = vsel %vm1741_vm3, %v7028_v60, -inf }
0x3fda   :  { %7037 = vmax.xlane.f32.xlu1 %v7036_v42 }
0x3feb   :  { %11906 = vrot.lane.b32.xlu1 %v14609_v20, %s13048_s30 }
0x3fef   :  { %11901 = vrot.lane.b32.xlu0 %v14609_v20, %s13047_s1 }
0x3ff3   :  { %7147 = vrot.lane.b32.xlu0 %v14601_v58, %s13049_s2 }
0x4066   :  { %v7041_v44 = vpop.xlane.xlu0 %7040 }
0x4067   :  { %v7043_v34 = vsub.f32 %v7033_v54, %v7041_v44  ;;  %v7038_v62 = vpop.xlane.xlu1 %7037 }
0x4068   :  { %v7042_v31 = vsub.f32 %v7028_v60, %v7038_v62 }
0x4069   :  { %v7046_v32 = vmul.f32 1.442695, %v7043_v34 }
0x406a   :  { %v7044_v33 = vmul.f32 1.442695, %v7042_v31  ;;  %v11902_v37 = vpop.permute.xlu0 %11901 }
0x406b   :  { %12283 = vpow2.f32 %v7046_v32  ;;  %v11904_v14 = vunpack.i.h.bf16 %v11902_v37  ;;  %v11903_v36 = vunpack.i.l.bf16 %v11902_v37  ;;  %v11907_v51 = vpop.permute.xlu1 %11906 }
0x406c   :  { %v11909_v29 = vunpack.i.h.bf16 %v11907_v51  ;;  %v11908_v38 = vunpack.i.l.bf16 %v11907_v51  ;;  %12285 = vpow2.f32 %v7044_v33 }
0x406d   :  { %v11375_v63 = vpack.c.bf16 %v11904_v14, %v11903_v36 }
0x406e   :  { %v11379_v9 = vpack.c.bf16 %v11909_v29, %v11908_v38  ;;  %v7148_v48 = vpop.permute.xlu0 %7147 }
0x406f   :  { %11376 = vmatprep.subr.bf16.mxu0 %v11375_v63 }
0x4070   :  { %11378 = vmatpush3.bf16.msra.mxu0 %v11375_v63 }
0x4071   :  { %11381 = vmatprep.subr.msk.bf16.mxu0 %vm13503_vm2, %v11379_v9 }
0x4075   :  { %v12284_v26 = vpop.eup %12283 }
0x4076   :  { %v7051_v35 = vsel %vm1741_vm3, %v12284_v26, 0.0  ;;  %v12286_v52 = vpop.eup %12285 }
0x4077   :  { %7052 = vadd.xlane.f32.xlu1 %v7051_v35  ;;  %v7048_v30 = vsel %vm1741_vm3, %v12286_v52, 0.0 }
0x407b   :  { %7049 = vadd.xlane.f32.xlu1 %v7048_v30 }
0x408c   :  { %7145 = vrot.lane.b32.xlu1 %v14603_v27, %s13049_s2 }
0x4104   :  { %v7053_v55 = vpop.xlane.xlu1 %7052 }
0x4105   :  { %12287 = vrcp.f32 %v7053_v55 }
0x4108   :  { %v7050_v18 = vpop.xlane.xlu1 %7049 }
0x4109   :  { %12289 = vrcp.f32 %v7050_v18 }
0x410c   :  { %v7146_v28 = vpop.permute.xlu1 %7145 }
0x410f   :  { %v12288_v39 = vpop.eup %12287 }
0x4110   :  { %v7057_v23 = vmul.f32 %v12288_v39, %v12284_v26 }
0x4113   :  { %v12290_v12 = vpop.eup %12289 }
0x4114   :  { %v7055_v49 = vmul.f32 %v12290_v12, %v12286_v52 }
0x4116   :  { %10731 = vmatprep.mubr.msk.f32.mxu0 %vm1741_vm3, %v7055_v49 }
0x4117   :  { %10732 = vmatmul.mubr.msk.f32.vlgmr.msra.gmra.mrb[80].mxu0 %vm1741_vm3, %v7057_v23 }
0x4118   :  { %11384 = vmatpush3.bf16.xpose.msk.msra.mxu0 %vm13503_vm2, %v11379_v9  ;;  %10738 = vmatprep.mubr.msk.f32.mxu0 %vm624_vm1, %v7146_v28 }
0x411f   :  { %10739 = vmatmul.mubr.msk.f32.vlgmr.msra.gmra.mrb[82].mxu0 %vm624_vm1, %v7148_v48 }
0x41ea   :  { %v14673_v59 = vpop.f32.mrb[80].mxu0 }
0x41eb   :  { %v14675_v17 = vpop.f32.mrb[81].mxu0 }
0x41f2   :  { %v10740_v15 = vpop.f32.mrb[82].mxu0 }
0x41f3   :  { %v7233_v1 = vadd.f32 %v14630_v11, %v10740_v15  ;;  %v7227_v0 = vpop.f32.mrb[83].mxu0 }
0x41f4   :  { %v7228_v8 = vadd.f32 %v14626_v53, %v7227_v0 }
0x41f5   :  { %v7239_v6 = vsel %vm1741_vm3, %v7233_v1, -inf }
0x41f6   :  { %7240 = vmax.xlane.f32.xlu0 %v7239_v6  ;;  %v7236_v46 = vsel %vm1741_vm3, %v7228_v8, -inf }
0x41f7   :  { %7237 = vmax.xlane.f32.xlu1 %v7236_v46  ;;  %v9550_v46 = vld [vmem:[%s15014_s16 + $0x20] sm:$0xff] }
0x4283   :  { %v7241_v7 = vpop.xlane.xlu0 %7240 }
0x4284   :  { %v7243_v43 = vsub.f32 %v7233_v1, %v7241_v7  ;;  %v7238_v19 = vpop.xlane.xlu1 %7237  ;;  %v9551_v7 = vld [vmem:[%s15014_s16 + $0x28] sm:$0xff] }
0x4285   :  { %v7242_v50 = vsub.f32 %v7228_v8, %v7238_v19  ;;  %v11399_v19 = vpack.c.bf16 %v9551_v7, %v9550_v46 }
0x4286   :  { %v7246_v57 = vmul.f32 1.442695, %v7243_v43  ;;  %v9552_v43 = vld [vmem:[%s15014_s16 + $0x30] sm:$0xff] }
0x4287   :  { %v7244_v2 = vmul.f32 1.442695, %v7242_v50  ;;  %v9553_v50 = vld [vmem:[%s15014_s16 + $0x38] sm:$0xff] }
0x4288   :  { %12291 = vpow2.f32 %v7246_v57  ;;  %v11403_v57 = vpack.c.bf16 %v9553_v50, %v9552_v43 }
0x4289   :  { %12293 = vpow2.f32 %v7244_v2  ;;  %v7732_v2 = vld [vmem:[#allocation22 + $0x20] sm:$0xff] }
0x4292   :  { %v12292_v47 = vpop.eup %12291 }
0x4293   :  { %v12294_v4 = vpop.eup %12293  ;;  %v7251_v5 = vsel %vm1741_vm3, %v12292_v47, 0.0 }
0x4294   :  { %7252 = vadd.xlane.f32.xlu1 %v7251_v5  ;;  %v7248_v45 = vsel %vm1741_vm3, %v12294_v4, 0.0 }
0x4295   :  { %7249 = vadd.xlane.f32.xlu0 %v7248_v45 }
0x42a5   :  { %11916 = vrot.lane.b32.xlu1 %v14609_v20, %s13051_s7 }
0x42a9   :  { %7345 = vrot.lane.b32.xlu1 %v14603_v27, %s13052_s25 }
0x42ab   :  { %11911 = vrot.lane.b32.xlu0 %v14609_v20, %s13050_s17 }
0x42af   :  { %7347 = vrot.lane.b32.xlu0 %v14601_v58, %s13052_s25 }
0x4321   :  { %v7253_v56 = vpop.xlane.xlu1 %7252 }
0x4322   :  { %12295 = vrcp.f32 %v7253_v56  ;;  %v7250_v54 = vpop.xlane.xlu0 %7249 }
0x4323   :  { %12297 = vrcp.f32 %v7250_v54 }
0x4325   :  { %v11917_v16 = vpop.permute.xlu1 %11916 }
0x4326   :  { %v11912_v60 = vpop.permute.xlu0 %11911  ;;  %v11919_v41 = vunpack.i.h.bf16 %v11917_v16  ;;  %v11918_v42 = vunpack.i.l.bf16 %v11917_v16 }
0x4327   :  { %v11914_v44 = vunpack.i.h.bf16 %v11912_v60  ;;  %v11913_v34 = vunpack.i.l.bf16 %v11912_v60 }
0x4328   :  { %v11389_v31 = vpack.c.bf16 %v11919_v41, %v11918_v42  ;;  %v7734_v41 = vld [vmem:[#allocation22 + $0x30] sm:$0xff]  ;;  %v7735_v42 = vld [vmem:[#allocation22 + $0x38] sm:$0xff] }
0x4329   :  { %v11385_v62 = vpack.c.bf16 %v11914_v44, %v11913_v34  ;;  %v7346_v37 = vpop.permute.xlu1 %7345 }
0x432a   :  { %v7348_v14 = vpop.permute.xlu0 %7347 }
0x432b   :  { %11386 = vmatprep.subr.bf16.mxu1 %v11385_v62 }
0x432c   :  { %v12296_v27 = vpop.eup %12295  ;;  %11388 = vmatpush3.bf16.msra.mxu1 %v11385_v62 }
0x432d   :  { %v12298_v32 = vpop.eup %12297  ;;  %11391 = vmatprep.subr.msk.bf16.mxu1 %vm13503_vm2, %v11389_v31  ;;  %v7257_v33 = vmul.f32 %v12296_v27, %v12292_v47  ;;  %v7733_v47 = vld [vmem:[#allocation22 + $0x28] sm:$0xff] }
0x432e   :  { %v7255_v58 = vmul.f32 %v12298_v32, %v12294_v4  ;;  %v11415_v4 = vpack.c.bf16 %v7733_v47, %v7732_v2 }
0x4330   :  { %10745 = vmatprep.mubr.msk.f32.mxu1 %vm1741_vm3, %v7255_v58 }
0x4331   :  { %10746 = vmatmul.mubr.msk.f32.vlgmr.msra.gmra.mrb[72].mxu1 %vm1741_vm3, %v7257_v33  ;;  %v11419_v33 = vpack.c.bf16 %v7735_v42, %v7734_v41 }
0x4332   :  { %10752 = vmatprep.mubr.msk.f32.mxu1 %vm624_vm1, %v7346_v37 }
0x4335   :  { %11394 = vmatpush3.bf16.xpose.msk.msra.mxu1 %vm13503_vm2, %v11389_v31 }
0x433c   :  { %10753 = vmatmul.mubr.msk.f32.vlgmr.msra.gmra.mrb[74].mxu1 %vm624_vm1, %v7348_v14 }
0x4404   :  { %v10747_v36 = vpop.f32.mrb[72].mxu1 }
0x4405   :  { %v7336_v51 = vpop.f32.mrb[73].mxu1 }
0x440f   :  { %v10754_v29 = vpop.f32.mrb[74].mxu1 }
0x4410   :  { %v7433_v38 = vadd.f32 %v14630_v11, %v10754_v29  ;;  %v7427_v63 = vpop.f32.mrb[75].mxu1 }
0x4411   :  { %v7428_v9 = vadd.f32 %v14626_v53, %v7427_v63 }
0x4412   :  { %v7439_v26 = vsel %vm1741_vm3, %v7433_v38, -inf }
0x4413   :  { %7440 = vmax.xlane.f32.xlu0 %v7439_v26  ;;  %v7436_v35 = vsel %vm1741_vm3, %v7428_v9, -inf }
0x4414   :  { %7437 = vmax.xlane.f32.xlu1 %v7436_v35  ;;  %v9593_v35 = vld [vmem:[#allocation23 + $0x1] ss:$0 sm:$0xff] }
0x44a0   :  { %v7441_v52 = vpop.xlane.xlu0 %7440 }
0x44a1   :  { %v7443_v30 = vsub.f32 %v7433_v38, %v7441_v52  ;;  %v7438_v55 = vpop.xlane.xlu1 %7437 }
0x44a2   :  { %v7442_v18 = vsub.f32 %v7428_v9, %v7438_v55 }
0x44a3   :  { %v7446_v39 = vmul.f32 1.442695, %v7443_v30 }
0x44a4   :  { %v7444_v12 = vmul.f32 1.442695, %v7442_v18 }
0x44a5   :  { %12299 = vpow2.f32 %v7446_v39 }
0x44a6   :  { %12301 = vpow2.f32 %v7444_v12 }
0x44af   :  { %v12300_v49 = vpop.eup %12299 }
0x44b0   :  { %v12302_v23 = vpop.eup %12301  ;;  %v7451_v11 = vsel %vm1741_vm3, %v12300_v49, 0.0 }
0x44b1   :  { %7452 = vadd.xlane.f32.xlu1 %v7451_v11  ;;  %v7448_v53 = vsel %vm1741_vm3, %v12302_v23, 0.0 }
0x44b2   :  { %7449 = vadd.xlane.f32.xlu0 %v7448_v53 }
0x44c2   :  { %7547 = vrot.lane.b32.xlu1 %v14675_v17, %s13030_s24 }
0x44c6   :  { %7549 = vrot.lane.b32.xlu1 %v14673_v59, %s13030_s24 }
0x44c8   :  { %11921 = vrot.lane.b32.xlu0 %v14609_v20, %s13053_s10 }
0x44ca   :  { %7557 = vrot.lane.b32.xlu1 %v10747_v36, %s13016_s22  ;;  %v9588_v36 = vld [vmem:[%s15015_s18 + $0x30] sm:$0xff] }
0x44cc   :  { %7555 = vrot.lane.b32.xlu0 %v7336_v51, %s13016_s22  ;;  %v9589_v51 = vld [vmem:[%s15015_s18 + $0x38] sm:$0xff] }
0x44cd   :  { %v11411_v29 = vpack.c.bf16 %v9589_v51, %v9588_v36 }
0x453e   :  { %v7453_v28 = vpop.xlane.xlu1 %7452 }
0x453f   :  { %12303 = vrcp.f32 %v7453_v28  ;;  %v7450_v48 = vpop.xlane.xlu0 %7449 }
0x4540   :  { %12305 = vrcp.f32 %v7450_v48 }
0x4542   :  { %v7548_v56 = vpop.permute.xlu1 %7547 }
0x4543   :  { %v11922_v15 = vpop.permute.xlu0 %11921  ;;  %v7569_v44 = vsel %vm624_vm1, %v14649_v25, %v7548_v56  ;;  %v9587_v25 = vld [vmem:[%s15015_s18 + $0x28] sm:$0xff] }
0x4544   :  { %v11924_v17 = vunpack.i.h.bf16 %v11922_v15  ;;  %v11923_v1 = vunpack.i.l.bf16 %v11922_v15 }
0x4546   :  { %v11395_v0 = vpack.c.bf16 %v11924_v17, %v11923_v1  ;;  %v7550_v54 = vpop.permute.xlu1 %7549 }
0x4547   :  { %v7556_v60 = vpop.permute.xlu0 %7555  ;;  %v7570_v62 = vsel %vm624_vm1, %v14647_v21, %v7550_v54  ;;  %v9586_v21 = vld [vmem:[%s15015_s18 + $0x20] sm:$0xff] }
0x4548   :  { %11396 = vmatprep.subr.bf16.mxu0 %v11395_v0  ;;  %v7571_v31 = vsel %vm1741_vm3, %v7569_v44, %v7556_v60  ;;  %v11407_v14 = vpack.c.bf16 %v9587_v25, %v9586_v21  ;;  %v9584_v44 = vld [vmem:[#allocation31 + $0x1] ss:$0 sm:$0xff]  ;;  %v9590_v25 = vld [vmem:[#allocation20 + $0x1] ss:$0 sm:$0xff] }
0x4549   :  { %v12304_v59 = vpop.eup %12303  ;;  %11398 = vmatpush3.bf16.msra.mxu0 %v11395_v0 }
0x454a   :  { %v12306_v20 = vpop.eup %12305  ;;  %v7457_v6 = vmul.f32 %v12304_v59, %v12300_v49  ;;  %11400 = vmatprep.subr.bf16.mxu0 %v11399_v19  ;;  %v7558_v16 = vpop.permute.xlu1 %7557  ;;  %11408 = vmatprep.subr.bf16.mxu1 %v11407_v14 }
0x454b   :  { %v7455_v8 = vmul.f32 %v12306_v20, %v12302_v23  ;;  %v7572_v32 = vsel %vm1741_vm3, %v7570_v62, %v7558_v16  ;;  %11410 = vmatpush3.bf16.msra.mxu1 %v11407_v14 }
0x454c   :  { %11412 = vmatprep.subr.bf16.mxu1 %v11411_v29 }
0x454d   :  { %10759 = vmatprep.mubr.msk.f32.mxu0 %vm1741_vm3, %v7455_v8 }
0x454e   :  { %10760 = vmatmul.mubr.msk.f32.vlgmr.msra.gmra.mrb[84].mxu0 %vm1741_vm3, %v7457_v6 }
0x454f   :  { %11402 = vmatpush3.bf16.msra.mxu0 %v11399_v19  ;;  %11414 = vmatpush3.bf16.msra.mxu1 %v11411_v29 }
0x4550   :  { %11404 = vmatprep.subr.bf16.mxu0 %v11403_v57 }
0x4553   :  { %11406 = vmatpush3.bf16.msra.mxu0 %v11403_v57 }
0x4554   :  { %11416 = vmatprep.subr.bf16.mxu0 %v11415_v4 }
0x4621   :  { %v10761_v5 = vpop.f32.mrb[84].mxu0 }
0x4622   :  { %7565 = vrot.lane.b32.xlu1 %v10761_v5, %s13054_s21  ;;  %v7536_v45 = vpop.f32.mrb[85].mxu0 }
0x4623   :  { %7563 = vrot.lane.b32.xlu0 %v7536_v45, %s13054_s21 }
0x4694   :  { %v7566_v34 = vpop.permute.xlu1 %7565 }
0x4695   :  { %v7564_v27 = vpop.permute.xlu0 %7563  ;;  %v7574_v37 = vsel %vm1746_vm4, %v7572_v32, %v7566_v34 }
0x4696   :  { %v7573_v58 = vsel %vm1746_vm4, %v7571_v31, %v7564_v27  ;;  %v9585_v31 = vld [vmem:[#allocation32 + $0x1] ss:$0 sm:$0xff] }
0x4697   :  { %10770 = vmatprep.mubr.msk.f32.mxu0 %vm514_vm0, %v7573_v58 }
0x4698   :  { %10771 = vmatmul.mubr.msk.f32.vlgmr.msra.gmra.mrb[86].mxu0 %vm514_vm0, %v7574_v37 }
0x4699   :  { %11418 = vmatpush3.bf16.msra.mxu0 %v11415_v4  ;;  %10792 = vmatprep.mubr.msk.f32.mxu0 %vm514_vm0, %v14373_v3  ;;  %v9581_v3 = vld [vmem:[#allocation19 + $0x1] ss:$0 sm:$0xff] }
0x469a   :  { %11420 = vmatprep.subr.bf16.mxu0 %v11419_v33 }
0x469d   :  { %11422 = vmatpush3.bf16.msra.mxu0 %v11419_v33 }
0x46a0   :  { %10793 = vmatmul.mubr.msk.f32.vlgmr.msra.gmra.mrb[88].mxu0 %vm514_vm0, %v14370_v61 }
0x46a1   :  { %10795 = vmatprep.mubr.msk.f32.mxu0 %vm514_vm0, %v14388_v13 }
0x46a4   :  { %10796 = vmatmul.mubr.msk.f32.gmra.mrb[90].mxu0 %vm514_vm0, %v14383_v10 }
0x476b   :  { %v10772_v38 = vpop.f32.mrb[86].mxu0 }
0x476c   :  { %v7659_v63 = vadd.f32 %v10772_v38, %v9581_v3  ;;  %v7653_v61 = vpop.f32.mrb[87].mxu0  ;;  %v14778_v38 = vld [vmem:[%s15016_s9 + $0x8] sm:$0xff] }
0x476d   :  { %v7654_v9 = vadd.f32 %v9581_v3, %v7653_v61 }
0x476e   :  { %v7667_v13 = vadd.f32 %v7659_v63, %v14595_v40 }
0x476f   :  { %v7666_v26 = vadd.f32 %v7654_v9, %v14593_v22  ;;  %v14782_v9 = vld [vmem:[%s15016_s9] sm:$0xff] }
0x4770   :  { %v7671_v10 = vsel %vm514_vm0, %v7667_v13, 0.0 }
0x4771   :  { %7672 = vadd.xlane.f32.xlu1 %v7671_v10  ;;  %v7668_v52 = vsel %vm514_vm0, %v7666_v26, 0.0 }
0x4772   :  { %7669 = vadd.xlane.f32.xlu0 %v7668_v52 }
0x4773   :  { %v10794_v30 = vpop.f32.mrb[88].mxu0 }
0x4774   :  { %v7910_v55 = vadd.f32 %v10794_v30, %v9593_v35  ;;  %v7904_v18 = vpop.f32.mrb[89].mxu0 }
0x4775   :  { %v7905_v39 = vadd.f32 %v9593_v35, %v7904_v18 }
0x4777   :  { %v10797_v12 = vpop.f32.mrb[90].mxu0  ;;  %v11423_v49 = vpack.c.bf16 %v7910_v55, %v7905_v39  ;;  %v14747_v23 = vpack.i.bf16 %v7910_v55, %v7905_v39 }
0x4778   :  { %v7920_v11 = vadd.f32 %v10797_v12, %v9593_v35  ;;  %v7914_v53 = vpop.f32.mrb[91].mxu0 }
0x4779   :  { %v7915_v40 = vadd.f32 %v9593_v35, %v7914_v53  ;;  %11425 = vmatprep.subr.msk.bf16.mxu1 %vm13503_vm2, %v11423_v49 }
0x477b   :  { %v11429_v22 = vpack.c.bf16 %v7920_v11, %v7915_v40  ;;  %v14751_v28 = vpack.i.bf16 %v7920_v11, %v7915_v40 }
0x47fe   :  { %v7673_v48 = vpop.xlane.xlu1 %7672 }
0x47ff   :  { %v7675_v15 = vmul.f32 0.03125, %v7673_v48  ;;  %v7670_v17 = vpop.xlane.xlu0 %7669 }
0x4800   :  { %v7674_v1 = vmul.f32 0.03125, %v7670_v17 }
0x4801   :  { %v7677_v0 = vsub.f32 %v7667_v13, %v7675_v15 }
0x4802   :  { %v7676_v59 = vsub.f32 %v7666_v26, %v7674_v1 }
0x4803   :  { %v7679_v6 = vmul.f32 %v7677_v0, %v7677_v0  ;;  %v7709_v32 = vmul.f32 %v9584_v44, %v7677_v0 }
0x4804   :  { %v7678_v20 = vmul.f32 %v7676_v59, %v7676_v59  ;;  %v7708_v34 = vmul.f32 %v9584_v44, %v7676_v59 }
0x4805   :  { %v7683_v46 = vsel %vm514_vm0, %v7679_v6, 0.0 }
0x4806   :  { %v7680_v8 = vsel %vm514_vm0, %v7678_v20, 0.0 }
0x4807   :  { %7681 = vadd.xlane.f32.xlu0 %v7680_v8 }
0x480b   :  { %7684 = vadd.xlane.f32.xlu0 %v7683_v46 }
0x4894   :  { %v7682_v7 = vpop.xlane.xlu0 %7681 }
0x4895   :  { %v7686_v43 = vmul.f32 0.032258064, %v7682_v7 }
0x4897   :  { %12307 = vrsqrt.f32 %v7686_v43  ;;  %vm7690_vm9 = vcmp.eq.f32.partialorder %v7686_v43, inf  ;;  %v7693_v47 = vand.u32 2147483648, %v7686_v43  ;;  %vm7692_vm10 = vcmp.eq.f32.partialorder %v7686_v43, 0.0 }
0x4898   :  { %v7685_v19 = vpop.xlane.xlu0 %7684 }
0x4899   :  { %v7687_v50 = vmul.f32 0.032258064, %v7685_v19 }
0x489b   :  { %12309 = vrsqrt.f32 %v7687_v50  ;;  %vm7697_vm11 = vcmp.eq.f32.partialorder %v7687_v50, inf  ;;  %v7700_v16 = vand.u32 2147483648, %v7687_v50  ;;  %vm7699_vm12 = vcmp.eq.f32.partialorder %v7687_v50, 0.0 }
0x48a1   :  { %v12308_v57 = vpop.eup %12307 }
0x48a2   :  { %v7689_v2 = vmul.f32 %v12308_v57, %v7686_v43 }
0x48a4   :  { %v7691_v4 = vsel %vm7690_vm9, %v7686_v43, %v7689_v2 }
0x48a5   :  { %v12310_v5 = vpop.eup %12309  ;;  %v7694_v45 = vsel %vm7692_vm10, %v7693_v47, %v7691_v4 }
0x48a6   :  { %v7696_v56 = vmul.f32 %v12310_v5, %v7687_v50  ;;  %v7710_v54 = vadd.f32 1e-06, %v7694_v45 }
0x48a8   :  { %v7698_v60 = vsel %vm7697_vm11, %v7687_v50, %v7696_v56  ;;  %12311 = vrcp.f32 %v7710_v54 }
0x48a9   :  { %v7701_v41 = vsel %vm7699_vm12, %v7700_v16, %v7698_v60 }
0x48aa   :  { %v7711_v42 = vadd.f32 1e-06, %v7701_v41 }
0x48ac   :  { %12313 = vrcp.f32 %v7711_v42 }
0x48b2   :  { %v12312_v62 = vpop.eup %12311 }
0x48b3   :  { %v7713_v27 = vmul.f32 %v12312_v62, %v7708_v34 }
0x48b5   :  { %v14755_v58 = vadd.f32 %v9585_v31, %v7713_v27 }
0x48b6   :  { %v12314_v33 = vpop.eup %12313 }
0x48b7   :  { %v7715_v37 = vmul.f32 %v12314_v33, %v7709_v32  ;;  %10781 = vmatprep.mubr.msk.f32.mxu1 %vm514_vm0, %v14755_v58 }
0x48b9   :  { %v14759_v21 = vadd.f32 %v9585_v31, %v7715_v37 }
0x48bb   :  { %10782 = vmatmul.mubr.msk.f32.vlgmr.msra.gmra.mrb[76].mxu1 %vm514_vm0, %v14759_v21 }
0x48bc   :  { %11428 = vmatpush3.bf16.xpose.msk.msra.mxu1 %vm13503_vm2, %v11423_v49 }
0x48bd   :  { %11431 = vmatprep.subr.msk.bf16.mxu1 %vm13503_vm2, %v11429_v22 }
0x48c4   :  { %11434 = vmatpush3.bf16.xpose.msk.msra.mxu1 %vm13503_vm2, %v11429_v22 }
0x498e   :  { %v10783_v14 = vpop.f32.mrb[76].mxu1 }
0x498f   :  { %v7823_v36 = vpop.f32.mrb[77].mxu1  ;;  %v14771_v29 = vadd.f32 %v10783_v14, %v9590_v25 }
0x4990   :  { %v14769_v51 = vadd.f32 %v9590_v25, %v7823_v36 }
0x4992   :  { %10806 = vmatprep.mubr.msk.f32.mxu1 %vm624_vm1, %v14769_v51 }
0x4993   :  { %10807 = vmatmul.mubr.msk.f32.vlgmr.msra.gmra.mrb[78].mxu1 %vm624_vm1, %v14771_v29 }
0x4a66   :  { %v10808_v3 = vpop.f32.mrb[78].mxu1 }
0x4a67   :  { %v8013_v63 = vadd.f32 %v14778_v38, %v10808_v3  ;;  %v8007_v61 = vpop.f32.mrb[79].mxu1 }
0x4a68   :  { %v8008_v13 = vadd.f32 %v14782_v9, %v8007_v61 }
0x4a69   :  { %v8019_v26 = vsel %vm514_vm0, %v8013_v63, -inf }
0x4a6a   :  { %8020 = vmax.xlane.f32.xlu0 %v8019_v26  ;;  %v8016_v10 = vsel %vm514_vm0, %v8008_v13, -inf }
0x4a6b   :  { %8017 = vmax.xlane.f32.xlu1 %v8016_v10 }
0x4a7c   :  { %11926 = vrot.lane.b32.xlu1 %v14747_v23, %s13043_s23 }
0x4a80   :  { %11936 = vrot.lane.b32.xlu1 %v14747_v23, %s13046_s20 }
0x4af7   :  { %v8021_v35 = vpop.xlane.xlu0 %8020 }
0x4af8   :  { %v8023_v52 = vsub.f32 %v8013_v63, %v8021_v35  ;;  %v8018_v30 = vpop.xlane.xlu1 %8017 }
0x4af9   :  { %v8022_v55 = vsub.f32 %v8008_v13, %v8018_v30 }
0x4afa   :  { %v8026_v18 = vmul.f32 1.442695, %v8023_v52 }
0x4afb   :  { %v8024_v39 = vmul.f32 1.442695, %v8022_v55 }
0x4afc   :  { %12315 = vpow2.f32 %v8026_v18  ;;  %v11927_v12 = vpop.permute.xlu1 %11926 }
0x4afd   :  { %12317 = vpow2.f32 %v8024_v39  ;;  %v11929_v49 = vunpack.i.h.bf16 %v11927_v12  ;;  %v11928_v11 = vunpack.i.l.bf16 %v11927_v12 }
0x4aff   :  { %v11435_v53 = vpack.c.bf16 %v11929_v49, %v11928_v11 }
0x4b00   :  { %v11937_v17 = vpop.permute.xlu1 %11936 }
0x4b01   :  { %11436 = vmatprep.subr.bf16.mxu0 %v11435_v53  ;;  %v11939_v20 = vunpack.i.h.bf16 %v11937_v17  ;;  %v11938_v8 = vunpack.i.l.bf16 %v11937_v17 }
0x4b02   :  { %11438 = vmatpush3.bf16.msra.mxu0 %v11435_v53 }
0x4b03   :  { %v11443_v43 = vpack.c.bf16 %v11939_v20, %v11938_v8 }
0x4b06   :  { %v12316_v40 = vpop.eup %12315 }
0x4b07   :  { %v12318_v22 = vpop.eup %12317  ;;  %v8031_v48 = vsel %vm514_vm0, %v12316_v40, 0.0 }
0x4b08   :  { %8032 = vadd.xlane.f32.xlu0 %v8031_v48  ;;  %v8028_v15 = vsel %vm514_vm0, %v12318_v22, 0.0 }
0x4b09   :  { %8029 = vadd.xlane.f32.xlu1 %v8028_v15 }
0x4b1a   :  { %11941 = vrot.lane.b32.xlu1 %v14751_v28, %s13046_s20 }
0x4b1e   :  { %11931 = vrot.lane.b32.xlu0 %v14751_v28, %s13043_s23  ;;  %8133 = vrot.lane.b32.xlu1 %v14771_v29, %s13046_s20 }
0x4b22   :  { %8131 = vrot.lane.b32.xlu0 %v14769_v51, %s13046_s20 }
0x4b95   :  { %v8033_v1 = vpop.xlane.xlu0 %8032 }
0x4b96   :  { %12319 = vrcp.f32 %v8033_v1  ;;  %v8030_v0 = vpop.xlane.xlu1 %8029 }
0x4b97   :  { %12321 = vrcp.f32 %v8030_v0 }
0x4b99   :  { %v11932_v59 = vpop.permute.xlu0 %11931 }
0x4b9a   :  { %v11934_v6 = vunpack.i.h.bf16 %v11932_v59  ;;  %v11933_v46 = vunpack.i.l.bf16 %v11932_v59  ;;  %v11942_v50 = vpop.permute.xlu1 %11941 }
0x4b9b   :  { %v11944_v4 = vunpack.i.h.bf16 %v11942_v50  ;;  %v11943_v5 = vunpack.i.l.bf16 %v11942_v50 }
0x4b9c   :  { %v11439_v7 = vpack.c.bf16 %v11934_v6, %v11933_v46 }
0x4b9d   :  { %v8132_v45 = vpop.permute.xlu0 %8131  ;;  %v11449_v56 = vpack.c.bf16 %v11944_v4, %v11943_v5 }
0x4b9e   :  { %11440 = vmatprep.subr.bf16.mxu0 %v11439_v7  ;;  %v8134_v54 = vpop.permute.xlu1 %8133 }
0x4b9f   :  { %11442 = vmatpush3.bf16.msra.mxu0 %v11439_v7 }
0x4ba0   :  { %v12320_v19 = vpop.eup %12319  ;;  %11445 = vmatprep.subr.msk.bf16.mxu0 %vm13503_vm2, %v11443_v43 }
0x4ba1   :  { %v12322_v57 = vpop.eup %12321  ;;  %v8037_v47 = vmul.f32 %v12320_v19, %v12316_v40 }
0x4ba2   :  { %v8035_v2 = vmul.f32 %v12322_v57, %v12318_v22 }
0x4ba4   :  { %10817 = vmatprep.mubr.msk.f32.mxu0 %vm514_vm0, %v8035_v2 }
0x4ba5   :  { %10818 = vmatmul.mubr.msk.f32.vlgmr.msra.gmra.mrb[92].mxu0 %vm514_vm0, %v8037_v47 }
0x4ba6   :  { %10828 = vmatprep.mubr.msk.f32.mxu0 %vm624_vm1, %v8132_v45 }
0x4ba8   :  { %11448 = vmatpush3.bf16.xpose.msk.msra.mxu0 %vm13503_vm2, %v11443_v43 }
0x4ba9   :  { %11451 = vmatprep.subr.msk.bf16.mxu0 %vm13503_vm2, %v11449_v56 }
0x4bb0   :  { %11454 = vmatpush3.bf16.xpose.msk.msra.mxu0 %vm13503_vm2, %v11449_v56 }
0x4bb7   :  { %10829 = vmatmul.mubr.msk.f32.vlgmr.msra.gmra.mrb[94].mxu0 %vm624_vm1, %v8134_v54 }
0x4c78   :  { %v14813_v16 = vpop.f32.mrb[92].mxu0 }
0x4c79   :  { %v14815_v60 = vpop.f32.mrb[93].mxu0 }
0x4c8a   :  { %v10830_v41 = vpop.f32.mrb[94].mxu0 }
0x4c8b   :  { %v8227_v42 = vadd.f32 %v14778_v38, %v10830_v41  ;;  %v8221_v44 = vpop.f32.mrb[95].mxu0 }
0x4c8c   :  { %v8222_v34 = vadd.f32 %v14782_v9, %v8221_v44 }
0x4c8d   :  { %v8233_v62 = vsel %vm514_vm0, %v8227_v42, -inf }
0x4c8e   :  { %8234 = vmax.xlane.f32.xlu1 %v8233_v62  ;;  %v8230_v31 = vsel %vm514_vm0, %v8222_v34, -inf }
0x4c8f   :  { %8231 = vmax.xlane.f32.xlu0 %v8230_v31 }
0x4c9f   :  { %11946 = vrot.lane.b32.xlu1 %v14747_v23, %s13045_s28 }
0x4ca3   :  { %11956 = vrot.lane.b32.xlu1 %v14747_v23, %s13049_s2 }
0x4ca7   :  { %11961 = vrot.lane.b32.xlu1 %v14751_v28, %s13049_s2 }
0x4cab   :  { %8347 = vrot.lane.b32.xlu1 %v14771_v29, %s13049_s2 }
0x4d1b   :  { %v8235_v27 = vpop.xlane.xlu1 %8234 }
0x4d1c   :  { %v8237_v32 = vsub.f32 %v8227_v42, %v8235_v27  ;;  %v8232_v33 = vpop.xlane.xlu0 %8231 }
0x4d1d   :  { %v8236_v37 = vsub.f32 %v8222_v34, %v8232_v33 }
0x4d1e   :  { %v8240_v25 = vmul.f32 1.442695, %v8237_v32 }
0x4d1f   :  { %v8238_v14 = vmul.f32 1.442695, %v8236_v37  ;;  %v11947_v36 = vpop.permute.xlu1 %11946 }
0x4d20   :  { %12323 = vpow2.f32 %v8240_v25  ;;  %v11949_v3 = vunpack.i.h.bf16 %v11947_v36  ;;  %v11948_v63 = vunpack.i.l.bf16 %v11947_v36 }
0x4d21   :  { %12325 = vpow2.f32 %v8238_v14 }
0x4d22   :  { %v11455_v61 = vpack.c.bf16 %v11949_v3, %v11948_v63 }
0x4d23   :  { %v11957_v55 = vpop.permute.xlu1 %11956 }
0x4d24   :  { %11456 = vmatprep.subr.bf16.mxu1 %v11455_v61  ;;  %v11959_v39 = vunpack.i.h.bf16 %v11957_v55  ;;  %v11958_v12 = vunpack.i.l.bf16 %v11957_v55 }
0x4d25   :  { %11458 = vmatpush3.bf16.msra.mxu1 %v11455_v61 }
0x4d26   :  { %v11463_v40 = vpack.c.bf16 %v11959_v39, %v11958_v12 }
0x4d27   :  { %v11962_v15 = vpop.permute.xlu1 %11961 }
0x4d28   :  { %v11964_v0 = vunpack.i.h.bf16 %v11962_v15  ;;  %v11963_v59 = vunpack.i.l.bf16 %v11962_v15 }
0x4d2a   :  { %v12324_v13 = vpop.eup %12323  ;;  %v11469_v8 = vpack.c.bf16 %v11964_v0, %v11963_v59 }
0x4d2b   :  { %v8245_v26 = vsel %vm514_vm0, %v12324_v13, 0.0  ;;  %v12326_v10 = vpop.eup %12325  ;;  %v8348_v6 = vpop.permute.xlu1 %8347 }
0x4d2c   :  { %8246 = vadd.xlane.f32.xlu0 %v8245_v26  ;;  %v8242_v35 = vsel %vm514_vm0, %v12326_v10, 0.0 }
0x4d30   :  { %8243 = vadd.xlane.f32.xlu0 %v8242_v35 }
0x4d46   :  { %11951 = vrot.lane.b32.xlu0 %v14751_v28, %s13045_s28 }
0x4d4a   :  { %8345 = vrot.lane.b32.xlu0 %v14769_v51, %s13049_s2 }
0x4db9   :  { %v8247_v52 = vpop.xlane.xlu0 %8246 }
0x4dba   :  { %12327 = vrcp.f32 %v8247_v52 }
0x4dbd   :  { %v8244_v30 = vpop.xlane.xlu0 %8243 }
0x4dbe   :  { %12329 = vrcp.f32 %v8244_v30 }
0x4dc1   :  { %v11952_v18 = vpop.permute.xlu0 %11951 }
0x4dc2   :  { %v11954_v49 = vunpack.i.h.bf16 %v11952_v18  ;;  %v11953_v11 = vunpack.i.l.bf16 %v11952_v18 }
0x4dc4   :  { %v11459_v53 = vpack.c.bf16 %v11954_v49, %v11953_v11  ;;  %v12328_v22 = vpop.eup %12327 }
0x4dc5   :  { %v8251_v1 = vmul.f32 %v12328_v22, %v12324_v13  ;;  %v8346_v20 = vpop.permute.xlu0 %8345 }
0x4dc6   :  { %11460 = vmatprep.subr.bf16.mxu1 %v11459_v53 }
0x4dc7   :  { %11462 = vmatpush3.bf16.msra.mxu1 %v11459_v53 }
0x4dc8   :  { %v12330_v48 = vpop.eup %12329  ;;  %11465 = vmatprep.subr.msk.bf16.mxu1 %vm13503_vm2, %v11463_v40 }
0x4dc9   :  { %v8249_v17 = vmul.f32 %v12330_v48, %v12326_v10 }
0x4dcb   :  { %10839 = vmatprep.mubr.msk.f32.mxu1 %vm514_vm0, %v8249_v17 }
0x4dcc   :  { %10840 = vmatmul.mubr.msk.f32.vlgmr.msra.gmra.mrb[80].mxu1 %vm514_vm0, %v8251_v1 }
0x4dcd   :  { %10850 = vmatprep.mubr.msk.f32.mxu1 %vm624_vm1, %v8346_v20 }
0x4dd0   :  { %11468 = vmatpush3.bf16.xpose.msk.msra.mxu1 %vm13503_vm2, %v11463_v40 }
0x4dd1   :  { %11471 = vmatprep.subr.msk.bf16.mxu1 %vm13503_vm2, %v11469_v8 }
0x4dd8   :  { %11474 = vmatpush3.bf16.xpose.msk.msra.mxu1 %vm13503_vm2, %v11469_v8 }
0x4ddf   :  { %10851 = vmatmul.mubr.msk.f32.vlgmr.msra.gmra.mrb[82].mxu1 %vm624_vm1, %v8348_v6 }
0x4e9f   :  { %v14847_v46 = vpop.f32.mrb[80].mxu1 }
0x4ea0   :  { %v14849_v7 = vpop.f32.mrb[81].mxu1 }
0x4eb2   :  { %v10852_v43 = vpop.f32.mrb[82].mxu1 }
0x4eb3   :  { %v8441_v19 = vadd.f32 %v14778_v38, %v10852_v43  ;;  %v8435_v50 = vpop.f32.mrb[83].mxu1 }
0x4eb4   :  { %v8436_v57 = vadd.f32 %v14782_v9, %v8435_v50 }
0x4eb5   :  { %v8447_v2 = vsel %vm514_vm0, %v8441_v19, -inf }
0x4eb6   :  { %8448 = vmax.xlane.f32.xlu1 %v8447_v2  ;;  %v8444_v47 = vsel %vm514_vm0, %v8436_v57, -inf }
0x4eb7   :  { %8445 = vmax.xlane.f32.xlu0 %v8444_v47 }
0x4ec7   :  { %11966 = vrot.lane.b32.xlu1 %v14747_v23, %s13048_s30 }
0x4ecb   :  { %11976 = vrot.lane.b32.xlu1 %v14747_v23, %s13052_s25 }
0x4ecf   :  { %11981 = vrot.lane.b32.xlu1 %v14751_v28, %s13052_s25 }
0x4ed3   :  { %8561 = vrot.lane.b32.xlu1 %v14771_v29, %s13052_s25 }
0x4f43   :  { %v8449_v4 = vpop.xlane.xlu1 %8448 }
0x4f44   :  { %v8451_v5 = vsub.f32 %v8441_v19, %v8449_v4  ;;  %v8446_v45 = vpop.xlane.xlu0 %8445 }
0x4f45   :  { %v8450_v56 = vsub.f32 %v8436_v57, %v8446_v45 }
0x4f46   :  { %v8454_v54 = vmul.f32 1.442695, %v8451_v5 }
0x4f47   :  { %v8452_v41 = vmul.f32 1.442695, %v8450_v56  ;;  %v11967_v42 = vpop.permute.xlu1 %11966 }
0x4f48   :  { %12331 = vpow2.f32 %v8454_v54  ;;  %v11969_v44 = vunpack.i.h.bf16 %v11967_v42  ;;  %v11968_v34 = vunpack.i.l.bf16 %v11967_v42 }
0x4f49   :  { %12333 = vpow2.f32 %v8452_v41 }
0x4f4a   :  { %v11475_v62 = vpack.c.bf16 %v11969_v44, %v11968_v34  ;;  %v7740_v44 = vld [vmem:[#allocation25 + $0x28] sm:$0xff]  ;;  %v7741_v34 = vld [vmem:[#allocation25 + $0x30] sm:$0xff] }
0x4f4b   :  { %v11977_v25 = vpop.permute.xlu1 %11976 }
0x4f4c   :  { %11476 = vmatprep.subr.bf16.mxu0 %v11475_v62  ;;  %v11979_v36 = vunpack.i.h.bf16 %v11977_v25  ;;  %v11978_v3 = vunpack.i.l.bf16 %v11977_v25 }
0x4f4d   :  { %11478 = vmatpush3.bf16.msra.mxu0 %v11475_v62 }
0x4f4e   :  { %v11483_v26 = vpack.c.bf16 %v11979_v36, %v11978_v3 }
0x4f4f   :  { %v11982_v52 = vpop.permute.xlu1 %11981 }
0x4f50   :  { %v11984_v55 = vunpack.i.h.bf16 %v11982_v52  ;;  %v11983_v18 = vunpack.i.l.bf16 %v11982_v52  ;;  %v9630_v52 = vld [vmem:[#allocation26 + $0x1] ss:$0 sm:$0xff] }
0x4f52   :  { %v12332_v31 = vpop.eup %12331  ;;  %v11489_v12 = vpack.c.bf16 %v11984_v55, %v11983_v18 }
0x4f53   :  { %v8459_v27 = vsel %vm514_vm0, %v12332_v31, 0.0  ;;  %v12334_v32 = vpop.eup %12333  ;;  %v8562_v49 = vpop.permute.xlu1 %8561 }
0x4f54   :  { %8460 = vadd.xlane.f32.xlu0 %v8459_v27  ;;  %v8456_v29 = vsel %vm514_vm0, %v12334_v32, 0.0 }
0x4f58   :  { %8457 = vadd.xlane.f32.xlu0 %v8456_v29 }
0x4f6e   :  { %11971 = vrot.lane.b32.xlu0 %v14751_v28, %s13048_s30 }
0x4f72   :  { %8559 = vrot.lane.b32.xlu0 %v14769_v51, %s13052_s25 }
0x4fe1   :  { %v8461_v33 = vpop.xlane.xlu0 %8460 }
0x4fe2   :  { %12335 = vrcp.f32 %v8461_v33 }
0x4fe5   :  { %v8458_v37 = vpop.xlane.xlu0 %8457 }
0x4fe6   :  { %12337 = vrcp.f32 %v8458_v37 }
0x4fe9   :  { %v11972_v14 = vpop.permute.xlu0 %11971 }
0x4fea   :  { %v11974_v63 = vunpack.i.h.bf16 %v11972_v14  ;;  %v11973_v61 = vunpack.i.l.bf16 %v11972_v14 }
0x4fec   :  { %v11479_v13 = vpack.c.bf16 %v11974_v63, %v11973_v61  ;;  %v12336_v10 = vpop.eup %12335 }
0x4fed   :  { %v8465_v30 = vmul.f32 %v12336_v10, %v12332_v31  ;;  %v8560_v39 = vpop.permute.xlu0 %8559  ;;  %v7742_v31 = vld [vmem:[#allocation25 + $0x38] sm:$0xff] }
0x4fee   :  { %11480 = vmatprep.subr.bf16.mxu0 %v11479_v13  ;;  %v11507_v27 = vpack.c.bf16 %v7742_v31, %v7741_v34 }
0x4fef   :  { %11482 = vmatpush3.bf16.msra.mxu0 %v11479_v13 }
0x4ff0   :  { %v12338_v35 = vpop.eup %12337  ;;  %11485 = vmatprep.subr.msk.bf16.mxu0 %vm13503_vm2, %v11483_v26 }
0x4ff1   :  { %v8463_v51 = vmul.f32 %v12338_v35, %v12334_v32 }
0x4ff3   :  { %10861 = vmatprep.mubr.msk.f32.mxu0 %vm514_vm0, %v8463_v51 }
0x4ff4   :  { %10862 = vmatmul.mubr.msk.f32.vlgmr.msra.gmra.mrb[96].mxu0 %vm514_vm0, %v8465_v30 }
0x4ff5   :  { %10872 = vmatprep.mubr.msk.f32.mxu0 %vm624_vm1, %v8560_v39 }
0x4ff8   :  { %11488 = vmatpush3.bf16.xpose.msk.msra.mxu0 %vm13503_vm2, %v11483_v26 }
0x4ff9   :  { %11491 = vmatprep.subr.msk.bf16.mxu0 %vm13503_vm2, %v11489_v12 }
0x5000   :  { %11494 = vmatpush3.bf16.xpose.msk.msra.mxu0 %vm13503_vm2, %v11489_v12 }
0x5007   :  { %10873 = vmatmul.mubr.msk.f32.vlgmr.msra.gmra.mrb[98].mxu0 %vm624_vm1, %v8562_v49 }
0x50c7   :  { %v10863_v11 = vpop.f32.mrb[96].mxu0 }
0x50c8   :  { %v8550_v53 = vpop.f32.mrb[97].mxu0 }
0x50da   :  { %v10874_v40 = vpop.f32.mrb[98].mxu0 }
0x50db   :  { %v8655_v22 = vadd.f32 %v14778_v38, %v10874_v40  ;;  %v8649_v48 = vpop.f32.mrb[99].mxu0 }
0x50dc   :  { %v8650_v15 = vadd.f32 %v14782_v9, %v8649_v48 }
0x50dd   :  { %v8661_v17 = vsel %vm514_vm0, %v8655_v22, -inf }
0x50de   :  { %8662 = vmax.xlane.f32.xlu1 %v8661_v17  ;;  %v8658_v1 = vsel %vm514_vm0, %v8650_v15, -inf }
0x50df   :  { %8659 = vmax.xlane.f32.xlu0 %v8658_v1  ;;  %v9635_v1 = vld [vmem:[%s15017_s3 + $0x20] sm:$0xff] }
0x50ef   :  { %11986 = vrot.lane.b32.xlu1 %v14747_v23, %s13051_s7 }
0x50f3   :  { %8775 = vrot.lane.b32.xlu1 %v14849_v7, %s13030_s24 }
0x50f7   :  { %8777 = vrot.lane.b32.xlu1 %v14847_v46, %s13030_s24 }
0x50fb   :  { %8785 = vrot.lane.b32.xlu1 %v10863_v11, %s13016_s22 }
0x516b   :  { %v8663_v24 = vpop.xlane.xlu1 %8662 }
0x516c   :  { %v8665_v38 = vsub.f32 %v8655_v22, %v8663_v24  ;;  %v8660_v9 = vpop.xlane.xlu0 %8659  ;;  %v9636_v24 = vld [vmem:[%s15017_s3 + $0x28] sm:$0xff] }
0x516d   :  { %v8664_v0 = vsub.f32 %v8650_v15, %v8660_v9  ;;  %v11511_v9 = vpack.c.bf16 %v9636_v24, %v9635_v1 }
0x516e   :  { %v8668_v59 = vmul.f32 1.442695, %v8665_v38  ;;  %v9637_v38 = vld [vmem:[%s15017_s3 + $0x30] sm:$0xff] }
0x516f   :  { %v8666_v20 = vmul.f32 1.442695, %v8664_v0  ;;  %v11987_v8 = vpop.permute.xlu1 %11986  ;;  %v9638_v0 = vld [vmem:[%s15017_s3 + $0x38] sm:$0xff]  ;;  %11512 = vmatprep.subr.bf16.mxu0 %v11511_v9 }
0x5170   :  { %12339 = vpow2.f32 %v8668_v59  ;;  %v11989_v6 = vunpack.i.h.bf16 %v11987_v8  ;;  %v11988_v43 = vunpack.i.l.bf16 %v11987_v8  ;;  %v11515_v59 = vpack.c.bf16 %v9638_v0, %v9637_v38  ;;  %11514 = vmatpush3.bf16.msra.mxu0 %v11511_v9  ;;  %v9640_v8 = vld [vmem:[%s15018_s8 + $0x48] sm:$0xff] }
0x5171   :  { %12341 = vpow2.f32 %v8666_v20  ;;  %v9639_v20 = vld [vmem:[%s15018_s8 + $0x40] sm:$0xff] }
0x5172   :  { %v11495_v23 = vpack.c.bf16 %v11989_v6, %v11988_v43  ;;  %11516 = vmatprep.subr.bf16.mxu0 %v11515_v59  ;;  %v9641_v6 = vld [vmem:[%s15018_s8 + $0x50] sm:$0xff]  ;;  %v11519_v43 = vpack.c.bf16 %v9640_v8, %v9639_v20 }
0x5173   :  { %v8776_v33 = vpop.permute.xlu1 %8775 }
0x5174   :  { %11496 = vmatprep.subr.bf16.mxu1 %v11495_v23  ;;  %v8797_v36 = vsel %vm624_vm1, %v14815_v60, %v8776_v33  ;;  %11518 = vmatpush3.bf16.msra.mxu0 %v11515_v59 }
0x5175   :  { %11498 = vmatpush3.bf16.msra.mxu1 %v11495_v23  ;;  %v9642_v23 = vld [vmem:[%s15018_s8 + $0x58] sm:$0xff] }
0x5177   :  { %v8778_v37 = vpop.permute.xlu1 %8777 }
0x5178   :  { %v8798_v63 = vsel %vm624_vm1, %v14813_v16, %v8778_v37  ;;  %v9634_v37 = vld [vmem:[#allocation35 + $0x1] ss:$0 sm:$0xff] }
0x517a   :  { %v12340_v7 = vpop.eup %12339 }
0x517b   :  { %v8673_v19 = vsel %vm514_vm0, %v12340_v7, 0.0  ;;  %v12342_v46 = vpop.eup %12341  ;;  %v8786_v25 = vpop.permute.xlu1 %8785 }
0x517c   :  { %8674 = vadd.xlane.f32.xlu0 %v8673_v19  ;;  %v8670_v50 = vsel %vm514_vm0, %v12342_v46, 0.0  ;;  %v8800_v26 = vsel %vm1741_vm3, %v8798_v63, %v8786_v25  ;;  %v9643_v19 = vld [vmem:[%s15018_s8 + $0x60] sm:$0xff] }
0x5180   :  { %8671 = vadd.xlane.f32.xlu0 %v8670_v50 }
0x5196   :  { %11991 = vrot.lane.b32.xlu0 %v14751_v28, %s13051_s7  ;;  %v7739_v28 = vld [vmem:[#allocation25 + $0x20] sm:$0xff] }
0x5197   :  { %v11503_v62 = vpack.c.bf16 %v7740_v44, %v7739_v28 }
0x519a   :  { %8783 = vrot.lane.b32.xlu0 %v8550_v53, %s13016_s22  ;;  %s13055_s22 = smov [#allocation40]  }
0x519b   :  { %s9219_s26 = sshll.u32 %s13055_s22, 4  ;;  %s9220_s26 = int_to_ptr.vmem [resolvable:$true] %s9219_s26 }
0x519c   :  { %s12903_s5 = scalar_lea.vmem %s9220_s26, 512  ;;  %p12908_p11 = scmp.lt.s32.totalorder %s9220_s26, %s9220_s26 }
0x519d   :  { %p12904_p10 = scmp.ne.s32.totalorder %s9220_s26, %s12903_s5  ;;  %p12909_p12 = scmp.lt.s32.totalorder %s12903_s5, %s12903_s5 }
0x519f   :  { %p12910_p13 = por %p12909_p12, %p12908_p11 }
0x51a1   :  { %p12911_p0 = pnand %p12910_p13, %p12904_p10 }
0x5209   :  { %v8675_v57 = vpop.xlane.xlu0 %8674 }
0x520a   :  { %12343 = vrcp.f32 %v8675_v57 }
0x520d   :  { %v8672_v2 = vpop.xlane.xlu0 %8671 }
0x520e   :  { %12345 = vrcp.f32 %v8672_v2 }
0x5211   :  { %v11992_v47 = vpop.permute.xlu0 %11991 }
0x5212   :  { %v11994_v4 = vunpack.i.h.bf16 %v11992_v47  ;;  %v11993_v5 = vunpack.i.l.bf16 %v11992_v47 }
0x5214   :  { %v11499_v45 = vpack.c.bf16 %v11994_v4, %v11993_v5  ;;  %v12344_v56 = vpop.eup %12343 }
0x5215   :  { %v8679_v42 = vmul.f32 %v12344_v56, %v12340_v7  ;;  %v8784_v14 = vpop.permute.xlu0 %8783  ;;  %v11523_v7 = vpack.c.bf16 %v9642_v23, %v9641_v6 }
0x5216   :  { %11500 = vmatprep.subr.bf16.mxu1 %v11499_v45  ;;  %v8799_v61 = vsel %vm1741_vm3, %v8797_v36, %v8784_v14 }
0x5217   :  { %11502 = vmatpush3.bf16.msra.mxu1 %v11499_v45 }
0x5218   :  { %v12346_v54 = vpop.eup %12345  ;;  %11504 = vmatprep.subr.bf16.mxu1 %v11503_v62 }
0x5219   :  { %v8677_v41 = vmul.f32 %v12346_v54, %v12342_v46  ;;  %v9644_v46 = vld [vmem:[%s15018_s8 + $0x68] sm:$0xff] }
0x521a   :  { %v11527_v50 = vpack.c.bf16 %v9644_v46, %v9643_v19 }
0x521b   :  { %10883 = vmatprep.mubr.msk.f32.mxu1 %vm514_vm0, %v8677_v41 }
0x521c   :  { %10884 = vmatmul.mubr.msk.f32.vlgmr.msra.gmra.mrb[84].mxu1 %vm514_vm0, %v8679_v42 }
0x521d   :  { %11506 = vmatpush3.bf16.msra.mxu1 %v11503_v62 }
0x521e   :  { %11508 = vmatprep.subr.bf16.mxu1 %v11507_v27 }
0x5221   :  { %11510 = vmatpush3.bf16.msra.mxu1 %v11507_v27 }
0x5222   :  { %11520 = vmatprep.subr.bf16.mxu1 %v11519_v43 }
0x52ef   :  { %v10885_v32 = vpop.f32.mrb[84].mxu1 }
0x52f0   :  { %8793 = vrot.lane.b32.xlu1 %v10885_v32, %s13054_s21  ;;  %v8764_v29 = vpop.f32.mrb[85].mxu1  ;;  %v9633_v32 = vld [vmem:[#allocation34 + $0x1] ss:$0 sm:$0xff] }
0x52f1   :  { %8791 = vrot.lane.b32.xlu0 %v8764_v29, %s13054_s21 }
0x5362   :  { %v8794_v3 = vpop.permute.xlu1 %8793 }
0x5363   :  { %v8792_v13 = vpop.permute.xlu0 %8791  ;;  %v8802_v35 = vsel %vm1746_vm4, %v8800_v26, %v8794_v3  ;;  %v9646_v26 = vld [vmem:[%s15018_s8 + $0x78] sm:$0xff] }
0x5364   :  { %v8801_v10 = vsel %vm1746_vm4, %v8799_v61, %v8792_v13  ;;  %v9645_v13 = vld [vmem:[%s15018_s8 + $0x70] sm:$0xff] }
0x5365   :  { %10894 = vmatprep.mubr.msk.f32.mxu1 %vm514_vm0, %v8801_v10  ;;  %v11531_v10 = vpack.c.bf16 %v9646_v26, %v9645_v13 }
0x5366   :  { %10895 = vmatmul.mubr.msk.f32.vlgmr.msra.gmra.mrb[86].mxu1 %vm514_vm0, %v8802_v35  ;;  %v9647_v35 = vld [vmem:[#allocation28 + $0x1] ss:$0 sm:$0xff] }
0x5367   :  { %11522 = vmatpush3.bf16.msra.mxu1 %v11519_v43 }
0x5368   :  { %11524 = vmatprep.subr.bf16.mxu1 %v11523_v7 }
0x536b   :  { %11526 = vmatpush3.bf16.msra.mxu1 %v11523_v7 }
0x536c   :  { %11528 = vmatprep.subr.bf16.mxu1 %v11527_v50 }
0x536f   :  { %11530 = vmatpush3.bf16.msra.mxu1 %v11527_v50 }
0x5370   :  { %11532 = vmatprep.subr.bf16.mxu1 %v11531_v10 }
0x5373   :  { %11534 = vmatpush3.bf16.msra.mxu1 %v11531_v10 }
0x5439   :  { %v10896_v51 = vpop.f32.mrb[86].mxu1 }
0x543a   :  { %v8887_v60 = vadd.f32 %v10896_v51, %v9630_v52  ;;  %v8881_v30 = vpop.f32.mrb[87].mxu1 }
0x543b   :  { %v8882_v55 = vadd.f32 %v9630_v52, %v8881_v30 }
0x543c   :  { %v8895_v16 = vadd.f32 %v8887_v60, %v14759_v21 }
0x543d   :  { %v8894_v18 = vadd.f32 %v8882_v55, %v14755_v58 }
0x543e   :  { %v8899_v39 = vsel %vm514_vm0, %v8895_v16, 0.0 }
0x543f   :  { %8900 = vadd.xlane.f32.xlu1 %v8899_v39  ;;  %v8896_v12 = vsel %vm514_vm0, %v8894_v18, 0.0 }
0x5440   :  { %8897 = vadd.xlane.f32.xlu0 %v8896_v12 }
0x54cc   :  { %v8901_v49 = vpop.xlane.xlu1 %8900 }
0x54cd   :  { %v8903_v11 = vmul.f32 0.03125, %v8901_v49  ;;  %v8898_v53 = vpop.xlane.xlu0 %8897 }
0x54ce   :  { %v8902_v40 = vmul.f32 0.03125, %v8898_v53 }
0x54cf   :  { %v8905_v22 = vsub.f32 %v8895_v16, %v8903_v11 }
0x54d0   :  { %v8904_v48 = vsub.f32 %v8894_v18, %v8902_v40  ;;  %v9650_v18 = vld [vmem:[#allocation29 + $0x1] ss:$0 sm:$0xff] }
0x54d1   :  { %v8907_v21 = vmul.f32 %v8905_v22, %v8905_v22  ;;  %v8937_v14 = vmul.f32 %v9633_v32, %v8905_v22 }
0x54d2   :  { %v8906_v15 = vmul.f32 %v8904_v48, %v8904_v48  ;;  %v8936_v29 = vmul.f32 %v9633_v32, %v8904_v48 }
0x54d3   :  { %v8911_v17 = vsel %vm514_vm0, %v8907_v21, 0.0 }
0x54d4   :  { %v8908_v58 = vsel %vm514_vm0, %v8906_v15, 0.0 }
0x54d5   :  { %8909 = vadd.xlane.f32.xlu0 %v8908_v58 }
0x54d9   :  { %8912 = vadd.xlane.f32.xlu0 %v8911_v17 }
0x5562   :  { %v8910_v57 = vpop.xlane.xlu0 %8909 }
0x5563   :  { %v8914_v2 = vmul.f32 0.032258064, %v8910_v57 }
0x5565   :  { %12347 = vrsqrt.f32 %v8914_v2  ;;  %vm8918_vm1 = vcmp.eq.f32.partialorder %v8914_v2, inf  ;;  %v8921_v56 = vand.u32 2147483648, %v8914_v2  ;;  %vm8920_vm2 = vcmp.eq.f32.partialorder %v8914_v2, 0.0 }
0x5566   :  { %v8913_v47 = vpop.xlane.xlu0 %8912 }
0x5567   :  { %v8915_v4 = vmul.f32 0.032258064, %v8913_v47 }
0x5569   :  { %12349 = vrsqrt.f32 %v8915_v4  ;;  %vm8925_vm3 = vcmp.eq.f32.partialorder %v8915_v4, inf  ;;  %v8928_v34 = vand.u32 2147483648, %v8915_v4  ;;  %vm8927_vm4 = vcmp.eq.f32.partialorder %v8915_v4, 0.0 }
0x556f   :  { %v12348_v5 = vpop.eup %12347 }
0x5570   :  { %v8917_v45 = vmul.f32 %v12348_v5, %v8914_v2 }
0x5572   :  { %v8919_v54 = vsel %vm8918_vm1, %v8914_v2, %v8917_v45 }
0x5573   :  { %v12350_v41 = vpop.eup %12349  ;;  %v8922_v42 = vsel %vm8920_vm2, %v8921_v56, %v8919_v54 }
0x5574   :  { %v8924_v28 = vmul.f32 %v12350_v41, %v8915_v4  ;;  %v8938_v44 = vadd.f32 1e-06, %v8922_v42 }
0x5576   :  { %v8926_v62 = vsel %vm8925_vm3, %v8915_v4, %v8924_v28  ;;  %12351 = vrcp.f32 %v8938_v44 }
0x5577   :  { %v8929_v31 = vsel %vm8927_vm4, %v8928_v34, %v8926_v62 }
0x5578   :  { %v8939_v27 = vadd.f32 1e-06, %v8929_v31 }
0x557a   :  { %12353 = vrcp.f32 %v8939_v27 }
0x5580   :  { %v12352_v33 = vpop.eup %12351 }
0x5581   :  { %v8941_v25 = vmul.f32 %v12352_v33, %v8936_v29 }
0x5583   :  { %v8950_v36 = vadd.f32 %v9634_v37, %v8941_v25 }
0x5584   :  { %v12354_v3 = vpop.eup %12353 }
0x5585   :  { %v8943_v63 = vmul.f32 %v12354_v3, %v8937_v14  ;;  %10905 = vmatprep.mubr.msk.f32.mxu0 %vm514_vm0, %v8950_v36 }
0x5587   :  { %v8951_v61 = vadd.f32 %v9634_v37, %v8943_v63 }
0x5589   :  { %10906 = vmatmul.mubr.msk.f32.vlgmr.msra.gmra.mrb[100].mxu0 %vm514_vm0, %v8951_v61 }
0x565c   :  { %v10907_v52 = vpop.f32.mrb[100].mxu0 }
0x565d   :  { %v9054_v51 = vadd.f32 %v10907_v52, %v9647_v35  ;;  %v9048_v60 = vpop.f32.mrb[101].mxu0 }
0x565e   :  { %v9049_v30 = vadd.f32 %v9647_v35, %v9048_v60 }
0x565f   :  { %v9058_v16 = vmax.f32 %v9054_v51, 0.0 }
0x5660   :  { %v9057_v55 = vmax.f32 %v9049_v30, 0.0 }
0x5662   :  { %10924 = vmatprep.mubr.msk.f32.mxu1 %vm2088_vm13, %v9057_v55 }
0x5663   :  { %10925 = vmatmul.mubr.msk.f32.vlgmr.msra.gmra.mrb[88].mxu1 %vm2088_vm13, %v9058_v16 }
0x5736   :  { %v10926_v39 = vpop.f32.mrb[88].mxu1 }
0x5737   :  { %v9143_v12 = vadd.f32 %v10926_v39, %v9650_v18  ;;  %v9137_v49 = vpop.f32.mrb[89].mxu1 }
0x5738   :  { %v9138_v11 = vadd.f32 %v9650_v18, %v9137_v49 }
0x5739   :  { %v9151_v53 = vadd.f32 %v9143_v12, %v8951_v61 }
0x573a   :  { %v9150_v40 = vadd.f32 %v9138_v11, %v8950_v36 }
0x573b   :  { %v9155_v22 = vsel %vm514_vm0, %v9151_v53, 0.0 }
0x573c   :  { %9156 = vadd.xlane.f32.xlu0 %v9155_v22  ;;  %v9152_v48 = vsel %vm514_vm0, %v9150_v40, 0.0 }
0x573d   :  { %9153 = vadd.xlane.f32.xlu1 %v9152_v48 }
0x57c9   :  { %v9157_v15 = vpop.xlane.xlu0 %9156 }
0x57ca   :  { %v9159_v58 = vmul.f32 0.03125, %v9157_v15  ;;  %v9154_v21 = vpop.xlane.xlu1 %9153 }
0x57cb   :  { %v9158_v17 = vmul.f32 0.03125, %v9154_v21 }
0x57cc   :  { %v9161_v1 = vsub.f32 %v9151_v53, %v9159_v58 }
0x57cd   :  { %v9160_v24 = vsub.f32 %v9150_v40, %v9158_v17 }
0x57ce   :  { %v9163_v38 = vmul.f32 %v9161_v1, %v9161_v1 }
0x57cf   :  { %v9162_v9 = vmul.f32 %v9160_v24, %v9160_v24 }
0x57d0   :  { %v9167_v0 = vsel %vm514_vm0, %v9163_v38, 0.0 }
0x57d1   :  { %9168 = vadd.xlane.f32.xlu0 %v9167_v0  ;;  %v9164_v59 = vsel %vm514_vm0, %v9162_v9, 0.0 }
0x57d2   :  { %9165 = vadd.xlane.f32.xlu1 %v9164_v59 }
0x57d3   :  { %12914 = shalt.err (!%p12911_p0)
}
0x57d4   :  { %s12915_s27 = scalar_lea.hbm %s13250_s4, 512 }
0x57d5   :  { %p12916_p1 = scmp.ne.s32.totalorder %s13250_s4, %s12915_s27  ;;  %p12919_p2 = scmp.lt.u32.totalorder %s12915_s27, %s13250_s4 }
0x57d7   :  { %p12921_p3 = pnand %p12919_p2, %p12916_p1 }
0x57d9   :  { %12924 = shalt.err (!%p12921_p3)
}
0x57da   :  { %9225 = dma.vmem_to_hbm [thread:$0]  %s9220_s26, 512, %s13250_s4, [#allocation4], %s13029_s11, %s13029_s11, %s13030_s24   ;;  %v9653_v54 = vld [vmem:[#allocation37 + $0x1] ss:$0 sm:$0xff]  ;;  %v9654_v44 = vld [vmem:[#allocation38 + $0x1] ss:$0 sm:$0xff] }
0x57db   :  { %v9193_v41 = vmul.f32 %v9653_v54, %v9161_v1  ;;  %v9192_v28 = vmul.f32 %v9653_v54, %v9160_v24  ;;  %s13056_s4 = smov [#allocation41]  }
0x57dc   :  { %s9231_s23 = sshll.u32 %s13056_s4, 4  ;;  %s9232_s23 = int_to_ptr.vmem [resolvable:$true] %s9231_s23 }
0x57dd   :  { %s12925_s13 = scalar_lea.vmem %s9232_s23, 256  ;;  %p12930_p5 = scmp.lt.s32.totalorder %s9232_s23, %s9232_s23 }
0x57de   :  { %p12926_p4 = scmp.ne.s32.totalorder %s9232_s23, %s12925_s13  ;;  %p12931_p6 = scmp.lt.s32.totalorder %s12925_s13, %s12925_s13 }
0x57e0   :  { %p12932_p7 = por %p12931_p6, %p12930_p5 }
0x57e2   :  { %p12933_p8 = pnand %p12932_p7, %p12926_p4 }
0x585e   :  { %v9169_v20 = vpop.xlane.xlu0 %9168 }
0x585f   :  { %v9171_v8 = vmul.f32 0.032258064, %v9169_v20  ;;  %v9166_v6 = vpop.xlane.xlu1 %9165 }
0x5860   :  { %v9170_v43 = vmul.f32 0.032258064, %v9166_v6 }
0x5861   :  { %12355 = vrsqrt.f32 %v9171_v8  ;;  %vm9181_vm13 = vcmp.eq.f32.partialorder %v9171_v8, inf  ;;  %v9184_v46 = vand.u32 2147483648, %v9171_v8  ;;  %vm9183_vm14 = vcmp.eq.f32.partialorder %v9171_v8, 0.0 }
0x5862   :  { %12357 = vrsqrt.f32 %v9170_v43  ;;  %vm9174_vm15 = vcmp.eq.f32.partialorder %v9170_v43, inf  ;;  %v9177_v2 = vand.u32 2147483648, %v9170_v43  ;;  %vm9176_vm5 = vcmp.eq.f32.partialorder %v9170_v43, 0.0 }
0x586b   :  { %v12356_v23 = vpop.eup %12355 }
0x586c   :  { %v12358_v7 = vpop.eup %12357  ;;  %v9180_v19 = vmul.f32 %v12356_v23, %v9171_v8 }
0x586d   :  { %v9173_v50 = vmul.f32 %v12358_v7, %v9170_v43 }
0x586e   :  { %v9182_v57 = vsel %vm9181_vm13, %v9171_v8, %v9180_v19 }
0x586f   :  { %v9185_v47 = vsel %vm9183_vm14, %v9184_v46, %v9182_v57  ;;  %v9175_v4 = vsel %vm9174_vm15, %v9170_v43, %v9173_v50 }
0x5870   :  { %v9195_v5 = vadd.f32 1e-06, %v9185_v47  ;;  %v9178_v45 = vsel %vm9176_vm5, %v9177_v2, %v9175_v4 }
0x5871   :  { %v9194_v56 = vadd.f32 1e-06, %v9178_v45 }
0x5872   :  { %12359 = vrcp.f32 %v9195_v5 }
0x5873   :  { %12361 = vrcp.f32 %v9194_v56 }
0x587c   :  { %v12360_v42 = vpop.eup %12359 }
0x587d   :  { %v12362_v34 = vpop.eup %12361  ;;  %v9199_v62 = vmul.f32 %v12360_v42, %v9193_v41 }
0x587e   :  { %v9197_v31 = vmul.f32 %v12362_v34, %v9192_v28 }
0x587f   :  { %v9207_v27 = vadd.f32 %v9654_v44, %v9199_v62 }
0x5880   :  { %v9206_v32 = vadd.f32 %v9654_v44, %v9197_v31 }
0x5881   :  { %9213 = vst.msk [vmem:[#allocation41 + $0x8] sm:$0xff] %vm514_vm0, %v9207_v27 }
0x5882   :  { %9212 = vst.msk [vmem:[#allocation41] sm:$0xff] %vm514_vm0, %v9206_v32 }
0x5883   :  { %12936 = shalt.err (!%p12933_p8)
}
0x5884   :  { %s12937_s6 = scalar_lea.hbm %s13255_s12, 256 }
0x5885   :  { %p12938_p9 = scmp.ne.s32.totalorder %s13255_s12, %s12937_s6  ;;  %p12941_p10 = scmp.lt.u32.totalorder %s12937_s6, %s13255_s12 }
0x5887   :  { %p12943_p11 = pnand %p12941_p10, %p12938_p9 }
0x5889   :  { %12946 = shalt.err (!%p12943_p11)
}
0x588a   :  { %9237 = dma.vmem_to_hbm [thread:$0]  %s9232_s23, 256, %s13255_s12, [#allocation42], %s13029_s11, %s13029_s11, %s13030_s24  }
0x588b   :  { %12973 = dma.done.wait [#allocation4], 512  }
0x588c   :  { %12974 = vsyncadd [#allocation4], 4294966784 }
0x588d   :  { %12975 = dma.done.wait [#allocation42], 256  }
0x588e   :  { %12976 = vsyncadd [#allocation42], 4294967040 }
0x588f   :  { %9244 = vsyncpa [#allocation3], 1 }
0x5890   :  { %9245 = vsyncpa [#allocation6], 1 }
0x5891   :  { %9246 = vsyncpa [#allocation9], 1 }
0x5892   :  { %9247 = vsyncpa [#allocation12], 1 }
0x5893   :  { %9248 = vsyncpa [#allocation15], 1 }
0x5894   :  { %9249 = vsyncpa [#allocation18], 1 }
0x5895   :  { %9250 = vsyncpa [#allocation21], 1 }
0x5896   :  { %9251 = vsyncpa [#allocation24], 1 }
0x5897   :  { %9252 = vsyncpa [#allocation27], 1 }
0x5898   :  { %9253 = vsyncpa [#allocation30], 1 }
0x5899   :  { %9254 = vsyncpa [#allocation33], 1 }
0x589a   :  { %9255 = vsyncpa [#allocation36], 1 }
0x589b   :  { %9256 = vsyncpa [#allocation39], 1 }
0x589c   :  { %9257 = vsyncpa [#allocation4], 1 }
0x589d   :  { %9258 = vsyncpa [#allocation42], 1 }

</bundles_post_ra>
